<compile_context>
chip_gen: v7x
topology: tpu7x:2x2x1
jax: 0.10.0
libtpu: 0.0.40
codegen_flags: <defaults>
</compile_context>

<pallas_src>
import numpy as np

import jax
import jax.numpy as jnp
from jax import lax
from jax.experimental import pallas as pl
from jax.experimental.pallas import tpu as pltpu

# ----------------------------- fixed architecture dims -----------------------------
NFFT_BINS = 129   # nfft // 2 + 1 with nfft = 256
NFILT = 32        # number of triangular filters
NFRAMES = 29      # spectrogram frames per epoch
HIDDEN = 64       # GRU hidden size (bidirectional -> 128 features)
ATT_LANES = 128   # attention params zero-padded from 64 to full lanes


# ----------------------------- filterbank (constant buffer) -----------------------------
def lin_tri_filter_shape(nfilt=20, nfft=512, samplerate=16000, lowfreq=0, highfreq=None):
    """Linear triangular filterbank, returns (nfft//2+1, nfilt)."""
    highfreq = highfreq or samplerate / 2
    hzpoints = np.linspace(lowfreq, highfreq, nfilt + 2)
    bins = np.floor((nfft + 1) * hzpoints / samplerate)
    fbank = np.zeros([nfilt, nfft // 2 + 1], dtype=np.float64)
    for j in range(nfilt):
        for i in range(int(bins[j]), int(bins[j + 1])):
            fbank[j, i] = (i - bins[j]) / (bins[j + 1] - bins[j])
        for i in range(int(bins[j + 1]), int(bins[j + 2])):
            fbank[j, i] = (bins[j + 2] - i) / (bins[j + 2] - bins[j + 1])
    return np.transpose(fbank).astype(np.float32)


# ----------------------------- shared lane-packed BiGRU recurrence -----------------------------
def _bigru_recurrence(x_flat, w_ref, b_ref, u_ref, bhn_ref, h0, gi_ref, h_ref):
    """Single-layer bidirectional GRU, both directions lane-packed in one state.

    x_flat  : (T*B, K) value, time-major row order.
    w_ref   : (K, 3*2H) gate-fused input weights, lanes = [r|z|n], each [fwd|bwd].
    b_ref   : (1, 3*2H) input bias (b_ih + b_hh for r,z; b_ih only for n).
    u_ref   : (2H, 3*2H) gate-fused block-diagonal hidden-to-hidden weights.
    bhn_ref : (1, 2H) hidden bias of the n gate (kept outside the r*(...) fold).
    h0      : (B, 2H) initial hidden [h0_fwd | h0_bwd].
    gi_ref  : (T, B, 3*2H) f32 scratch.   h_ref : (T, B, 2H) f32 scratch.
    Returns the interleaved history value: hist[t] = [h_fwd(t) | h_bwd(t)], (T, B, 2H).
    """
    T, B, H2 = h_ref.shape
    H = H2 // 2
    G = 3 * H2

    # ---- hoisted, gate-fused input projection: ONE (T*B,K)@(K,3*2H) MXU matmul ----
    gi_all = jnp.dot(x_flat.astype(w_ref.dtype), w_ref[...],
                     preferred_element_type=jnp.float32) + b_ref[...]
    gi_ref[...] = gi_all.reshape(T, B, G)

    # ---- direction pre-select, off the serial critical path -------------------
    # Within every 128-lane gate block: lanes [:H] (fwd) keep time t, lanes [H:]
    # (bwd) take time T-1-t.  In-place pairwise swap-select (T/2 parallel steps).
    lane_g = lax.broadcasted_iota(jnp.int32, (B, G), 1)
    fwd_g = (lane_g % H2) < H
    for t in range((T + 1) // 2):
        tb = T - 1 - t
        a = gi_ref[t]
        b = gi_ref[tb]
        gi_ref[t] = jnp.where(fwd_g, a, b)
        gi_ref[tb] = jnp.where(fwd_g, b, a)

    lane_h = lax.broadcasted_iota(jnp.int32, (B, H2), 1)
    fwd_h = lane_h < H

    u_cat = u_ref[...]                                       # (2H, 3*2H), hoisted
    bhn = jnp.broadcast_to(bhn_ref[...], (B, H2))            # hoisted broadcast

    # ---- serial recurrence: 1 load, 1 matmul, 1 store per step ----------------
    def step(i, h):
        gi = gi_ref[i]                                       # (B, 3*2H), pre-selected
        gh = jnp.dot(h.astype(u_cat.dtype), u_cat,
                     preferred_element_type=jnp.float32)     # (B, 3*2H)
        r = jax.nn.sigmoid(gi[:, :H2] + gh[:, :H2])
        z = jax.nn.sigmoid(gi[:, H2:2 * H2] + gh[:, H2:2 * H2])
        n = jnp.tanh(gi[:, 2 * H2:] + r * (gh[:, 2 * H2:] + bhn))
        h_new = (1.0 - z) * n + z * h
        h_ref[i] = h_new                                     # unconditional store
        return h_new

    lax.fori_loop(0, T, step, h0, unroll=True)

    # ---- re-interleave fwd/bwd halves into per-time rows (vectorized post-pass) ----
    # h_ref[i] holds [fwd(time i) | bwd(time T-1-i)]; hist[t] wants [fwd(t) | bwd(t)].
    for t in range((T + 1) // 2):
        tb = T - 1 - t
        a = h_ref[t]
        b = h_ref[tb]
        h_ref[t] = jnp.where(fwd_h, a, b)
        h_ref[tb] = jnp.where(fwd_h, b, a)

    return h_ref[...]


# ----------------------------- kernel A: epoch encoder -----------------------------
def _epoch_kernel(x_ref, w_ref, b_ref, u_ref, bhn_ref, h0_ref,
                  attw_ref, attb_ref, attu_ref, out_ref, gi_ref, h_ref):
    T, B, K = x_ref.shape
    H2 = out_ref.shape[-1]
    hist = _bigru_recurrence(x_ref[...].reshape(T * B, K), w_ref, b_ref, u_ref,
                             bhn_ref, h0_ref[...], gi_ref, h_ref)
    # Attention pooling over the T frames (unnormalized exp weights = PyTorch ref).
    # attw/attb/attu are zero-padded to 128 lanes; padded lanes contribute 0.
    ep = hist.reshape(T * B, H2)
    v = jnp.tanh(jnp.dot(ep, attw_ref[...], preferred_element_type=jnp.float32)
                 + attb_ref[...])
    score = jnp.sum(v * attu_ref[...], axis=-1, keepdims=True)          # (T*B, 1)
    out_ref[...] = jnp.sum((ep * jnp.exp(score)).reshape(T, B, H2), axis=0)


def _epoch_call(x_tm, w_cat, b_cat, u_cat, bhn, h0c, attw, attb, attu, *, block_epochs):
    T, N, K = x_tm.shape
    H2 = h0c.shape[-1]
    G = w_cat.shape[-1]
    A = attw.shape[-1]
    EB = block_epochs
    assert N % EB == 0
    return pl.pallas_call(
        _epoch_kernel,
        grid=(N // EB,),
        in_specs=[
            pl.BlockSpec((T, EB, K), lambda i: (0, i, 0)),     # spectrogram block
            pl.BlockSpec((K, G), lambda i: (0, 0)),            # gate-fused input weights
            pl.BlockSpec((1, G), lambda i: (0, 0)),
            pl.BlockSpec((H2, G), lambda i: (0, 0)),            # gate-fused hidden weights
            pl.BlockSpec((1, H2), lambda i: (0, 0)),
            pl.BlockSpec((EB, H2), lambda i: (i, 0)),           # h0 block
            pl.BlockSpec((H2, A), lambda i: (0, 0)),
            pl.BlockSpec((1, A), lambda i: (0, 0)),
            pl.BlockSpec((1, A), lambda i: (0, 0)),
        ],
        out_specs=pl.BlockSpec((EB, H2), lambda i: (i, 0)),
        out_shape=jax.ShapeDtypeStruct((N, H2), jnp.float32),
        scratch_shapes=[pltpu.VMEM((T, EB, G), jnp.float32),    # pre-selected gate inputs
                        pltpu.VMEM((T, EB, H2), jnp.float32)],  # hidden history
        compiler_params=pltpu.CompilerParams(
            dimension_semantics=("parallel",),      # independent epoch blocks (2nd TC on v7x)
            vmem_limit_bytes=64 * 1024 * 1024),     # headroom for 128-256 epoch blocks
    )(x_tm, w_cat, b_cat, u_cat, bhn, h0c, attw, attb, attu)


def _pick_block_epochs(n_ep):
    # Target 128-256 epochs/block at scale (fills MXU rows per serial step) while
    # keeping >=2 grid steps so the "parallel" axis can feed both v7x TensorCores.
    for eb in (256, 192, 128, 64, 32, 16, 8):
        if n_ep % eb == 0 and n_ep // eb >= 2:
            return eb
    return n_ep


# ----------------------------- kernel B: sequence BiGRU + Parabit classifier -----------------------------
def _seq_kernel(x_ref, w_ref, b_ref, u_ref, bhn_ref, h0_ref,
                clsw_ref, clsb_ref, out_ref, gi_ref, h_ref):
    S, B, D = x_ref.shape
    hist = _bigru_recurrence(x_ref[...].reshape(S * B, D), w_ref, b_ref, u_ref,
                             bhn_ref, h0_ref[...], gi_ref, h_ref)
    # Parabit: independent Linear(2H -> C) per position, as ONE batched contraction.
    out_ref[...] = (jnp.einsum('sbh,shc->sbc', hist, clsw_ref[...],
                               preferred_element_type=jnp.float32) + clsb_ref[...])


def _seq_call(x_tm, w_cat, b_cat, u_cat, bhn, h0c, cls_wt, cls_b):
    S, B, D = x_tm.shape
    H2 = h0c.shape[-1]
    C = cls_wt.shape[-1]
    # Tiny, latency-bound problem: gridless, whole arrays resident in VMEM.
    # TODO(synk): give this a "parallel" grid over batch (or fold it into the tail
    # of kernel A's grid) when batch scales up; today it is pure fixed overhead.
    return pl.pallas_call(
        _seq_kernel,
        out_shape=jax.ShapeDtypeStruct((S, B, C), jnp.float32),
        scratch_shapes=[pltpu.VMEM((S, B, 3 * H2), jnp.float32),
                        pltpu.VMEM((S, B, H2), jnp.float32)],
    )(x_tm, w_cat, b_cat, u_cat, bhn, h0c, cls_wt, cls_b)


# ----------------------------- parameter repacking (glue) -----------------------------
def pack_bigru(wih, whh, bih, bhh, h0, in_proj=None, mxu_dtype=jnp.float32):
    """Repack torch-layout GRU params (gate order [r, z, n]) for the lane-packed kernel.

    wih: (2, 3H, D)  whh: (2, 3H, H)  bih, bhh: (2, 3H)  h0: (2, N, H)
    in_proj: optional (K, D) matrix folded into the input projection (here: the
             stacked per-channel filterbank including the 1/ch channel mean).
             NOTE(v5e): at scale the fold multiplies projection MACs ~5x; on a
             197 TF/s MXU consider keeping the 258->32 matmul as a separate
             in-kernel op instead of folding.
    mxu_dtype: f32 for parity with the PyTorch reference; bf16 for MXU throughput.
    Returns gate-fused (w_cat, b_cat, u_cat, bhn, h0c).
    """
    H = wih.shape[1] // 3
    f32 = jnp.float32
    w_list, b_list, u_list = [], [], []
    for g in range(3):
        sl = slice(g * H, (g + 1) * H)
        wg = jnp.concatenate([wih[0, sl, :].T, wih[1, sl, :].T], axis=1)    # (D, 2H)
        if in_proj is not None:
            wg = in_proj @ wg                                               # (K, 2H)
        w_list.append(wg)
        bg = jnp.concatenate([bih[0, sl], bih[1, sl]])
        if g < 2:   # r, z gates: hidden bias is purely additive -> fold it in
            bg = bg + jnp.concatenate([bhh[0, sl], bhh[1, sl]])
        b_list.append(bg)
        uf, ub = whh[0, sl, :].T, whh[1, sl, :].T                           # (H, H)
        zero = jnp.zeros((H, H), f32)
        u_list.append(jnp.concatenate(
            [jnp.concatenate([uf, zero], axis=1),
             jnp.concatenate([zero, ub], axis=1)], axis=0))                 # (2H, 2H)
    w_cat = jnp.concatenate(w_list, axis=1)                                 # (K, 3*2H)
    b_cat = jnp.concatenate(b_list)[None, :]                                # (1, 3*2H)
    u_cat = jnp.concatenate(u_list, axis=1)                                 # (2H, 3*2H)
    bhn = jnp.concatenate([bhh[0, 2 * H:], bhh[1, 2 * H:]])[None, :]        # (1, 2H)
    h0c = jnp.concatenate([h0[0], h0[1]], axis=-1)                          # (N, 2H)
    return (w_cat.astype(mxu_dtype), b_cat.astype(f32),
            u_cat.astype(mxu_dtype), bhn.astype(f32), h0c.astype(f32))


def _pad_lanes(a, width=ATT_LANES):
    """Zero-pad the last dim to a full 128-lane width (free: parameter packing)."""
    pad = width - a.shape[-1]
    return jnp.pad(a, [(0, 0)] * (a.ndim - 1) + [(0, pad)])


# ----------------------------- full forward -----------------------------
def seqsleepnet_forward(x, params):
    batch, seq_len, ch, T, F = x.shape
    n_ep = batch * seq_len
    H2 = 2 * HIDDEN
    # (batch, seq, ch, T, F) -> time-major, channels stacked along K: (T, n_ep, ch*F)
    x_tm = jnp.transpose(x, (3, 0, 1, 2, 4)).reshape(T, n_ep, ch * F)
    eb = _pick_block_epochs(n_ep)
    att = _epoch_call(x_tm, *params['epoch'], block_epochs=eb)              # (n_ep, 2H)
    seq_tm = jnp.transpose(att.reshape(batch, seq_len, H2), (1, 0, 2))      # (S, B, 2H)
    logits = _seq_call(seq_tm, *params['seq'], params['cls_wt'], params['cls_b'])  # (S, B, C)
    return jnp.transpose(logits, (1, 2, 0))                                 # (B, C, S)


# ----------------------------- deterministic parameter init -----------------------------
def init_gru(key, d_in, hidden, n_batch):
    k = 1.0 / np.sqrt(hidden)
    ks = jax.random.split(key, 5)
    wih = jax.random.uniform(ks[0], (2, 3 * hidden, d_in), jnp.float32, -k, k)
    whh = jax.random.uniform(ks[1], (2, 3 * hidden, hidden), jnp.float32, -k, k)
    bih = jax.random.uniform(ks[2], (2, 3 * hidden), jnp.float32, -k, k)
    bhh = jax.random.uniform(ks[3], (2, 3 * hidden), jnp.float32, -k, k)
    # NOTE: the PyTorch reference draws torch.randn h0 on every forward; here h0 is
    # a fixed deterministic draw.
    h0 = jax.random.normal(ks[4], (2, n_batch, hidden), jnp.float32)
    return wih, whh, bih, bhh, h0


if __name__ == "__main__":
    batch, seq_len, ch_num, class_num = 2, 8, 2, 5

    key = jax.random.PRNGKey(0)
    keys = jax.random.split(key, 12)

    fbanks = jnp.asarray(lin_tri_filter_shape(NFILT, 256, 100, 0, 50))      # (129, 32)
    filterweight = jax.random.normal(keys[0], (ch_num, NFFT_BINS, NFILT), jnp.float32)

    # Fold (filterweight * filterbanks) and the channel mean into the epoch-GRU
    # input projection: the GRU gate pre-activations are linear in the fb output.
    fb_stacked = (filterweight * fbanks).reshape(ch_num * NFFT_BINS, NFILT) / ch_num

    params = {}
    ep_raw = init_gru(keys[1], NFILT, HIDDEN, batch * seq_len)
    params['epoch'] = pack_bigru(*ep_raw, in_proj=fb_stacked) + (
        _pad_lanes(jax.random.normal(keys[3], (2 * HIDDEN, HIDDEN), jnp.float32)),  # attweight_w -> (2H,128)
        _pad_lanes(jax.random.normal(keys[4], (1, HIDDEN), jnp.float32)),           # attweight_b -> (1,128)
        _pad_lanes(jax.random.normal(keys[5], (1, HIDDEN), jnp.float32)),           # attweight_u -> (1,128)
    )
    sq_raw = init_gru(keys[2], 2 * HIDDEN, HIDDEN, batch)
    params['seq'] = pack_bigru(*sq_raw)

    kcls = 1.0 / np.sqrt(2 * HIDDEN)
    cls_w = jax.random.uniform(keys[6], (seq_len, class_num, 2 * HIDDEN), jnp.float32, -kcls, kcls)
    params['cls_wt'] = jnp.transpose(cls_w, (0, 2, 1))                      # (S, 2H, C)
    params['cls_b'] = jax.random.uniform(keys[7], (seq_len, 1, class_num), jnp.float32, -kcls, kcls)

    x = jax.random.normal(keys[10], (batch, seq_len, ch_num, NFRAMES, NFFT_BINS), jnp.float32)

    out = jax.block_until_ready(seqsleepnet_forward(x, params))
    assert out.shape == (batch, class_num, seq_len), out.shape
    print("KERNEL_OK")
</pallas_src>

<mosaic_0001>
module attributes {stable_mosaic.version = 11 : i64} {
  func.func @_epoch_kernel(%arg0: i32, %arg1: memref<29x8x258xf32, #tpu.memory_space<vmem>>, %arg2: memref<258x384xf32, #tpu.memory_space<vmem>>, %arg3: memref<1x384xf32, #tpu.memory_space<vmem>>, %arg4: memref<128x384xf32, #tpu.memory_space<vmem>>, %arg5: memref<1x128xf32, #tpu.memory_space<vmem>>, %arg6: memref<8x128xf32, #tpu.memory_space<vmem>>, %arg7: memref<128x128xf32, #tpu.memory_space<vmem>>, %arg8: memref<1x128xf32, #tpu.memory_space<vmem>>, %arg9: memref<1x128xf32, #tpu.memory_space<vmem>>, %arg10: memref<8x128xf32, #tpu.memory_space<vmem>>, %arg11: memref<29x8x384xf32, #tpu.memory_space<vmem>>, %arg12: memref<29x8x128xf32, #tpu.memory_space<vmem>>) attributes {dimension_semantics = [#tpu.dimension_semantics<parallel>], iteration_bounds = array<i64: 2>, scalar_prefetch = 0 : i64, scratch_operands = 2 : i64, tpu.core_type = #tpu.core_type<tc>, window_params = [{transform_indices = @transform_0, window_bounds = array<i64: 29, 8, 258>}, {pipeline_mode = #tpu.pipeline_mode<synchronous>, transform_indices = @transform_1, window_bounds = array<i64: 258, 384>}, {pipeline_mode = #tpu.pipeline_mode<synchronous>, transform_indices = @transform_2, window_bounds = array<i64: 1, 384>}, {pipeline_mode = #tpu.pipeline_mode<synchronous>, transform_indices = @transform_3, window_bounds = array<i64: 128, 384>}, {pipeline_mode = #tpu.pipeline_mode<synchronous>, transform_indices = @transform_4, window_bounds = array<i64: 1, 128>}, {transform_indices = @transform_5, window_bounds = array<i64: 8, 128>}, {pipeline_mode = #tpu.pipeline_mode<synchronous>, transform_indices = @transform_6, window_bounds = array<i64: 128, 128>}, {pipeline_mode = #tpu.pipeline_mode<synchronous>, transform_indices = @transform_7, window_bounds = array<i64: 1, 128>}, {pipeline_mode = #tpu.pipeline_mode<synchronous>, transform_indices = @transform_8, window_bounds = array<i64: 1, 128>}, {transform_indices = @transform_9, window_bounds = array<i64: 8, 128>}]} {
    %c0 = arith.constant 0 : index
    %c0_0 = arith.constant 0 : index
    %c0_1 = arith.constant 0 : index
    %0 = vector.load %arg1[%c0, %c0_0, %c0_1] : memref<29x8x258xf32, #tpu.memory_space<vmem>>, vector<29x8x258xf32>
    %1 = vector.shape_cast %0 : vector<29x8x258xf32> to vector<232x258xf32>
    %c0_2 = arith.constant 0 : index
    %c0_3 = arith.constant 0 : index
    %2 = vector.load %arg6[%c0_2, %c0_3] : memref<8x128xf32, #tpu.memory_space<vmem>>, vector<8x128xf32>
    %c0_4 = arith.constant 0 : index
    %c0_5 = arith.constant 0 : index
    %3 = vector.load %arg2[%c0_4, %c0_5] : memref<258x384xf32, #tpu.memory_space<vmem>>, vector<258x384xf32>
    %cst = arith.constant dense<0.000000e+00> : vector<232x384xf32>
    %4 = tpu.matmul %1, %3, %cst {dimension_numbers = #tpu.dot_dimension_numbers<[1], [0], [0], [1], [0, 0, 1, 1], [], []>} : vector<232x258xf32>, vector<258x384xf32>, vector<232x384xf32> -> vector<232x384xf32>
    %c0_6 = arith.constant 0 : index
    %c0_7 = arith.constant 0 : index
    %5 = vector.load %arg3[%c0_6, %c0_7] : memref<1x384xf32, #tpu.memory_space<vmem>>, vector<1x384xf32>
    %6 = vector.broadcast %5 : vector<1x384xf32> to vector<232x384xf32>
    %7 = arith.addf %4, %6 : vector<232x384xf32>
    %8 = vector.shape_cast %7 : vector<232x384xf32> to vector<29x8x384xf32>
    %c0_8 = arith.constant 0 : index
    %c0_9 = arith.constant 0 : index
    %c0_10 = arith.constant 0 : index
    %9 = vector.load %arg11[%c0_8, %c0_9, %c0_10] : memref<29x8x384xf32, #tpu.memory_space<vmem>>, vector<29x8x384xf32>
    tpu.vector_store %arg11[%c0_8, %c0_9, %c0_10], %8 {strides = array<i32>} : memref<29x8x384xf32, #tpu.memory_space<vmem>>, vector<29x8x384xf32>,
    %10 = tpu.iota {dimensions = array<i32: 1>} : vector<8x384xi32>
    %c128_i32 = arith.constant 128 : i32
    %c0_i32 = arith.constant 0 : i32
    %11 = arith.cmpi eq, %c128_i32, %c0_i32 : i32
    %c1_i32 = arith.constant 1 : i32
    %12 = arith.select %11, %c1_i32, %c128_i32 : i32
    %13 = vector.broadcast %12 : i32 to vector<8x384xi32>
    %14 = arith.remsi %10, %13 : vector<8x384xi32>
    %c0_i32_11 = arith.constant 0 : i32
    %15 = vector.broadcast %c0_i32_11 : i32 to vector<8x384xi32>
    %16 = arith.cmpi ne, %14, %15 : vector<8x384xi32>
    %c0_i32_12 = arith.constant 0 : i32
    %17 = vector.broadcast %c0_i32_12 : i32 to vector<8x384xi32>
    %18 = arith.cmpi slt, %14, %17 : vector<8x384xi32>
    %c0_i32_13 = arith.constant 0 : i32
    %19 = arith.cmpi slt, %12, %c0_i32_13 : i32
    %20 = vector.broadcast %19 : i1 to vector<8x384xi1>
    %21 = vector.broadcast %20 : vector<8x384xi1> to vector<8x384xi1>
    %22 = arith.xori %18, %21 : vector<8x384xi1>
    %23 = arith.andi %22, %16 : vector<8x384xi1>
    %24 = vector.broadcast %12 : i32 to vector<8x384xi32>
    %25 = arith.addi %14, %24 : vector<8x384xi32>
    %26 = arith.select %23, %25, %14 : vector<8x384xi1>, vector<8x384xi32>
    %c64_i32 = arith.constant 64 : i32
    %27 = vector.broadcast %c64_i32 : i32 to vector<8x384xi32>
    %28 = arith.cmpi slt, %26, %27 : vector<8x384xi32>
    %c0_14 = arith.constant 0 : index
    %c0_15 = arith.constant 0 : index
    %c0_16 = arith.constant 0 : index
    %29 = vector.load %arg11[%c0_14, %c0_15, %c0_16] : memref<29x8x384xf32, #tpu.memory_space<vmem>>, vector<1x8x384xf32>
    %30 = vector.shape_cast %29 : vector<1x8x384xf32> to vector<8x384xf32>
    %c28 = arith.constant 28 : index
    %c0_17 = arith.constant 0 : index
    %c0_18 = arith.constant 0 : index
    %31 = vector.load %arg11[%c28, %c0_17, %c0_18] : memref<29x8x384xf32, #tpu.memory_space<vmem>>, vector<1x8x384xf32>
    %32 = vector.shape_cast %31 : vector<1x8x384xf32> to vector<8x384xf32>
    %33 = arith.select %28, %30, %32 : vector<8x384xi1>, vector<8x384xf32>
    %c0_19 = arith.constant 0 : index
    %c0_20 = arith.constant 0 : index
    %c0_21 = arith.constant 0 : index
    %34 = vector.load %arg11[%c0_19, %c0_20, %c0_21] : memref<29x8x384xf32, #tpu.memory_space<vmem>>, vector<1x8x384xf32>
    %35 = vector.shape_cast %34 : vector<1x8x384xf32> to vector<8x384xf32>
    %36 = vector.shape_cast %33 : vector<8x384xf32> to vector<1x8x384xf32>
    tpu.vector_store %arg11[%c0_19, %c0_20, %c0_21], %36 {strides = array<i32>} : memref<29x8x384xf32, #tpu.memory_space<vmem>>, vector<1x8x384xf32>,
    %37 = arith.select %28, %32, %30 : vector<8x384xi1>, vector<8x384xf32>
    %c28_22 = arith.constant 28 : index
    %c0_23 = arith.constant 0 : index
    %c0_24 = arith.constant 0 : index
    %38 = vector.load %arg11[%c28_22, %c0_23, %c0_24] : memref<29x8x384xf32, #tpu.memory_space<vmem>>, vector<1x8x384xf32>
    %39 = vector.shape_cast %38 : vector<1x8x384xf32> to vector<8x384xf32>
    %40 = vector.shape_cast %37 : vector<8x384xf32> to vector<1x8x384xf32>
    tpu.vector_store %arg11[%c28_22, %c0_23, %c0_24], %40 {strides = array<i32>} : memref<29x8x384xf32, #tpu.memory_space<vmem>>, vector<1x8x384xf32>,
    %c1 = arith.constant 1 : index
    %c0_25 = arith.constant 0 : index
    %c0_26 = arith.constant 0 : index
    %41 = vector.load %arg11[%c1, %c0_25, %c0_26] : memref<29x8x384xf32, #tpu.memory_space<vmem>>, vector<1x8x384xf32>
    %42 = vector.shape_cast %41 : vector<1x8x384xf32> to vector<8x384xf32>
    %c27 = arith.constant 27 : index
    %c0_27 = arith.constant 0 : index
    %c0_28 = arith.constant 0 : index
    %43 = vector.load %arg11[%c27, %c0_27, %c0_28] : memref<29x8x384xf32, #tpu.memory_space<vmem>>, vector<1x8x384xf32>
    %44 = vector.shape_cast %43 : vector<1x8x384xf32> to vector<8x384xf32>
    %45 = arith.select %28, %42, %44 : vector<8x384xi1>, vector<8x384xf32>
    %c1_29 = arith.constant 1 : index
    %c0_30 = arith.constant 0 : index
    %c0_31 = arith.constant 0 : index
    %46 = vector.load %arg11[%c1_29, %c0_30, %c0_31] : memref<29x8x384xf32, #tpu.memory_space<vmem>>, vector<1x8x384xf32>
    %47 = vector.shape_cast %46 : vector<1x8x384xf32> to vector<8x384xf32>
    %48 = vector.shape_cast %45 : vector<8x384xf32> to vector<1x8x384xf32>
    tpu.vector_store %arg11[%c1_29, %c0_30, %c0_31], %48 {strides = array<i32>} : memref<29x8x384xf32, #tpu.memory_space<vmem>>, vector<1x8x384xf32>,
    %49 = arith.select %28, %44, %42 : vector<8x384xi1>, vector<8x384xf32>
    %c27_32 = arith.constant 27 : index
    %c0_33 = arith.constant 0 : index
    %c0_34 = arith.constant 0 : index
    %50 = vector.load %arg11[%c27_32, %c0_33, %c0_34] : memref<29x8x384xf32, #tpu.memory_space<vmem>>, vector<1x8x384xf32>
    %51 = vector.shape_cast %50 : vector<1x8x384xf32> to vector<8x384xf32>
    %52 = vector.shape_cast %49 : vector<8x384xf32> to vector<1x8x384xf32>
    tpu.vector_store %arg11[%c27_32, %c0_33, %c0_34], %52 {strides = array<i32>} : memref<29x8x384xf32, #tpu.memory_space<vmem>>, vector<1x8x384xf32>,
    %c2 = arith.constant 2 : index
    %c0_35 = arith.constant 0 : index
    %c0_36 = arith.constant 0 : index
    %53 = vector.load %arg11[%c2, %c0_35, %c0_36] : memref<29x8x384xf32, #tpu.memory_space<vmem>>, vector<1x8x384xf32>
    %54 = vector.shape_cast %53 : vector<1x8x384xf32> to vector<8x384xf32>
    %c26 = arith.constant 26 : index
    %c0_37 = arith.constant 0 : index
    %c0_38 = arith.constant 0 : index
    %55 = vector.load %arg11[%c26, %c0_37, %c0_38] : memref<29x8x384xf32, #tpu.memory_space<vmem>>, vector<1x8x384xf32>
    %56 = vector.shape_cast %55 : vector<1x8x384xf32> to vector<8x384xf32>
    %57 = arith.select %28, %54, %56 : vector<8x384xi1>, vector<8x384xf32>
    %c2_39 = arith.constant 2 : index
    %c0_40 = arith.constant 0 : index
    %c0_41 = arith.constant 0 : index
    %58 = vector.load %arg11[%c2_39, %c0_40, %c0_41] : memref<29x8x384xf32, #tpu.memory_space<vmem>>, vector<1x8x384xf32>
    %59 = vector.shape_cast %58 : vector<1x8x384xf32> to vector<8x384xf32>
    %60 = vector.shape_cast %57 : vector<8x384xf32> to vector<1x8x384xf32>
    tpu.vector_store %arg11[%c2_39, %c0_40, %c0_41], %60 {strides = array<i32>} : memref<29x8x384xf32, #tpu.memory_space<vmem>>, vector<1x8x384xf32>,
    %61 = arith.select %28, %56, %54 : vector<8x384xi1>, vector<8x384xf32>
    %c26_42 = arith.constant 26 : index
    %c0_43 = arith.constant 0 : index
    %c0_44 = arith.constant 0 : index
    %62 = vector.load %arg11[%c26_42, %c0_43, %c0_44] : memref<29x8x384xf32, #tpu.memory_space<vmem>>, vector<1x8x384xf32>
    %63 = vector.shape_cast %62 : vector<1x8x384xf32> to vector<8x384xf32>
    %64 = vector.shape_cast %61 : vector<8x384xf32> to vector<1x8x384xf32>
    tpu.vector_store %arg11[%c26_42, %c0_43, %c0_44], %64 {strides = array<i32>} : memref<29x8x384xf32, #tpu.memory_space<vmem>>, vector<1x8x384xf32>,
    %c3 = arith.constant 3 : index
    %c0_45 = arith.constant 0 : index
    %c0_46 = arith.constant 0 : index
    %65 = vector.load %arg11[%c3, %c0_45, %c0_46] : memref<29x8x384xf32, #tpu.memory_space<vmem>>, vector<1x8x384xf32>
    %66 = vector.shape_cast %65 : vector<1x8x384xf32> to vector<8x384xf32>
    %c25 = arith.constant 25 : index
    %c0_47 = arith.constant 0 : index
    %c0_48 = arith.constant 0 : index
    %67 = vector.load %arg11[%c25, %c0_47, %c0_48] : memref<29x8x384xf32, #tpu.memory_space<vmem>>, vector<1x8x384xf32>
    %68 = vector.shape_cast %67 : vector<1x8x384xf32> to vector<8x384xf32>
    %69 = arith.select %28, %66, %68 : vector<8x384xi1>, vector<8x384xf32>
    %c3_49 = arith.constant 3 : index
    %c0_50 = arith.constant 0 : index
    %c0_51 = arith.constant 0 : index
    %70 = vector.load %arg11[%c3_49, %c0_50, %c0_51] : memref<29x8x384xf32, #tpu.memory_space<vmem>>, vector<1x8x384xf32>
    %71 = vector.shape_cast %70 : vector<1x8x384xf32> to vector<8x384xf32>
    %72 = vector.shape_cast %69 : vector<8x384xf32> to vector<1x8x384xf32>
    tpu.vector_store %arg11[%c3_49, %c0_50, %c0_51], %72 {strides = array<i32>} : memref<29x8x384xf32, #tpu.memory_space<vmem>>, vector<1x8x384xf32>,
    %73 = arith.select %28, %68, %66 : vector<8x384xi1>, vector<8x384xf32>
    %c25_52 = arith.constant 25 : index
    %c0_53 = arith.constant 0 : index
    %c0_54 = arith.constant 0 : index
    %74 = vector.load %arg11[%c25_52, %c0_53, %c0_54] : memref<29x8x384xf32, #tpu.memory_space<vmem>>, vector<1x8x384xf32>
    %75 = vector.shape_cast %74 : vector<1x8x384xf32> to vector<8x384xf32>
    %76 = vector.shape_cast %73 : vector<8x384xf32> to vector<1x8x384xf32>
    tpu.vector_store %arg11[%c25_52, %c0_53, %c0_54], %76 {strides = array<i32>} : memref<29x8x384xf32, #tpu.memory_space<vmem>>, vector<1x8x384xf32>,
    %c4 = arith.constant 4 : index
    %c0_55 = arith.constant 0 : index
    %c0_56 = arith.constant 0 : index
    %77 = vector.load %arg11[%c4, %c0_55, %c0_56] : memref<29x8x384xf32, #tpu.memory_space<vmem>>, vector<1x8x384xf32>
    %78 = vector.shape_cast %77 : vector<1x8x384xf32> to vector<8x384xf32>
    %c24 = arith.constant 24 : index
    %c0_57 = arith.constant 0 : index
    %c0_58 = arith.constant 0 : index
    %79 = vector.load %arg11[%c24, %c0_57, %c0_58] : memref<29x8x384xf32, #tpu.memory_space<vmem>>, vector<1x8x384xf32>
    %80 = vector.shape_cast %79 : vector<1x8x384xf32> to vector<8x384xf32>
    %81 = arith.select %28, %78, %80 : vector<8x384xi1>, vector<8x384xf32>
    %c4_59 = arith.constant 4 : index
    %c0_60 = arith.constant 0 : index
    %c0_61 = arith.constant 0 : index
    %82 = vector.load %arg11[%c4_59, %c0_60, %c0_61] : memref<29x8x384xf32, #tpu.memory_space<vmem>>, vector<1x8x384xf32>
    %83 = vector.shape_cast %82 : vector<1x8x384xf32> to vector<8x384xf32>
    %84 = vector.shape_cast %81 : vector<8x384xf32> to vector<1x8x384xf32>
    tpu.vector_store %arg11[%c4_59, %c0_60, %c0_61], %84 {strides = array<i32>} : memref<29x8x384xf32, #tpu.memory_space<vmem>>, vector<1x8x384xf32>,
    %85 = arith.select %28, %80, %78 : vector<8x384xi1>, vector<8x384xf32>
    %c24_62 = arith.constant 24 : index
    %c0_63 = arith.constant 0 : index
    %c0_64 = arith.constant 0 : index
    %86 = vector.load %arg11[%c24_62, %c0_63, %c0_64] : memref<29x8x384xf32, #tpu.memory_space<vmem>>, vector<1x8x384xf32>
    %87 = vector.shape_cast %86 : vector<1x8x384xf32> to vector<8x384xf32>
    %88 = vector.shape_cast %85 : vector<8x384xf32> to vector<1x8x384xf32>
    tpu.vector_store %arg11[%c24_62, %c0_63, %c0_64], %88 {strides = array<i32>} : memref<29x8x384xf32, #tpu.memory_space<vmem>>, vector<1x8x384xf32>,
    %c5 = arith.constant 5 : index
    %c0_65 = arith.constant 0 : index
    %c0_66 = arith.constant 0 : index
    %89 = vector.load %arg11[%c5, %c0_65, %c0_66] : memref<29x8x384xf32, #tpu.memory_space<vmem>>, vector<1x8x384xf32>
    %90 = vector.shape_cast %89 : vector<1x8x384xf32> to vector<8x384xf32>
    %c23 = arith.constant 23 : index
    %c0_67 = arith.constant 0 : index
    %c0_68 = arith.constant 0 : index
    %91 = vector.load %arg11[%c23, %c0_67, %c0_68] : memref<29x8x384xf32, #tpu.memory_space<vmem>>, vector<1x8x384xf32>
    %92 = vector.shape_cast %91 : vector<1x8x384xf32> to vector<8x384xf32>
    %93 = arith.select %28, %90, %92 : vector<8x384xi1>, vector<8x384xf32>
    %c5_69 = arith.constant 5 : index
    %c0_70 = arith.constant 0 : index
    %c0_71 = arith.constant 0 : index
    %94 = vector.load %arg11[%c5_69, %c0_70, %c0_71] : memref<29x8x384xf32, #tpu.memory_space<vmem>>, vector<1x8x384xf32>
    %95 = vector.shape_cast %94 : vector<1x8x384xf32> to vector<8x384xf32>
    %96 = vector.shape_cast %93 : vector<8x384xf32> to vector<1x8x384xf32>
    tpu.vector_store %arg11[%c5_69, %c0_70, %c0_71], %96 {strides = array<i32>} : memref<29x8x384xf32, #tpu.memory_space<vmem>>, vector<1x8x384xf32>,
    %97 = arith.select %28, %92, %90 : vector<8x384xi1>, vector<8x384xf32>
    %c23_72 = arith.constant 23 : index
    %c0_73 = arith.constant 0 : index
    %c0_74 = arith.constant 0 : index
    %98 = vector.load %arg11[%c23_72, %c0_73, %c0_74] : memref<29x8x384xf32, #tpu.memory_space<vmem>>, vector<1x8x384xf32>
    %99 = vector.shape_cast %98 : vector<1x8x384xf32> to vector<8x384xf32>
    %100 = vector.shape_cast %97 : vector<8x384xf32> to vector<1x8x384xf32>
    tpu.vector_store %arg11[%c23_72, %c0_73, %c0_74], %100 {strides = array<i32>} : memref<29x8x384xf32, #tpu.memory_space<vmem>>, vector<1x8x384xf32>,
    %c6 = arith.constant 6 : index
    %c0_75 = arith.constant 0 : index
    %c0_76 = arith.constant 0 : index
    %101 = vector.load %arg11[%c6, %c0_75, %c0_76] : memref<29x8x384xf32, #tpu.memory_space<vmem>>, vector<1x8x384xf32>
    %102 = vector.shape_cast %101 : vector<1x8x384xf32> to vector<8x384xf32>
    %c22 = arith.constant 22 : index
    %c0_77 = arith.constant 0 : index
    %c0_78 = arith.constant 0 : index
    %103 = vector.load %arg11[%c22, %c0_77, %c0_78] : memref<29x8x384xf32, #tpu.memory_space<vmem>>, vector<1x8x384xf32>
    %104 = vector.shape_cast %103 : vector<1x8x384xf32> to vector<8x384xf32>
    %105 = arith.select %28, %102, %104 : vector<8x384xi1>, vector<8x384xf32>
    %c6_79 = arith.constant 6 : index
    %c0_80 = arith.constant 0 : index
    %c0_81 = arith.constant 0 : index
    %106 = vector.load %arg11[%c6_79, %c0_80, %c0_81] : memref<29x8x384xf32, #tpu.memory_space<vmem>>, vector<1x8x384xf32>
    %107 = vector.shape_cast %106 : vector<1x8x384xf32> to vector<8x384xf32>
    %108 = vector.shape_cast %105 : vector<8x384xf32> to vector<1x8x384xf32>
    tpu.vector_store %arg11[%c6_79, %c0_80, %c0_81], %108 {strides = array<i32>} : memref<29x8x384xf32, #tpu.memory_space<vmem>>, vector<1x8x384xf32>,
    %109 = arith.select %28, %104, %102 : vector<8x384xi1>, vector<8x384xf32>
    %c22_82 = arith.constant 22 : index
    %c0_83 = arith.constant 0 : index
    %c0_84 = arith.constant 0 : index
    %110 = vector.load %arg11[%c22_82, %c0_83, %c0_84] : memref<29x8x384xf32, #tpu.memory_space<vmem>>, vector<1x8x384xf32>
    %111 = vector.shape_cast %110 : vector<1x8x384xf32> to vector<8x384xf32>
    %112 = vector.shape_cast %109 : vector<8x384xf32> to vector<1x8x384xf32>
    tpu.vector_store %arg11[%c22_82, %c0_83, %c0_84], %112 {strides = array<i32>} : memref<29x8x384xf32, #tpu.memory_space<vmem>>, vector<1x8x384xf32>,
    %c7 = arith.constant 7 : index
    %c0_85 = arith.constant 0 : index
    %c0_86 = arith.constant 0 : index
    %113 = vector.load %arg11[%c7, %c0_85, %c0_86] : memref<29x8x384xf32, #tpu.memory_space<vmem>>, vector<1x8x384xf32>
    %114 = vector.shape_cast %113 : vector<1x8x384xf32> to vector<8x384xf32>
    %c21 = arith.constant 21 : index
    %c0_87 = arith.constant 0 : index
    %c0_88 = arith.constant 0 : index
    %115 = vector.load %arg11[%c21, %c0_87, %c0_88] : memref<29x8x384xf32, #tpu.memory_space<vmem>>, vector<1x8x384xf32>
    %116 = vector.shape_cast %115 : vector<1x8x384xf32> to vector<8x384xf32>
    %117 = arith.select %28, %114, %116 : vector<8x384xi1>, vector<8x384xf32>
    %c7_89 = arith.constant 7 : index
    %c0_90 = arith.constant 0 : index
    %c0_91 = arith.constant 0 : index
    %118 = vector.load %arg11[%c7_89, %c0_90, %c0_91] : memref<29x8x384xf32, #tpu.memory_space<vmem>>, vector<1x8x384xf32>
    %119 = vector.shape_cast %118 : vector<1x8x384xf32> to vector<8x384xf32>
    %120 = vector.shape_cast %117 : vector<8x384xf32> to vector<1x8x384xf32>
    tpu.vector_store %arg11[%c7_89, %c0_90, %c0_91], %120 {strides = array<i32>} : memref<29x8x384xf32, #tpu.memory_space<vmem>>, vector<1x8x384xf32>,
    %121 = arith.select %28, %116, %114 : vector<8x384xi1>, vector<8x384xf32>
    %c21_92 = arith.constant 21 : index
    %c0_93 = arith.constant 0 : index
    %c0_94 = arith.constant 0 : index
    %122 = vector.load %arg11[%c21_92, %c0_93, %c0_94] : memref<29x8x384xf32, #tpu.memory_space<vmem>>, vector<1x8x384xf32>
    %123 = vector.shape_cast %122 : vector<1x8x384xf32> to vector<8x384xf32>
    %124 = vector.shape_cast %121 : vector<8x384xf32> to vector<1x8x384xf32>
    tpu.vector_store %arg11[%c21_92, %c0_93, %c0_94], %124 {strides = array<i32>} : memref<29x8x384xf32, #tpu.memory_space<vmem>>, vector<1x8x384xf32>,
    %c8 = arith.constant 8 : index
    %c0_95 = arith.constant 0 : index
    %c0_96 = arith.constant 0 : index
    %125 = vector.load %arg11[%c8, %c0_95, %c0_96] : memref<29x8x384xf32, #tpu.memory_space<vmem>>, vector<1x8x384xf32>
    %126 = vector.shape_cast %125 : vector<1x8x384xf32> to vector<8x384xf32>
    %c20 = arith.constant 20 : index
    %c0_97 = arith.constant 0 : index
    %c0_98 = arith.constant 0 : index
    %127 = vector.load %arg11[%c20, %c0_97, %c0_98] : memref<29x8x384xf32, #tpu.memory_space<vmem>>, vector<1x8x384xf32>
    %128 = vector.shape_cast %127 : vector<1x8x384xf32> to vector<8x384xf32>
    %129 = arith.select %28, %126, %128 : vector<8x384xi1>, vector<8x384xf32>
    %c8_99 = arith.constant 8 : index
    %c0_100 = arith.constant 0 : index
    %c0_101 = arith.constant 0 : index
    %130 = vector.load %arg11[%c8_99, %c0_100, %c0_101] : memref<29x8x384xf32, #tpu.memory_space<vmem>>, vector<1x8x384xf32>
    %131 = vector.shape_cast %130 : vector<1x8x384xf32> to vector<8x384xf32>
    %132 = vector.shape_cast %129 : vector<8x384xf32> to vector<1x8x384xf32>
    tpu.vector_store %arg11[%c8_99, %c0_100, %c0_101], %132 {strides = array<i32>} : memref<29x8x384xf32, #tpu.memory_space<vmem>>, vector<1x8x384xf32>,
    %133 = arith.select %28, %128, %126 : vector<8x384xi1>, vector<8x384xf32>
    %c20_102 = arith.constant 20 : index
    %c0_103 = arith.constant 0 : index
    %c0_104 = arith.constant 0 : index
    %134 = vector.load %arg11[%c20_102, %c0_103, %c0_104] : memref<29x8x384xf32, #tpu.memory_space<vmem>>, vector<1x8x384xf32>
    %135 = vector.shape_cast %134 : vector<1x8x384xf32> to vector<8x384xf32>
    %136 = vector.shape_cast %133 : vector<8x384xf32> to vector<1x8x384xf32>
    tpu.vector_store %arg11[%c20_102, %c0_103, %c0_104], %136 {strides = array<i32>} : memref<29x8x384xf32, #tpu.memory_space<vmem>>, vector<1x8x384xf32>,
    %c9 = arith.constant 9 : index
    %c0_105 = arith.constant 0 : index
    %c0_106 = arith.constant 0 : index
    %137 = vector.load %arg11[%c9, %c0_105, %c0_106] : memref<29x8x384xf32, #tpu.memory_space<vmem>>, vector<1x8x384xf32>
    %138 = vector.shape_cast %137 : vector<1x8x384xf32> to vector<8x384xf32>
    %c19 = arith.constant 19 : index
    %c0_107 = arith.constant 0 : index
    %c0_108 = arith.constant 0 : index
    %139 = vector.load %arg11[%c19, %c0_107, %c0_108] : memref<29x8x384xf32, #tpu.memory_space<vmem>>, vector<1x8x384xf32>
    %140 = vector.shape_cast %139 : vector<1x8x384xf32> to vector<8x384xf32>
    %141 = arith.select %28, %138, %140 : vector<8x384xi1>, vector<8x384xf32>
    %c9_109 = arith.constant 9 : index
    %c0_110 = arith.constant 0 : index
    %c0_111 = arith.constant 0 : index
    %142 = vector.load %arg11[%c9_109, %c0_110, %c0_111] : memref<29x8x384xf32, #tpu.memory_space<vmem>>, vector<1x8x384xf32>
    %143 = vector.shape_cast %142 : vector<1x8x384xf32> to vector<8x384xf32>
    %144 = vector.shape_cast %141 : vector<8x384xf32> to vector<1x8x384xf32>
    tpu.vector_store %arg11[%c9_109, %c0_110, %c0_111], %144 {strides = array<i32>} : memref<29x8x384xf32, #tpu.memory_space<vmem>>, vector<1x8x384xf32>,
    %145 = arith.select %28, %140, %138 : vector<8x384xi1>, vector<8x384xf32>
    %c19_112 = arith.constant 19 : index
    %c0_113 = arith.constant 0 : index
    %c0_114 = arith.constant 0 : index
    %146 = vector.load %arg11[%c19_112, %c0_113, %c0_114] : memref<29x8x384xf32, #tpu.memory_space<vmem>>, vector<1x8x384xf32>
    %147 = vector.shape_cast %146 : vector<1x8x384xf32> to vector<8x384xf32>
    %148 = vector.shape_cast %145 : vector<8x384xf32> to vector<1x8x384xf32>
    tpu.vector_store %arg11[%c19_112, %c0_113, %c0_114], %148 {strides = array<i32>} : memref<29x8x384xf32, #tpu.memory_space<vmem>>, vector<1x8x384xf32>,
    %c10 = arith.constant 10 : index
    %c0_115 = arith.constant 0 : index
    %c0_116 = arith.constant 0 : index
    %149 = vector.load %arg11[%c10, %c0_115, %c0_116] : memref<29x8x384xf32, #tpu.memory_space<vmem>>, vector<1x8x384xf32>
    %150 = vector.shape_cast %149 : vector<1x8x384xf32> to vector<8x384xf32>
    %c18 = arith.constant 18 : index
    %c0_117 = arith.constant 0 : index
    %c0_118 = arith.constant 0 : index
    %151 = vector.load %arg11[%c18, %c0_117, %c0_118] : memref<29x8x384xf32, #tpu.memory_space<vmem>>, vector<1x8x384xf32>
    %152 = vector.shape_cast %151 : vector<1x8x384xf32> to vector<8x384xf32>
    %153 = arith.select %28, %150, %152 : vector<8x384xi1>, vector<8x384xf32>
    %c10_119 = arith.constant 10 : index
    %c0_120 = arith.constant 0 : index
    %c0_121 = arith.constant 0 : index
    %154 = vector.load %arg11[%c10_119, %c0_120, %c0_121] : memref<29x8x384xf32, #tpu.memory_space<vmem>>, vector<1x8x384xf32>
    %155 = vector.shape_cast %154 : vector<1x8x384xf32> to vector<8x384xf32>
    %156 = vector.shape_cast %153 : vector<8x384xf32> to vector<1x8x384xf32>
    tpu.vector_store %arg11[%c10_119, %c0_120, %c0_121], %156 {strides = array<i32>} : memref<29x8x384xf32, #tpu.memory_space<vmem>>, vector<1x8x384xf32>,
    %157 = arith.select %28, %152, %150 : vector<8x384xi1>, vector<8x384xf32>
    %c18_122 = arith.constant 18 : index
    %c0_123 = arith.constant 0 : index
    %c0_124 = arith.constant 0 : index
    %158 = vector.load %arg11[%c18_122, %c0_123, %c0_124] : memref<29x8x384xf32, #tpu.memory_space<vmem>>, vector<1x8x384xf32>
    %159 = vector.shape_cast %158 : vector<1x8x384xf32> to vector<8x384xf32>
    %160 = vector.shape_cast %157 : vector<8x384xf32> to vector<1x8x384xf32>
    tpu.vector_store %arg11[%c18_122, %c0_123, %c0_124], %160 {strides = array<i32>} : memref<29x8x384xf32, #tpu.memory_space<vmem>>, vector<1x8x384xf32>,
    %c11 = arith.constant 11 : index
    %c0_125 = arith.constant 0 : index
    %c0_126 = arith.constant 0 : index
    %161 = vector.load %arg11[%c11, %c0_125, %c0_126] : memref<29x8x384xf32, #tpu.memory_space<vmem>>, vector<1x8x384xf32>
    %162 = vector.shape_cast %161 : vector<1x8x384xf32> to vector<8x384xf32>
    %c17 = arith.constant 17 : index
    %c0_127 = arith.constant 0 : index
    %c0_128 = arith.constant 0 : index
    %163 = vector.load %arg11[%c17, %c0_127, %c0_128] : memref<29x8x384xf32, #tpu.memory_space<vmem>>, vector<1x8x384xf32>
    %164 = vector.shape_cast %163 : vector<1x8x384xf32> to vector<8x384xf32>
    %165 = arith.select %28, %162, %164 : vector<8x384xi1>, vector<8x384xf32>
    %c11_129 = arith.constant 11 : index
    %c0_130 = arith.constant 0 : index
    %c0_131 = arith.constant 0 : index
    %166 = vector.load %arg11[%c11_129, %c0_130, %c0_131] : memref<29x8x384xf32, #tpu.memory_space<vmem>>, vector<1x8x384xf32>
    %167 = vector.shape_cast %166 : vector<1x8x384xf32> to vector<8x384xf32>
    %168 = vector.shape_cast %165 : vector<8x384xf32> to vector<1x8x384xf32>
    tpu.vector_store %arg11[%c11_129, %c0_130, %c0_131], %168 {strides = array<i32>} : memref<29x8x384xf32, #tpu.memory_space<vmem>>, vector<1x8x384xf32>,
    %169 = arith.select %28, %164, %162 : vector<8x384xi1>, vector<8x384xf32>
    %c17_132 = arith.constant 17 : index
    %c0_133 = arith.constant 0 : index
    %c0_134 = arith.constant 0 : index
    %170 = vector.load %arg11[%c17_132, %c0_133, %c0_134] : memref<29x8x384xf32, #tpu.memory_space<vmem>>, vector<1x8x384xf32>
    %171 = vector.shape_cast %170 : vector<1x8x384xf32> to vector<8x384xf32>
    %172 = vector.shape_cast %169 : vector<8x384xf32> to vector<1x8x384xf32>
    tpu.vector_store %arg11[%c17_132, %c0_133, %c0_134], %172 {strides = array<i32>} : memref<29x8x384xf32, #tpu.memory_space<vmem>>, vector<1x8x384xf32>,
    %c12 = arith.constant 12 : index
    %c0_135 = arith.constant 0 : index
    %c0_136 = arith.constant 0 : index
    %173 = vector.load %arg11[%c12, %c0_135, %c0_136] : memref<29x8x384xf32, #tpu.memory_space<vmem>>, vector<1x8x384xf32>
    %174 = vector.shape_cast %173 : vector<1x8x384xf32> to vector<8x384xf32>
    %c16 = arith.constant 16 : index
    %c0_137 = arith.constant 0 : index
    %c0_138 = arith.constant 0 : index
    %175 = vector.load %arg11[%c16, %c0_137, %c0_138] : memref<29x8x384xf32, #tpu.memory_space<vmem>>, vector<1x8x384xf32>
    %176 = vector.shape_cast %175 : vector<1x8x384xf32> to vector<8x384xf32>
    %177 = arith.select %28, %174, %176 : vector<8x384xi1>, vector<8x384xf32>
    %c12_139 = arith.constant 12 : index
    %c0_140 = arith.constant 0 : index
    %c0_141 = arith.constant 0 : index
    %178 = vector.load %arg11[%c12_139, %c0_140, %c0_141] : memref<29x8x384xf32, #tpu.memory_space<vmem>>, vector<1x8x384xf32>
    %179 = vector.shape_cast %178 : vector<1x8x384xf32> to vector<8x384xf32>
    %180 = vector.shape_cast %177 : vector<8x384xf32> to vector<1x8x384xf32>
    tpu.vector_store %arg11[%c12_139, %c0_140, %c0_141], %180 {strides = array<i32>} : memref<29x8x384xf32, #tpu.memory_space<vmem>>, vector<1x8x384xf32>,
    %181 = arith.select %28, %176, %174 : vector<8x384xi1>, vector<8x384xf32>
    %c16_142 = arith.constant 16 : index
    %c0_143 = arith.constant 0 : index
    %c0_144 = arith.constant 0 : index
    %182 = vector.load %arg11[%c16_142, %c0_143, %c0_144] : memref<29x8x384xf32, #tpu.memory_space<vmem>>, vector<1x8x384xf32>
    %183 = vector.shape_cast %182 : vector<1x8x384xf32> to vector<8x384xf32>
    %184 = vector.shape_cast %181 : vector<8x384xf32> to vector<1x8x384xf32>
    tpu.vector_store %arg11[%c16_142, %c0_143, %c0_144], %184 {strides = array<i32>} : memref<29x8x384xf32, #tpu.memory_space<vmem>>, vector<1x8x384xf32>,
    %c13 = arith.constant 13 : index
    %c0_145 = arith.constant 0 : index
    %c0_146 = arith.constant 0 : index
    %185 = vector.load %arg11[%c13, %c0_145, %c0_146] : memref<29x8x384xf32, #tpu.memory_space<vmem>>, vector<1x8x384xf32>
    %186 = vector.shape_cast %185 : vector<1x8x384xf32> to vector<8x384xf32>
    %c15 = arith.constant 15 : index
    %c0_147 = arith.constant 0 : index
    %c0_148 = arith.constant 0 : index
    %187 = vector.load %arg11[%c15, %c0_147, %c0_148] : memref<29x8x384xf32, #tpu.memory_space<vmem>>, vector<1x8x384xf32>
    %188 = vector.shape_cast %187 : vector<1x8x384xf32> to vector<8x384xf32>
    %189 = arith.select %28, %186, %188 : vector<8x384xi1>, vector<8x384xf32>
    %c13_149 = arith.constant 13 : index
    %c0_150 = arith.constant 0 : index
    %c0_151 = arith.constant 0 : index
    %190 = vector.load %arg11[%c13_149, %c0_150, %c0_151] : memref<29x8x384xf32, #tpu.memory_space<vmem>>, vector<1x8x384xf32>
    %191 = vector.shape_cast %190 : vector<1x8x384xf32> to vector<8x384xf32>
    %192 = vector.shape_cast %189 : vector<8x384xf32> to vector<1x8x384xf32>
    tpu.vector_store %arg11[%c13_149, %c0_150, %c0_151], %192 {strides = array<i32>} : memref<29x8x384xf32, #tpu.memory_space<vmem>>, vector<1x8x384xf32>,
    %193 = arith.select %28, %188, %186 : vector<8x384xi1>, vector<8x384xf32>
    %c15_152 = arith.constant 15 : index
    %c0_153 = arith.constant 0 : index
    %c0_154 = arith.constant 0 : index
    %194 = vector.load %arg11[%c15_152, %c0_153, %c0_154] : memref<29x8x384xf32, #tpu.memory_space<vmem>>, vector<1x8x384xf32>
    %195 = vector.shape_cast %194 : vector<1x8x384xf32> to vector<8x384xf32>
    %196 = vector.shape_cast %193 : vector<8x384xf32> to vector<1x8x384xf32>
    tpu.vector_store %arg11[%c15_152, %c0_153, %c0_154], %196 {strides = array<i32>} : memref<29x8x384xf32, #tpu.memory_space<vmem>>, vector<1x8x384xf32>,
    %c14 = arith.constant 14 : index
    %c0_155 = arith.constant 0 : index
    %c0_156 = arith.constant 0 : index
    %197 = vector.load %arg11[%c14, %c0_155, %c0_156] : memref<29x8x384xf32, #tpu.memory_space<vmem>>, vector<1x8x384xf32>
    %198 = vector.shape_cast %197 : vector<1x8x384xf32> to vector<8x384xf32>
    %c14_157 = arith.constant 14 : index
    %c0_158 = arith.constant 0 : index
    %c0_159 = arith.constant 0 : index
    %199 = vector.load %arg11[%c14_157, %c0_158, %c0_159] : memref<29x8x384xf32, #tpu.memory_space<vmem>>, vector<1x8x384xf32>
    %200 = vector.shape_cast %199 : vector<1x8x384xf32> to vector<8x384xf32>
    %201 = arith.select %28, %198, %200 : vector<8x384xi1>, vector<8x384xf32>
    %c14_160 = arith.constant 14 : index
    %c0_161 = arith.constant 0 : index
    %c0_162 = arith.constant 0 : index
    %202 = vector.load %arg11[%c14_160, %c0_161, %c0_162] : memref<29x8x384xf32, #tpu.memory_space<vmem>>, vector<1x8x384xf32>
    %203 = vector.shape_cast %202 : vector<1x8x384xf32> to vector<8x384xf32>
    %204 = vector.shape_cast %201 : vector<8x384xf32> to vector<1x8x384xf32>
    tpu.vector_store %arg11[%c14_160, %c0_161, %c0_162], %204 {strides = array<i32>} : memref<29x8x384xf32, #tpu.memory_space<vmem>>, vector<1x8x384xf32>,
    %205 = arith.select %28, %200, %198 : vector<8x384xi1>, vector<8x384xf32>
    %c14_163 = arith.constant 14 : index
    %c0_164 = arith.constant 0 : index
    %c0_165 = arith.constant 0 : index
    %206 = vector.load %arg11[%c14_163, %c0_164, %c0_165] : memref<29x8x384xf32, #tpu.memory_space<vmem>>, vector<1x8x384xf32>
    %207 = vector.shape_cast %206 : vector<1x8x384xf32> to vector<8x384xf32>
    %208 = vector.shape_cast %205 : vector<8x384xf32> to vector<1x8x384xf32>
    tpu.vector_store %arg11[%c14_163, %c0_164, %c0_165], %208 {strides = array<i32>} : memref<29x8x384xf32, #tpu.memory_space<vmem>>, vector<1x8x384xf32>,
    %209 = tpu.iota {dimensions = array<i32: 1>} : vector<8x128xi32>
    %c64_i32_166 = arith.constant 64 : i32
    %210 = vector.broadcast %c64_i32_166 : i32 to vector<8x128xi32>
    %211 = arith.cmpi slt, %209, %210 : vector<8x128xi32>
    %c0_167 = arith.constant 0 : index
    %c0_168 = arith.constant 0 : index
    %212 = vector.load %arg4[%c0_167, %c0_168] : memref<128x384xf32, #tpu.memory_space<vmem>>, vector<128x384xf32>
    %c0_169 = arith.constant 0 : index
    %c0_170 = arith.constant 0 : index
    %213 = vector.load %arg5[%c0_169, %c0_170] : memref<1x128xf32, #tpu.memory_space<vmem>>, vector<1x128xf32>
    %214 = vector.shape_cast %213 : vector<1x128xf32> to vector<1x128xf32>
    %215 = vector.broadcast %214 : vector<1x128xf32> to vector<8x128xf32>
    %c0_i32_171 = arith.constant 0 : i32
    %216 = arith.index_cast %c0_i32_171 : i32 to index
    %c0_172 = arith.constant 0 : index
    %c0_173 = arith.constant 0 : index
    %217 = vector.load %arg11[%216, %c0_172, %c0_173] : memref<29x8x384xf32, #tpu.memory_space<vmem>>, vector<1x8x384xf32>
    %218 = vector.shape_cast %217 : vector<1x8x384xf32> to vector<8x384xf32>
    %cst_174 = arith.constant dense<0.000000e+00> : vector<8x384xf32>
    %219 = tpu.matmul %2, %212, %cst_174 {dimension_numbers = #tpu.dot_dimension_numbers<[1], [0], [0], [1], [0, 0, 1, 1], [], []>} : vector<8x128xf32>, vector<128x384xf32>, vector<8x384xf32> -> vector<8x384xf32>
    %220 = vector.extract_strided_slice %218 {offsets = [0, 0], sizes = [8, 128], strides = [1, 1]} : vector<8x384xf32> to vector<8x128xf32>
    %221 = vector.extract_strided_slice %219 {offsets = [0, 0], sizes = [8, 128], strides = [1, 1]} : vector<8x384xf32> to vector<8x128xf32>
    %222 = arith.addf %220, %221 : vector<8x128xf32>
    %223 = arith.negf %222 : vector<8x128xf32>
    %224 = math.exp %223 : vector<8x128xf32>
    %cst_175 = arith.constant 1.000000e+00 : f32
    %225 = vector.broadcast %cst_175 : f32 to vector<8x128xf32>
    %226 = arith.addf %225, %224 : vector<8x128xf32>
    %227 = arith.divf %225, %226 : vector<8x128xf32>
    %228 = vector.extract_strided_slice %218 {offsets = [0, 128], sizes = [8, 128], strides = [1, 1]} : vector<8x384xf32> to vector<8x128xf32>
    %229 = vector.extract_strided_slice %219 {offsets = [0, 128], sizes = [8, 128], strides = [1, 1]} : vector<8x384xf32> to vector<8x128xf32>
    %230 = arith.addf %228, %229 : vector<8x128xf32>
    %231 = arith.negf %230 : vector<8x128xf32>
    %232 = math.exp %231 : vector<8x128xf32>
    %cst_176 = arith.constant 1.000000e+00 : f32
    %233 = vector.broadcast %cst_176 : f32 to vector<8x128xf32>
    %234 = arith.addf %233, %232 : vector<8x128xf32>
    %235 = arith.divf %233, %234 : vector<8x128xf32>
    %236 = vector.extract_strided_slice %218 {offsets = [0, 256], sizes = [8, 128], strides = [1, 1]} : vector<8x384xf32> to vector<8x128xf32>
    %237 = vector.extract_strided_slice %219 {offsets = [0, 256], sizes = [8, 128], strides = [1, 1]} : vector<8x384xf32> to vector<8x128xf32>
    %238 = arith.addf %237, %215 : vector<8x128xf32>
    %239 = arith.mulf %227, %238 : vector<8x128xf32>
    %240 = arith.addf %236, %239 : vector<8x128xf32>
    %241 = math.tanh %240 : vector<8x128xf32>
    %cst_177 = arith.constant 1.000000e+00 : f32
    %242 = vector.broadcast %cst_177 : f32 to vector<8x128xf32>
    %243 = arith.subf %242, %235 : vector<8x128xf32>
    %244 = arith.mulf %243, %241 : vector<8x128xf32>
    %245 = arith.mulf %235, %2 : vector<8x128xf32>
    %246 = arith.addf %244, %245 : vector<8x128xf32>
    %247 = arith.index_cast %c0_i32_171 : i32 to index
    %c0_178 = arith.constant 0 : index
    %c0_179 = arith.constant 0 : index
    %248 = vector.load %arg12[%247, %c0_178, %c0_179] : memref<29x8x128xf32, #tpu.memory_space<vmem>>, vector<1x8x128xf32>
    %249 = vector.shape_cast %248 : vector<1x8x128xf32> to vector<8x128xf32>
    %250 = vector.shape_cast %246 : vector<8x128xf32> to vector<1x8x128xf32>
    tpu.vector_store %arg12[%247, %c0_178, %c0_179], %250 {strides = array<i32>} : memref<29x8x128xf32, #tpu.memory_space<vmem>>, vector<1x8x128xf32>,
    %c1_i32_180 = arith.constant 1 : i32
    %251 = arith.index_cast %c1_i32_180 : i32 to index
    %c0_181 = arith.constant 0 : index
    %c0_182 = arith.constant 0 : index
    %252 = vector.load %arg11[%251, %c0_181, %c0_182] : memref<29x8x384xf32, #tpu.memory_space<vmem>>, vector<1x8x384xf32>
    %253 = vector.shape_cast %252 : vector<1x8x384xf32> to vector<8x384xf32>
    %cst_183 = arith.constant dense<0.000000e+00> : vector<8x384xf32>
    %254 = tpu.matmul %246, %212, %cst_183 {dimension_numbers = #tpu.dot_dimension_numbers<[1], [0], [0], [1], [0, 0, 1, 1], [], []>} : vector<8x128xf32>, vector<128x384xf32>, vector<8x384xf32> -> vector<8x384xf32>
    %255 = vector.extract_strided_slice %253 {offsets = [0, 0], sizes = [8, 128], strides = [1, 1]} : vector<8x384xf32> to vector<8x128xf32>
    %256 = vector.extract_strided_slice %254 {offsets = [0, 0], sizes = [8, 128], strides = [1, 1]} : vector<8x384xf32> to vector<8x128xf32>
    %257 = arith.addf %255, %256 : vector<8x128xf32>
    %258 = arith.negf %257 : vector<8x128xf32>
    %259 = math.exp %258 : vector<8x128xf32>
    %cst_184 = arith.constant 1.000000e+00 : f32
    %260 = vector.broadcast %cst_184 : f32 to vector<8x128xf32>
    %261 = arith.addf %260, %259 : vector<8x128xf32>
    %262 = arith.divf %260, %261 : vector<8x128xf32>
    %263 = vector.extract_strided_slice %253 {offsets = [0, 128], sizes = [8, 128], strides = [1, 1]} : vector<8x384xf32> to vector<8x128xf32>
    %264 = vector.extract_strided_slice %254 {offsets = [0, 128], sizes = [8, 128], strides = [1, 1]} : vector<8x384xf32> to vector<8x128xf32>
    %265 = arith.addf %263, %264 : vector<8x128xf32>
    %266 = arith.negf %265 : vector<8x128xf32>
    %267 = math.exp %266 : vector<8x128xf32>
    %cst_185 = arith.constant 1.000000e+00 : f32
    %268 = vector.broadcast %cst_185 : f32 to vector<8x128xf32>
    %269 = arith.addf %268, %267 : vector<8x128xf32>
    %270 = arith.divf %268, %269 : vector<8x128xf32>
    %271 = vector.extract_strided_slice %253 {offsets = [0, 256], sizes = [8, 128], strides = [1, 1]} : vector<8x384xf32> to vector<8x128xf32>
    %272 = vector.extract_strided_slice %254 {offsets = [0, 256], sizes = [8, 128], strides = [1, 1]} : vector<8x384xf32> to vector<8x128xf32>
    %273 = arith.addf %272, %215 : vector<8x128xf32>
    %274 = arith.mulf %262, %273 : vector<8x128xf32>
    %275 = arith.addf %271, %274 : vector<8x128xf32>
    %276 = math.tanh %275 : vector<8x128xf32>
    %cst_186 = arith.constant 1.000000e+00 : f32
    %277 = vector.broadcast %cst_186 : f32 to vector<8x128xf32>
    %278 = arith.subf %277, %270 : vector<8x128xf32>
    %279 = arith.mulf %278, %276 : vector<8x128xf32>
    %280 = arith.mulf %270, %246 : vector<8x128xf32>
    %281 = arith.addf %279, %280 : vector<8x128xf32>
    %282 = arith.index_cast %c1_i32_180 : i32 to index
    %c0_187 = arith.constant 0 : index
    %c0_188 = arith.constant 0 : index
    %283 = vector.load %arg12[%282, %c0_187, %c0_188] : memref<29x8x128xf32, #tpu.memory_space<vmem>>, vector<1x8x128xf32>
    %284 = vector.shape_cast %283 : vector<1x8x128xf32> to vector<8x128xf32>
    %285 = vector.shape_cast %281 : vector<8x128xf32> to vector<1x8x128xf32>
    tpu.vector_store %arg12[%282, %c0_187, %c0_188], %285 {strides = array<i32>} : memref<29x8x128xf32, #tpu.memory_space<vmem>>, vector<1x8x128xf32>,
    %c2_i32 = arith.constant 2 : i32
    %286 = arith.index_cast %c2_i32 : i32 to index
    %c0_189 = arith.constant 0 : index
    %c0_190 = arith.constant 0 : index
    %287 = vector.load %arg11[%286, %c0_189, %c0_190] : memref<29x8x384xf32, #tpu.memory_space<vmem>>, vector<1x8x384xf32>
    %288 = vector.shape_cast %287 : vector<1x8x384xf32> to vector<8x384xf32>
    %cst_191 = arith.constant dense<0.000000e+00> : vector<8x384xf32>
    %289 = tpu.matmul %281, %212, %cst_191 {dimension_numbers = #tpu.dot_dimension_numbers<[1], [0], [0], [1], [0, 0, 1, 1], [], []>} : vector<8x128xf32>, vector<128x384xf32>, vector<8x384xf32> -> vector<8x384xf32>
    %290 = vector.extract_strided_slice %288 {offsets = [0, 0], sizes = [8, 128], strides = [1, 1]} : vector<8x384xf32> to vector<8x128xf32>
    %291 = vector.extract_strided_slice %289 {offsets = [0, 0], sizes = [8, 128], strides = [1, 1]} : vector<8x384xf32> to vector<8x128xf32>
    %292 = arith.addf %290, %291 : vector<8x128xf32>
    %293 = arith.negf %292 : vector<8x128xf32>
    %294 = math.exp %293 : vector<8x128xf32>
    %cst_192 = arith.constant 1.000000e+00 : f32
    %295 = vector.broadcast %cst_192 : f32 to vector<8x128xf32>
    %296 = arith.addf %295, %294 : vector<8x128xf32>
    %297 = arith.divf %295, %296 : vector<8x128xf32>
    %298 = vector.extract_strided_slice %288 {offsets = [0, 128], sizes = [8, 128], strides = [1, 1]} : vector<8x384xf32> to vector<8x128xf32>
    %299 = vector.extract_strided_slice %289 {offsets = [0, 128], sizes = [8, 128], strides = [1, 1]} : vector<8x384xf32> to vector<8x128xf32>
    %300 = arith.addf %298, %299 : vector<8x128xf32>
    %301 = arith.negf %300 : vector<8x128xf32>
    %302 = math.exp %301 : vector<8x128xf32>
    %cst_193 = arith.constant 1.000000e+00 : f32
    %303 = vector.broadcast %cst_193 : f32 to vector<8x128xf32>
    %304 = arith.addf %303, %302 : vector<8x128xf32>
    %305 = arith.divf %303, %304 : vector<8x128xf32>
    %306 = vector.extract_strided_slice %288 {offsets = [0, 256], sizes = [8, 128], strides = [1, 1]} : vector<8x384xf32> to vector<8x128xf32>
    %307 = vector.extract_strided_slice %289 {offsets = [0, 256], sizes = [8, 128], strides = [1, 1]} : vector<8x384xf32> to vector<8x128xf32>
    %308 = arith.addf %307, %215 : vector<8x128xf32>
    %309 = arith.mulf %297, %308 : vector<8x128xf32>
    %310 = arith.addf %306, %309 : vector<8x128xf32>
    %311 = math.tanh %310 : vector<8x128xf32>
    %cst_194 = arith.constant 1.000000e+00 : f32
    %312 = vector.broadcast %cst_194 : f32 to vector<8x128xf32>
    %313 = arith.subf %312, %305 : vector<8x128xf32>
    %314 = arith.mulf %313, %311 : vector<8x128xf32>
    %315 = arith.mulf %305, %281 : vector<8x128xf32>
    %316 = arith.addf %314, %315 : vector<8x128xf32>
    %317 = arith.index_cast %c2_i32 : i32 to index
    %c0_195 = arith.constant 0 : index
    %c0_196 = arith.constant 0 : index
    %318 = vector.load %arg12[%317, %c0_195, %c0_196] : memref<29x8x128xf32, #tpu.memory_space<vmem>>, vector<1x8x128xf32>
    %319 = vector.shape_cast %318 : vector<1x8x128xf32> to vector<8x128xf32>
    %320 = vector.shape_cast %316 : vector<8x128xf32> to vector<1x8x128xf32>
    tpu.vector_store %arg12[%317, %c0_195, %c0_196], %320 {strides = array<i32>} : memref<29x8x128xf32, #tpu.memory_space<vmem>>, vector<1x8x128xf32>,
    %c3_i32 = arith.constant 3 : i32
    %321 = arith.index_cast %c3_i32 : i32 to index
    %c0_197 = arith.constant 0 : index
    %c0_198 = arith.constant 0 : index
    %322 = vector.load %arg11[%321, %c0_197, %c0_198] : memref<29x8x384xf32, #tpu.memory_space<vmem>>, vector<1x8x384xf32>
    %323 = vector.shape_cast %322 : vector<1x8x384xf32> to vector<8x384xf32>
    %cst_199 = arith.constant dense<0.000000e+00> : vector<8x384xf32>
    %324 = tpu.matmul %316, %212, %cst_199 {dimension_numbers = #tpu.dot_dimension_numbers<[1], [0], [0], [1], [0, 0, 1, 1], [], []>} : vector<8x128xf32>, vector<128x384xf32>, vector<8x384xf32> -> vector<8x384xf32>
    %325 = vector.extract_strided_slice %323 {offsets = [0, 0], sizes = [8, 128], strides = [1, 1]} : vector<8x384xf32> to vector<8x128xf32>
    %326 = vector.extract_strided_slice %324 {offsets = [0, 0], sizes = [8, 128], strides = [1, 1]} : vector<8x384xf32> to vector<8x128xf32>
    %327 = arith.addf %325, %326 : vector<8x128xf32>
    %328 = arith.negf %327 : vector<8x128xf32>
    %329 = math.exp %328 : vector<8x128xf32>
    %cst_200 = arith.constant 1.000000e+00 : f32
    %330 = vector.broadcast %cst_200 : f32 to vector<8x128xf32>
    %331 = arith.addf %330, %329 : vector<8x128xf32>
    %332 = arith.divf %330, %331 : vector<8x128xf32>
    %333 = vector.extract_strided_slice %323 {offsets = [0, 128], sizes = [8, 128], strides = [1, 1]} : vector<8x384xf32> to vector<8x128xf32>
    %334 = vector.extract_strided_slice %324 {offsets = [0, 128], sizes = [8, 128], strides = [1, 1]} : vector<8x384xf32> to vector<8x128xf32>
    %335 = arith.addf %333, %334 : vector<8x128xf32>
    %336 = arith.negf %335 : vector<8x128xf32>
    %337 = math.exp %336 : vector<8x128xf32>
    %cst_201 = arith.constant 1.000000e+00 : f32
    %338 = vector.broadcast %cst_201 : f32 to vector<8x128xf32>
    %339 = arith.addf %338, %337 : vector<8x128xf32>
    %340 = arith.divf %338, %339 : vector<8x128xf32>
    %341 = vector.extract_strided_slice %323 {offsets = [0, 256], sizes = [8, 128], strides = [1, 1]} : vector<8x384xf32> to vector<8x128xf32>
    %342 = vector.extract_strided_slice %324 {offsets = [0, 256], sizes = [8, 128], strides = [1, 1]} : vector<8x384xf32> to vector<8x128xf32>
    %343 = arith.addf %342, %215 : vector<8x128xf32>
    %344 = arith.mulf %332, %343 : vector<8x128xf32>
    %345 = arith.addf %341, %344 : vector<8x128xf32>
    %346 = math.tanh %345 : vector<8x128xf32>
    %cst_202 = arith.constant 1.000000e+00 : f32
    %347 = vector.broadcast %cst_202 : f32 to vector<8x128xf32>
    %348 = arith.subf %347, %340 : vector<8x128xf32>
    %349 = arith.mulf %348, %346 : vector<8x128xf32>
    %350 = arith.mulf %340, %316 : vector<8x128xf32>
    %351 = arith.addf %349, %350 : vector<8x128xf32>
    %352 = arith.index_cast %c3_i32 : i32 to index
    %c0_203 = arith.constant 0 : index
    %c0_204 = arith.constant 0 : index
    %353 = vector.load %arg12[%352, %c0_203, %c0_204] : memref<29x8x128xf32, #tpu.memory_space<vmem>>, vector<1x8x128xf32>
    %354 = vector.shape_cast %353 : vector<1x8x128xf32> to vector<8x128xf32>
    %355 = vector.shape_cast %351 : vector<8x128xf32> to vector<1x8x128xf32>
    tpu.vector_store %arg12[%352, %c0_203, %c0_204], %355 {strides = array<i32>} : memref<29x8x128xf32, #tpu.memory_space<vmem>>, vector<1x8x128xf32>,
    %c4_i32 = arith.constant 4 : i32
    %356 = arith.index_cast %c4_i32 : i32 to index
    %c0_205 = arith.constant 0 : index
    %c0_206 = arith.constant 0 : index
    %357 = vector.load %arg11[%356, %c0_205, %c0_206] : memref<29x8x384xf32, #tpu.memory_space<vmem>>, vector<1x8x384xf32>
    %358 = vector.shape_cast %357 : vector<1x8x384xf32> to vector<8x384xf32>
    %cst_207 = arith.constant dense<0.000000e+00> : vector<8x384xf32>
    %359 = tpu.matmul %351, %212, %cst_207 {dimension_numbers = #tpu.dot_dimension_numbers<[1], [0], [0], [1], [0, 0, 1, 1], [], []>} : vector<8x128xf32>, vector<128x384xf32>, vector<8x384xf32> -> vector<8x384xf32>
    %360 = vector.extract_strided_slice %358 {offsets = [0, 0], sizes = [8, 128], strides = [1, 1]} : vector<8x384xf32> to vector<8x128xf32>
    %361 = vector.extract_strided_slice %359 {offsets = [0, 0], sizes = [8, 128], strides = [1, 1]} : vector<8x384xf32> to vector<8x128xf32>
    %362 = arith.addf %360, %361 : vector<8x128xf32>
    %363 = arith.negf %362 : vector<8x128xf32>
    %364 = math.exp %363 : vector<8x128xf32>
    %cst_208 = arith.constant 1.000000e+00 : f32
    %365 = vector.broadcast %cst_208 : f32 to vector<8x128xf32>
    %366 = arith.addf %365, %364 : vector<8x128xf32>
    %367 = arith.divf %365, %366 : vector<8x128xf32>
    %368 = vector.extract_strided_slice %358 {offsets = [0, 128], sizes = [8, 128], strides = [1, 1]} : vector<8x384xf32> to vector<8x128xf32>
    %369 = vector.extract_strided_slice %359 {offsets = [0, 128], sizes = [8, 128], strides = [1, 1]} : vector<8x384xf32> to vector<8x128xf32>
    %370 = arith.addf %368, %369 : vector<8x128xf32>
    %371 = arith.negf %370 : vector<8x128xf32>
    %372 = math.exp %371 : vector<8x128xf32>
    %cst_209 = arith.constant 1.000000e+00 : f32
    %373 = vector.broadcast %cst_209 : f32 to vector<8x128xf32>
    %374 = arith.addf %373, %372 : vector<8x128xf32>
    %375 = arith.divf %373, %374 : vector<8x128xf32>
    %376 = vector.extract_strided_slice %358 {offsets = [0, 256], sizes = [8, 128], strides = [1, 1]} : vector<8x384xf32> to vector<8x128xf32>
    %377 = vector.extract_strided_slice %359 {offsets = [0, 256], sizes = [8, 128], strides = [1, 1]} : vector<8x384xf32> to vector<8x128xf32>
    %378 = arith.addf %377, %215 : vector<8x128xf32>
    %379 = arith.mulf %367, %378 : vector<8x128xf32>
    %380 = arith.addf %376, %379 : vector<8x128xf32>
    %381 = math.tanh %380 : vector<8x128xf32>
    %cst_210 = arith.constant 1.000000e+00 : f32
    %382 = vector.broadcast %cst_210 : f32 to vector<8x128xf32>
    %383 = arith.subf %382, %375 : vector<8x128xf32>
    %384 = arith.mulf %383, %381 : vector<8x128xf32>
    %385 = arith.mulf %375, %351 : vector<8x128xf32>
    %386 = arith.addf %384, %385 : vector<8x128xf32>
    %387 = arith.index_cast %c4_i32 : i32 to index
    %c0_211 = arith.constant 0 : index
    %c0_212 = arith.constant 0 : index
    %388 = vector.load %arg12[%387, %c0_211, %c0_212] : memref<29x8x128xf32, #tpu.memory_space<vmem>>, vector<1x8x128xf32>
    %389 = vector.shape_cast %388 : vector<1x8x128xf32> to vector<8x128xf32>
    %390 = vector.shape_cast %386 : vector<8x128xf32> to vector<1x8x128xf32>
    tpu.vector_store %arg12[%387, %c0_211, %c0_212], %390 {strides = array<i32>} : memref<29x8x128xf32, #tpu.memory_space<vmem>>, vector<1x8x128xf32>,
    %c5_i32 = arith.constant 5 : i32
    %391 = arith.index_cast %c5_i32 : i32 to index
    %c0_213 = arith.constant 0 : index
    %c0_214 = arith.constant 0 : index
    %392 = vector.load %arg11[%391, %c0_213, %c0_214] : memref<29x8x384xf32, #tpu.memory_space<vmem>>, vector<1x8x384xf32>
    %393 = vector.shape_cast %392 : vector<1x8x384xf32> to vector<8x384xf32>
    %cst_215 = arith.constant dense<0.000000e+00> : vector<8x384xf32>
    %394 = tpu.matmul %386, %212, %cst_215 {dimension_numbers = #tpu.dot_dimension_numbers<[1], [0], [0], [1], [0, 0, 1, 1], [], []>} : vector<8x128xf32>, vector<128x384xf32>, vector<8x384xf32> -> vector<8x384xf32>
    %395 = vector.extract_strided_slice %393 {offsets = [0, 0], sizes = [8, 128], strides = [1, 1]} : vector<8x384xf32> to vector<8x128xf32>
    %396 = vector.extract_strided_slice %394 {offsets = [0, 0], sizes = [8, 128], strides = [1, 1]} : vector<8x384xf32> to vector<8x128xf32>
    %397 = arith.addf %395, %396 : vector<8x128xf32>
    %398 = arith.negf %397 : vector<8x128xf32>
    %399 = math.exp %398 : vector<8x128xf32>
    %cst_216 = arith.constant 1.000000e+00 : f32
    %400 = vector.broadcast %cst_216 : f32 to vector<8x128xf32>
    %401 = arith.addf %400, %399 : vector<8x128xf32>
    %402 = arith.divf %400, %401 : vector<8x128xf32>
    %403 = vector.extract_strided_slice %393 {offsets = [0, 128], sizes = [8, 128], strides = [1, 1]} : vector<8x384xf32> to vector<8x128xf32>
    %404 = vector.extract_strided_slice %394 {offsets = [0, 128], sizes = [8, 128], strides = [1, 1]} : vector<8x384xf32> to vector<8x128xf32>
    %405 = arith.addf %403, %404 : vector<8x128xf32>
    %406 = arith.negf %405 : vector<8x128xf32>
    %407 = math.exp %406 : vector<8x128xf32>
    %cst_217 = arith.constant 1.000000e+00 : f32
    %408 = vector.broadcast %cst_217 : f32 to vector<8x128xf32>
    %409 = arith.addf %408, %407 : vector<8x128xf32>
    %410 = arith.divf %408, %409 : vector<8x128xf32>
    %411 = vector.extract_strided_slice %393 {offsets = [0, 256], sizes = [8, 128], strides = [1, 1]} : vector<8x384xf32> to vector<8x128xf32>
    %412 = vector.extract_strided_slice %394 {offsets = [0, 256], sizes = [8, 128], strides = [1, 1]} : vector<8x384xf32> to vector<8x128xf32>
    %413 = arith.addf %412, %215 : vector<8x128xf32>
    %414 = arith.mulf %402, %413 : vector<8x128xf32>
    %415 = arith.addf %411, %414 : vector<8x128xf32>
    %416 = math.tanh %415 : vector<8x128xf32>
    %cst_218 = arith.constant 1.000000e+00 : f32
    %417 = vector.broadcast %cst_218 : f32 to vector<8x128xf32>
    %418 = arith.subf %417, %410 : vector<8x128xf32>
    %419 = arith.mulf %418, %416 : vector<8x128xf32>
    %420 = arith.mulf %410, %386 : vector<8x128xf32>
    %421 = arith.addf %419, %420 : vector<8x128xf32>
    %422 = arith.index_cast %c5_i32 : i32 to index
    %c0_219 = arith.constant 0 : index
    %c0_220 = arith.constant 0 : index
    %423 = vector.load %arg12[%422, %c0_219, %c0_220] : memref<29x8x128xf32, #tpu.memory_space<vmem>>, vector<1x8x128xf32>
    %424 = vector.shape_cast %423 : vector<1x8x128xf32> to vector<8x128xf32>
    %425 = vector.shape_cast %421 : vector<8x128xf32> to vector<1x8x128xf32>
    tpu.vector_store %arg12[%422, %c0_219, %c0_220], %425 {strides = array<i32>} : memref<29x8x128xf32, #tpu.memory_space<vmem>>, vector<1x8x128xf32>,
    %c6_i32 = arith.constant 6 : i32
    %426 = arith.index_cast %c6_i32 : i32 to index
    %c0_221 = arith.constant 0 : index
    %c0_222 = arith.constant 0 : index
    %427 = vector.load %arg11[%426, %c0_221, %c0_222] : memref<29x8x384xf32, #tpu.memory_space<vmem>>, vector<1x8x384xf32>
    %428 = vector.shape_cast %427 : vector<1x8x384xf32> to vector<8x384xf32>
    %cst_223 = arith.constant dense<0.000000e+00> : vector<8x384xf32>
    %429 = tpu.matmul %421, %212, %cst_223 {dimension_numbers = #tpu.dot_dimension_numbers<[1], [0], [0], [1], [0, 0, 1, 1], [], []>} : vector<8x128xf32>, vector<128x384xf32>, vector<8x384xf32> -> vector<8x384xf32>
    %430 = vector.extract_strided_slice %428 {offsets = [0, 0], sizes = [8, 128], strides = [1, 1]} : vector<8x384xf32> to vector<8x128xf32>
    %431 = vector.extract_strided_slice %429 {offsets = [0, 0], sizes = [8, 128], strides = [1, 1]} : vector<8x384xf32> to vector<8x128xf32>
    %432 = arith.addf %430, %431 : vector<8x128xf32>
    %433 = arith.negf %432 : vector<8x128xf32>
    %434 = math.exp %433 : vector<8x128xf32>
    %cst_224 = arith.constant 1.000000e+00 : f32
    %435 = vector.broadcast %cst_224 : f32 to vector<8x128xf32>
    %436 = arith.addf %435, %434 : vector<8x128xf32>
    %437 = arith.divf %435, %436 : vector<8x128xf32>
    %438 = vector.extract_strided_slice %428 {offsets = [0, 128], sizes = [8, 128], strides = [1, 1]} : vector<8x384xf32> to vector<8x128xf32>
    %439 = vector.extract_strided_slice %429 {offsets = [0, 128], sizes = [8, 128], strides = [1, 1]} : vector<8x384xf32> to vector<8x128xf32>
    %440 = arith.addf %438, %439 : vector<8x128xf32>
    %441 = arith.negf %440 : vector<8x128xf32>
    %442 = math.exp %441 : vector<8x128xf32>
    %cst_225 = arith.constant 1.000000e+00 : f32
    %443 = vector.broadcast %cst_225 : f32 to vector<8x128xf32>
    %444 = arith.addf %443, %442 : vector<8x128xf32>
    %445 = arith.divf %443, %444 : vector<8x128xf32>
    %446 = vector.extract_strided_slice %428 {offsets = [0, 256], sizes = [8, 128], strides = [1, 1]} : vector<8x384xf32> to vector<8x128xf32>
    %447 = vector.extract_strided_slice %429 {offsets = [0, 256], sizes = [8, 128], strides = [1, 1]} : vector<8x384xf32> to vector<8x128xf32>
    %448 = arith.addf %447, %215 : vector<8x128xf32>
    %449 = arith.mulf %437, %448 : vector<8x128xf32>
    %450 = arith.addf %446, %449 : vector<8x128xf32>
    %451 = math.tanh %450 : vector<8x128xf32>
    %cst_226 = arith.constant 1.000000e+00 : f32
    %452 = vector.broadcast %cst_226 : f32 to vector<8x128xf32>
    %453 = arith.subf %452, %445 : vector<8x128xf32>
    %454 = arith.mulf %453, %451 : vector<8x128xf32>
    %455 = arith.mulf %445, %421 : vector<8x128xf32>
    %456 = arith.addf %454, %455 : vector<8x128xf32>
    %457 = arith.index_cast %c6_i32 : i32 to index
    %c0_227 = arith.constant 0 : index
    %c0_228 = arith.constant 0 : index
    %458 = vector.load %arg12[%457, %c0_227, %c0_228] : memref<29x8x128xf32, #tpu.memory_space<vmem>>, vector<1x8x128xf32>
    %459 = vector.shape_cast %458 : vector<1x8x128xf32> to vector<8x128xf32>
    %460 = vector.shape_cast %456 : vector<8x128xf32> to vector<1x8x128xf32>
    tpu.vector_store %arg12[%457, %c0_227, %c0_228], %460 {strides = array<i32>} : memref<29x8x128xf32, #tpu.memory_space<vmem>>, vector<1x8x128xf32>,
    %c7_i32 = arith.constant 7 : i32
    %461 = arith.index_cast %c7_i32 : i32 to index
    %c0_229 = arith.constant 0 : index
    %c0_230 = arith.constant 0 : index
    %462 = vector.load %arg11[%461, %c0_229, %c0_230] : memref<29x8x384xf32, #tpu.memory_space<vmem>>, vector<1x8x384xf32>
    %463 = vector.shape_cast %462 : vector<1x8x384xf32> to vector<8x384xf32>
    %cst_231 = arith.constant dense<0.000000e+00> : vector<8x384xf32>
    %464 = tpu.matmul %456, %212, %cst_231 {dimension_numbers = #tpu.dot_dimension_numbers<[1], [0], [0], [1], [0, 0, 1, 1], [], []>} : vector<8x128xf32>, vector<128x384xf32>, vector<8x384xf32> -> vector<8x384xf32>
    %465 = vector.extract_strided_slice %463 {offsets = [0, 0], sizes = [8, 128], strides = [1, 1]} : vector<8x384xf32> to vector<8x128xf32>
    %466 = vector.extract_strided_slice %464 {offsets = [0, 0], sizes = [8, 128], strides = [1, 1]} : vector<8x384xf32> to vector<8x128xf32>
    %467 = arith.addf %465, %466 : vector<8x128xf32>
    %468 = arith.negf %467 : vector<8x128xf32>
    %469 = math.exp %468 : vector<8x128xf32>
    %cst_232 = arith.constant 1.000000e+00 : f32
    %470 = vector.broadcast %cst_232 : f32 to vector<8x128xf32>
    %471 = arith.addf %470, %469 : vector<8x128xf32>
    %472 = arith.divf %470, %471 : vector<8x128xf32>
    %473 = vector.extract_strided_slice %463 {offsets = [0, 128], sizes = [8, 128], strides = [1, 1]} : vector<8x384xf32> to vector<8x128xf32>
    %474 = vector.extract_strided_slice %464 {offsets = [0, 128], sizes = [8, 128], strides = [1, 1]} : vector<8x384xf32> to vector<8x128xf32>
    %475 = arith.addf %473, %474 : vector<8x128xf32>
    %476 = arith.negf %475 : vector<8x128xf32>
    %477 = math.exp %476 : vector<8x128xf32>
    %cst_233 = arith.constant 1.000000e+00 : f32
    %478 = vector.broadcast %cst_233 : f32 to vector<8x128xf32>
    %479 = arith.addf %478, %477 : vector<8x128xf32>
    %480 = arith.divf %478, %479 : vector<8x128xf32>
    %481 = vector.extract_strided_slice %463 {offsets = [0, 256], sizes = [8, 128], strides = [1, 1]} : vector<8x384xf32> to vector<8x128xf32>
    %482 = vector.extract_strided_slice %464 {offsets = [0, 256], sizes = [8, 128], strides = [1, 1]} : vector<8x384xf32> to vector<8x128xf32>
    %483 = arith.addf %482, %215 : vector<8x128xf32>
    %484 = arith.mulf %472, %483 : vector<8x128xf32>
    %485 = arith.addf %481, %484 : vector<8x128xf32>
    %486 = math.tanh %485 : vector<8x128xf32>
    %cst_234 = arith.constant 1.000000e+00 : f32
    %487 = vector.broadcast %cst_234 : f32 to vector<8x128xf32>
    %488 = arith.subf %487, %480 : vector<8x128xf32>
    %489 = arith.mulf %488, %486 : vector<8x128xf32>
    %490 = arith.mulf %480, %456 : vector<8x128xf32>
    %491 = arith.addf %489, %490 : vector<8x128xf32>
    %492 = arith.index_cast %c7_i32 : i32 to index
    %c0_235 = arith.constant 0 : index
    %c0_236 = arith.constant 0 : index
    %493 = vector.load %arg12[%492, %c0_235, %c0_236] : memref<29x8x128xf32, #tpu.memory_space<vmem>>, vector<1x8x128xf32>
    %494 = vector.shape_cast %493 : vector<1x8x128xf32> to vector<8x128xf32>
    %495 = vector.shape_cast %491 : vector<8x128xf32> to vector<1x8x128xf32>
    tpu.vector_store %arg12[%492, %c0_235, %c0_236], %495 {strides = array<i32>} : memref<29x8x128xf32, #tpu.memory_space<vmem>>, vector<1x8x128xf32>,
    %c8_i32 = arith.constant 8 : i32
    %496 = arith.index_cast %c8_i32 : i32 to index
    %c0_237 = arith.constant 0 : index
    %c0_238 = arith.constant 0 : index
    %497 = vector.load %arg11[%496, %c0_237, %c0_238] : memref<29x8x384xf32, #tpu.memory_space<vmem>>, vector<1x8x384xf32>
    %498 = vector.shape_cast %497 : vector<1x8x384xf32> to vector<8x384xf32>
    %cst_239 = arith.constant dense<0.000000e+00> : vector<8x384xf32>
    %499 = tpu.matmul %491, %212, %cst_239 {dimension_numbers = #tpu.dot_dimension_numbers<[1], [0], [0], [1], [0, 0, 1, 1], [], []>} : vector<8x128xf32>, vector<128x384xf32>, vector<8x384xf32> -> vector<8x384xf32>
    %500 = vector.extract_strided_slice %498 {offsets = [0, 0], sizes = [8, 128], strides = [1, 1]} : vector<8x384xf32> to vector<8x128xf32>
    %501 = vector.extract_strided_slice %499 {offsets = [0, 0], sizes = [8, 128], strides = [1, 1]} : vector<8x384xf32> to vector<8x128xf32>
    %502 = arith.addf %500, %501 : vector<8x128xf32>
    %503 = arith.negf %502 : vector<8x128xf32>
    %504 = math.exp %503 : vector<8x128xf32>
    %cst_240 = arith.constant 1.000000e+00 : f32
    %505 = vector.broadcast %cst_240 : f32 to vector<8x128xf32>
    %506 = arith.addf %505, %504 : vector<8x128xf32>
    %507 = arith.divf %505, %506 : vector<8x128xf32>
    %508 = vector.extract_strided_slice %498 {offsets = [0, 128], sizes = [8, 128], strides = [1, 1]} : vector<8x384xf32> to vector<8x128xf32>
    %509 = vector.extract_strided_slice %499 {offsets = [0, 128], sizes = [8, 128], strides = [1, 1]} : vector<8x384xf32> to vector<8x128xf32>
    %510 = arith.addf %508, %509 : vector<8x128xf32>
    %511 = arith.negf %510 : vector<8x128xf32>
    %512 = math.exp %511 : vector<8x128xf32>
    %cst_241 = arith.constant 1.000000e+00 : f32
    %513 = vector.broadcast %cst_241 : f32 to vector<8x128xf32>
    %514 = arith.addf %513, %512 : vector<8x128xf32>
    %515 = arith.divf %513, %514 : vector<8x128xf32>
    %516 = vector.extract_strided_slice %498 {offsets = [0, 256], sizes = [8, 128], strides = [1, 1]} : vector<8x384xf32> to vector<8x128xf32>
    %517 = vector.extract_strided_slice %499 {offsets = [0, 256], sizes = [8, 128], strides = [1, 1]} : vector<8x384xf32> to vector<8x128xf32>
    %518 = arith.addf %517, %215 : vector<8x128xf32>
    %519 = arith.mulf %507, %518 : vector<8x128xf32>
    %520 = arith.addf %516, %519 : vector<8x128xf32>
    %521 = math.tanh %520 : vector<8x128xf32>
    %cst_242 = arith.constant 1.000000e+00 : f32
    %522 = vector.broadcast %cst_242 : f32 to vector<8x128xf32>
    %523 = arith.subf %522, %515 : vector<8x128xf32>
    %524 = arith.mulf %523, %521 : vector<8x128xf32>
    %525 = arith.mulf %515, %491 : vector<8x128xf32>
    %526 = arith.addf %524, %525 : vector<8x128xf32>
    %527 = arith.index_cast %c8_i32 : i32 to index
    %c0_243 = arith.constant 0 : index
    %c0_244 = arith.constant 0 : index
    %528 = vector.load %arg12[%527, %c0_243, %c0_244] : memref<29x8x128xf32, #tpu.memory_space<vmem>>, vector<1x8x128xf32>
    %529 = vector.shape_cast %528 : vector<1x8x128xf32> to vector<8x128xf32>
    %530 = vector.shape_cast %526 : vector<8x128xf32> to vector<1x8x128xf32>
    tpu.vector_store %arg12[%527, %c0_243, %c0_244], %530 {strides = array<i32>} : memref<29x8x128xf32, #tpu.memory_space<vmem>>, vector<1x8x128xf32>,
    %c9_i32 = arith.constant 9 : i32
    %531 = arith.index_cast %c9_i32 : i32 to index
    %c0_245 = arith.constant 0 : index
    %c0_246 = arith.constant 0 : index
    %532 = vector.load %arg11[%531, %c0_245, %c0_246] : memref<29x8x384xf32, #tpu.memory_space<vmem>>, vector<1x8x384xf32>
    %533 = vector.shape_cast %532 : vector<1x8x384xf32> to vector<8x384xf32>
    %cst_247 = arith.constant dense<0.000000e+00> : vector<8x384xf32>
    %534 = tpu.matmul %526, %212, %cst_247 {dimension_numbers = #tpu.dot_dimension_numbers<[1], [0], [0], [1], [0, 0, 1, 1], [], []>} : vector<8x128xf32>, vector<128x384xf32>, vector<8x384xf32> -> vector<8x384xf32>
    %535 = vector.extract_strided_slice %533 {offsets = [0, 0], sizes = [8, 128], strides = [1, 1]} : vector<8x384xf32> to vector<8x128xf32>
    %536 = vector.extract_strided_slice %534 {offsets = [0, 0], sizes = [8, 128], strides = [1, 1]} : vector<8x384xf32> to vector<8x128xf32>
    %537 = arith.addf %535, %536 : vector<8x128xf32>
    %538 = arith.negf %537 : vector<8x128xf32>
    %539 = math.exp %538 : vector<8x128xf32>
    %cst_248 = arith.constant 1.000000e+00 : f32
    %540 = vector.broadcast %cst_248 : f32 to vector<8x128xf32>
    %541 = arith.addf %540, %539 : vector<8x128xf32>
    %542 = arith.divf %540, %541 : vector<8x128xf32>
    %543 = vector.extract_strided_slice %533 {offsets = [0, 128], sizes = [8, 128], strides = [1, 1]} : vector<8x384xf32> to vector<8x128xf32>
    %544 = vector.extract_strided_slice %534 {offsets = [0, 128], sizes = [8, 128], strides = [1, 1]} : vector<8x384xf32> to vector<8x128xf32>
    %545 = arith.addf %543, %544 : vector<8x128xf32>
    %546 = arith.negf %545 : vector<8x128xf32>
    %547 = math.exp %546 : vector<8x128xf32>
    %cst_249 = arith.constant 1.000000e+00 : f32
    %548 = vector.broadcast %cst_249 : f32 to vector<8x128xf32>
    %549 = arith.addf %548, %547 : vector<8x128xf32>
    %550 = arith.divf %548, %549 : vector<8x128xf32>
    %551 = vector.extract_strided_slice %533 {offsets = [0, 256], sizes = [8, 128], strides = [1, 1]} : vector<8x384xf32> to vector<8x128xf32>
    %552 = vector.extract_strided_slice %534 {offsets = [0, 256], sizes = [8, 128], strides = [1, 1]} : vector<8x384xf32> to vector<8x128xf32>
    %553 = arith.addf %552, %215 : vector<8x128xf32>
    %554 = arith.mulf %542, %553 : vector<8x128xf32>
    %555 = arith.addf %551, %554 : vector<8x128xf32>
    %556 = math.tanh %555 : vector<8x128xf32>
    %cst_250 = arith.constant 1.000000e+00 : f32
    %557 = vector.broadcast %cst_250 : f32 to vector<8x128xf32>
    %558 = arith.subf %557, %550 : vector<8x128xf32>
    %559 = arith.mulf %558, %556 : vector<8x128xf32>
    %560 = arith.mulf %550, %526 : vector<8x128xf32>
    %561 = arith.addf %559, %560 : vector<8x128xf32>
    %562 = arith.index_cast %c9_i32 : i32 to index
    %c0_251 = arith.constant 0 : index
    %c0_252 = arith.constant 0 : index
    %563 = vector.load %arg12[%562, %c0_251, %c0_252] : memref<29x8x128xf32, #tpu.memory_space<vmem>>, vector<1x8x128xf32>
    %564 = vector.shape_cast %563 : vector<1x8x128xf32> to vector<8x128xf32>
    %565 = vector.shape_cast %561 : vector<8x128xf32> to vector<1x8x128xf32>
    tpu.vector_store %arg12[%562, %c0_251, %c0_252], %565 {strides = array<i32>} : memref<29x8x128xf32, #tpu.memory_space<vmem>>, vector<1x8x128xf32>,
    %c10_i32 = arith.constant 10 : i32
    %566 = arith.index_cast %c10_i32 : i32 to index
    %c0_253 = arith.constant 0 : index
    %c0_254 = arith.constant 0 : index
    %567 = vector.load %arg11[%566, %c0_253, %c0_254] : memref<29x8x384xf32, #tpu.memory_space<vmem>>, vector<1x8x384xf32>
    %568 = vector.shape_cast %567 : vector<1x8x384xf32> to vector<8x384xf32>
    %cst_255 = arith.constant dense<0.000000e+00> : vector<8x384xf32>
    %569 = tpu.matmul %561, %212, %cst_255 {dimension_numbers = #tpu.dot_dimension_numbers<[1], [0], [0], [1], [0, 0, 1, 1], [], []>} : vector<8x128xf32>, vector<128x384xf32>, vector<8x384xf32> -> vector<8x384xf32>
    %570 = vector.extract_strided_slice %568 {offsets = [0, 0], sizes = [8, 128], strides = [1, 1]} : vector<8x384xf32> to vector<8x128xf32>
    %571 = vector.extract_strided_slice %569 {offsets = [0, 0], sizes = [8, 128], strides = [1, 1]} : vector<8x384xf32> to vector<8x128xf32>
    %572 = arith.addf %570, %571 : vector<8x128xf32>
    %573 = arith.negf %572 : vector<8x128xf32>
    %574 = math.exp %573 : vector<8x128xf32>
    %cst_256 = arith.constant 1.000000e+00 : f32
    %575 = vector.broadcast %cst_256 : f32 to vector<8x128xf32>
    %576 = arith.addf %575, %574 : vector<8x128xf32>
    %577 = arith.divf %575, %576 : vector<8x128xf32>
    %578 = vector.extract_strided_slice %568 {offsets = [0, 128], sizes = [8, 128], strides = [1, 1]} : vector<8x384xf32> to vector<8x128xf32>
    %579 = vector.extract_strided_slice %569 {offsets = [0, 128], sizes = [8, 128], strides = [1, 1]} : vector<8x384xf32> to vector<8x128xf32>
    %580 = arith.addf %578, %579 : vector<8x128xf32>
    %581 = arith.negf %580 : vector<8x128xf32>
    %582 = math.exp %581 : vector<8x128xf32>
    %cst_257 = arith.constant 1.000000e+00 : f32
    %583 = vector.broadcast %cst_257 : f32 to vector<8x128xf32>
    %584 = arith.addf %583, %582 : vector<8x128xf32>
    %585 = arith.divf %583, %584 : vector<8x128xf32>
    %586 = vector.extract_strided_slice %568 {offsets = [0, 256], sizes = [8, 128], strides = [1, 1]} : vector<8x384xf32> to vector<8x128xf32>
    %587 = vector.extract_strided_slice %569 {offsets = [0, 256], sizes = [8, 128], strides = [1, 1]} : vector<8x384xf32> to vector<8x128xf32>
    %588 = arith.addf %587, %215 : vector<8x128xf32>
    %589 = arith.mulf %577, %588 : vector<8x128xf32>
    %590 = arith.addf %586, %589 : vector<8x128xf32>
    %591 = math.tanh %590 : vector<8x128xf32>
    %cst_258 = arith.constant 1.000000e+00 : f32
    %592 = vector.broadcast %cst_258 : f32 to vector<8x128xf32>
    %593 = arith.subf %592, %585 : vector<8x128xf32>
    %594 = arith.mulf %593, %591 : vector<8x128xf32>
    %595 = arith.mulf %585, %561 : vector<8x128xf32>
    %596 = arith.addf %594, %595 : vector<8x128xf32>
    %597 = arith.index_cast %c10_i32 : i32 to index
    %c0_259 = arith.constant 0 : index
    %c0_260 = arith.constant 0 : index
    %598 = vector.load %arg12[%597, %c0_259, %c0_260] : memref<29x8x128xf32, #tpu.memory_space<vmem>>, vector<1x8x128xf32>
    %599 = vector.shape_cast %598 : vector<1x8x128xf32> to vector<8x128xf32>
    %600 = vector.shape_cast %596 : vector<8x128xf32> to vector<1x8x128xf32>
    tpu.vector_store %arg12[%597, %c0_259, %c0_260], %600 {strides = array<i32>} : memref<29x8x128xf32, #tpu.memory_space<vmem>>, vector<1x8x128xf32>,
    %c11_i32 = arith.constant 11 : i32
    %601 = arith.index_cast %c11_i32 : i32 to index
    %c0_261 = arith.constant 0 : index
    %c0_262 = arith.constant 0 : index
    %602 = vector.load %arg11[%601, %c0_261, %c0_262] : memref<29x8x384xf32, #tpu.memory_space<vmem>>, vector<1x8x384xf32>
    %603 = vector.shape_cast %602 : vector<1x8x384xf32> to vector<8x384xf32>
    %cst_263 = arith.constant dense<0.000000e+00> : vector<8x384xf32>
    %604 = tpu.matmul %596, %212, %cst_263 {dimension_numbers = #tpu.dot_dimension_numbers<[1], [0], [0], [1], [0, 0, 1, 1], [], []>} : vector<8x128xf32>, vector<128x384xf32>, vector<8x384xf32> -> vector<8x384xf32>
    %605 = vector.extract_strided_slice %603 {offsets = [0, 0], sizes = [8, 128], strides = [1, 1]} : vector<8x384xf32> to vector<8x128xf32>
    %606 = vector.extract_strided_slice %604 {offsets = [0, 0], sizes = [8, 128], strides = [1, 1]} : vector<8x384xf32> to vector<8x128xf32>
    %607 = arith.addf %605, %606 : vector<8x128xf32>
    %608 = arith.negf %607 : vector<8x128xf32>
    %609 = math.exp %608 : vector<8x128xf32>
    %cst_264 = arith.constant 1.000000e+00 : f32
    %610 = vector.broadcast %cst_264 : f32 to vector<8x128xf32>
    %611 = arith.addf %610, %609 : vector<8x128xf32>
    %612 = arith.divf %610, %611 : vector<8x128xf32>
    %613 = vector.extract_strided_slice %603 {offsets = [0, 128], sizes = [8, 128], strides = [1, 1]} : vector<8x384xf32> to vector<8x128xf32>
    %614 = vector.extract_strided_slice %604 {offsets = [0, 128], sizes = [8, 128], strides = [1, 1]} : vector<8x384xf32> to vector<8x128xf32>
    %615 = arith.addf %613, %614 : vector<8x128xf32>
    %616 = arith.negf %615 : vector<8x128xf32>
    %617 = math.exp %616 : vector<8x128xf32>
    %cst_265 = arith.constant 1.000000e+00 : f32
    %618 = vector.broadcast %cst_265 : f32 to vector<8x128xf32>
    %619 = arith.addf %618, %617 : vector<8x128xf32>
    %620 = arith.divf %618, %619 : vector<8x128xf32>
    %621 = vector.extract_strided_slice %603 {offsets = [0, 256], sizes = [8, 128], strides = [1, 1]} : vector<8x384xf32> to vector<8x128xf32>
    %622 = vector.extract_strided_slice %604 {offsets = [0, 256], sizes = [8, 128], strides = [1, 1]} : vector<8x384xf32> to vector<8x128xf32>
    %623 = arith.addf %622, %215 : vector<8x128xf32>
    %624 = arith.mulf %612, %623 : vector<8x128xf32>
    %625 = arith.addf %621, %624 : vector<8x128xf32>
    %626 = math.tanh %625 : vector<8x128xf32>
    %cst_266 = arith.constant 1.000000e+00 : f32
    %627 = vector.broadcast %cst_266 : f32 to vector<8x128xf32>
    %628 = arith.subf %627, %620 : vector<8x128xf32>
    %629 = arith.mulf %628, %626 : vector<8x128xf32>
    %630 = arith.mulf %620, %596 : vector<8x128xf32>
    %631 = arith.addf %629, %630 : vector<8x128xf32>
    %632 = arith.index_cast %c11_i32 : i32 to index
    %c0_267 = arith.constant 0 : index
    %c0_268 = arith.constant 0 : index
    %633 = vector.load %arg12[%632, %c0_267, %c0_268] : memref<29x8x128xf32, #tpu.memory_space<vmem>>, vector<1x8x128xf32>
    %634 = vector.shape_cast %633 : vector<1x8x128xf32> to vector<8x128xf32>
    %635 = vector.shape_cast %631 : vector<8x128xf32> to vector<1x8x128xf32>
    tpu.vector_store %arg12[%632, %c0_267, %c0_268], %635 {strides = array<i32>} : memref<29x8x128xf32, #tpu.memory_space<vmem>>, vector<1x8x128xf32>,
    %c12_i32 = arith.constant 12 : i32
    %636 = arith.index_cast %c12_i32 : i32 to index
    %c0_269 = arith.constant 0 : index
    %c0_270 = arith.constant 0 : index
    %637 = vector.load %arg11[%636, %c0_269, %c0_270] : memref<29x8x384xf32, #tpu.memory_space<vmem>>, vector<1x8x384xf32>
    %638 = vector.shape_cast %637 : vector<1x8x384xf32> to vector<8x384xf32>
    %cst_271 = arith.constant dense<0.000000e+00> : vector<8x384xf32>
    %639 = tpu.matmul %631, %212, %cst_271 {dimension_numbers = #tpu.dot_dimension_numbers<[1], [0], [0], [1], [0, 0, 1, 1], [], []>} : vector<8x128xf32>, vector<128x384xf32>, vector<8x384xf32> -> vector<8x384xf32>
    %640 = vector.extract_strided_slice %638 {offsets = [0, 0], sizes = [8, 128], strides = [1, 1]} : vector<8x384xf32> to vector<8x128xf32>
    %641 = vector.extract_strided_slice %639 {offsets = [0, 0], sizes = [8, 128], strides = [1, 1]} : vector<8x384xf32> to vector<8x128xf32>
    %642 = arith.addf %640, %641 : vector<8x128xf32>
    %643 = arith.negf %642 : vector<8x128xf32>
    %644 = math.exp %643 : vector<8x128xf32>
    %cst_272 = arith.constant 1.000000e+00 : f32
    %645 = vector.broadcast %cst_272 : f32 to vector<8x128xf32>
    %646 = arith.addf %645, %644 : vector<8x128xf32>
    %647 = arith.divf %645, %646 : vector<8x128xf32>
    %648 = vector.extract_strided_slice %638 {offsets = [0, 128], sizes = [8, 128], strides = [1, 1]} : vector<8x384xf32> to vector<8x128xf32>
    %649 = vector.extract_strided_slice %639 {offsets = [0, 128], sizes = [8, 128], strides = [1, 1]} : vector<8x384xf32> to vector<8x128xf32>
    %650 = arith.addf %648, %649 : vector<8x128xf32>
    %651 = arith.negf %650 : vector<8x128xf32>
    %652 = math.exp %651 : vector<8x128xf32>
    %cst_273 = arith.constant 1.000000e+00 : f32
    %653 = vector.broadcast %cst_273 : f32 to vector<8x128xf32>
    %654 = arith.addf %653, %652 : vector<8x128xf32>
    %655 = arith.divf %653, %654 : vector<8x128xf32>
    %656 = vector.extract_strided_slice %638 {offsets = [0, 256], sizes = [8, 128], strides = [1, 1]} : vector<8x384xf32> to vector<8x128xf32>
    %657 = vector.extract_strided_slice %639 {offsets = [0, 256], sizes = [8, 128], strides = [1, 1]} : vector<8x384xf32> to vector<8x128xf32>
    %658 = arith.addf %657, %215 : vector<8x128xf32>
    %659 = arith.mulf %647, %658 : vector<8x128xf32>
    %660 = arith.addf %656, %659 : vector<8x128xf32>
    %661 = math.tanh %660 : vector<8x128xf32>
    %cst_274 = arith.constant 1.000000e+00 : f32
    %662 = vector.broadcast %cst_274 : f32 to vector<8x128xf32>
    %663 = arith.subf %662, %655 : vector<8x128xf32>
    %664 = arith.mulf %663, %661 : vector<8x128xf32>
    %665 = arith.mulf %655, %631 : vector<8x128xf32>
    %666 = arith.addf %664, %665 : vector<8x128xf32>
    %667 = arith.index_cast %c12_i32 : i32 to index
    %c0_275 = arith.constant 0 : index
    %c0_276 = arith.constant 0 : index
    %668 = vector.load %arg12[%667, %c0_275, %c0_276] : memref<29x8x128xf32, #tpu.memory_space<vmem>>, vector<1x8x128xf32>
    %669 = vector.shape_cast %668 : vector<1x8x128xf32> to vector<8x128xf32>
    %670 = vector.shape_cast %666 : vector<8x128xf32> to vector<1x8x128xf32>
    tpu.vector_store %arg12[%667, %c0_275, %c0_276], %670 {strides = array<i32>} : memref<29x8x128xf32, #tpu.memory_space<vmem>>, vector<1x8x128xf32>,
    %c13_i32 = arith.constant 13 : i32
    %671 = arith.index_cast %c13_i32 : i32 to index
    %c0_277 = arith.constant 0 : index
    %c0_278 = arith.constant 0 : index
    %672 = vector.load %arg11[%671, %c0_277, %c0_278] : memref<29x8x384xf32, #tpu.memory_space<vmem>>, vector<1x8x384xf32>
    %673 = vector.shape_cast %672 : vector<1x8x384xf32> to vector<8x384xf32>
    %cst_279 = arith.constant dense<0.000000e+00> : vector<8x384xf32>
    %674 = tpu.matmul %666, %212, %cst_279 {dimension_numbers = #tpu.dot_dimension_numbers<[1], [0], [0], [1], [0, 0, 1, 1], [], []>} : vector<8x128xf32>, vector<128x384xf32>, vector<8x384xf32> -> vector<8x384xf32>
    %675 = vector.extract_strided_slice %673 {offsets = [0, 0], sizes = [8, 128], strides = [1, 1]} : vector<8x384xf32> to vector<8x128xf32>
    %676 = vector.extract_strided_slice %674 {offsets = [0, 0], sizes = [8, 128], strides = [1, 1]} : vector<8x384xf32> to vector<8x128xf32>
    %677 = arith.addf %675, %676 : vector<8x128xf32>
    %678 = arith.negf %677 : vector<8x128xf32>
    %679 = math.exp %678 : vector<8x128xf32>
    %cst_280 = arith.constant 1.000000e+00 : f32
    %680 = vector.broadcast %cst_280 : f32 to vector<8x128xf32>
    %681 = arith.addf %680, %679 : vector<8x128xf32>
    %682 = arith.divf %680, %681 : vector<8x128xf32>
    %683 = vector.extract_strided_slice %673 {offsets = [0, 128], sizes = [8, 128], strides = [1, 1]} : vector<8x384xf32> to vector<8x128xf32>
    %684 = vector.extract_strided_slice %674 {offsets = [0, 128], sizes = [8, 128], strides = [1, 1]} : vector<8x384xf32> to vector<8x128xf32>
    %685 = arith.addf %683, %684 : vector<8x128xf32>
    %686 = arith.negf %685 : vector<8x128xf32>
    %687 = math.exp %686 : vector<8x128xf32>
    %cst_281 = arith.constant 1.000000e+00 : f32
    %688 = vector.broadcast %cst_281 : f32 to vector<8x128xf32>
    %689 = arith.addf %688, %687 : vector<8x128xf32>
    %690 = arith.divf %688, %689 : vector<8x128xf32>
    %691 = vector.extract_strided_slice %673 {offsets = [0, 256], sizes = [8, 128], strides = [1, 1]} : vector<8x384xf32> to vector<8x128xf32>
    %692 = vector.extract_strided_slice %674 {offsets = [0, 256], sizes = [8, 128], strides = [1, 1]} : vector<8x384xf32> to vector<8x128xf32>
    %693 = arith.addf %692, %215 : vector<8x128xf32>
    %694 = arith.mulf %682, %693 : vector<8x128xf32>
    %695 = arith.addf %691, %694 : vector<8x128xf32>
    %696 = math.tanh %695 : vector<8x128xf32>
    %cst_282 = arith.constant 1.000000e+00 : f32
    %697 = vector.broadcast %cst_282 : f32 to vector<8x128xf32>
    %698 = arith.subf %697, %690 : vector<8x128xf32>
    %699 = arith.mulf %698, %696 : vector<8x128xf32>
    %700 = arith.mulf %690, %666 : vector<8x128xf32>
    %701 = arith.addf %699, %700 : vector<8x128xf32>
    %702 = arith.index_cast %c13_i32 : i32 to index
    %c0_283 = arith.constant 0 : index
    %c0_284 = arith.constant 0 : index
    %703 = vector.load %arg12[%702, %c0_283, %c0_284] : memref<29x8x128xf32, #tpu.memory_space<vmem>>, vector<1x8x128xf32>
    %704 = vector.shape_cast %703 : vector<1x8x128xf32> to vector<8x128xf32>
    %705 = vector.shape_cast %701 : vector<8x128xf32> to vector<1x8x128xf32>
    tpu.vector_store %arg12[%702, %c0_283, %c0_284], %705 {strides = array<i32>} : memref<29x8x128xf32, #tpu.memory_space<vmem>>, vector<1x8x128xf32>,
    %c14_i32 = arith.constant 14 : i32
    %706 = arith.index_cast %c14_i32 : i32 to index
    %c0_285 = arith.constant 0 : index
    %c0_286 = arith.constant 0 : index
    %707 = vector.load %arg11[%706, %c0_285, %c0_286] : memref<29x8x384xf32, #tpu.memory_space<vmem>>, vector<1x8x384xf32>
    %708 = vector.shape_cast %707 : vector<1x8x384xf32> to vector<8x384xf32>
    %cst_287 = arith.constant dense<0.000000e+00> : vector<8x384xf32>
    %709 = tpu.matmul %701, %212, %cst_287 {dimension_numbers = #tpu.dot_dimension_numbers<[1], [0], [0], [1], [0, 0, 1, 1], [], []>} : vector<8x128xf32>, vector<128x384xf32>, vector<8x384xf32> -> vector<8x384xf32>
    %710 = vector.extract_strided_slice %708 {offsets = [0, 0], sizes = [8, 128], strides = [1, 1]} : vector<8x384xf32> to vector<8x128xf32>
    %711 = vector.extract_strided_slice %709 {offsets = [0, 0], sizes = [8, 128], strides = [1, 1]} : vector<8x384xf32> to vector<8x128xf32>
    %712 = arith.addf %710, %711 : vector<8x128xf32>
    %713 = arith.negf %712 : vector<8x128xf32>
    %714 = math.exp %713 : vector<8x128xf32>
    %cst_288 = arith.constant 1.000000e+00 : f32
    %715 = vector.broadcast %cst_288 : f32 to vector<8x128xf32>
    %716 = arith.addf %715, %714 : vector<8x128xf32>
    %717 = arith.divf %715, %716 : vector<8x128xf32>
    %718 = vector.extract_strided_slice %708 {offsets = [0, 128], sizes = [8, 128], strides = [1, 1]} : vector<8x384xf32> to vector<8x128xf32>
    %719 = vector.extract_strided_slice %709 {offsets = [0, 128], sizes = [8, 128], strides = [1, 1]} : vector<8x384xf32> to vector<8x128xf32>
    %720 = arith.addf %718, %719 : vector<8x128xf32>
    %721 = arith.negf %720 : vector<8x128xf32>
    %722 = math.exp %721 : vector<8x128xf32>
    %cst_289 = arith.constant 1.000000e+00 : f32
    %723 = vector.broadcast %cst_289 : f32 to vector<8x128xf32>
    %724 = arith.addf %723, %722 : vector<8x128xf32>
    %725 = arith.divf %723, %724 : vector<8x128xf32>
    %726 = vector.extract_strided_slice %708 {offsets = [0, 256], sizes = [8, 128], strides = [1, 1]} : vector<8x384xf32> to vector<8x128xf32>
    %727 = vector.extract_strided_slice %709 {offsets = [0, 256], sizes = [8, 128], strides = [1, 1]} : vector<8x384xf32> to vector<8x128xf32>
    %728 = arith.addf %727, %215 : vector<8x128xf32>
    %729 = arith.mulf %717, %728 : vector<8x128xf32>
    %730 = arith.addf %726, %729 : vector<8x128xf32>
    %731 = math.tanh %730 : vector<8x128xf32>
    %cst_290 = arith.constant 1.000000e+00 : f32
    %732 = vector.broadcast %cst_290 : f32 to vector<8x128xf32>
    %733 = arith.subf %732, %725 : vector<8x128xf32>
    %734 = arith.mulf %733, %731 : vector<8x128xf32>
    %735 = arith.mulf %725, %701 : vector<8x128xf32>
    %736 = arith.addf %734, %735 : vector<8x128xf32>
    %737 = arith.index_cast %c14_i32 : i32 to index
    %c0_291 = arith.constant 0 : index
    %c0_292 = arith.constant 0 : index
    %738 = vector.load %arg12[%737, %c0_291, %c0_292] : memref<29x8x128xf32, #tpu.memory_space<vmem>>, vector<1x8x128xf32>
    %739 = vector.shape_cast %738 : vector<1x8x128xf32> to vector<8x128xf32>
    %740 = vector.shape_cast %736 : vector<8x128xf32> to vector<1x8x128xf32>
    tpu.vector_store %arg12[%737, %c0_291, %c0_292], %740 {strides = array<i32>} : memref<29x8x128xf32, #tpu.memory_space<vmem>>, vector<1x8x128xf32>,
    %c15_i32 = arith.constant 15 : i32
    %741 = arith.index_cast %c15_i32 : i32 to index
    %c0_293 = arith.constant 0 : index
    %c0_294 = arith.constant 0 : index
    %742 = vector.load %arg11[%741, %c0_293, %c0_294] : memref<29x8x384xf32, #tpu.memory_space<vmem>>, vector<1x8x384xf32>
    %743 = vector.shape_cast %742 : vector<1x8x384xf32> to vector<8x384xf32>
    %cst_295 = arith.constant dense<0.000000e+00> : vector<8x384xf32>
    %744 = tpu.matmul %736, %212, %cst_295 {dimension_numbers = #tpu.dot_dimension_numbers<[1], [0], [0], [1], [0, 0, 1, 1], [], []>} : vector<8x128xf32>, vector<128x384xf32>, vector<8x384xf32> -> vector<8x384xf32>
    %745 = vector.extract_strided_slice %743 {offsets = [0, 0], sizes = [8, 128], strides = [1, 1]} : vector<8x384xf32> to vector<8x128xf32>
    %746 = vector.extract_strided_slice %744 {offsets = [0, 0], sizes = [8, 128], strides = [1, 1]} : vector<8x384xf32> to vector<8x128xf32>
    %747 = arith.addf %745, %746 : vector<8x128xf32>
    %748 = arith.negf %747 : vector<8x128xf32>
    %749 = math.exp %748 : vector<8x128xf32>
    %cst_296 = arith.constant 1.000000e+00 : f32
    %750 = vector.broadcast %cst_296 : f32 to vector<8x128xf32>
    %751 = arith.addf %750, %749 : vector<8x128xf32>
    %752 = arith.divf %750, %751 : vector<8x128xf32>
    %753 = vector.extract_strided_slice %743 {offsets = [0, 128], sizes = [8, 128], strides = [1, 1]} : vector<8x384xf32> to vector<8x128xf32>
    %754 = vector.extract_strided_slice %744 {offsets = [0, 128], sizes = [8, 128], strides = [1, 1]} : vector<8x384xf32> to vector<8x128xf32>
    %755 = arith.addf %753, %754 : vector<8x128xf32>
    %756 = arith.negf %755 : vector<8x128xf32>
    %757 = math.exp %756 : vector<8x128xf32>
    %cst_297 = arith.constant 1.000000e+00 : f32
    %758 = vector.broadcast %cst_297 : f32 to vector<8x128xf32>
    %759 = arith.addf %758, %757 : vector<8x128xf32>
    %760 = arith.divf %758, %759 : vector<8x128xf32>
    %761 = vector.extract_strided_slice %743 {offsets = [0, 256], sizes = [8, 128], strides = [1, 1]} : vector<8x384xf32> to vector<8x128xf32>
    %762 = vector.extract_strided_slice %744 {offsets = [0, 256], sizes = [8, 128], strides = [1, 1]} : vector<8x384xf32> to vector<8x128xf32>
    %763 = arith.addf %762, %215 : vector<8x128xf32>
    %764 = arith.mulf %752, %763 : vector<8x128xf32>
    %765 = arith.addf %761, %764 : vector<8x128xf32>
    %766 = math.tanh %765 : vector<8x128xf32>
    %cst_298 = arith.constant 1.000000e+00 : f32
    %767 = vector.broadcast %cst_298 : f32 to vector<8x128xf32>
    %768 = arith.subf %767, %760 : vector<8x128xf32>
    %769 = arith.mulf %768, %766 : vector<8x128xf32>
    %770 = arith.mulf %760, %736 : vector<8x128xf32>
    %771 = arith.addf %769, %770 : vector<8x128xf32>
    %772 = arith.index_cast %c15_i32 : i32 to index
    %c0_299 = arith.constant 0 : index
    %c0_300 = arith.constant 0 : index
    %773 = vector.load %arg12[%772, %c0_299, %c0_300] : memref<29x8x128xf32, #tpu.memory_space<vmem>>, vector<1x8x128xf32>
    %774 = vector.shape_cast %773 : vector<1x8x128xf32> to vector<8x128xf32>
    %775 = vector.shape_cast %771 : vector<8x128xf32> to vector<1x8x128xf32>
    tpu.vector_store %arg12[%772, %c0_299, %c0_300], %775 {strides = array<i32>} : memref<29x8x128xf32, #tpu.memory_space<vmem>>, vector<1x8x128xf32>,
    %c16_i32 = arith.constant 16 : i32
    %776 = arith.index_cast %c16_i32 : i32 to index
    %c0_301 = arith.constant 0 : index
    %c0_302 = arith.constant 0 : index
    %777 = vector.load %arg11[%776, %c0_301, %c0_302] : memref<29x8x384xf32, #tpu.memory_space<vmem>>, vector<1x8x384xf32>
    %778 = vector.shape_cast %777 : vector<1x8x384xf32> to vector<8x384xf32>
    %cst_303 = arith.constant dense<0.000000e+00> : vector<8x384xf32>
    %779 = tpu.matmul %771, %212, %cst_303 {dimension_numbers = #tpu.dot_dimension_numbers<[1], [0], [0], [1], [0, 0, 1, 1], [], []>} : vector<8x128xf32>, vector<128x384xf32>, vector<8x384xf32> -> vector<8x384xf32>
    %780 = vector.extract_strided_slice %778 {offsets = [0, 0], sizes = [8, 128], strides = [1, 1]} : vector<8x384xf32> to vector<8x128xf32>
    %781 = vector.extract_strided_slice %779 {offsets = [0, 0], sizes = [8, 128], strides = [1, 1]} : vector<8x384xf32> to vector<8x128xf32>
    %782 = arith.addf %780, %781 : vector<8x128xf32>
    %783 = arith.negf %782 : vector<8x128xf32>
    %784 = math.exp %783 : vector<8x128xf32>
    %cst_304 = arith.constant 1.000000e+00 : f32
    %785 = vector.broadcast %cst_304 : f32 to vector<8x128xf32>
    %786 = arith.addf %785, %784 : vector<8x128xf32>
    %787 = arith.divf %785, %786 : vector<8x128xf32>
    %788 = vector.extract_strided_slice %778 {offsets = [0, 128], sizes = [8, 128], strides = [1, 1]} : vector<8x384xf32> to vector<8x128xf32>
    %789 = vector.extract_strided_slice %779 {offsets = [0, 128], sizes = [8, 128], strides = [1, 1]} : vector<8x384xf32> to vector<8x128xf32>
    %790 = arith.addf %788, %789 : vector<8x128xf32>
    %791 = arith.negf %790 : vector<8x128xf32>
    %792 = math.exp %791 : vector<8x128xf32>
    %cst_305 = arith.constant 1.000000e+00 : f32
    %793 = vector.broadcast %cst_305 : f32 to vector<8x128xf32>
    %794 = arith.addf %793, %792 : vector<8x128xf32>
    %795 = arith.divf %793, %794 : vector<8x128xf32>
    %796 = vector.extract_strided_slice %778 {offsets = [0, 256], sizes = [8, 128], strides = [1, 1]} : vector<8x384xf32> to vector<8x128xf32>
    %797 = vector.extract_strided_slice %779 {offsets = [0, 256], sizes = [8, 128], strides = [1, 1]} : vector<8x384xf32> to vector<8x128xf32>
    %798 = arith.addf %797, %215 : vector<8x128xf32>
    %799 = arith.mulf %787, %798 : vector<8x128xf32>
    %800 = arith.addf %796, %799 : vector<8x128xf32>
    %801 = math.tanh %800 : vector<8x128xf32>
    %cst_306 = arith.constant 1.000000e+00 : f32
    %802 = vector.broadcast %cst_306 : f32 to vector<8x128xf32>
    %803 = arith.subf %802, %795 : vector<8x128xf32>
    %804 = arith.mulf %803, %801 : vector<8x128xf32>
    %805 = arith.mulf %795, %771 : vector<8x128xf32>
    %806 = arith.addf %804, %805 : vector<8x128xf32>
    %807 = arith.index_cast %c16_i32 : i32 to index
    %c0_307 = arith.constant 0 : index
    %c0_308 = arith.constant 0 : index
    %808 = vector.load %arg12[%807, %c0_307, %c0_308] : memref<29x8x128xf32, #tpu.memory_space<vmem>>, vector<1x8x128xf32>
    %809 = vector.shape_cast %808 : vector<1x8x128xf32> to vector<8x128xf32>
    %810 = vector.shape_cast %806 : vector<8x128xf32> to vector<1x8x128xf32>
    tpu.vector_store %arg12[%807, %c0_307, %c0_308], %810 {strides = array<i32>} : memref<29x8x128xf32, #tpu.memory_space<vmem>>, vector<1x8x128xf32>,
    %c17_i32 = arith.constant 17 : i32
    %811 = arith.index_cast %c17_i32 : i32 to index
    %c0_309 = arith.constant 0 : index
    %c0_310 = arith.constant 0 : index
    %812 = vector.load %arg11[%811, %c0_309, %c0_310] : memref<29x8x384xf32, #tpu.memory_space<vmem>>, vector<1x8x384xf32>
    %813 = vector.shape_cast %812 : vector<1x8x384xf32> to vector<8x384xf32>
    %cst_311 = arith.constant dense<0.000000e+00> : vector<8x384xf32>
    %814 = tpu.matmul %806, %212, %cst_311 {dimension_numbers = #tpu.dot_dimension_numbers<[1], [0], [0], [1], [0, 0, 1, 1], [], []>} : vector<8x128xf32>, vector<128x384xf32>, vector<8x384xf32> -> vector<8x384xf32>
    %815 = vector.extract_strided_slice %813 {offsets = [0, 0], sizes = [8, 128], strides = [1, 1]} : vector<8x384xf32> to vector<8x128xf32>
    %816 = vector.extract_strided_slice %814 {offsets = [0, 0], sizes = [8, 128], strides = [1, 1]} : vector<8x384xf32> to vector<8x128xf32>
    %817 = arith.addf %815, %816 : vector<8x128xf32>
    %818 = arith.negf %817 : vector<8x128xf32>
    %819 = math.exp %818 : vector<8x128xf32>
    %cst_312 = arith.constant 1.000000e+00 : f32
    %820 = vector.broadcast %cst_312 : f32 to vector<8x128xf32>
    %821 = arith.addf %820, %819 : vector<8x128xf32>
    %822 = arith.divf %820, %821 : vector<8x128xf32>
    %823 = vector.extract_strided_slice %813 {offsets = [0, 128], sizes = [8, 128], strides = [1, 1]} : vector<8x384xf32> to vector<8x128xf32>
    %824 = vector.extract_strided_slice %814 {offsets = [0, 128], sizes = [8, 128], strides = [1, 1]} : vector<8x384xf32> to vector<8x128xf32>
    %825 = arith.addf %823, %824 : vector<8x128xf32>
    %826 = arith.negf %825 : vector<8x128xf32>
    %827 = math.exp %826 : vector<8x128xf32>
    %cst_313 = arith.constant 1.000000e+00 : f32
    %828 = vector.broadcast %cst_313 : f32 to vector<8x128xf32>
    %829 = arith.addf %828, %827 : vector<8x128xf32>
    %830 = arith.divf %828, %829 : vector<8x128xf32>
    %831 = vector.extract_strided_slice %813 {offsets = [0, 256], sizes = [8, 128], strides = [1, 1]} : vector<8x384xf32> to vector<8x128xf32>
    %832 = vector.extract_strided_slice %814 {offsets = [0, 256], sizes = [8, 128], strides = [1, 1]} : vector<8x384xf32> to vector<8x128xf32>
    %833 = arith.addf %832, %215 : vector<8x128xf32>
    %834 = arith.mulf %822, %833 : vector<8x128xf32>
    %835 = arith.addf %831, %834 : vector<8x128xf32>
    %836 = math.tanh %835 : vector<8x128xf32>
    %cst_314 = arith.constant 1.000000e+00 : f32
    %837 = vector.broadcast %cst_314 : f32 to vector<8x128xf32>
    %838 = arith.subf %837, %830 : vector<8x128xf32>
    %839 = arith.mulf %838, %836 : vector<8x128xf32>
    %840 = arith.mulf %830, %806 : vector<8x128xf32>
    %841 = arith.addf %839, %840 : vector<8x128xf32>
    %842 = arith.index_cast %c17_i32 : i32 to index
    %c0_315 = arith.constant 0 : index
    %c0_316 = arith.constant 0 : index
    %843 = vector.load %arg12[%842, %c0_315, %c0_316] : memref<29x8x128xf32, #tpu.memory_space<vmem>>, vector<1x8x128xf32>
    %844 = vector.shape_cast %843 : vector<1x8x128xf32> to vector<8x128xf32>
    %845 = vector.shape_cast %841 : vector<8x128xf32> to vector<1x8x128xf32>
    tpu.vector_store %arg12[%842, %c0_315, %c0_316], %845 {strides = array<i32>} : memref<29x8x128xf32, #tpu.memory_space<vmem>>, vector<1x8x128xf32>,
    %c18_i32 = arith.constant 18 : i32
    %846 = arith.index_cast %c18_i32 : i32 to index
    %c0_317 = arith.constant 0 : index
    %c0_318 = arith.constant 0 : index
    %847 = vector.load %arg11[%846, %c0_317, %c0_318] : memref<29x8x384xf32, #tpu.memory_space<vmem>>, vector<1x8x384xf32>
    %848 = vector.shape_cast %847 : vector<1x8x384xf32> to vector<8x384xf32>
    %cst_319 = arith.constant dense<0.000000e+00> : vector<8x384xf32>
    %849 = tpu.matmul %841, %212, %cst_319 {dimension_numbers = #tpu.dot_dimension_numbers<[1], [0], [0], [1], [0, 0, 1, 1], [], []>} : vector<8x128xf32>, vector<128x384xf32>, vector<8x384xf32> -> vector<8x384xf32>
    %850 = vector.extract_strided_slice %848 {offsets = [0, 0], sizes = [8, 128], strides = [1, 1]} : vector<8x384xf32> to vector<8x128xf32>
    %851 = vector.extract_strided_slice %849 {offsets = [0, 0], sizes = [8, 128], strides = [1, 1]} : vector<8x384xf32> to vector<8x128xf32>
    %852 = arith.addf %850, %851 : vector<8x128xf32>
    %853 = arith.negf %852 : vector<8x128xf32>
    %854 = math.exp %853 : vector<8x128xf32>
    %cst_320 = arith.constant 1.000000e+00 : f32
    %855 = vector.broadcast %cst_320 : f32 to vector<8x128xf32>
    %856 = arith.addf %855, %854 : vector<8x128xf32>
    %857 = arith.divf %855, %856 : vector<8x128xf32>
    %858 = vector.extract_strided_slice %848 {offsets = [0, 128], sizes = [8, 128], strides = [1, 1]} : vector<8x384xf32> to vector<8x128xf32>
    %859 = vector.extract_strided_slice %849 {offsets = [0, 128], sizes = [8, 128], strides = [1, 1]} : vector<8x384xf32> to vector<8x128xf32>
    %860 = arith.addf %858, %859 : vector<8x128xf32>
    %861 = arith.negf %860 : vector<8x128xf32>
    %862 = math.exp %861 : vector<8x128xf32>
    %cst_321 = arith.constant 1.000000e+00 : f32
    %863 = vector.broadcast %cst_321 : f32 to vector<8x128xf32>
    %864 = arith.addf %863, %862 : vector<8x128xf32>
    %865 = arith.divf %863, %864 : vector<8x128xf32>
    %866 = vector.extract_strided_slice %848 {offsets = [0, 256], sizes = [8, 128], strides = [1, 1]} : vector<8x384xf32> to vector<8x128xf32>
    %867 = vector.extract_strided_slice %849 {offsets = [0, 256], sizes = [8, 128], strides = [1, 1]} : vector<8x384xf32> to vector<8x128xf32>
    %868 = arith.addf %867, %215 : vector<8x128xf32>
    %869 = arith.mulf %857, %868 : vector<8x128xf32>
    %870 = arith.addf %866, %869 : vector<8x128xf32>
    %871 = math.tanh %870 : vector<8x128xf32>
    %cst_322 = arith.constant 1.000000e+00 : f32
    %872 = vector.broadcast %cst_322 : f32 to vector<8x128xf32>
    %873 = arith.subf %872, %865 : vector<8x128xf32>
    %874 = arith.mulf %873, %871 : vector<8x128xf32>
    %875 = arith.mulf %865, %841 : vector<8x128xf32>
    %876 = arith.addf %874, %875 : vector<8x128xf32>
    %877 = arith.index_cast %c18_i32 : i32 to index
    %c0_323 = arith.constant 0 : index
    %c0_324 = arith.constant 0 : index
    %878 = vector.load %arg12[%877, %c0_323, %c0_324] : memref<29x8x128xf32, #tpu.memory_space<vmem>>, vector<1x8x128xf32>
    %879 = vector.shape_cast %878 : vector<1x8x128xf32> to vector<8x128xf32>
    %880 = vector.shape_cast %876 : vector<8x128xf32> to vector<1x8x128xf32>
    tpu.vector_store %arg12[%877, %c0_323, %c0_324], %880 {strides = array<i32>} : memref<29x8x128xf32, #tpu.memory_space<vmem>>, vector<1x8x128xf32>,
    %c19_i32 = arith.constant 19 : i32
    %881 = arith.index_cast %c19_i32 : i32 to index
    %c0_325 = arith.constant 0 : index
    %c0_326 = arith.constant 0 : index
    %882 = vector.load %arg11[%881, %c0_325, %c0_326] : memref<29x8x384xf32, #tpu.memory_space<vmem>>, vector<1x8x384xf32>
    %883 = vector.shape_cast %882 : vector<1x8x384xf32> to vector<8x384xf32>
    %cst_327 = arith.constant dense<0.000000e+00> : vector<8x384xf32>
    %884 = tpu.matmul %876, %212, %cst_327 {dimension_numbers = #tpu.dot_dimension_numbers<[1], [0], [0], [1], [0, 0, 1, 1], [], []>} : vector<8x128xf32>, vector<128x384xf32>, vector<8x384xf32> -> vector<8x384xf32>
    %885 = vector.extract_strided_slice %883 {offsets = [0, 0], sizes = [8, 128], strides = [1, 1]} : vector<8x384xf32> to vector<8x128xf32>
    %886 = vector.extract_strided_slice %884 {offsets = [0, 0], sizes = [8, 128], strides = [1, 1]} : vector<8x384xf32> to vector<8x128xf32>
    %887 = arith.addf %885, %886 : vector<8x128xf32>
    %888 = arith.negf %887 : vector<8x128xf32>
    %889 = math.exp %888 : vector<8x128xf32>
    %cst_328 = arith.constant 1.000000e+00 : f32
    %890 = vector.broadcast %cst_328 : f32 to vector<8x128xf32>
    %891 = arith.addf %890, %889 : vector<8x128xf32>
    %892 = arith.divf %890, %891 : vector<8x128xf32>
    %893 = vector.extract_strided_slice %883 {offsets = [0, 128], sizes = [8, 128], strides = [1, 1]} : vector<8x384xf32> to vector<8x128xf32>
    %894 = vector.extract_strided_slice %884 {offsets = [0, 128], sizes = [8, 128], strides = [1, 1]} : vector<8x384xf32> to vector<8x128xf32>
    %895 = arith.addf %893, %894 : vector<8x128xf32>
    %896 = arith.negf %895 : vector<8x128xf32>
    %897 = math.exp %896 : vector<8x128xf32>
    %cst_329 = arith.constant 1.000000e+00 : f32
    %898 = vector.broadcast %cst_329 : f32 to vector<8x128xf32>
    %899 = arith.addf %898, %897 : vector<8x128xf32>
    %900 = arith.divf %898, %899 : vector<8x128xf32>
    %901 = vector.extract_strided_slice %883 {offsets = [0, 256], sizes = [8, 128], strides = [1, 1]} : vector<8x384xf32> to vector<8x128xf32>
    %902 = vector.extract_strided_slice %884 {offsets = [0, 256], sizes = [8, 128], strides = [1, 1]} : vector<8x384xf32> to vector<8x128xf32>
    %903 = arith.addf %902, %215 : vector<8x128xf32>
    %904 = arith.mulf %892, %903 : vector<8x128xf32>
    %905 = arith.addf %901, %904 : vector<8x128xf32>
    %906 = math.tanh %905 : vector<8x128xf32>
    %cst_330 = arith.constant 1.000000e+00 : f32
    %907 = vector.broadcast %cst_330 : f32 to vector<8x128xf32>
    %908 = arith.subf %907, %900 : vector<8x128xf32>
    %909 = arith.mulf %908, %906 : vector<8x128xf32>
    %910 = arith.mulf %900, %876 : vector<8x128xf32>
    %911 = arith.addf %909, %910 : vector<8x128xf32>
    %912 = arith.index_cast %c19_i32 : i32 to index
    %c0_331 = arith.constant 0 : index
    %c0_332 = arith.constant 0 : index
    %913 = vector.load %arg12[%912, %c0_331, %c0_332] : memref<29x8x128xf32, #tpu.memory_space<vmem>>, vector<1x8x128xf32>
    %914 = vector.shape_cast %913 : vector<1x8x128xf32> to vector<8x128xf32>
    %915 = vector.shape_cast %911 : vector<8x128xf32> to vector<1x8x128xf32>
    tpu.vector_store %arg12[%912, %c0_331, %c0_332], %915 {strides = array<i32>} : memref<29x8x128xf32, #tpu.memory_space<vmem>>, vector<1x8x128xf32>,
    %c20_i32 = arith.constant 20 : i32
    %916 = arith.index_cast %c20_i32 : i32 to index
    %c0_333 = arith.constant 0 : index
    %c0_334 = arith.constant 0 : index
    %917 = vector.load %arg11[%916, %c0_333, %c0_334] : memref<29x8x384xf32, #tpu.memory_space<vmem>>, vector<1x8x384xf32>
    %918 = vector.shape_cast %917 : vector<1x8x384xf32> to vector<8x384xf32>
    %cst_335 = arith.constant dense<0.000000e+00> : vector<8x384xf32>
    %919 = tpu.matmul %911, %212, %cst_335 {dimension_numbers = #tpu.dot_dimension_numbers<[1], [0], [0], [1], [0, 0, 1, 1], [], []>} : vector<8x128xf32>, vector<128x384xf32>, vector<8x384xf32> -> vector<8x384xf32>
    %920 = vector.extract_strided_slice %918 {offsets = [0, 0], sizes = [8, 128], strides = [1, 1]} : vector<8x384xf32> to vector<8x128xf32>
    %921 = vector.extract_strided_slice %919 {offsets = [0, 0], sizes = [8, 128], strides = [1, 1]} : vector<8x384xf32> to vector<8x128xf32>
    %922 = arith.addf %920, %921 : vector<8x128xf32>
    %923 = arith.negf %922 : vector<8x128xf32>
    %924 = math.exp %923 : vector<8x128xf32>
    %cst_336 = arith.constant 1.000000e+00 : f32
    %925 = vector.broadcast %cst_336 : f32 to vector<8x128xf32>
    %926 = arith.addf %925, %924 : vector<8x128xf32>
    %927 = arith.divf %925, %926 : vector<8x128xf32>
    %928 = vector.extract_strided_slice %918 {offsets = [0, 128], sizes = [8, 128], strides = [1, 1]} : vector<8x384xf32> to vector<8x128xf32>
    %929 = vector.extract_strided_slice %919 {offsets = [0, 128], sizes = [8, 128], strides = [1, 1]} : vector<8x384xf32> to vector<8x128xf32>
    %930 = arith.addf %928, %929 : vector<8x128xf32>
    %931 = arith.negf %930 : vector<8x128xf32>
    %932 = math.exp %931 : vector<8x128xf32>
    %cst_337 = arith.constant 1.000000e+00 : f32
    %933 = vector.broadcast %cst_337 : f32 to vector<8x128xf32>
    %934 = arith.addf %933, %932 : vector<8x128xf32>
    %935 = arith.divf %933, %934 : vector<8x128xf32>
    %936 = vector.extract_strided_slice %918 {offsets = [0, 256], sizes = [8, 128], strides = [1, 1]} : vector<8x384xf32> to vector<8x128xf32>
    %937 = vector.extract_strided_slice %919 {offsets = [0, 256], sizes = [8, 128], strides = [1, 1]} : vector<8x384xf32> to vector<8x128xf32>
    %938 = arith.addf %937, %215 : vector<8x128xf32>
    %939 = arith.mulf %927, %938 : vector<8x128xf32>
    %940 = arith.addf %936, %939 : vector<8x128xf32>
    %941 = math.tanh %940 : vector<8x128xf32>
    %cst_338 = arith.constant 1.000000e+00 : f32
    %942 = vector.broadcast %cst_338 : f32 to vector<8x128xf32>
    %943 = arith.subf %942, %935 : vector<8x128xf32>
    %944 = arith.mulf %943, %941 : vector<8x128xf32>
    %945 = arith.mulf %935, %911 : vector<8x128xf32>
    %946 = arith.addf %944, %945 : vector<8x128xf32>
    %947 = arith.index_cast %c20_i32 : i32 to index
    %c0_339 = arith.constant 0 : index
    %c0_340 = arith.constant 0 : index
    %948 = vector.load %arg12[%947, %c0_339, %c0_340] : memref<29x8x128xf32, #tpu.memory_space<vmem>>, vector<1x8x128xf32>
    %949 = vector.shape_cast %948 : vector<1x8x128xf32> to vector<8x128xf32>
    %950 = vector.shape_cast %946 : vector<8x128xf32> to vector<1x8x128xf32>
    tpu.vector_store %arg12[%947, %c0_339, %c0_340], %950 {strides = array<i32>} : memref<29x8x128xf32, #tpu.memory_space<vmem>>, vector<1x8x128xf32>,
    %c21_i32 = arith.constant 21 : i32
    %951 = arith.index_cast %c21_i32 : i32 to index
    %c0_341 = arith.constant 0 : index
    %c0_342 = arith.constant 0 : index
    %952 = vector.load %arg11[%951, %c0_341, %c0_342] : memref<29x8x384xf32, #tpu.memory_space<vmem>>, vector<1x8x384xf32>
    %953 = vector.shape_cast %952 : vector<1x8x384xf32> to vector<8x384xf32>
    %cst_343 = arith.constant dense<0.000000e+00> : vector<8x384xf32>
    %954 = tpu.matmul %946, %212, %cst_343 {dimension_numbers = #tpu.dot_dimension_numbers<[1], [0], [0], [1], [0, 0, 1, 1], [], []>} : vector<8x128xf32>, vector<128x384xf32>, vector<8x384xf32> -> vector<8x384xf32>
    %955 = vector.extract_strided_slice %953 {offsets = [0, 0], sizes = [8, 128], strides = [1, 1]} : vector<8x384xf32> to vector<8x128xf32>
    %956 = vector.extract_strided_slice %954 {offsets = [0, 0], sizes = [8, 128], strides = [1, 1]} : vector<8x384xf32> to vector<8x128xf32>
    %957 = arith.addf %955, %956 : vector<8x128xf32>
    %958 = arith.negf %957 : vector<8x128xf32>
    %959 = math.exp %958 : vector<8x128xf32>
    %cst_344 = arith.constant 1.000000e+00 : f32
    %960 = vector.broadcast %cst_344 : f32 to vector<8x128xf32>
    %961 = arith.addf %960, %959 : vector<8x128xf32>
    %962 = arith.divf %960, %961 : vector<8x128xf32>
    %963 = vector.extract_strided_slice %953 {offsets = [0, 128], sizes = [8, 128], strides = [1, 1]} : vector<8x384xf32> to vector<8x128xf32>
    %964 = vector.extract_strided_slice %954 {offsets = [0, 128], sizes = [8, 128], strides = [1, 1]} : vector<8x384xf32> to vector<8x128xf32>
    %965 = arith.addf %963, %964 : vector<8x128xf32>
    %966 = arith.negf %965 : vector<8x128xf32>
    %967 = math.exp %966 : vector<8x128xf32>
    %cst_345 = arith.constant 1.000000e+00 : f32
    %968 = vector.broadcast %cst_345 : f32 to vector<8x128xf32>
    %969 = arith.addf %968, %967 : vector<8x128xf32>
    %970 = arith.divf %968, %969 : vector<8x128xf32>
    %971 = vector.extract_strided_slice %953 {offsets = [0, 256], sizes = [8, 128], strides = [1, 1]} : vector<8x384xf32> to vector<8x128xf32>
    %972 = vector.extract_strided_slice %954 {offsets = [0, 256], sizes = [8, 128], strides = [1, 1]} : vector<8x384xf32> to vector<8x128xf32>
    %973 = arith.addf %972, %215 : vector<8x128xf32>
    %974 = arith.mulf %962, %973 : vector<8x128xf32>
    %975 = arith.addf %971, %974 : vector<8x128xf32>
    %976 = math.tanh %975 : vector<8x128xf32>
    %cst_346 = arith.constant 1.000000e+00 : f32
    %977 = vector.broadcast %cst_346 : f32 to vector<8x128xf32>
    %978 = arith.subf %977, %970 : vector<8x128xf32>
    %979 = arith.mulf %978, %976 : vector<8x128xf32>
    %980 = arith.mulf %970, %946 : vector<8x128xf32>
    %981 = arith.addf %979, %980 : vector<8x128xf32>
    %982 = arith.index_cast %c21_i32 : i32 to index
    %c0_347 = arith.constant 0 : index
    %c0_348 = arith.constant 0 : index
    %983 = vector.load %arg12[%982, %c0_347, %c0_348] : memref<29x8x128xf32, #tpu.memory_space<vmem>>, vector<1x8x128xf32>
    %984 = vector.shape_cast %983 : vector<1x8x128xf32> to vector<8x128xf32>
    %985 = vector.shape_cast %981 : vector<8x128xf32> to vector<1x8x128xf32>
    tpu.vector_store %arg12[%982, %c0_347, %c0_348], %985 {strides = array<i32>} : memref<29x8x128xf32, #tpu.memory_space<vmem>>, vector<1x8x128xf32>,
    %c22_i32 = arith.constant 22 : i32
    %986 = arith.index_cast %c22_i32 : i32 to index
    %c0_349 = arith.constant 0 : index
    %c0_350 = arith.constant 0 : index
    %987 = vector.load %arg11[%986, %c0_349, %c0_350] : memref<29x8x384xf32, #tpu.memory_space<vmem>>, vector<1x8x384xf32>
    %988 = vector.shape_cast %987 : vector<1x8x384xf32> to vector<8x384xf32>
    %cst_351 = arith.constant dense<0.000000e+00> : vector<8x384xf32>
    %989 = tpu.matmul %981, %212, %cst_351 {dimension_numbers = #tpu.dot_dimension_numbers<[1], [0], [0], [1], [0, 0, 1, 1], [], []>} : vector<8x128xf32>, vector<128x384xf32>, vector<8x384xf32> -> vector<8x384xf32>
    %990 = vector.extract_strided_slice %988 {offsets = [0, 0], sizes = [8, 128], strides = [1, 1]} : vector<8x384xf32> to vector<8x128xf32>
    %991 = vector.extract_strided_slice %989 {offsets = [0, 0], sizes = [8, 128], strides = [1, 1]} : vector<8x384xf32> to vector<8x128xf32>
    %992 = arith.addf %990, %991 : vector<8x128xf32>
    %993 = arith.negf %992 : vector<8x128xf32>
    %994 = math.exp %993 : vector<8x128xf32>
    %cst_352 = arith.constant 1.000000e+00 : f32
    %995 = vector.broadcast %cst_352 : f32 to vector<8x128xf32>
    %996 = arith.addf %995, %994 : vector<8x128xf32>
    %997 = arith.divf %995, %996 : vector<8x128xf32>
    %998 = vector.extract_strided_slice %988 {offsets = [0, 128], sizes = [8, 128], strides = [1, 1]} : vector<8x384xf32> to vector<8x128xf32>
    %999 = vector.extract_strided_slice %989 {offsets = [0, 128], sizes = [8, 128], strides = [1, 1]} : vector<8x384xf32> to vector<8x128xf32>
    %1000 = arith.addf %998, %999 : vector<8x128xf32>
    %1001 = arith.negf %1000 : vector<8x128xf32>
    %1002 = math.exp %1001 : vector<8x128xf32>
    %cst_353 = arith.constant 1.000000e+00 : f32
    %1003 = vector.broadcast %cst_353 : f32 to vector<8x128xf32>
    %1004 = arith.addf %1003, %1002 : vector<8x128xf32>
    %1005 = arith.divf %1003, %1004 : vector<8x128xf32>
    %1006 = vector.extract_strided_slice %988 {offsets = [0, 256], sizes = [8, 128], strides = [1, 1]} : vector<8x384xf32> to vector<8x128xf32>
    %1007 = vector.extract_strided_slice %989 {offsets = [0, 256], sizes = [8, 128], strides = [1, 1]} : vector<8x384xf32> to vector<8x128xf32>
    %1008 = arith.addf %1007, %215 : vector<8x128xf32>
    %1009 = arith.mulf %997, %1008 : vector<8x128xf32>
    %1010 = arith.addf %1006, %1009 : vector<8x128xf32>
    %1011 = math.tanh %1010 : vector<8x128xf32>
    %cst_354 = arith.constant 1.000000e+00 : f32
    %1012 = vector.broadcast %cst_354 : f32 to vector<8x128xf32>
    %1013 = arith.subf %1012, %1005 : vector<8x128xf32>
    %1014 = arith.mulf %1013, %1011 : vector<8x128xf32>
    %1015 = arith.mulf %1005, %981 : vector<8x128xf32>
    %1016 = arith.addf %1014, %1015 : vector<8x128xf32>
    %1017 = arith.index_cast %c22_i32 : i32 to index
    %c0_355 = arith.constant 0 : index
    %c0_356 = arith.constant 0 : index
    %1018 = vector.load %arg12[%1017, %c0_355, %c0_356] : memref<29x8x128xf32, #tpu.memory_space<vmem>>, vector<1x8x128xf32>
    %1019 = vector.shape_cast %1018 : vector<1x8x128xf32> to vector<8x128xf32>
    %1020 = vector.shape_cast %1016 : vector<8x128xf32> to vector<1x8x128xf32>
    tpu.vector_store %arg12[%1017, %c0_355, %c0_356], %1020 {strides = array<i32>} : memref<29x8x128xf32, #tpu.memory_space<vmem>>, vector<1x8x128xf32>,
    %c23_i32 = arith.constant 23 : i32
    %1021 = arith.index_cast %c23_i32 : i32 to index
    %c0_357 = arith.constant 0 : index
    %c0_358 = arith.constant 0 : index
    %1022 = vector.load %arg11[%1021, %c0_357, %c0_358] : memref<29x8x384xf32, #tpu.memory_space<vmem>>, vector<1x8x384xf32>
    %1023 = vector.shape_cast %1022 : vector<1x8x384xf32> to vector<8x384xf32>
    %cst_359 = arith.constant dense<0.000000e+00> : vector<8x384xf32>
    %1024 = tpu.matmul %1016, %212, %cst_359 {dimension_numbers = #tpu.dot_dimension_numbers<[1], [0], [0], [1], [0, 0, 1, 1], [], []>} : vector<8x128xf32>, vector<128x384xf32>, vector<8x384xf32> -> vector<8x384xf32>
    %1025 = vector.extract_strided_slice %1023 {offsets = [0, 0], sizes = [8, 128], strides = [1, 1]} : vector<8x384xf32> to vector<8x128xf32>
    %1026 = vector.extract_strided_slice %1024 {offsets = [0, 0], sizes = [8, 128], strides = [1, 1]} : vector<8x384xf32> to vector<8x128xf32>
    %1027 = arith.addf %1025, %1026 : vector<8x128xf32>
    %1028 = arith.negf %1027 : vector<8x128xf32>
    %1029 = math.exp %1028 : vector<8x128xf32>
    %cst_360 = arith.constant 1.000000e+00 : f32
    %1030 = vector.broadcast %cst_360 : f32 to vector<8x128xf32>
    %1031 = arith.addf %1030, %1029 : vector<8x128xf32>
    %1032 = arith.divf %1030, %1031 : vector<8x128xf32>
    %1033 = vector.extract_strided_slice %1023 {offsets = [0, 128], sizes = [8, 128], strides = [1, 1]} : vector<8x384xf32> to vector<8x128xf32>
    %1034 = vector.extract_strided_slice %1024 {offsets = [0, 128], sizes = [8, 128], strides = [1, 1]} : vector<8x384xf32> to vector<8x128xf32>
    %1035 = arith.addf %1033, %1034 : vector<8x128xf32>
    %1036 = arith.negf %1035 : vector<8x128xf32>
    %1037 = math.exp %1036 : vector<8x128xf32>
    %cst_361 = arith.constant 1.000000e+00 : f32
    %1038 = vector.broadcast %cst_361 : f32 to vector<8x128xf32>
    %1039 = arith.addf %1038, %1037 : vector<8x128xf32>
    %1040 = arith.divf %1038, %1039 : vector<8x128xf32>
    %1041 = vector.extract_strided_slice %1023 {offsets = [0, 256], sizes = [8, 128], strides = [1, 1]} : vector<8x384xf32> to vector<8x128xf32>
    %1042 = vector.extract_strided_slice %1024 {offsets = [0, 256], sizes = [8, 128], strides = [1, 1]} : vector<8x384xf32> to vector<8x128xf32>
    %1043 = arith.addf %1042, %215 : vector<8x128xf32>
    %1044 = arith.mulf %1032, %1043 : vector<8x128xf32>
    %1045 = arith.addf %1041, %1044 : vector<8x128xf32>
    %1046 = math.tanh %1045 : vector<8x128xf32>
    %cst_362 = arith.constant 1.000000e+00 : f32
    %1047 = vector.broadcast %cst_362 : f32 to vector<8x128xf32>
    %1048 = arith.subf %1047, %1040 : vector<8x128xf32>
    %1049 = arith.mulf %1048, %1046 : vector<8x128xf32>
    %1050 = arith.mulf %1040, %1016 : vector<8x128xf32>
    %1051 = arith.addf %1049, %1050 : vector<8x128xf32>
    %1052 = arith.index_cast %c23_i32 : i32 to index
    %c0_363 = arith.constant 0 : index
    %c0_364 = arith.constant 0 : index
    %1053 = vector.load %arg12[%1052, %c0_363, %c0_364] : memref<29x8x128xf32, #tpu.memory_space<vmem>>, vector<1x8x128xf32>
    %1054 = vector.shape_cast %1053 : vector<1x8x128xf32> to vector<8x128xf32>
    %1055 = vector.shape_cast %1051 : vector<8x128xf32> to vector<1x8x128xf32>
    tpu.vector_store %arg12[%1052, %c0_363, %c0_364], %1055 {strides = array<i32>} : memref<29x8x128xf32, #tpu.memory_space<vmem>>, vector<1x8x128xf32>,
    %c24_i32 = arith.constant 24 : i32
    %1056 = arith.index_cast %c24_i32 : i32 to index
    %c0_365 = arith.constant 0 : index
    %c0_366 = arith.constant 0 : index
    %1057 = vector.load %arg11[%1056, %c0_365, %c0_366] : memref<29x8x384xf32, #tpu.memory_space<vmem>>, vector<1x8x384xf32>
    %1058 = vector.shape_cast %1057 : vector<1x8x384xf32> to vector<8x384xf32>
    %cst_367 = arith.constant dense<0.000000e+00> : vector<8x384xf32>
    %1059 = tpu.matmul %1051, %212, %cst_367 {dimension_numbers = #tpu.dot_dimension_numbers<[1], [0], [0], [1], [0, 0, 1, 1], [], []>} : vector<8x128xf32>, vector<128x384xf32>, vector<8x384xf32> -> vector<8x384xf32>
    %1060 = vector.extract_strided_slice %1058 {offsets = [0, 0], sizes = [8, 128], strides = [1, 1]} : vector<8x384xf32> to vector<8x128xf32>
    %1061 = vector.extract_strided_slice %1059 {offsets = [0, 0], sizes = [8, 128], strides = [1, 1]} : vector<8x384xf32> to vector<8x128xf32>
    %1062 = arith.addf %1060, %1061 : vector<8x128xf32>
    %1063 = arith.negf %1062 : vector<8x128xf32>
    %1064 = math.exp %1063 : vector<8x128xf32>
    %cst_368 = arith.constant 1.000000e+00 : f32
    %1065 = vector.broadcast %cst_368 : f32 to vector<8x128xf32>
    %1066 = arith.addf %1065, %1064 : vector<8x128xf32>
    %1067 = arith.divf %1065, %1066 : vector<8x128xf32>
    %1068 = vector.extract_strided_slice %1058 {offsets = [0, 128], sizes = [8, 128], strides = [1, 1]} : vector<8x384xf32> to vector<8x128xf32>
    %1069 = vector.extract_strided_slice %1059 {offsets = [0, 128], sizes = [8, 128], strides = [1, 1]} : vector<8x384xf32> to vector<8x128xf32>
    %1070 = arith.addf %1068, %1069 : vector<8x128xf32>
    %1071 = arith.negf %1070 : vector<8x128xf32>
    %1072 = math.exp %1071 : vector<8x128xf32>
    %cst_369 = arith.constant 1.000000e+00 : f32
    %1073 = vector.broadcast %cst_369 : f32 to vector<8x128xf32>
    %1074 = arith.addf %1073, %1072 : vector<8x128xf32>
    %1075 = arith.divf %1073, %1074 : vector<8x128xf32>
    %1076 = vector.extract_strided_slice %1058 {offsets = [0, 256], sizes = [8, 128], strides = [1, 1]} : vector<8x384xf32> to vector<8x128xf32>
    %1077 = vector.extract_strided_slice %1059 {offsets = [0, 256], sizes = [8, 128], strides = [1, 1]} : vector<8x384xf32> to vector<8x128xf32>
    %1078 = arith.addf %1077, %215 : vector<8x128xf32>
    %1079 = arith.mulf %1067, %1078 : vector<8x128xf32>
    %1080 = arith.addf %1076, %1079 : vector<8x128xf32>
    %1081 = math.tanh %1080 : vector<8x128xf32>
    %cst_370 = arith.constant 1.000000e+00 : f32
    %1082 = vector.broadcast %cst_370 : f32 to vector<8x128xf32>
    %1083 = arith.subf %1082, %1075 : vector<8x128xf32>
    %1084 = arith.mulf %1083, %1081 : vector<8x128xf32>
    %1085 = arith.mulf %1075, %1051 : vector<8x128xf32>
    %1086 = arith.addf %1084, %1085 : vector<8x128xf32>
    %1087 = arith.index_cast %c24_i32 : i32 to index
    %c0_371 = arith.constant 0 : index
    %c0_372 = arith.constant 0 : index
    %1088 = vector.load %arg12[%1087, %c0_371, %c0_372] : memref<29x8x128xf32, #tpu.memory_space<vmem>>, vector<1x8x128xf32>
    %1089 = vector.shape_cast %1088 : vector<1x8x128xf32> to vector<8x128xf32>
    %1090 = vector.shape_cast %1086 : vector<8x128xf32> to vector<1x8x128xf32>
    tpu.vector_store %arg12[%1087, %c0_371, %c0_372], %1090 {strides = array<i32>} : memref<29x8x128xf32, #tpu.memory_space<vmem>>, vector<1x8x128xf32>,
    %c25_i32 = arith.constant 25 : i32
    %1091 = arith.index_cast %c25_i32 : i32 to index
    %c0_373 = arith.constant 0 : index
    %c0_374 = arith.constant 0 : index
    %1092 = vector.load %arg11[%1091, %c0_373, %c0_374] : memref<29x8x384xf32, #tpu.memory_space<vmem>>, vector<1x8x384xf32>
    %1093 = vector.shape_cast %1092 : vector<1x8x384xf32> to vector<8x384xf32>
    %cst_375 = arith.constant dense<0.000000e+00> : vector<8x384xf32>
    %1094 = tpu.matmul %1086, %212, %cst_375 {dimension_numbers = #tpu.dot_dimension_numbers<[1], [0], [0], [1], [0, 0, 1, 1], [], []>} : vector<8x128xf32>, vector<128x384xf32>, vector<8x384xf32> -> vector<8x384xf32>
    %1095 = vector.extract_strided_slice %1093 {offsets = [0, 0], sizes = [8, 128], strides = [1, 1]} : vector<8x384xf32> to vector<8x128xf32>
    %1096 = vector.extract_strided_slice %1094 {offsets = [0, 0], sizes = [8, 128], strides = [1, 1]} : vector<8x384xf32> to vector<8x128xf32>
    %1097 = arith.addf %1095, %1096 : vector<8x128xf32>
    %1098 = arith.negf %1097 : vector<8x128xf32>
    %1099 = math.exp %1098 : vector<8x128xf32>
    %cst_376 = arith.constant 1.000000e+00 : f32
    %1100 = vector.broadcast %cst_376 : f32 to vector<8x128xf32>
    %1101 = arith.addf %1100, %1099 : vector<8x128xf32>
    %1102 = arith.divf %1100, %1101 : vector<8x128xf32>
    %1103 = vector.extract_strided_slice %1093 {offsets = [0, 128], sizes = [8, 128], strides = [1, 1]} : vector<8x384xf32> to vector<8x128xf32>
    %1104 = vector.extract_strided_slice %1094 {offsets = [0, 128], sizes = [8, 128], strides = [1, 1]} : vector<8x384xf32> to vector<8x128xf32>
    %1105 = arith.addf %1103, %1104 : vector<8x128xf32>
    %1106 = arith.negf %1105 : vector<8x128xf32>
    %1107 = math.exp %1106 : vector<8x128xf32>
    %cst_377 = arith.constant 1.000000e+00 : f32
    %1108 = vector.broadcast %cst_377 : f32 to vector<8x128xf32>
    %1109 = arith.addf %1108, %1107 : vector<8x128xf32>
    %1110 = arith.divf %1108, %1109 : vector<8x128xf32>
    %1111 = vector.extract_strided_slice %1093 {offsets = [0, 256], sizes = [8, 128], strides = [1, 1]} : vector<8x384xf32> to vector<8x128xf32>
    %1112 = vector.extract_strided_slice %1094 {offsets = [0, 256], sizes = [8, 128], strides = [1, 1]} : vector<8x384xf32> to vector<8x128xf32>
    %1113 = arith.addf %1112, %215 : vector<8x128xf32>
    %1114 = arith.mulf %1102, %1113 : vector<8x128xf32>
    %1115 = arith.addf %1111, %1114 : vector<8x128xf32>
    %1116 = math.tanh %1115 : vector<8x128xf32>
    %cst_378 = arith.constant 1.000000e+00 : f32
    %1117 = vector.broadcast %cst_378 : f32 to vector<8x128xf32>
    %1118 = arith.subf %1117, %1110 : vector<8x128xf32>
    %1119 = arith.mulf %1118, %1116 : vector<8x128xf32>
    %1120 = arith.mulf %1110, %1086 : vector<8x128xf32>
    %1121 = arith.addf %1119, %1120 : vector<8x128xf32>
    %1122 = arith.index_cast %c25_i32 : i32 to index
    %c0_379 = arith.constant 0 : index
    %c0_380 = arith.constant 0 : index
    %1123 = vector.load %arg12[%1122, %c0_379, %c0_380] : memref<29x8x128xf32, #tpu.memory_space<vmem>>, vector<1x8x128xf32>
    %1124 = vector.shape_cast %1123 : vector<1x8x128xf32> to vector<8x128xf32>
    %1125 = vector.shape_cast %1121 : vector<8x128xf32> to vector<1x8x128xf32>
    tpu.vector_store %arg12[%1122, %c0_379, %c0_380], %1125 {strides = array<i32>} : memref<29x8x128xf32, #tpu.memory_space<vmem>>, vector<1x8x128xf32>,
    %c26_i32 = arith.constant 26 : i32
    %1126 = arith.index_cast %c26_i32 : i32 to index
    %c0_381 = arith.constant 0 : index
    %c0_382 = arith.constant 0 : index
    %1127 = vector.load %arg11[%1126, %c0_381, %c0_382] : memref<29x8x384xf32, #tpu.memory_space<vmem>>, vector<1x8x384xf32>
    %1128 = vector.shape_cast %1127 : vector<1x8x384xf32> to vector<8x384xf32>
    %cst_383 = arith.constant dense<0.000000e+00> : vector<8x384xf32>
    %1129 = tpu.matmul %1121, %212, %cst_383 {dimension_numbers = #tpu.dot_dimension_numbers<[1], [0], [0], [1], [0, 0, 1, 1], [], []>} : vector<8x128xf32>, vector<128x384xf32>, vector<8x384xf32> -> vector<8x384xf32>
    %1130 = vector.extract_strided_slice %1128 {offsets = [0, 0], sizes = [8, 128], strides = [1, 1]} : vector<8x384xf32> to vector<8x128xf32>
    %1131 = vector.extract_strided_slice %1129 {offsets = [0, 0], sizes = [8, 128], strides = [1, 1]} : vector<8x384xf32> to vector<8x128xf32>
    %1132 = arith.addf %1130, %1131 : vector<8x128xf32>
    %1133 = arith.negf %1132 : vector<8x128xf32>
    %1134 = math.exp %1133 : vector<8x128xf32>
    %cst_384 = arith.constant 1.000000e+00 : f32
    %1135 = vector.broadcast %cst_384 : f32 to vector<8x128xf32>
    %1136 = arith.addf %1135, %1134 : vector<8x128xf32>
    %1137 = arith.divf %1135, %1136 : vector<8x128xf32>
    %1138 = vector.extract_strided_slice %1128 {offsets = [0, 128], sizes = [8, 128], strides = [1, 1]} : vector<8x384xf32> to vector<8x128xf32>
    %1139 = vector.extract_strided_slice %1129 {offsets = [0, 128], sizes = [8, 128], strides = [1, 1]} : vector<8x384xf32> to vector<8x128xf32>
    %1140 = arith.addf %1138, %1139 : vector<8x128xf32>
    %1141 = arith.negf %1140 : vector<8x128xf32>
    %1142 = math.exp %1141 : vector<8x128xf32>
    %cst_385 = arith.constant 1.000000e+00 : f32
    %1143 = vector.broadcast %cst_385 : f32 to vector<8x128xf32>
    %1144 = arith.addf %1143, %1142 : vector<8x128xf32>
    %1145 = arith.divf %1143, %1144 : vector<8x128xf32>
    %1146 = vector.extract_strided_slice %1128 {offsets = [0, 256], sizes = [8, 128], strides = [1, 1]} : vector<8x384xf32> to vector<8x128xf32>
    %1147 = vector.extract_strided_slice %1129 {offsets = [0, 256], sizes = [8, 128], strides = [1, 1]} : vector<8x384xf32> to vector<8x128xf32>
    %1148 = arith.addf %1147, %215 : vector<8x128xf32>
    %1149 = arith.mulf %1137, %1148 : vector<8x128xf32>
    %1150 = arith.addf %1146, %1149 : vector<8x128xf32>
    %1151 = math.tanh %1150 : vector<8x128xf32>
    %cst_386 = arith.constant 1.000000e+00 : f32
    %1152 = vector.broadcast %cst_386 : f32 to vector<8x128xf32>
    %1153 = arith.subf %1152, %1145 : vector<8x128xf32>
    %1154 = arith.mulf %1153, %1151 : vector<8x128xf32>
    %1155 = arith.mulf %1145, %1121 : vector<8x128xf32>
    %1156 = arith.addf %1154, %1155 : vector<8x128xf32>
    %1157 = arith.index_cast %c26_i32 : i32 to index
    %c0_387 = arith.constant 0 : index
    %c0_388 = arith.constant 0 : index
    %1158 = vector.load %arg12[%1157, %c0_387, %c0_388] : memref<29x8x128xf32, #tpu.memory_space<vmem>>, vector<1x8x128xf32>
    %1159 = vector.shape_cast %1158 : vector<1x8x128xf32> to vector<8x128xf32>
    %1160 = vector.shape_cast %1156 : vector<8x128xf32> to vector<1x8x128xf32>
    tpu.vector_store %arg12[%1157, %c0_387, %c0_388], %1160 {strides = array<i32>} : memref<29x8x128xf32, #tpu.memory_space<vmem>>, vector<1x8x128xf32>,
    %c27_i32 = arith.constant 27 : i32
    %1161 = arith.index_cast %c27_i32 : i32 to index
    %c0_389 = arith.constant 0 : index
    %c0_390 = arith.constant 0 : index
    %1162 = vector.load %arg11[%1161, %c0_389, %c0_390] : memref<29x8x384xf32, #tpu.memory_space<vmem>>, vector<1x8x384xf32>
    %1163 = vector.shape_cast %1162 : vector<1x8x384xf32> to vector<8x384xf32>
    %cst_391 = arith.constant dense<0.000000e+00> : vector<8x384xf32>
    %1164 = tpu.matmul %1156, %212, %cst_391 {dimension_numbers = #tpu.dot_dimension_numbers<[1], [0], [0], [1], [0, 0, 1, 1], [], []>} : vector<8x128xf32>, vector<128x384xf32>, vector<8x384xf32> -> vector<8x384xf32>
    %1165 = vector.extract_strided_slice %1163 {offsets = [0, 0], sizes = [8, 128], strides = [1, 1]} : vector<8x384xf32> to vector<8x128xf32>
    %1166 = vector.extract_strided_slice %1164 {offsets = [0, 0], sizes = [8, 128], strides = [1, 1]} : vector<8x384xf32> to vector<8x128xf32>
    %1167 = arith.addf %1165, %1166 : vector<8x128xf32>
    %1168 = arith.negf %1167 : vector<8x128xf32>
    %1169 = math.exp %1168 : vector<8x128xf32>
    %cst_392 = arith.constant 1.000000e+00 : f32
    %1170 = vector.broadcast %cst_392 : f32 to vector<8x128xf32>
    %1171 = arith.addf %1170, %1169 : vector<8x128xf32>
    %1172 = arith.divf %1170, %1171 : vector<8x128xf32>
    %1173 = vector.extract_strided_slice %1163 {offsets = [0, 128], sizes = [8, 128], strides = [1, 1]} : vector<8x384xf32> to vector<8x128xf32>
    %1174 = vector.extract_strided_slice %1164 {offsets = [0, 128], sizes = [8, 128], strides = [1, 1]} : vector<8x384xf32> to vector<8x128xf32>
    %1175 = arith.addf %1173, %1174 : vector<8x128xf32>
    %1176 = arith.negf %1175 : vector<8x128xf32>
    %1177 = math.exp %1176 : vector<8x128xf32>
    %cst_393 = arith.constant 1.000000e+00 : f32
    %1178 = vector.broadcast %cst_393 : f32 to vector<8x128xf32>
    %1179 = arith.addf %1178, %1177 : vector<8x128xf32>
    %1180 = arith.divf %1178, %1179 : vector<8x128xf32>
    %1181 = vector.extract_strided_slice %1163 {offsets = [0, 256], sizes = [8, 128], strides = [1, 1]} : vector<8x384xf32> to vector<8x128xf32>
    %1182 = vector.extract_strided_slice %1164 {offsets = [0, 256], sizes = [8, 128], strides = [1, 1]} : vector<8x384xf32> to vector<8x128xf32>
    %1183 = arith.addf %1182, %215 : vector<8x128xf32>
    %1184 = arith.mulf %1172, %1183 : vector<8x128xf32>
    %1185 = arith.addf %1181, %1184 : vector<8x128xf32>
    %1186 = math.tanh %1185 : vector<8x128xf32>
    %cst_394 = arith.constant 1.000000e+00 : f32
    %1187 = vector.broadcast %cst_394 : f32 to vector<8x128xf32>
    %1188 = arith.subf %1187, %1180 : vector<8x128xf32>
    %1189 = arith.mulf %1188, %1186 : vector<8x128xf32>
    %1190 = arith.mulf %1180, %1156 : vector<8x128xf32>
    %1191 = arith.addf %1189, %1190 : vector<8x128xf32>
    %1192 = arith.index_cast %c27_i32 : i32 to index
    %c0_395 = arith.constant 0 : index
    %c0_396 = arith.constant 0 : index
    %1193 = vector.load %arg12[%1192, %c0_395, %c0_396] : memref<29x8x128xf32, #tpu.memory_space<vmem>>, vector<1x8x128xf32>
    %1194 = vector.shape_cast %1193 : vector<1x8x128xf32> to vector<8x128xf32>
    %1195 = vector.shape_cast %1191 : vector<8x128xf32> to vector<1x8x128xf32>
    tpu.vector_store %arg12[%1192, %c0_395, %c0_396], %1195 {strides = array<i32>} : memref<29x8x128xf32, #tpu.memory_space<vmem>>, vector<1x8x128xf32>,
    %c28_i32 = arith.constant 28 : i32
    %1196 = arith.index_cast %c28_i32 : i32 to index
    %c0_397 = arith.constant 0 : index
    %c0_398 = arith.constant 0 : index
    %1197 = vector.load %arg11[%1196, %c0_397, %c0_398] : memref<29x8x384xf32, #tpu.memory_space<vmem>>, vector<1x8x384xf32>
    %1198 = vector.shape_cast %1197 : vector<1x8x384xf32> to vector<8x384xf32>
    %cst_399 = arith.constant dense<0.000000e+00> : vector<8x384xf32>
    %1199 = tpu.matmul %1191, %212, %cst_399 {dimension_numbers = #tpu.dot_dimension_numbers<[1], [0], [0], [1], [0, 0, 1, 1], [], []>} : vector<8x128xf32>, vector<128x384xf32>, vector<8x384xf32> -> vector<8x384xf32>
    %1200 = vector.extract_strided_slice %1198 {offsets = [0, 0], sizes = [8, 128], strides = [1, 1]} : vector<8x384xf32> to vector<8x128xf32>
    %1201 = vector.extract_strided_slice %1199 {offsets = [0, 0], sizes = [8, 128], strides = [1, 1]} : vector<8x384xf32> to vector<8x128xf32>
    %1202 = arith.addf %1200, %1201 : vector<8x128xf32>
    %1203 = arith.negf %1202 : vector<8x128xf32>
    %1204 = math.exp %1203 : vector<8x128xf32>
    %cst_400 = arith.constant 1.000000e+00 : f32
    %1205 = vector.broadcast %cst_400 : f32 to vector<8x128xf32>
    %1206 = arith.addf %1205, %1204 : vector<8x128xf32>
    %1207 = arith.divf %1205, %1206 : vector<8x128xf32>
    %1208 = vector.extract_strided_slice %1198 {offsets = [0, 128], sizes = [8, 128], strides = [1, 1]} : vector<8x384xf32> to vector<8x128xf32>
    %1209 = vector.extract_strided_slice %1199 {offsets = [0, 128], sizes = [8, 128], strides = [1, 1]} : vector<8x384xf32> to vector<8x128xf32>
    %1210 = arith.addf %1208, %1209 : vector<8x128xf32>
    %1211 = arith.negf %1210 : vector<8x128xf32>
    %1212 = math.exp %1211 : vector<8x128xf32>
    %cst_401 = arith.constant 1.000000e+00 : f32
    %1213 = vector.broadcast %cst_401 : f32 to vector<8x128xf32>
    %1214 = arith.addf %1213, %1212 : vector<8x128xf32>
    %1215 = arith.divf %1213, %1214 : vector<8x128xf32>
    %1216 = vector.extract_strided_slice %1198 {offsets = [0, 256], sizes = [8, 128], strides = [1, 1]} : vector<8x384xf32> to vector<8x128xf32>
    %1217 = vector.extract_strided_slice %1199 {offsets = [0, 256], sizes = [8, 128], strides = [1, 1]} : vector<8x384xf32> to vector<8x128xf32>
    %1218 = arith.addf %1217, %215 : vector<8x128xf32>
    %1219 = arith.mulf %1207, %1218 : vector<8x128xf32>
    %1220 = arith.addf %1216, %1219 : vector<8x128xf32>
    %1221 = math.tanh %1220 : vector<8x128xf32>
    %cst_402 = arith.constant 1.000000e+00 : f32
    %1222 = vector.broadcast %cst_402 : f32 to vector<8x128xf32>
    %1223 = arith.subf %1222, %1215 : vector<8x128xf32>
    %1224 = arith.mulf %1223, %1221 : vector<8x128xf32>
    %1225 = arith.mulf %1215, %1191 : vector<8x128xf32>
    %1226 = arith.addf %1224, %1225 : vector<8x128xf32>
    %1227 = arith.index_cast %c28_i32 : i32 to index
    %c0_403 = arith.constant 0 : index
    %c0_404 = arith.constant 0 : index
    %1228 = vector.load %arg12[%1227, %c0_403, %c0_404] : memref<29x8x128xf32, #tpu.memory_space<vmem>>, vector<1x8x128xf32>
    %1229 = vector.shape_cast %1228 : vector<1x8x128xf32> to vector<8x128xf32>
    %1230 = vector.shape_cast %1226 : vector<8x128xf32> to vector<1x8x128xf32>
    tpu.vector_store %arg12[%1227, %c0_403, %c0_404], %1230 {strides = array<i32>} : memref<29x8x128xf32, #tpu.memory_space<vmem>>, vector<1x8x128xf32>,
    %c29_i32 = arith.constant 29 : i32
    %c0_405 = arith.constant 0 : index
    %c0_406 = arith.constant 0 : index
    %c0_407 = arith.constant 0 : index
    %1231 = vector.load %arg12[%c0_405, %c0_406, %c0_407] : memref<29x8x128xf32, #tpu.memory_space<vmem>>, vector<1x8x128xf32>
    %1232 = vector.shape_cast %1231 : vector<1x8x128xf32> to vector<8x128xf32>
    %c28_408 = arith.constant 28 : index
    %c0_409 = arith.constant 0 : index
    %c0_410 = arith.constant 0 : index
    %1233 = vector.load %arg12[%c28_408, %c0_409, %c0_410] : memref<29x8x128xf32, #tpu.memory_space<vmem>>, vector<1x8x128xf32>
    %1234 = vector.shape_cast %1233 : vector<1x8x128xf32> to vector<8x128xf32>
    %1235 = arith.select %211, %1232, %1234 : vector<8x128xi1>, vector<8x128xf32>
    %c0_411 = arith.constant 0 : index
    %c0_412 = arith.constant 0 : index
    %c0_413 = arith.constant 0 : index
    %1236 = vector.load %arg12[%c0_411, %c0_412, %c0_413] : memref<29x8x128xf32, #tpu.memory_space<vmem>>, vector<1x8x128xf32>
    %1237 = vector.shape_cast %1236 : vector<1x8x128xf32> to vector<8x128xf32>
    %1238 = vector.shape_cast %1235 : vector<8x128xf32> to vector<1x8x128xf32>
    tpu.vector_store %arg12[%c0_411, %c0_412, %c0_413], %1238 {strides = array<i32>} : memref<29x8x128xf32, #tpu.memory_space<vmem>>, vector<1x8x128xf32>,
    %1239 = arith.select %211, %1234, %1232 : vector<8x128xi1>, vector<8x128xf32>
    %c28_414 = arith.constant 28 : index
    %c0_415 = arith.constant 0 : index
    %c0_416 = arith.constant 0 : index
    %1240 = vector.load %arg12[%c28_414, %c0_415, %c0_416] : memref<29x8x128xf32, #tpu.memory_space<vmem>>, vector<1x8x128xf32>
    %1241 = vector.shape_cast %1240 : vector<1x8x128xf32> to vector<8x128xf32>
    %1242 = vector.shape_cast %1239 : vector<8x128xf32> to vector<1x8x128xf32>
    tpu.vector_store %arg12[%c28_414, %c0_415, %c0_416], %1242 {strides = array<i32>} : memref<29x8x128xf32, #tpu.memory_space<vmem>>, vector<1x8x128xf32>,
    %c1_417 = arith.constant 1 : index
    %c0_418 = arith.constant 0 : index
    %c0_419 = arith.constant 0 : index
    %1243 = vector.load %arg12[%c1_417, %c0_418, %c0_419] : memref<29x8x128xf32, #tpu.memory_space<vmem>>, vector<1x8x128xf32>
    %1244 = vector.shape_cast %1243 : vector<1x8x128xf32> to vector<8x128xf32>
    %c27_420 = arith.constant 27 : index
    %c0_421 = arith.constant 0 : index
    %c0_422 = arith.constant 0 : index
    %1245 = vector.load %arg12[%c27_420, %c0_421, %c0_422] : memref<29x8x128xf32, #tpu.memory_space<vmem>>, vector<1x8x128xf32>
    %1246 = vector.shape_cast %1245 : vector<1x8x128xf32> to vector<8x128xf32>
    %1247 = arith.select %211, %1244, %1246 : vector<8x128xi1>, vector<8x128xf32>
    %c1_423 = arith.constant 1 : index
    %c0_424 = arith.constant 0 : index
    %c0_425 = arith.constant 0 : index
    %1248 = vector.load %arg12[%c1_423, %c0_424, %c0_425] : memref<29x8x128xf32, #tpu.memory_space<vmem>>, vector<1x8x128xf32>
    %1249 = vector.shape_cast %1248 : vector<1x8x128xf32> to vector<8x128xf32>
    %1250 = vector.shape_cast %1247 : vector<8x128xf32> to vector<1x8x128xf32>
    tpu.vector_store %arg12[%c1_423, %c0_424, %c0_425], %1250 {strides = array<i32>} : memref<29x8x128xf32, #tpu.memory_space<vmem>>, vector<1x8x128xf32>,
    %1251 = arith.select %211, %1246, %1244 : vector<8x128xi1>, vector<8x128xf32>
    %c27_426 = arith.constant 27 : index
    %c0_427 = arith.constant 0 : index
    %c0_428 = arith.constant 0 : index
    %1252 = vector.load %arg12[%c27_426, %c0_427, %c0_428] : memref<29x8x128xf32, #tpu.memory_space<vmem>>, vector<1x8x128xf32>
    %1253 = vector.shape_cast %1252 : vector<1x8x128xf32> to vector<8x128xf32>
    %1254 = vector.shape_cast %1251 : vector<8x128xf32> to vector<1x8x128xf32>
    tpu.vector_store %arg12[%c27_426, %c0_427, %c0_428], %1254 {strides = array<i32>} : memref<29x8x128xf32, #tpu.memory_space<vmem>>, vector<1x8x128xf32>,
    %c2_429 = arith.constant 2 : index
    %c0_430 = arith.constant 0 : index
    %c0_431 = arith.constant 0 : index
    %1255 = vector.load %arg12[%c2_429, %c0_430, %c0_431] : memref<29x8x128xf32, #tpu.memory_space<vmem>>, vector<1x8x128xf32>
    %1256 = vector.shape_cast %1255 : vector<1x8x128xf32> to vector<8x128xf32>
    %c26_432 = arith.constant 26 : index
    %c0_433 = arith.constant 0 : index
    %c0_434 = arith.constant 0 : index
    %1257 = vector.load %arg12[%c26_432, %c0_433, %c0_434] : memref<29x8x128xf32, #tpu.memory_space<vmem>>, vector<1x8x128xf32>
    %1258 = vector.shape_cast %1257 : vector<1x8x128xf32> to vector<8x128xf32>
    %1259 = arith.select %211, %1256, %1258 : vector<8x128xi1>, vector<8x128xf32>
    %c2_435 = arith.constant 2 : index
    %c0_436 = arith.constant 0 : index
    %c0_437 = arith.constant 0 : index
    %1260 = vector.load %arg12[%c2_435, %c0_436, %c0_437] : memref<29x8x128xf32, #tpu.memory_space<vmem>>, vector<1x8x128xf32>
    %1261 = vector.shape_cast %1260 : vector<1x8x128xf32> to vector<8x128xf32>
    %1262 = vector.shape_cast %1259 : vector<8x128xf32> to vector<1x8x128xf32>
    tpu.vector_store %arg12[%c2_435, %c0_436, %c0_437], %1262 {strides = array<i32>} : memref<29x8x128xf32, #tpu.memory_space<vmem>>, vector<1x8x128xf32>,
    %1263 = arith.select %211, %1258, %1256 : vector<8x128xi1>, vector<8x128xf32>
    %c26_438 = arith.constant 26 : index
    %c0_439 = arith.constant 0 : index
    %c0_440 = arith.constant 0 : index
    %1264 = vector.load %arg12[%c26_438, %c0_439, %c0_440] : memref<29x8x128xf32, #tpu.memory_space<vmem>>, vector<1x8x128xf32>
    %1265 = vector.shape_cast %1264 : vector<1x8x128xf32> to vector<8x128xf32>
    %1266 = vector.shape_cast %1263 : vector<8x128xf32> to vector<1x8x128xf32>
    tpu.vector_store %arg12[%c26_438, %c0_439, %c0_440], %1266 {strides = array<i32>} : memref<29x8x128xf32, #tpu.memory_space<vmem>>, vector<1x8x128xf32>,
    %c3_441 = arith.constant 3 : index
    %c0_442 = arith.constant 0 : index
    %c0_443 = arith.constant 0 : index
    %1267 = vector.load %arg12[%c3_441, %c0_442, %c0_443] : memref<29x8x128xf32, #tpu.memory_space<vmem>>, vector<1x8x128xf32>
    %1268 = vector.shape_cast %1267 : vector<1x8x128xf32> to vector<8x128xf32>
    %c25_444 = arith.constant 25 : index
    %c0_445 = arith.constant 0 : index
    %c0_446 = arith.constant 0 : index
    %1269 = vector.load %arg12[%c25_444, %c0_445, %c0_446] : memref<29x8x128xf32, #tpu.memory_space<vmem>>, vector<1x8x128xf32>
    %1270 = vector.shape_cast %1269 : vector<1x8x128xf32> to vector<8x128xf32>
    %1271 = arith.select %211, %1268, %1270 : vector<8x128xi1>, vector<8x128xf32>
    %c3_447 = arith.constant 3 : index
    %c0_448 = arith.constant 0 : index
    %c0_449 = arith.constant 0 : index
    %1272 = vector.load %arg12[%c3_447, %c0_448, %c0_449] : memref<29x8x128xf32, #tpu.memory_space<vmem>>, vector<1x8x128xf32>
    %1273 = vector.shape_cast %1272 : vector<1x8x128xf32> to vector<8x128xf32>
    %1274 = vector.shape_cast %1271 : vector<8x128xf32> to vector<1x8x128xf32>
    tpu.vector_store %arg12[%c3_447, %c0_448, %c0_449], %1274 {strides = array<i32>} : memref<29x8x128xf32, #tpu.memory_space<vmem>>, vector<1x8x128xf32>,
    %1275 = arith.select %211, %1270, %1268 : vector<8x128xi1>, vector<8x128xf32>
    %c25_450 = arith.constant 25 : index
    %c0_451 = arith.constant 0 : index
    %c0_452 = arith.constant 0 : index
    %1276 = vector.load %arg12[%c25_450, %c0_451, %c0_452] : memref<29x8x128xf32, #tpu.memory_space<vmem>>, vector<1x8x128xf32>
    %1277 = vector.shape_cast %1276 : vector<1x8x128xf32> to vector<8x128xf32>
    %1278 = vector.shape_cast %1275 : vector<8x128xf32> to vector<1x8x128xf32>
    tpu.vector_store %arg12[%c25_450, %c0_451, %c0_452], %1278 {strides = array<i32>} : memref<29x8x128xf32, #tpu.memory_space<vmem>>, vector<1x8x128xf32>,
    %c4_453 = arith.constant 4 : index
    %c0_454 = arith.constant 0 : index
    %c0_455 = arith.constant 0 : index
    %1279 = vector.load %arg12[%c4_453, %c0_454, %c0_455] : memref<29x8x128xf32, #tpu.memory_space<vmem>>, vector<1x8x128xf32>
    %1280 = vector.shape_cast %1279 : vector<1x8x128xf32> to vector<8x128xf32>
    %c24_456 = arith.constant 24 : index
    %c0_457 = arith.constant 0 : index
    %c0_458 = arith.constant 0 : index
    %1281 = vector.load %arg12[%c24_456, %c0_457, %c0_458] : memref<29x8x128xf32, #tpu.memory_space<vmem>>, vector<1x8x128xf32>
    %1282 = vector.shape_cast %1281 : vector<1x8x128xf32> to vector<8x128xf32>
    %1283 = arith.select %211, %1280, %1282 : vector<8x128xi1>, vector<8x128xf32>
    %c4_459 = arith.constant 4 : index
    %c0_460 = arith.constant 0 : index
    %c0_461 = arith.constant 0 : index
    %1284 = vector.load %arg12[%c4_459, %c0_460, %c0_461] : memref<29x8x128xf32, #tpu.memory_space<vmem>>, vector<1x8x128xf32>
    %1285 = vector.shape_cast %1284 : vector<1x8x128xf32> to vector<8x128xf32>
    %1286 = vector.shape_cast %1283 : vector<8x128xf32> to vector<1x8x128xf32>
    tpu.vector_store %arg12[%c4_459, %c0_460, %c0_461], %1286 {strides = array<i32>} : memref<29x8x128xf32, #tpu.memory_space<vmem>>, vector<1x8x128xf32>,
    %1287 = arith.select %211, %1282, %1280 : vector<8x128xi1>, vector<8x128xf32>
    %c24_462 = arith.constant 24 : index
    %c0_463 = arith.constant 0 : index
    %c0_464 = arith.constant 0 : index
    %1288 = vector.load %arg12[%c24_462, %c0_463, %c0_464] : memref<29x8x128xf32, #tpu.memory_space<vmem>>, vector<1x8x128xf32>
    %1289 = vector.shape_cast %1288 : vector<1x8x128xf32> to vector<8x128xf32>
    %1290 = vector.shape_cast %1287 : vector<8x128xf32> to vector<1x8x128xf32>
    tpu.vector_store %arg12[%c24_462, %c0_463, %c0_464], %1290 {strides = array<i32>} : memref<29x8x128xf32, #tpu.memory_space<vmem>>, vector<1x8x128xf32>,
    %c5_465 = arith.constant 5 : index
    %c0_466 = arith.constant 0 : index
    %c0_467 = arith.constant 0 : index
    %1291 = vector.load %arg12[%c5_465, %c0_466, %c0_467] : memref<29x8x128xf32, #tpu.memory_space<vmem>>, vector<1x8x128xf32>
    %1292 = vector.shape_cast %1291 : vector<1x8x128xf32> to vector<8x128xf32>
    %c23_468 = arith.constant 23 : index
    %c0_469 = arith.constant 0 : index
    %c0_470 = arith.constant 0 : index
    %1293 = vector.load %arg12[%c23_468, %c0_469, %c0_470] : memref<29x8x128xf32, #tpu.memory_space<vmem>>, vector<1x8x128xf32>
    %1294 = vector.shape_cast %1293 : vector<1x8x128xf32> to vector<8x128xf32>
    %1295 = arith.select %211, %1292, %1294 : vector<8x128xi1>, vector<8x128xf32>
    %c5_471 = arith.constant 5 : index
    %c0_472 = arith.constant 0 : index
    %c0_473 = arith.constant 0 : index
    %1296 = vector.load %arg12[%c5_471, %c0_472, %c0_473] : memref<29x8x128xf32, #tpu.memory_space<vmem>>, vector<1x8x128xf32>
    %1297 = vector.shape_cast %1296 : vector<1x8x128xf32> to vector<8x128xf32>
    %1298 = vector.shape_cast %1295 : vector<8x128xf32> to vector<1x8x128xf32>
    tpu.vector_store %arg12[%c5_471, %c0_472, %c0_473], %1298 {strides = array<i32>} : memref<29x8x128xf32, #tpu.memory_space<vmem>>, vector<1x8x128xf32>,
    %1299 = arith.select %211, %1294, %1292 : vector<8x128xi1>, vector<8x128xf32>
    %c23_474 = arith.constant 23 : index
    %c0_475 = arith.constant 0 : index
    %c0_476 = arith.constant 0 : index
    %1300 = vector.load %arg12[%c23_474, %c0_475, %c0_476] : memref<29x8x128xf32, #tpu.memory_space<vmem>>, vector<1x8x128xf32>
    %1301 = vector.shape_cast %1300 : vector<1x8x128xf32> to vector<8x128xf32>
    %1302 = vector.shape_cast %1299 : vector<8x128xf32> to vector<1x8x128xf32>
    tpu.vector_store %arg12[%c23_474, %c0_475, %c0_476], %1302 {strides = array<i32>} : memref<29x8x128xf32, #tpu.memory_space<vmem>>, vector<1x8x128xf32>,
    %c6_477 = arith.constant 6 : index
    %c0_478 = arith.constant 0 : index
    %c0_479 = arith.constant 0 : index
    %1303 = vector.load %arg12[%c6_477, %c0_478, %c0_479] : memref<29x8x128xf32, #tpu.memory_space<vmem>>, vector<1x8x128xf32>
    %1304 = vector.shape_cast %1303 : vector<1x8x128xf32> to vector<8x128xf32>
    %c22_480 = arith.constant 22 : index
    %c0_481 = arith.constant 0 : index
    %c0_482 = arith.constant 0 : index
    %1305 = vector.load %arg12[%c22_480, %c0_481, %c0_482] : memref<29x8x128xf32, #tpu.memory_space<vmem>>, vector<1x8x128xf32>
    %1306 = vector.shape_cast %1305 : vector<1x8x128xf32> to vector<8x128xf32>
    %1307 = arith.select %211, %1304, %1306 : vector<8x128xi1>, vector<8x128xf32>
    %c6_483 = arith.constant 6 : index
    %c0_484 = arith.constant 0 : index
    %c0_485 = arith.constant 0 : index
    %1308 = vector.load %arg12[%c6_483, %c0_484, %c0_485] : memref<29x8x128xf32, #tpu.memory_space<vmem>>, vector<1x8x128xf32>
    %1309 = vector.shape_cast %1308 : vector<1x8x128xf32> to vector<8x128xf32>
    %1310 = vector.shape_cast %1307 : vector<8x128xf32> to vector<1x8x128xf32>
    tpu.vector_store %arg12[%c6_483, %c0_484, %c0_485], %1310 {strides = array<i32>} : memref<29x8x128xf32, #tpu.memory_space<vmem>>, vector<1x8x128xf32>,
    %1311 = arith.select %211, %1306, %1304 : vector<8x128xi1>, vector<8x128xf32>
    %c22_486 = arith.constant 22 : index
    %c0_487 = arith.constant 0 : index
    %c0_488 = arith.constant 0 : index
    %1312 = vector.load %arg12[%c22_486, %c0_487, %c0_488] : memref<29x8x128xf32, #tpu.memory_space<vmem>>, vector<1x8x128xf32>
    %1313 = vector.shape_cast %1312 : vector<1x8x128xf32> to vector<8x128xf32>
    %1314 = vector.shape_cast %1311 : vector<8x128xf32> to vector<1x8x128xf32>
    tpu.vector_store %arg12[%c22_486, %c0_487, %c0_488], %1314 {strides = array<i32>} : memref<29x8x128xf32, #tpu.memory_space<vmem>>, vector<1x8x128xf32>,
    %c7_489 = arith.constant 7 : index
    %c0_490 = arith.constant 0 : index
    %c0_491 = arith.constant 0 : index
    %1315 = vector.load %arg12[%c7_489, %c0_490, %c0_491] : memref<29x8x128xf32, #tpu.memory_space<vmem>>, vector<1x8x128xf32>
    %1316 = vector.shape_cast %1315 : vector<1x8x128xf32> to vector<8x128xf32>
    %c21_492 = arith.constant 21 : index
    %c0_493 = arith.constant 0 : index
    %c0_494 = arith.constant 0 : index
    %1317 = vector.load %arg12[%c21_492, %c0_493, %c0_494] : memref<29x8x128xf32, #tpu.memory_space<vmem>>, vector<1x8x128xf32>
    %1318 = vector.shape_cast %1317 : vector<1x8x128xf32> to vector<8x128xf32>
    %1319 = arith.select %211, %1316, %1318 : vector<8x128xi1>, vector<8x128xf32>
    %c7_495 = arith.constant 7 : index
    %c0_496 = arith.constant 0 : index
    %c0_497 = arith.constant 0 : index
    %1320 = vector.load %arg12[%c7_495, %c0_496, %c0_497] : memref<29x8x128xf32, #tpu.memory_space<vmem>>, vector<1x8x128xf32>
    %1321 = vector.shape_cast %1320 : vector<1x8x128xf32> to vector<8x128xf32>
    %1322 = vector.shape_cast %1319 : vector<8x128xf32> to vector<1x8x128xf32>
    tpu.vector_store %arg12[%c7_495, %c0_496, %c0_497], %1322 {strides = array<i32>} : memref<29x8x128xf32, #tpu.memory_space<vmem>>, vector<1x8x128xf32>,
    %1323 = arith.select %211, %1318, %1316 : vector<8x128xi1>, vector<8x128xf32>
    %c21_498 = arith.constant 21 : index
    %c0_499 = arith.constant 0 : index
    %c0_500 = arith.constant 0 : index
    %1324 = vector.load %arg12[%c21_498, %c0_499, %c0_500] : memref<29x8x128xf32, #tpu.memory_space<vmem>>, vector<1x8x128xf32>
    %1325 = vector.shape_cast %1324 : vector<1x8x128xf32> to vector<8x128xf32>
    %1326 = vector.shape_cast %1323 : vector<8x128xf32> to vector<1x8x128xf32>
    tpu.vector_store %arg12[%c21_498, %c0_499, %c0_500], %1326 {strides = array<i32>} : memref<29x8x128xf32, #tpu.memory_space<vmem>>, vector<1x8x128xf32>,
    %c8_501 = arith.constant 8 : index
    %c0_502 = arith.constant 0 : index
    %c0_503 = arith.constant 0 : index
    %1327 = vector.load %arg12[%c8_501, %c0_502, %c0_503] : memref<29x8x128xf32, #tpu.memory_space<vmem>>, vector<1x8x128xf32>
    %1328 = vector.shape_cast %1327 : vector<1x8x128xf32> to vector<8x128xf32>
    %c20_504 = arith.constant 20 : index
    %c0_505 = arith.constant 0 : index
    %c0_506 = arith.constant 0 : index
    %1329 = vector.load %arg12[%c20_504, %c0_505, %c0_506] : memref<29x8x128xf32, #tpu.memory_space<vmem>>, vector<1x8x128xf32>
    %1330 = vector.shape_cast %1329 : vector<1x8x128xf32> to vector<8x128xf32>
    %1331 = arith.select %211, %1328, %1330 : vector<8x128xi1>, vector<8x128xf32>
    %c8_507 = arith.constant 8 : index
    %c0_508 = arith.constant 0 : index
    %c0_509 = arith.constant 0 : index
    %1332 = vector.load %arg12[%c8_507, %c0_508, %c0_509] : memref<29x8x128xf32, #tpu.memory_space<vmem>>, vector<1x8x128xf32>
    %1333 = vector.shape_cast %1332 : vector<1x8x128xf32> to vector<8x128xf32>
    %1334 = vector.shape_cast %1331 : vector<8x128xf32> to vector<1x8x128xf32>
    tpu.vector_store %arg12[%c8_507, %c0_508, %c0_509], %1334 {strides = array<i32>} : memref<29x8x128xf32, #tpu.memory_space<vmem>>, vector<1x8x128xf32>,
    %1335 = arith.select %211, %1330, %1328 : vector<8x128xi1>, vector<8x128xf32>
    %c20_510 = arith.constant 20 : index
    %c0_511 = arith.constant 0 : index
    %c0_512 = arith.constant 0 : index
    %1336 = vector.load %arg12[%c20_510, %c0_511, %c0_512] : memref<29x8x128xf32, #tpu.memory_space<vmem>>, vector<1x8x128xf32>
    %1337 = vector.shape_cast %1336 : vector<1x8x128xf32> to vector<8x128xf32>
    %1338 = vector.shape_cast %1335 : vector<8x128xf32> to vector<1x8x128xf32>
    tpu.vector_store %arg12[%c20_510, %c0_511, %c0_512], %1338 {strides = array<i32>} : memref<29x8x128xf32, #tpu.memory_space<vmem>>, vector<1x8x128xf32>,
    %c9_513 = arith.constant 9 : index
    %c0_514 = arith.constant 0 : index
    %c0_515 = arith.constant 0 : index
    %1339 = vector.load %arg12[%c9_513, %c0_514, %c0_515] : memref<29x8x128xf32, #tpu.memory_space<vmem>>, vector<1x8x128xf32>
    %1340 = vector.shape_cast %1339 : vector<1x8x128xf32> to vector<8x128xf32>
    %c19_516 = arith.constant 19 : index
    %c0_517 = arith.constant 0 : index
    %c0_518 = arith.constant 0 : index
    %1341 = vector.load %arg12[%c19_516, %c0_517, %c0_518] : memref<29x8x128xf32, #tpu.memory_space<vmem>>, vector<1x8x128xf32>
    %1342 = vector.shape_cast %1341 : vector<1x8x128xf32> to vector<8x128xf32>
    %1343 = arith.select %211, %1340, %1342 : vector<8x128xi1>, vector<8x128xf32>
    %c9_519 = arith.constant 9 : index
    %c0_520 = arith.constant 0 : index
    %c0_521 = arith.constant 0 : index
    %1344 = vector.load %arg12[%c9_519, %c0_520, %c0_521] : memref<29x8x128xf32, #tpu.memory_space<vmem>>, vector<1x8x128xf32>
    %1345 = vector.shape_cast %1344 : vector<1x8x128xf32> to vector<8x128xf32>
    %1346 = vector.shape_cast %1343 : vector<8x128xf32> to vector<1x8x128xf32>
    tpu.vector_store %arg12[%c9_519, %c0_520, %c0_521], %1346 {strides = array<i32>} : memref<29x8x128xf32, #tpu.memory_space<vmem>>, vector<1x8x128xf32>,
    %1347 = arith.select %211, %1342, %1340 : vector<8x128xi1>, vector<8x128xf32>
    %c19_522 = arith.constant 19 : index
    %c0_523 = arith.constant 0 : index
    %c0_524 = arith.constant 0 : index
    %1348 = vector.load %arg12[%c19_522, %c0_523, %c0_524] : memref<29x8x128xf32, #tpu.memory_space<vmem>>, vector<1x8x128xf32>
    %1349 = vector.shape_cast %1348 : vector<1x8x128xf32> to vector<8x128xf32>
    %1350 = vector.shape_cast %1347 : vector<8x128xf32> to vector<1x8x128xf32>
    tpu.vector_store %arg12[%c19_522, %c0_523, %c0_524], %1350 {strides = array<i32>} : memref<29x8x128xf32, #tpu.memory_space<vmem>>, vector<1x8x128xf32>,
    %c10_525 = arith.constant 10 : index
    %c0_526 = arith.constant 0 : index
    %c0_527 = arith.constant 0 : index
    %1351 = vector.load %arg12[%c10_525, %c0_526, %c0_527] : memref<29x8x128xf32, #tpu.memory_space<vmem>>, vector<1x8x128xf32>
    %1352 = vector.shape_cast %1351 : vector<1x8x128xf32> to vector<8x128xf32>
    %c18_528 = arith.constant 18 : index
    %c0_529 = arith.constant 0 : index
    %c0_530 = arith.constant 0 : index
    %1353 = vector.load %arg12[%c18_528, %c0_529, %c0_530] : memref<29x8x128xf32, #tpu.memory_space<vmem>>, vector<1x8x128xf32>
    %1354 = vector.shape_cast %1353 : vector<1x8x128xf32> to vector<8x128xf32>
    %1355 = arith.select %211, %1352, %1354 : vector<8x128xi1>, vector<8x128xf32>
    %c10_531 = arith.constant 10 : index
    %c0_532 = arith.constant 0 : index
    %c0_533 = arith.constant 0 : index
    %1356 = vector.load %arg12[%c10_531, %c0_532, %c0_533] : memref<29x8x128xf32, #tpu.memory_space<vmem>>, vector<1x8x128xf32>
    %1357 = vector.shape_cast %1356 : vector<1x8x128xf32> to vector<8x128xf32>
    %1358 = vector.shape_cast %1355 : vector<8x128xf32> to vector<1x8x128xf32>
    tpu.vector_store %arg12[%c10_531, %c0_532, %c0_533], %1358 {strides = array<i32>} : memref<29x8x128xf32, #tpu.memory_space<vmem>>, vector<1x8x128xf32>,
    %1359 = arith.select %211, %1354, %1352 : vector<8x128xi1>, vector<8x128xf32>
    %c18_534 = arith.constant 18 : index
    %c0_535 = arith.constant 0 : index
    %c0_536 = arith.constant 0 : index
    %1360 = vector.load %arg12[%c18_534, %c0_535, %c0_536] : memref<29x8x128xf32, #tpu.memory_space<vmem>>, vector<1x8x128xf32>
    %1361 = vector.shape_cast %1360 : vector<1x8x128xf32> to vector<8x128xf32>
    %1362 = vector.shape_cast %1359 : vector<8x128xf32> to vector<1x8x128xf32>
    tpu.vector_store %arg12[%c18_534, %c0_535, %c0_536], %1362 {strides = array<i32>} : memref<29x8x128xf32, #tpu.memory_space<vmem>>, vector<1x8x128xf32>,
    %c11_537 = arith.constant 11 : index
    %c0_538 = arith.constant 0 : index
    %c0_539 = arith.constant 0 : index
    %1363 = vector.load %arg12[%c11_537, %c0_538, %c0_539] : memref<29x8x128xf32, #tpu.memory_space<vmem>>, vector<1x8x128xf32>
    %1364 = vector.shape_cast %1363 : vector<1x8x128xf32> to vector<8x128xf32>
    %c17_540 = arith.constant 17 : index
    %c0_541 = arith.constant 0 : index
    %c0_542 = arith.constant 0 : index
    %1365 = vector.load %arg12[%c17_540, %c0_541, %c0_542] : memref<29x8x128xf32, #tpu.memory_space<vmem>>, vector<1x8x128xf32>
    %1366 = vector.shape_cast %1365 : vector<1x8x128xf32> to vector<8x128xf32>
    %1367 = arith.select %211, %1364, %1366 : vector<8x128xi1>, vector<8x128xf32>
    %c11_543 = arith.constant 11 : index
    %c0_544 = arith.constant 0 : index
    %c0_545 = arith.constant 0 : index
    %1368 = vector.load %arg12[%c11_543, %c0_544, %c0_545] : memref<29x8x128xf32, #tpu.memory_space<vmem>>, vector<1x8x128xf32>
    %1369 = vector.shape_cast %1368 : vector<1x8x128xf32> to vector<8x128xf32>
    %1370 = vector.shape_cast %1367 : vector<8x128xf32> to vector<1x8x128xf32>
    tpu.vector_store %arg12[%c11_543, %c0_544, %c0_545], %1370 {strides = array<i32>} : memref<29x8x128xf32, #tpu.memory_space<vmem>>, vector<1x8x128xf32>,
    %1371 = arith.select %211, %1366, %1364 : vector<8x128xi1>, vector<8x128xf32>
    %c17_546 = arith.constant 17 : index
    %c0_547 = arith.constant 0 : index
    %c0_548 = arith.constant 0 : index
    %1372 = vector.load %arg12[%c17_546, %c0_547, %c0_548] : memref<29x8x128xf32, #tpu.memory_space<vmem>>, vector<1x8x128xf32>
    %1373 = vector.shape_cast %1372 : vector<1x8x128xf32> to vector<8x128xf32>
    %1374 = vector.shape_cast %1371 : vector<8x128xf32> to vector<1x8x128xf32>
    tpu.vector_store %arg12[%c17_546, %c0_547, %c0_548], %1374 {strides = array<i32>} : memref<29x8x128xf32, #tpu.memory_space<vmem>>, vector<1x8x128xf32>,
    %c12_549 = arith.constant 12 : index
    %c0_550 = arith.constant 0 : index
    %c0_551 = arith.constant 0 : index
    %1375 = vector.load %arg12[%c12_549, %c0_550, %c0_551] : memref<29x8x128xf32, #tpu.memory_space<vmem>>, vector<1x8x128xf32>
    %1376 = vector.shape_cast %1375 : vector<1x8x128xf32> to vector<8x128xf32>
    %c16_552 = arith.constant 16 : index
    %c0_553 = arith.constant 0 : index
    %c0_554 = arith.constant 0 : index
    %1377 = vector.load %arg12[%c16_552, %c0_553, %c0_554] : memref<29x8x128xf32, #tpu.memory_space<vmem>>, vector<1x8x128xf32>
    %1378 = vector.shape_cast %1377 : vector<1x8x128xf32> to vector<8x128xf32>
    %1379 = arith.select %211, %1376, %1378 : vector<8x128xi1>, vector<8x128xf32>
    %c12_555 = arith.constant 12 : index
    %c0_556 = arith.constant 0 : index
    %c0_557 = arith.constant 0 : index
    %1380 = vector.load %arg12[%c12_555, %c0_556, %c0_557] : memref<29x8x128xf32, #tpu.memory_space<vmem>>, vector<1x8x128xf32>
    %1381 = vector.shape_cast %1380 : vector<1x8x128xf32> to vector<8x128xf32>
    %1382 = vector.shape_cast %1379 : vector<8x128xf32> to vector<1x8x128xf32>
    tpu.vector_store %arg12[%c12_555, %c0_556, %c0_557], %1382 {strides = array<i32>} : memref<29x8x128xf32, #tpu.memory_space<vmem>>, vector<1x8x128xf32>,
    %1383 = arith.select %211, %1378, %1376 : vector<8x128xi1>, vector<8x128xf32>
    %c16_558 = arith.constant 16 : index
    %c0_559 = arith.constant 0 : index
    %c0_560 = arith.constant 0 : index
    %1384 = vector.load %arg12[%c16_558, %c0_559, %c0_560] : memref<29x8x128xf32, #tpu.memory_space<vmem>>, vector<1x8x128xf32>
    %1385 = vector.shape_cast %1384 : vector<1x8x128xf32> to vector<8x128xf32>
    %1386 = vector.shape_cast %1383 : vector<8x128xf32> to vector<1x8x128xf32>
    tpu.vector_store %arg12[%c16_558, %c0_559, %c0_560], %1386 {strides = array<i32>} : memref<29x8x128xf32, #tpu.memory_space<vmem>>, vector<1x8x128xf32>,
    %c13_561 = arith.constant 13 : index
    %c0_562 = arith.constant 0 : index
    %c0_563 = arith.constant 0 : index
    %1387 = vector.load %arg12[%c13_561, %c0_562, %c0_563] : memref<29x8x128xf32, #tpu.memory_space<vmem>>, vector<1x8x128xf32>
    %1388 = vector.shape_cast %1387 : vector<1x8x128xf32> to vector<8x128xf32>
    %c15_564 = arith.constant 15 : index
    %c0_565 = arith.constant 0 : index
    %c0_566 = arith.constant 0 : index
    %1389 = vector.load %arg12[%c15_564, %c0_565, %c0_566] : memref<29x8x128xf32, #tpu.memory_space<vmem>>, vector<1x8x128xf32>
    %1390 = vector.shape_cast %1389 : vector<1x8x128xf32> to vector<8x128xf32>
    %1391 = arith.select %211, %1388, %1390 : vector<8x128xi1>, vector<8x128xf32>
    %c13_567 = arith.constant 13 : index
    %c0_568 = arith.constant 0 : index
    %c0_569 = arith.constant 0 : index
    %1392 = vector.load %arg12[%c13_567, %c0_568, %c0_569] : memref<29x8x128xf32, #tpu.memory_space<vmem>>, vector<1x8x128xf32>
    %1393 = vector.shape_cast %1392 : vector<1x8x128xf32> to vector<8x128xf32>
    %1394 = vector.shape_cast %1391 : vector<8x128xf32> to vector<1x8x128xf32>
    tpu.vector_store %arg12[%c13_567, %c0_568, %c0_569], %1394 {strides = array<i32>} : memref<29x8x128xf32, #tpu.memory_space<vmem>>, vector<1x8x128xf32>,
    %1395 = arith.select %211, %1390, %1388 : vector<8x128xi1>, vector<8x128xf32>
    %c15_570 = arith.constant 15 : index
    %c0_571 = arith.constant 0 : index
    %c0_572 = arith.constant 0 : index
    %1396 = vector.load %arg12[%c15_570, %c0_571, %c0_572] : memref<29x8x128xf32, #tpu.memory_space<vmem>>, vector<1x8x128xf32>
    %1397 = vector.shape_cast %1396 : vector<1x8x128xf32> to vector<8x128xf32>
    %1398 = vector.shape_cast %1395 : vector<8x128xf32> to vector<1x8x128xf32>
    tpu.vector_store %arg12[%c15_570, %c0_571, %c0_572], %1398 {strides = array<i32>} : memref<29x8x128xf32, #tpu.memory_space<vmem>>, vector<1x8x128xf32>,
    %c14_573 = arith.constant 14 : index
    %c0_574 = arith.constant 0 : index
    %c0_575 = arith.constant 0 : index
    %1399 = vector.load %arg12[%c14_573, %c0_574, %c0_575] : memref<29x8x128xf32, #tpu.memory_space<vmem>>, vector<1x8x128xf32>
    %1400 = vector.shape_cast %1399 : vector<1x8x128xf32> to vector<8x128xf32>
    %c14_576 = arith.constant 14 : index
    %c0_577 = arith.constant 0 : index
    %c0_578 = arith.constant 0 : index
    %1401 = vector.load %arg12[%c14_576, %c0_577, %c0_578] : memref<29x8x128xf32, #tpu.memory_space<vmem>>, vector<1x8x128xf32>
    %1402 = vector.shape_cast %1401 : vector<1x8x128xf32> to vector<8x128xf32>
    %1403 = arith.select %211, %1400, %1402 : vector<8x128xi1>, vector<8x128xf32>
    %c14_579 = arith.constant 14 : index
    %c0_580 = arith.constant 0 : index
    %c0_581 = arith.constant 0 : index
    %1404 = vector.load %arg12[%c14_579, %c0_580, %c0_581] : memref<29x8x128xf32, #tpu.memory_space<vmem>>, vector<1x8x128xf32>
    %1405 = vector.shape_cast %1404 : vector<1x8x128xf32> to vector<8x128xf32>
    %1406 = vector.shape_cast %1403 : vector<8x128xf32> to vector<1x8x128xf32>
    tpu.vector_store %arg12[%c14_579, %c0_580, %c0_581], %1406 {strides = array<i32>} : memref<29x8x128xf32, #tpu.memory_space<vmem>>, vector<1x8x128xf32>,
    %1407 = arith.select %211, %1402, %1400 : vector<8x128xi1>, vector<8x128xf32>
    %c14_582 = arith.constant 14 : index
    %c0_583 = arith.constant 0 : index
    %c0_584 = arith.constant 0 : index
    %1408 = vector.load %arg12[%c14_582, %c0_583, %c0_584] : memref<29x8x128xf32, #tpu.memory_space<vmem>>, vector<1x8x128xf32>
    %1409 = vector.shape_cast %1408 : vector<1x8x128xf32> to vector<8x128xf32>
    %1410 = vector.shape_cast %1407 : vector<8x128xf32> to vector<1x8x128xf32>
    tpu.vector_store %arg12[%c14_582, %c0_583, %c0_584], %1410 {strides = array<i32>} : memref<29x8x128xf32, #tpu.memory_space<vmem>>, vector<1x8x128xf32>,
    %c0_585 = arith.constant 0 : index
    %c0_586 = arith.constant 0 : index
    %c0_587 = arith.constant 0 : index
    %1411 = vector.load %arg12[%c0_585, %c0_586, %c0_587] : memref<29x8x128xf32, #tpu.memory_space<vmem>>, vector<29x8x128xf32>
    %1412 = vector.shape_cast %1411 : vector<29x8x128xf32> to vector<232x128xf32>
    %c0_588 = arith.constant 0 : index
    %c0_589 = arith.constant 0 : index
    %1413 = vector.load %arg7[%c0_588, %c0_589] : memref<128x128xf32, #tpu.memory_space<vmem>>, vector<128x128xf32>
    %cst_590 = arith.constant dense<0.000000e+00> : vector<232x128xf32>
    %1414 = tpu.matmul %1412, %1413, %cst_590 {dimension_numbers = #tpu.dot_dimension_numbers<[1], [0], [0], [1], [0, 0, 1, 1], [], []>} : vector<232x128xf32>, vector<128x128xf32>, vector<232x128xf32> -> vector<232x128xf32>
    %c0_591 = arith.constant 0 : index
    %c0_592 = arith.constant 0 : index
    %1415 = vector.load %arg8[%c0_591, %c0_592] : memref<1x128xf32, #tpu.memory_space<vmem>>, vector<1x128xf32>
    %1416 = vector.broadcast %1415 : vector<1x128xf32> to vector<232x128xf32>
    %1417 = arith.addf %1414, %1416 : vector<232x128xf32>
    %1418 = math.tanh %1417 : vector<232x128xf32>
    %c0_593 = arith.constant 0 : index
    %c0_594 = arith.constant 0 : index
    %1419 = vector.load %arg9[%c0_593, %c0_594] : memref<1x128xf32, #tpu.memory_space<vmem>>, vector<1x128xf32>
    %1420 = vector.broadcast %1419 : vector<1x128xf32> to vector<232x128xf32>
    %1421 = arith.mulf %1418, %1420 : vector<232x128xf32>
    %cst_595 = arith.constant dense<0.000000e+00> : vector<232xf32>
    %1422 = vector.multi_reduction <add>, %1421, %cst_595 [1] : vector<232x128xf32> to vector<232xf32>
    %1423 = vector.shape_cast %1422 : vector<232xf32> to vector<232x1xf32>
    %1424 = math.exp %1423 : vector<232x1xf32>
    %1425 = vector.broadcast %1424 : vector<232x1xf32> to vector<232x128xf32>
    %1426 = arith.mulf %1412, %1425 : vector<232x128xf32>
    %1427 = vector.shape_cast %1426 : vector<232x128xf32> to vector<29x8x128xf32>
    %cst_596 = arith.constant dense<0.000000e+00> : vector<8x128xf32>
    %1428 = vector.multi_reduction <add>, %1427, %cst_596 [0] : vector<29x8x128xf32> to vector<8x128xf32>
    %c0_597 = arith.constant 0 : index
    %c0_598 = arith.constant 0 : index
    %1429 = vector.load %arg10[%c0_597, %c0_598] : memref<8x128xf32, #tpu.memory_space<vmem>>, vector<8x128xf32>
    tpu.vector_store %arg10[%c0_597, %c0_598], %1428 {strides = array<i32>} : memref<8x128xf32, #tpu.memory_space<vmem>>, vector<8x128xf32>,
    return
  }
  func.func @transform_0(%arg0: i32) -> (i32, i32, i32) {
    %c0_i32 = arith.constant 0 : i32
    %c0_i32_0 = arith.constant 0 : i32
    %c0_i32_1 = arith.constant 0 : i32
    return %c0_i32, %arg0, %c0_i32_0 : i32, i32, i32
  }
  func.func @transform_1(%arg0: i32) -> (i32, i32) {
    %c0_i32 = arith.constant 0 : i32
    %c0_i32_0 = arith.constant 0 : i32
    %c0_i32_1 = arith.constant 0 : i32
    return %c0_i32, %c0_i32_0 : i32, i32
  }
  func.func @transform_2(%arg0: i32) -> (i32, i32) {
    %c0_i32 = arith.constant 0 : i32
    %c0_i32_0 = arith.constant 0 : i32
    %c0_i32_1 = arith.constant 0 : i32
    return %c0_i32, %c0_i32_0 : i32, i32
  }
  func.func @transform_3(%arg0: i32) -> (i32, i32) {
    %c0_i32 = arith.constant 0 : i32
    %c0_i32_0 = arith.constant 0 : i32
    %c0_i32_1 = arith.constant 0 : i32
    return %c0_i32, %c0_i32_0 : i32, i32
  }
  func.func @transform_4(%arg0: i32) -> (i32, i32) {
    %c0_i32 = arith.constant 0 : i32
    %c0_i32_0 = arith.constant 0 : i32
    %c0_i32_1 = arith.constant 0 : i32
    return %c0_i32, %c0_i32_0 : i32, i32
  }
  func.func @transform_5(%arg0: i32) -> (i32, i32) {
    %c0_i32 = arith.constant 0 : i32
    %c0_i32_0 = arith.constant 0 : i32
    return %arg0, %c0_i32 : i32, i32
  }
  func.func @transform_6(%arg0: i32) -> (i32, i32) {
    %c0_i32 = arith.constant 0 : i32
    %c0_i32_0 = arith.constant 0 : i32
    %c0_i32_1 = arith.constant 0 : i32
    return %c0_i32, %c0_i32_0 : i32, i32
  }
  func.func @transform_7(%arg0: i32) -> (i32, i32) {
    %c0_i32 = arith.constant 0 : i32
    %c0_i32_0 = arith.constant 0 : i32
    %c0_i32_1 = arith.constant 0 : i32
    return %c0_i32, %c0_i32_0 : i32, i32
  }
  func.func @transform_8(%arg0: i32) -> (i32, i32) {
    %c0_i32 = arith.constant 0 : i32
    %c0_i32_0 = arith.constant 0 : i32
    %c0_i32_1 = arith.constant 0 : i32
    return %c0_i32, %c0_i32_0 : i32, i32
  }
  func.func @transform_9(%arg0: i32) -> (i32, i32) {
    %c0_i32 = arith.constant 0 : i32
    %c0_i32_0 = arith.constant 0 : i32
    return %arg0, %c0_i32 : i32, i32
  }
}

</mosaic_0001>

<bundles_post_ra>
// kernel: tpu_custom_call.1
= control target key start
LH: loop header
LB: loop body
LE: loop exit
PB: predicated region body
PF: predicated region fallthrough
CT: control target
= control target key end

     0   :  { %s16323_s0 = inlined_call_operand.hbm [shape: f32[29,16,258], index: 0, kind: input, shape index: {}]   ;;  %s16324_s1 = inlined_call_operand.hbm [shape: f32[258,384], index: 1, kind: input, shape index: {}]   ;;  %s16325_s2 = inlined_call_operand.hbm [shape: f32[1,384], index: 2, kind: input, shape index: {}]   ;;  %s16326_s3 = inlined_call_operand.hbm [shape: f32[128,384], index: 3, kind: input, shape index: {}]   ;;  %s16327_s4 = inlined_call_operand.hbm [shape: f32[1,128], index: 4, kind: input, shape index: {}]   ;;  %s16328_s5 = inlined_call_operand.hbm [shape: f32[16,128], index: 5, kind: input, shape index: {}]   ;;  %s16329_s6 = inlined_call_operand.hbm [shape: f32[128,128], index: 6, kind: input, shape index: {}]   ;;  %s16330_s7 = inlined_call_operand.hbm [shape: f32[1,128], index: 7, kind: input, shape index: {}]   ;;  %s16331_s8 = inlined_call_operand.hbm [shape: f32[1,128], index: 8, kind: input, shape index: {}]   ;;  %s16332_s9 = inlined_call_operand.hbm [shape: f32[16,128], index: 9, kind: output, shape index: {}]  }
   0x1   :  { %16521 = sst [smem:[#allocation127_spill]] %s16323_s0 }
   0x2   :  { %16522 = sst [smem:[#allocation128_spill]] %s16324_s1 }
   0x3   :  { %16523 = sst [smem:[#allocation129_spill]] %s16325_s2 }
   0x4   :  { %16524 = sst [smem:[#allocation130_spill]] %s16326_s3 }
   0x5   :  { %16525 = sst [smem:[#allocation131_spill]] %s16327_s4 }
   0x6   :  { %16526 = sst [smem:[#allocation132_spill]] %s16329_s6 }
   0x7   :  { %16527 = sst [smem:[#allocation133_spill]] %s16330_s7 }
   0x8   :  { %16528 = sst [smem:[#allocation134_spill]] %s16332_s9 }
   0x9   :  { %14 = vsyncpa [#allocation5], 0 }
   0xa   :  { %16 = vsyncpa [#allocation5 + $0x1], 0 }
   0xb   :  { %17 = vsyncpa [#allocation8], 0 }
   0xc   :  { %18 = vsyncpa [#allocation11], 0 }
   0xd   :  { %19 = vsyncpa [#allocation14], 0 }
   0xe   :  { %21 = vsyncpa [#allocation14 + $0x1], 0 }
   0xf   :  { %22 = vsyncpa [#allocation17], 0 }
  0x10   :  { %23 = vsyncpa [#allocation6], 0 }
  0x11   :  { %25 = vsyncpa [#allocation6 + $0x1], 0  ;;  %s12653_s30 = smov 0   ;;  %s12655_s10 = smov 0  }
  0x12   :  { %s12657_s11 = smov 0   ;;  %s12659_s12 = smov 0  }
  0x13 LB: > { %s12585_s13 = smov [#allocation7]   ;;  %s12674_s15 = sadd.s32 4294967295, %s12583_s12   ;;  %s12583_s12 = sphi %s12659_s12, %s16921_s12   ;;  %s12579_s11 = sphi %s12657_s11, %s16920_s11   ;;  %s12575_s10 = sphi %s12655_s10, %s16919_s10   ;;  %s12571_s30 = sphi %s12653_s30, %s16918_s30  }
  0x14   : > { %s273_s14 = sshll.u32 %s12585_s13, 4  ;;  %p7789_p0 = scmp.ge.s32.totalorder %s12583_s12, 1  ;;  %s12679_s14 = int_to_ptr.vmem [resolvable:$true] %s273_s14 }
  0x15   : > { %p16336_p1 = scmp.eq.s32.totalorder %s12674_s15, 0  ;;  %p261_p2 = scmp.lt.s32.totalorder %s12583_s12, 3 }
  0x16   : > { %s12586_s17 = smov [#allocation10]   ;;  %s12587_s20 = smov [#allocation15]  }
  0x17   : > { %p12681_p3 = pnand %p7789_p0, %p261_p2  ;;  %s297_s18 = sshll.u32 %s12586_s17, 4  ;;  %s12694_s18 = int_to_ptr.vmem [resolvable:$true] %s297_s18 }
  0x18   : > { %s321_s21 = sshll.u32 %s12587_s20, 4  ;;  %s16531_s1 = sld [smem:[#allocation128_spill]]  ;;  %s12696_s21 = int_to_ptr.vmem [resolvable:$true] %s321_s21 }
  0x19   : > { %s16529_s16 = scalar_select %p12681_p3, 1, 0 }
  0x1a   : > { %p11727_p5 = pneg %p12681_p3 }
  0x1c   : > { %p12690_p6 = pnand %p11727_p5, %p16336_p1 }
  0x1e   : > { %s12241_s24 = scalar_lea.hbm %s16531_s1, 12672  ;;  %p12706_p8 = pneg %p12690_p6 }
  0x1f   : > { %p12242_p7 = scmp.ne.s32.totalorder %s16531_s1, %s12241_s24  ;;  %p12248_p11 = scmp.lt.u32.totalorder %s12241_s24, %s16531_s1 }
  0x21   : > { %p12244_p9 = pnand %p12706_p8, %p12242_p7 }
  0x23   : > { %p12245_p10 = pneg %p12244_p9 }
  0x25   : > { %p12250_p12 = pnand %p12248_p11, %p12245_p10 }
  0x27   : > { %12253 = shalt.err (!%p12250_p12)
}
  0x28   : > { %s12254_s13 = scalar_lea.vmem %s12679_s14, 12672  ;;  %p12262_p5 = scmp.lt.s32.totalorder %s12679_s14, %s12679_s14 }
  0x29   : > { %p12255_p13 = scmp.ne.s32.totalorder %s12679_s14, %s12254_s13  ;;  %p12263_p4 = scmp.lt.s32.totalorder %s12254_s13, %s12254_s13 }
  0x2b   : > { %p12257_p0 = pnand %p12255_p13, %p12706_p8  ;;  %p12264_p7 = por %p12263_p4, %p12262_p5 }
  0x2d   : > { %p12258_p2 = pneg %p12257_p0 }
  0x2f   : > { %p12265_p9 = pnand %p12264_p7, %p12258_p2 }
  0x31   : > { %12268 = shalt.err (!%p12265_p9)
}
  0x32   : > { %s16334_s17 = smov 384   ;;  %s16335_s20 = smov 24  }
  0x33   : > { %11730 = dma.hbm_to_vmem [thread:$0]  (!%p12690_p6), %s16531_s1, 12672, %s12679_s14, [#allocation8], %s16334_s17, %s16334_s17, %s16335_s20  }
  0x34   : > { %s16533_s3 = sld [smem:[#allocation130_spill]] }
  0x3a   : > { %s12269_s26 = scalar_lea.hbm %s16533_s3, 6144 }
  0x3b   : > { %p12270_p4 = scmp.ne.s32.totalorder %s16533_s3, %s12269_s26  ;;  %p12276_p12 = scmp.lt.u32.totalorder %s12269_s26, %s16533_s3 }
  0x3d   : > { %p12272_p10 = pnand %p12270_p4, %p12706_p8 }
  0x3f   : > { %p12273_p11 = pneg %p12272_p10 }
  0x41   : > { %p12278_p13 = pnand %p12276_p12, %p12273_p11 }
  0x43   : > { %12281 = shalt.err (!%p12278_p13)
}
  0x44   : > { %s12282_s14 = scalar_lea.vmem %s12694_s18, 6144  ;;  %p12290_p7 = scmp.lt.s32.totalorder %s12694_s18, %s12694_s18 }
  0x45   : > { %p12283_p0 = scmp.ne.s32.totalorder %s12694_s18, %s12282_s14  ;;  %p12291_p9 = scmp.lt.s32.totalorder %s12282_s14, %s12282_s14 }
  0x47   : > { %p12285_p2 = pnand %p12283_p0, %p12706_p8  ;;  %p12292_p4 = por %p12291_p9, %p12290_p7 }
  0x49   : > { %p12286_p5 = pneg %p12285_p2 }
  0x4b   : > { %p12293_p10 = pnand %p12292_p4, %p12286_p5 }
  0x4d   : > { %12296 = shalt.err (!%p12293_p10)
}
  0x4e   : > { %11736 = dma.hbm_to_vmem [thread:$0]  (!%p12690_p6), %s16533_s3, 6144, %s12694_s18, [#allocation11], %s16334_s17, %s16334_s17, %s16335_s20  }
  0x4f   : > { %s16534_s6 = sld [smem:[#allocation132_spill]] }
  0x55   : > { %s12297_s25 = scalar_lea.hbm %s16534_s6, 2048 }
  0x56   : > { %p12298_p11 = scmp.ne.s32.totalorder %s16534_s6, %s12297_s25  ;;  %p12304_p0 = scmp.lt.u32.totalorder %s12297_s25, %s16534_s6 }
  0x58   : > { %p12300_p12 = pnand %p12298_p11, %p12706_p8 }
  0x5a   : > { %p12301_p13 = pneg %p12300_p12 }
  0x5c   : > { %p12306_p2 = pnand %p12304_p0, %p12301_p13 }
  0x5e   : > { %12309 = shalt.err (!%p12306_p2)
}
  0x5f   : > { %s12310_s18 = scalar_lea.vmem %s12696_s21, 2048  ;;  %p12318_p4 = scmp.lt.s32.totalorder %s12696_s21, %s12696_s21 }
  0x60   : > { %p12311_p5 = scmp.ne.s32.totalorder %s12696_s21, %s12310_s18  ;;  %p12319_p10 = scmp.lt.s32.totalorder %s12310_s18, %s12310_s18 }
  0x62   : > { %p12313_p7 = pnand %p12311_p5, %p12706_p8  ;;  %p12320_p11 = por %p12319_p10, %p12318_p4 }
  0x64   : > { %p12314_p9 = pneg %p12313_p7 }
  0x66   : > { %p12321_p12 = pnand %p12320_p11, %p12314_p9 }
  0x68   : > { %12324 = shalt.err (!%p12321_p12)
}
  0x69   : > { %s12590_s14 = smov 128   ;;  %s12591_s9 = smov 8  }
  0x6a   : > { %11742 = dma.hbm_to_vmem [thread:$0]  (!%p12690_p6), %s16534_s6, 2048, %s12696_s21, [#allocation14], %s12590_s14, %s12590_s14, %s12591_s9  }
  0x6b   : > { %s12592_s24 = smov [#allocation16]   ;;  %s12593_s26 = smov [#allocation9]  }
  0x6c   : > { %s335_s25 = sshll.u32 %s12592_s24, 4  ;;  %s287_s28 = sshll.u32 %s12593_s26, 4  ;;  %s336_s25 = int_to_ptr.vmem [resolvable:$true] %s335_s25  ;;  %s288_s28 = int_to_ptr.vmem [resolvable:$true] %s287_s28 }
  0x6d   : > { %s16535_s7 = sld [smem:[#allocation133_spill]] }
  0x73   : > { %s12325_s18 = scalar_lea.hbm %s16535_s7, 16 }
  0x74   : > { %p12326_p13 = scmp.ne.s32.totalorder %s16535_s7, %s12325_s18  ;;  %p12332_p5 = scmp.lt.u32.totalorder %s12325_s18, %s16535_s7 }
  0x76   : > { %p12328_p0 = pnand %p12326_p13, %p12706_p8 }
  0x78   : > { %p12329_p2 = pneg %p12328_p0 }
  0x7a   : > { %p12334_p7 = pnand %p12332_p5, %p12329_p2 }
  0x7c   : > { %12337 = shalt.err (!%p12334_p7)
}
  0x7d   : > { %s12338_s21 = scalar_lea.vmem %s336_s25, 16  ;;  %s12345_s14 = scalar_lea.vmem %s336_s25, 32 }
  0x7e   : > { %p12339_p9 = scmp.ne.s32.totalorder %s336_s25, %s12338_s21  ;;  %p12346_p11 = scmp.lt.s32.totalorder %s336_s25, %s336_s25 }
  0x7f   : > { %p12347_p12 = scmp.lt.s32.totalorder %s12345_s14, %s12338_s21 }
  0x80   : > { %p12341_p4 = pnand %p12339_p9, %p12706_p8 }
  0x81   : > { %p12348_p1 = por %p12347_p12, %p12346_p11 }
  0x82   : > { %p12342_p10 = pneg %p12341_p4 }
  0x84   : > { %p12349_p3 = pnand %p12348_p1, %p12342_p10 }
  0x86   : > { %12352 = shalt.err (!%p12349_p3)
}
  0x87   : > { %11745 = dma.hbm_to_vmem [thread:$0]  (!%p12690_p6), %s16535_s7, 16, %s336_s25, [#allocation17]  }
  0x88   : > { %s16536_s2 = sld [smem:[#allocation129_spill]] }
  0x8e   : > { %s12353_s9 = scalar_lea.hbm %s16536_s2, 48 }
  0x8f   : > { %p12354_p13 = scmp.ne.s32.totalorder %s16536_s2, %s12353_s9  ;;  %p12360_p3 = scmp.lt.u32.totalorder %s12353_s9, %s16536_s2 }
  0x91   : > { %p12356_p0 = pnand %p12354_p13, %p12706_p8 }
  0x93   : > { %p12357_p1 = pneg %p12356_p0 }
  0x95   : > { %p12362_p2 = pnand %p12360_p3, %p12357_p1 }
  0x97   : > { %12365 = shalt.err (!%p12362_p2)
}
  0x98   : > { %s12366_s29 = scalar_lea.vmem %s288_s28, 48  ;;  %s12373_s25 = scalar_lea.vmem %s288_s28, 64 }
  0x99   : > { %p12367_p5 = scmp.ne.s32.totalorder %s288_s28, %s12366_s29  ;;  %p12374_p4 = scmp.lt.s32.totalorder %s288_s28, %s288_s28 }
  0x9a   : > { %p12375_p10 = scmp.lt.s32.totalorder %s12373_s25, %s12366_s29 }
  0x9b   : > { %p12369_p7 = pnand %p12367_p5, %p12706_p8 }
  0x9c   : > { %p12376_p11 = por %p12375_p10, %p12374_p4 }
  0x9d   : > { %p12370_p9 = pneg %p12369_p7 }
  0x9f   : > { %p12377_p12 = pnand %p12376_p11, %p12370_p9 }
  0xa1   : > { %12380 = shalt.err (!%p12377_p12)
}
  0xa2   : > { %11733 = dma.hbm_to_vmem [thread:$0]  (!%p12690_p6), %s16536_s2, 48, %s288_s28, [#allocation8]  }
  0xa3   : > { %s12594_s21 = smov [#allocation12]   ;;  %s12595_s17 = smov [#allocation18]  }
  0xa4   : > { %s311_s14 = sshll.u32 %s12594_s21, 4  ;;  %s346_s20 = sshll.u32 %s12595_s17, 4  ;;  %s312_s14 = int_to_ptr.vmem [resolvable:$true] %s311_s14  ;;  %s347_s20 = int_to_ptr.vmem [resolvable:$true] %s346_s20 }
  0xa5   : > { %s16537_s4 = sld [smem:[#allocation131_spill]] }
  0xab   : > { %s12381_s9 = scalar_lea.hbm %s16537_s4, 16 }
  0xac   : > { %p12382_p13 = scmp.ne.s32.totalorder %s16537_s4, %s12381_s9  ;;  %p12388_p3 = scmp.lt.u32.totalorder %s12381_s9, %s16537_s4 }
  0xae   : > { %p12384_p0 = pnand %p12382_p13, %p12706_p8 }
  0xb0   : > { %p12385_p1 = pneg %p12384_p0 }
  0xb2   : > { %p12390_p2 = pnand %p12388_p3, %p12385_p1 }
  0xb4   : > { %12393 = shalt.err (!%p12390_p2)
}
  0xb5   : > { %s12394_s28 = scalar_lea.vmem %s312_s14, 16  ;;  %s12401_s29 = scalar_lea.vmem %s312_s14, 32 }
  0xb6   : > { %p12395_p5 = scmp.ne.s32.totalorder %s312_s14, %s12394_s28  ;;  %p12402_p4 = scmp.lt.s32.totalorder %s312_s14, %s312_s14 }
  0xb7   : > { %p12403_p10 = scmp.lt.s32.totalorder %s12401_s29, %s12394_s28 }
  0xb8   : > { %p12397_p7 = pnand %p12395_p5, %p12706_p8 }
  0xb9   : > { %p12404_p11 = por %p12403_p10, %p12402_p4 }
  0xba   : > { %p12398_p9 = pneg %p12397_p7 }
  0xbc   : > { %p12405_p12 = pnand %p12404_p11, %p12398_p9 }
  0xbe   : > { %12408 = shalt.err (!%p12405_p12)
}
  0xbf   : > { %11739 = dma.hbm_to_vmem [thread:$0]  (!%p12690_p6), %s16537_s4, 16, %s312_s14, [#allocation11]  }
  0xc0   : > { %s12409_s17 = scalar_lea.hbm %s16331_s8, 16 }
  0xc1   : > { %p12410_p13 = scmp.ne.s32.totalorder %s16331_s8, %s12409_s17  ;;  %p12416_p3 = scmp.lt.u32.totalorder %s12409_s17, %s16331_s8 }
  0xc3   : > { %p12412_p0 = pnand %p12410_p13, %p12706_p8 }
  0xc5   : > { %p12413_p1 = pneg %p12412_p0 }
  0xc7   : > { %p12418_p2 = pnand %p12416_p3, %p12413_p1 }
  0xc9   : > { %12421 = shalt.err (!%p12418_p2)
}
  0xca   : > { %s12422_s23 = scalar_lea.vmem %s347_s20, 16  ;;  %s12429_s14 = scalar_lea.vmem %s347_s20, 32 }
  0xcb   : > { %p12423_p5 = scmp.ne.s32.totalorder %s347_s20, %s12422_s23  ;;  %p12430_p4 = scmp.lt.s32.totalorder %s347_s20, %s347_s20 }
  0xcc   : > { %p12431_p10 = scmp.lt.s32.totalorder %s12429_s14, %s12422_s23 }
  0xcd   : > { %p12425_p7 = pnand %p12423_p5, %p12706_p8 }
  0xce   : > { %p12432_p11 = por %p12431_p10, %p12430_p4 }
  0xcf   : > { %p12426_p9 = pneg %p12425_p7 }
  0xd1   : > { %p12433_p12 = pnand %p12432_p11, %p12426_p9 }
  0xd3   : > { %12436 = shalt.err (!%p12433_p12)
}
  0xd4   : > { %11748 = dma.hbm_to_vmem [thread:$0]  (!%p12690_p6), %s16331_s8, 16, %s347_s20, [#allocation17]  }
  0xd5   : > { %s7788_s27 = sadd.s32 4294967294, %s12583_s12   ;;  %s12853_s19 = sadd.s32 1, %s12583_s12  }
  0xd6   : > { %s38_s28 = sadd.s32 1, %s12579_s11  ;;  %s35_s29 = ssub.s32 %s12583_s12, %s12853_s19 }
  0xd7   : > { %p45_p8 = scmp.ne.s32.totalorder %s12579_s11, %s12575_s10  ;;  %p36_p13 = scmp.eq.s32.totalorder %s35_s29, 0 }
  0xd8   : > { %p46_p0 = scmp.eq.s32.totalorder %s12583_s12, 0  ;;  %p51_p1 = scmp.ne.s32.totalorder %s12575_s10, %s12571_s30 }
  0xd9   : > { %p248_p3 = scmp.eq.s32.totalorder %s12674_s15, 1  ;;  %p16538_p5 = scmp.eq.s32.totalorder %s12674_s15, 0 }
  0xda   : > { %s12865_s25 = scalar_select %p36_p13, %s12579_s11, %s38_s28  }
  0xdb   : > { %p47_p2 = por %p46_p0, %p45_p8  ;;  %p12869_p7 = por %p16538_p5, %p51_p1 }
  0xdc   : > { %p12873_p6 = por %p248_p3, %p45_p8  ;;  %p254_p9 = scmp.eq.s32.totalorder %s7788_s27, 1 }
  0xdd   : > { %s16539_s20 = scalar_select %p12869_p7, 1, 0 }
  0xde   : > { %s16540_s13 = scalar_select %p12873_p6, 1, 0 }
  0xdf   : > { %p11767_p4 = scmp.lt.s32.totalorder %s12583_s12, 2  ;;  %s12879_s18 = sand.u32 1, %s12579_s11  }
  0xe0   : > { %p12881_p10 = por %p254_p9, %p51_p1  ;;  %s11690_s17 = smul.u32 696, %s12879_s18 }
  0xe1   : > { %p12886_p11 = pnand %p11767_p4, %p47_p2  ;;  %s11691_s3 = smul.u32 384, %s12583_s12 }
  0xe2   : > { %s16541_s21 = scalar_select %p12881_p10, 1, 0 }
  0xe3   : > { %s16543_s0 = sld [smem:[#allocation127_spill]]  ;;  %s361_s14 = scalar_lea.vmem [#allocation4], %s11690_s17 }
  0xe4   : > { %s368_s24 = sshll.u32 %s361_s14, 4  ;;  %s358_s27 = scalar_lea.sflag [#allocation5], %s12879_s18  ;;  %s12896_s24 = int_to_ptr.vmem [resolvable:$true] %s368_s24 }
  0xe5   : > { %p12439_p8 = pneg %p12886_p11 }
  0xe9   : > { %s12894_s23 = scalar_lea.hbm %s16543_s0, %s11691_s3  ;;  %s12442_s9 = scalar_lea.hbm %s16543_s0, 22272 }
  0xea   : > { %s12437_s28 = scalar_lea.hbm %s12894_s23, 11136  ;;  %p12443_p1 = scmp.lt.u32.totalorder %s12894_s23, %s16543_s0 }
  0xeb   : > { %p12438_p12 = scmp.ne.s32.totalorder %s12894_s23, %s12437_s28  ;;  %p12444_p3 = scmp.lt.u32.totalorder %s12442_s9, %s12437_s28 }
  0xec   : > { %p12446_p5 = scmp.lt.u32.totalorder %s12437_s28, %s12894_s23 }
  0xed   : > { %p12440_p13 = pnand %p12439_p8, %p12438_p12  ;;  %p12445_p2 = por %p12444_p3, %p12443_p1 }
  0xef   : > { %p12441_p0 = pneg %p12440_p13  ;;  %p12447_p9 = por %p12446_p5, %p12445_p2 }
  0xf1   : > { %p12448_p4 = pnand %p12447_p9, %p12441_p0 }
  0xf3   : > { %12451 = shalt.err (!%p12448_p4)
}
  0xf4   : > { %s12452_s17 = scalar_lea.vmem %s12896_s24, 11136  ;;  %s12596_s14 = smov [#allocation4]  }
  0xf5   : > { %p12453_p12 = scmp.ne.s32.totalorder %s12896_s24, %s12452_s17  ;;  %s12457_s29 = sshll.u32 %s12596_s14, 4  ;;  %s12458_s29 = int_to_ptr.vmem [resolvable:$false] %s12457_s29 }
  0xf6   : > { %s12459_s2 = scalar_lea.vmem %s12458_s29, 22272  ;;  %p12460_p6 = scmp.lt.s32.totalorder %s12896_s24, %s12458_s29 }
  0xf7   : > { %p12455_p13 = pnand %p12453_p12, %p12439_p8  ;;  %p12461_p1 = scmp.lt.s32.totalorder %s12459_s2, %s12452_s17 }
  0xf9   : > { %p12456_p10 = pneg %p12455_p13  ;;  %p12462_p3 = por %p12461_p1, %p12460_p6 }
  0xfb   : > { %p12463_p2 = pnand %p12462_p3, %p12456_p10 }
  0xfd   : > { %12466 = shalt.err (!%p12463_p2)
}
  0xfe   : > { %s12597_s28 = smov 768   ;;  %s16544_s3 = smov 24  }
  0xff   : > { %s16545_s9 = smov 384   ;;  %s7799_s22 = sshll.u32 %s12879_s18, 3 }
 0x100   : > { %11752 = dma.hbm_to_vmem [thread:$0]  (!%p12886_p11), %s12894_s23, 11136, %s12896_s24, %s358_s27, %s12597_s28, %s16545_s9, %s16544_s3  }
 0x101   : > { %s7800_s14 = sshll.u32 %s12583_s12, 7  ;;  %s382_s26 = scalar_lea.vmem [#allocation13], %s7799_s22 }
 0x102   : > { %s12934_s2 = scalar_lea.hbm %s16328_s5, %s7800_s14  ;;  %s389_s0 = sshll.u32 %s382_s26, 4  ;;  %s390_s0 = int_to_ptr.vmem [resolvable:$true] %s389_s0 }
 0x103   : > { %s16546_s4 = sand.u32 1, %s12583_s12   ;;  %s12467_s7 = scalar_lea.hbm %s12934_s2, 128 }
 0x104   : > { %s379_s6 = scalar_lea.sflag [#allocation14], %s16546_s4  ;;  %p12468_p6 = scmp.ne.s32.totalorder %s12934_s2, %s12467_s7 }
 0x105   : > { %s12472_s24 = scalar_lea.hbm %s16328_s5, 256  ;;  %p12473_p5 = scmp.lt.u32.totalorder %s12934_s2, %s16328_s5 }
 0x106   : > { %p12470_p10 = pnand %p12468_p6, %p12439_p8  ;;  %p12474_p9 = scmp.lt.u32.totalorder %s12472_s24, %s12467_s7 }
 0x107   : > { %p12476_p12 = scmp.lt.u32.totalorder %s12467_s7, %s12934_s2 }
 0x108   : > { %p12471_p0 = pneg %p12470_p10  ;;  %p12475_p4 = por %p12474_p9, %p12473_p5 }
 0x10a   : > { %p12477_p13 = por %p12476_p12, %p12475_p4 }
 0x10c   : > { %p12478_p1 = pnand %p12477_p13, %p12471_p0 }
 0x10e   : > { %12481 = shalt.err (!%p12478_p1)
}
 0x10f   : > { %s12482_s4 = scalar_lea.vmem %s390_s0, 128  ;;  %s12598_s26 = smov [#allocation13]  }
 0x110   : > { %p12483_p3 = scmp.ne.s32.totalorder %s390_s0, %s12482_s4  ;;  %s12487_s3 = sshll.u32 %s12598_s26, 4  ;;  %s12488_s3 = int_to_ptr.vmem [resolvable:$false] %s12487_s3 }
 0x111   : > { %s12489_s9 = scalar_lea.vmem %s12488_s3, 256  ;;  %p12490_p10 = scmp.lt.s32.totalorder %s390_s0, %s12488_s3 }
 0x112   : > { %p12485_p2 = pnand %p12483_p3, %p12439_p8  ;;  %p12491_p7 = scmp.lt.s32.totalorder %s12489_s9, %s12482_s4 }
 0x114   : > { %p12486_p6 = pneg %p12485_p2  ;;  %p12492_p5 = por %p12491_p7, %p12490_p10 }
 0x116   : > { %p12493_p9 = pnand %p12492_p5, %p12486_p6 }
 0x118   : > { %12496 = shalt.err (!%p12493_p9)
}
 0x119   : > { %11755 = dma.hbm_to_vmem [thread:$0]  (!%p12886_p11), %s12934_s2, 128, %s390_s0, %s379_s6  }
 0x11a   : > { %p16547_p0 = scmp.ne.s32.totalorder %s16529_s16, 0 }
 0x11c   : > { %398 = sbr.rel (%p16547_p0) target bundleno = 8662 (0x21d6), region = 56 }
 0x123   : > { %s12960_s7 = sand.u32 1, %s12575_s10   ;;  %p16548_p7 = scmp.ne.s32.totalorder %s16539_s20, 0 }
 0x124   : > { %s11692_s22 = smul.u32 696, %s12960_s7  ;;  %s401_s14 = scalar_lea.sflag [#allocation5], %s12960_s7 }
 0x126   : > { %s12964_s17 = scalar_lea.vmem [#allocation4], %s11692_s22 }
 0x127   : > { %12542 = dma.done.wait (%p16548_p7), %s401_s14, 11136  }
 0x128   : > { %12544 = vsyncadd (%p16548_p7), %s401_s14, 4294956160  ;;  %p16549_p11 = scmp.eq.s32.totalorder %s12674_s15, 0 }
 0x12a   : > { %12546 = dma.done.wait (%p16549_p11), [#allocation8], 12720   ;;  %p16550_p8 = pmov %p16549_p11 }
 0x12c   : > { %12548 = vsyncadd (%p16550_p8), [#allocation8], 4294954576  ;;  %p16551_p4 = pmov %p16550_p8 }
 0x12e   : > { %12550 = dma.done.wait (%p16551_p4), [#allocation11], 6160   ;;  %p16552_p12 = pmov %p16551_p4 }
 0x12f   : > { %s425_s0 = sand.u32 1, %s12674_s15   ;;  %s7806_s6 = sshll.u32 %s12960_s7, 3 }
 0x130   : > { %12552 = vsyncadd (%p16552_p12), [#allocation11], 4294961136  ;;  %s426_s16 = scalar_lea.sflag [#allocation14], %s425_s0  ;;  %s12982_s1 = scalar_lea.vmem [#allocation13], %s7806_s6 }
 0x131   : > { %12554 = dma.done.wait (%p16548_p7), %s426_s16, 128  }
 0x132   : > { %12556 = vsyncadd (%p16548_p7), %s426_s16, 4294967168  ;;  %p16553_p13 = pmov %p16551_p4 }
 0x133   : > { %p16554_p1 = pmov %p16551_p4 }
 0x134   : > { %12558 = dma.done.wait (%p16553_p13), [#allocation14], 2048  }
 0x135   : > { %12560 = vsyncadd (%p16554_p1), [#allocation14], 4294965248  ;;  %p16555_p3 = pmov %p16554_p1 }
 0x136   : > { %p16556_p2 = pmov %p16554_p1 }
 0x137   : > { %12562 = dma.done.wait (%p16555_p3), [#allocation17], 32  }
 0x138   : > { %12564 = vsyncadd (%p16556_p2), [#allocation17], 4294967264  ;;  %v16343_v0 = vmov 0.0   ;;  %vm773_vm0 = vcmask 1041408   ;;  %vm685_vm1 = vcmask 15360   ;;  %v570_v3 = vld [vmem:[#allocation7 + $0x8] sm:$0xff] }
 0x139   : > { %1086 = vmatprep.mubr.f32.mxu1 %v16343_v0  ;;  %v666_v1 = vld [vmem:[#allocation7 + $0x308] sm:$0x3]  ;;  %v665_v2 = vld [vmem:[#allocation7 + $0x300] sm:$0x3]  ;;  %v572_v8 = vld [vmem:[#allocation7 + $0x18] sm:$0xff]  ;;  %v16340_v11 = vmov 0.0|0.0  }
 0x13a   : > { %7811 = vmatprep.subr.msk.mxu1 %vm773_vm0, %v666_v1  ;;  %v573_v4 = vld [vmem:[#allocation7 + $0x20] sm:$0xff]  ;;  %v571_v9 = vld [vmem:[#allocation7 + $0x10] sm:$0xff]  ;;  %v574_v10 = vld [vmem:[#allocation7 + $0x28] sm:$0xff]  ;;  %vm12601_vm2 = vmmov 0   ;;  %s7934_s20 = sshll.u32 %s12674_s15, 7  ;;  %s480_s29 = scalar_lea.vmem [#allocation19], %s7806_s6 }
 0x13b   : > { %v483_v5 = vld [vmem:[%s12964_s17 + $0x10] sm:$0xff]  ;;  %7812 = vmatpush1.msk.msra.mxu1 %vm773_vm0, %v665_v2  ;;  %v9728_v7 = vpack.c.bf16 %v573_v4, %v570_v3  ;;  %v9793_v13 = vpack.c.bf16 %v574_v10, %v571_v9  ;;  %v579_v15 = vld [vmem:[#allocation7 + $0x50] sm:$0xff]  ;;  %v578_v19 = vld [vmem:[#allocation7 + $0x48] sm:$0xff]  ;;  %s7629_s2 = sshll.u32 %s480_s29, 4  ;;  %s16914_s24 = sld [smem:[#allocation134_spill]]  ;;  %s16281_s2 = int_to_ptr.vmem [resolvable:$true] %s7629_s2 }
 0x13c   : > { %v569_v6 = vld [vmem:[#allocation7] sm:$0xff]  ;;  %7813 = vmatmul.mubr.msk.f32.vlgmr.msra.gmra.mrb[0].mxu1 %vm685_vm1, %v483_v5  ;;  %9792 = vmatprep.subr.bf16.mxu1 %v16340_v11  ;;  %v576_v14 = vld [vmem:[#allocation7 + $0x38] sm:$0xff]  ;;  %v575_v18 = vld [vmem:[#allocation7 + $0x30] sm:$0xff]  ;;  %s7616_s28 = scalar_lea.sflag [#allocation6], %s12960_s7  ;;  %s12497_s15 = scalar_lea.vmem %s16281_s2, 128 }
 0x13d   : > { %v9730_v12 = vpack.c.bf16 %v572_v8, %v569_v6  ;;  %v486_v16 = vld [vmem:[%s12964_s17 + $0x28] sm:$0xff]  ;;  %9729 = vmatprep.subr.bf16.mxu0 %v9728_v7  ;;  %1092 = vmatprep.mubr.f32.mxu1 %v16343_v0  ;;  %v9732_v17 = vpack.c.bf16 %v579_v15, %v576_v14  ;;  %v582_v20 = vld [vmem:[#allocation7 + $0x68] sm:$0xff]  ;;  %v9734_v21 = vpack.c.bf16 %v578_v19, %v575_v18  ;;  %v585_v22 = vld [vmem:[#allocation7 + $0x80] sm:$0xff]  ;;  %p12498_p6 = scmp.ne.s32.totalorder %s16281_s2, %s12497_s15  ;;  %p16915_p10 = scmp.ne.s32.totalorder %s16540_s13, 0 }
 0x13e   : > { %9794 = vmatpush1.bf16.msra.mxu1 %v9793_v13  ;;  %v581_v23 = vld [vmem:[#allocation7 + $0x60] sm:$0xff]  ;;  %v9736_v24 = vpack.c.bf16 %v585_v22, %v582_v20  ;;  %v584_v25 = vld [vmem:[#allocation7 + $0x78] sm:$0xff]  ;;  %v591_v30 = vld [vmem:[#allocation7 + $0xb0] sm:$0xff]  ;;  %s12602_s4 = smov [#allocation19]  }
 0x13f   : > { %9731 = vmatpush1.bf16.msra.mxu0 %v9730_v12  ;;  %9795 = vmatprep.subr.bf16.mxu1 %v16340_v11  ;;  %v577_v26 = vld [vmem:[#allocation7 + $0x40] sm:$0xff]  ;;  %v580_v27 = vld [vmem:[#allocation7 + $0x58] sm:$0xff]  ;;  %v489_v31 = vld [vmem:[%s12964_s17 + $0x40] sm:$0xff]  ;;  %v9738_v32 = vpack.c.bf16 %v584_v25, %v581_v23  ;;  %p12499_p5 = pnand %p12498_p6, %p16915_p10  ;;  %s12501_s26 = sshll.u32 %s12602_s4, 4  ;;  %s12502_s26 = int_to_ptr.vmem [resolvable:$false] %s12501_s26 }
 0x140   : > { %9733 = vmatprep.subr.bf16.mxu0 %v9732_v17  ;;  %7814 = vmatmul.mubr.msk.f32.gmra.mrb[2].mxu1 %vm685_vm1, %v486_v16  ;;  %v9796_v28 = vpack.c.bf16 %v580_v27, %v577_v26  ;;  %v588_v29 = vld [vmem:[#allocation7 + $0x98] sm:$0xff]  ;;  %v583_v33 = vld [vmem:[#allocation7 + $0x70] sm:$0xff]  ;;  %v590_v36 = vld [vmem:[#allocation7 + $0xa8] sm:$0xff]  ;;  %s12503_s3 = scalar_lea.vmem %s12502_s26, 256  ;;  %p12504_p0 = scmp.lt.s32.totalorder %s16281_s2, %s12502_s26 }
 0x141   : > { %1098 = vmatprep.mubr.f32.mxu1 %v16343_v0  ;;  %v9740_v34 = vpack.c.bf16 %v591_v30, %v588_v29  ;;  %v587_v35 = vld [vmem:[#allocation7 + $0x90] sm:$0xff]  ;;  %v586_v37 = vld [vmem:[#allocation7 + $0x88] sm:$0xff]  ;;  %v597_v39 = vld [vmem:[#allocation7 + $0xe0] sm:$0xff]  ;;  %s16279_s27 = scalar_lea.hbm %s16914_s24, %s7934_s20  ;;  %p12500_p9 = pneg %p12499_p5 }
 0x142   : > { %9797 = vmatpush1.bf16.msra.mxu1 %v9796_v28  ;;  %v594_v38 = vld [vmem:[#allocation7 + $0xc8] sm:$0xff]  ;;  %v9799_v40 = vpack.c.bf16 %v586_v37, %v583_v33  ;;  %v589_v42 = vld [vmem:[#allocation7 + $0xa0] sm:$0xff]  ;;  %v9742_v43 = vpack.c.bf16 %v590_v36, %v587_v35  ;;  %v592_v44 = vld [vmem:[#allocation7 + $0xb8] sm:$0xff]  ;;  %p12505_p7 = scmp.lt.s32.totalorder %s12503_s3, %s12497_s15 }
 0x143   : > { %9735 = vmatpush1.bf16.msra.mxu0 %v9734_v21  ;;  %9798 = vmatprep.subr.bf16.mxu1 %v16340_v11  ;;  %v492_v41 = vld [vmem:[%s12964_s17 + $0x58] sm:$0xff]  ;;  %v9744_v45 = vpack.c.bf16 %v597_v39, %v594_v38  ;;  %v596_v47 = vld [vmem:[#allocation7 + $0xd8] sm:$0xff]  ;;  %v9802_v48 = vpack.c.bf16 %v592_v44, %v589_v42  ;;  %v603_v50 = vld [vmem:[#allocation7 + $0x110] sm:$0xff] }
 0x144   : > { %9737 = vmatprep.subr.bf16.mxu0 %v9736_v24  ;;  %7815 = vmatmul.mubr.msk.f32.gmra.mrb[4].mxu1 %vm685_vm1, %v489_v31  ;;  %v593_v46 = vld [vmem:[#allocation7 + $0xc0] sm:$0xff]  ;;  %v600_v49 = vld [vmem:[#allocation7 + $0xf8] sm:$0xff]  ;;  %v595_v52 = vld [vmem:[#allocation7 + $0xd0] sm:$0xff]  ;;  %p12506_p11 = por %p12505_p7, %p12504_p0 }
 0x145   : > { %1104 = vmatprep.mubr.f32.mxu1 %v16343_v0  ;;  %v495_v51 = vld [vmem:[%s12964_s17 + $0x70] sm:$0xff]  ;;  %v9746_v53 = vpack.c.bf16 %v596_v47, %v593_v46  ;;  %v598_v54 = vld [vmem:[#allocation7 + $0xe8] sm:$0xff]  ;;  %v9748_v55 = vpack.c.bf16 %v603_v50, %v600_v49  ;;  %v599_v56 = vld [vmem:[#allocation7 + $0xf0] sm:$0xff] }
 0x146   : > { %9800 = vmatpush1.bf16.msra.mxu1 %v9799_v40  ;;  %v602_v57 = vld [vmem:[#allocation7 + $0x108] sm:$0xff]  ;;  %v9805_v58 = vpack.c.bf16 %v598_v54, %v595_v52  ;;  %v609_v60 = vld [vmem:[#allocation7 + $0x140] sm:$0xff]  ;;  %v498_v61 = vld [vmem:[%s12964_s17 + $0x88] sm:$0xff]  ;;  %p12507_p8 = pnand %p12506_p11, %p12500_p9 }
 0x147   : > { %9739 = vmatpush1.bf16.msra.mxu0 %v9738_v32  ;;  %9801 = vmatprep.subr.bf16.mxu1 %v16340_v11  ;;  %v606_v59 = vld [vmem:[#allocation7 + $0x128] sm:$0xff]  ;;  %v601_v62 = vld [vmem:[#allocation7 + $0x100] sm:$0xff]  ;;  %v9750_v63 = vpack.c.bf16 %v602_v57, %v599_v56  ;;  %v604_v1 = vld [vmem:[#allocation7 + $0x118] sm:$0xff] }
 0x148   : > { %9741 = vmatprep.subr.bf16.mxu0 %v9740_v34  ;;  %7816 = vmatmul.mubr.msk.f32.gmra.mrb[6].mxu1 %vm685_vm1, %v492_v41  ;;  %v9752_v2 = vpack.c.bf16 %v609_v60, %v606_v59  ;;  %v605_v3 = vld [vmem:[#allocation7 + $0x120] sm:$0xff]  ;;  %v608_v4 = vld [vmem:[#allocation7 + $0x138] sm:$0xff]  ;;  %v9808_v5 = vpack.c.bf16 %v604_v1, %v601_v62  ;;  %v615_v7 = vld [vmem:[#allocation7 + $0x170] sm:$0xff] }
 0x149   : > { %1110 = vmatprep.mubr.f32.mxu1 %v16343_v0  ;;  %v612_v6 = vld [vmem:[#allocation7 + $0x158] sm:$0xff]  ;;  %v501_v8 = vld [vmem:[%s12964_s17 + $0xa0] sm:$0xff]  ;;  %v9754_v10 = vpack.c.bf16 %v608_v4, %v605_v3  ;;  %v621_v18 = vld [vmem:[#allocation7 + $0x1a0] sm:$0xff] }
 0x14a   : > { %9803 = vmatpush1.bf16.msra.mxu1 %v9802_v48  ;;  %v607_v9 = vld [vmem:[#allocation7 + $0x130] sm:$0xff]  ;;  %v610_v12 = vld [vmem:[#allocation7 + $0x148] sm:$0xff]  ;;  %v9756_v13 = vpack.c.bf16 %v615_v7, %v612_v6  ;;  %v613_v20 = vld [vmem:[#allocation7 + $0x160] sm:$0xff] }
 0x14b   : > { %9743 = vmatpush1.bf16.msra.mxu0 %v9742_v43  ;;  %9804 = vmatprep.subr.bf16.mxu1 %v16340_v11  ;;  %v611_v14 = vld [vmem:[#allocation7 + $0x150] sm:$0xff]  ;;  %v614_v15 = vld [vmem:[#allocation7 + $0x168] sm:$0xff]  ;;  %v9811_v16 = vpack.c.bf16 %v610_v12, %v607_v9  ;;  %v616_v21 = vld [vmem:[#allocation7 + $0x178] sm:$0xff] }
 0x14c   : > { %9745 = vmatprep.subr.bf16.mxu0 %v9744_v45  ;;  %7817 = vmatmul.mubr.msk.f32.gmra.mrb[8].mxu1 %vm685_vm1, %v495_v51  ;;  %v618_v17 = vld [vmem:[#allocation7 + $0x188] sm:$0xff]  ;;  %v9758_v22 = vpack.c.bf16 %v614_v15, %v611_v14  ;;  %v9814_v23 = vpack.c.bf16 %v616_v21, %v613_v20  ;;  %v617_v25 = vld [vmem:[#allocation7 + $0x180] sm:$0xff]  ;;  %v620_v26 = vld [vmem:[#allocation7 + $0x198] sm:$0xff] }
 0x14d   : > { %1116 = vmatprep.mubr.f32.mxu1 %v16343_v0  ;;  %v504_v19 = vld [vmem:[%s12964_s17 + $0xb8] sm:$0xff]  ;;  %v9760_v24 = vpack.c.bf16 %v621_v18, %v618_v17  ;;  %v624_v27 = vld [vmem:[#allocation7 + $0x1b8] sm:$0xff]  ;;  %v627_v28 = vld [vmem:[#allocation7 + $0x1d0] sm:$0xff]  ;;  %v9762_v32 = vpack.c.bf16 %v620_v26, %v617_v25 }
 0x14e   : > { %9806 = vmatpush1.bf16.msra.mxu1 %v9805_v58  ;;  %v619_v29 = vld [vmem:[#allocation7 + $0x190] sm:$0xff]  ;;  %v622_v30 = vld [vmem:[#allocation7 + $0x1a8] sm:$0xff]  ;;  %v13032_v31 = vld [vmem:[%s12964_s17 + $0xd0] sm:$0xff]  ;;  %v9764_v35 = vpack.c.bf16 %v627_v28, %v624_v27 }
 0x14f   : > { %9747 = vmatpush1.bf16.msra.mxu0 %v9746_v53  ;;  %9807 = vmatprep.subr.bf16.mxu1 %v16340_v11  ;;  %v9817_v33 = vpack.c.bf16 %v622_v30, %v619_v29  ;;  %v13035_v34 = vld [vmem:[%s12964_s17 + $0x8] sm:$0xff]  ;;  %v626_v37 = vld [vmem:[#allocation7 + $0x1c8] sm:$0xff]  ;;  %v625_v38 = vld [vmem:[#allocation7 + $0x1c0] sm:$0xff] }
 0x150   : > { %9749 = vmatprep.subr.bf16.mxu0 %v9748_v55  ;;  %7818 = vmatmul.mubr.msk.f32.gmra.mrb[10].mxu1 %vm685_vm1, %v498_v61  ;;  %v623_v36 = vld [vmem:[#allocation7 + $0x1b0] sm:$0xff]  ;;  %v630_v39 = vld [vmem:[#allocation7 + $0x1e8] sm:$0xff]  ;;  %v633_v40 = vld [vmem:[#allocation7 + $0x200] sm:$0xff] }
 0x151   : > { %1122 = vmatprep.mubr.f32.mxu1 %v16343_v0  ;;  %847 = vmatprep.mubr.f32.mxu0 %v13035_v34  ;;  %v628_v41 = vld [vmem:[#allocation7 + $0x1d8] sm:$0xff]  ;;  %v9766_v43 = vpack.c.bf16 %v626_v37, %v623_v36  ;;  %v629_v44 = vld [vmem:[#allocation7 + $0x1e0] sm:$0xff]  ;;  %v9768_v46 = vpack.c.bf16 %v633_v40, %v630_v39  ;;  %v631_v48 = vld [vmem:[#allocation7 + $0x1f0] sm:$0xff] }
 0x152   : > { %9809 = vmatpush1.bf16.msra.mxu1 %v9808_v5  ;;  %v13043_v42 = vld [vmem:[%s12964_s17 + $0xe8] sm:$0xff]  ;;  %v9820_v45 = vpack.c.bf16 %v628_v41, %v625_v38  ;;  %v634_v49 = vld [vmem:[#allocation7 + $0x208] sm:$0xff]  ;;  %v637_v58 = vld [vmem:[#allocation7 + $0x220] sm:$0xff] }
 0x153   : > { %9751 = vmatpush1.bf16.msra.mxu0 %v9750_v63  ;;  %9810 = vmatprep.subr.bf16.mxu1 %v16340_v11  ;;  %v632_v47 = vld [vmem:[#allocation7 + $0x1f8] sm:$0xff]  ;;  %v639_v51 = vld [vmem:[#allocation7 + $0x230] sm:$0xff]  ;;  %v9823_v55 = vpack.c.bf16 %v634_v49, %v631_v48  ;;  %v638_v57 = vld [vmem:[#allocation7 + $0x228] sm:$0xff] }
 0x154   : > { %9753 = vmatprep.subr.bf16.mxu0 %v9752_v2  ;;  %7819 = vmatmul.mubr.msk.f32.gmra.mrb[12].mxu1 %vm685_vm1, %v501_v8  ;;  %v636_v50 = vld [vmem:[#allocation7 + $0x218] sm:$0xff]  ;;  %v13050_v52 = vld [vmem:[%s12964_s17 + $0x100] sm:$0xff]  ;;  %v9770_v53 = vpack.c.bf16 %v632_v47, %v629_v44  ;;  %v645_v61 = vld [vmem:[#allocation7 + $0x260] sm:$0xff] }
 0x155   : > { %1128 = vmatprep.mubr.f32.mxu1 %v16343_v0  ;;  %v635_v54 = vld [vmem:[#allocation7 + $0x210] sm:$0xff]  ;;  %v9772_v56 = vpack.c.bf16 %v639_v51, %v636_v50  ;;  %v640_v59 = vld [vmem:[#allocation7 + $0x238] sm:$0xff]  ;;  %v642_v60 = vld [vmem:[#allocation7 + $0x248] sm:$0xff] }
 0x156   : > { %9812 = vmatpush1.bf16.msra.mxu1 %v9811_v16  ;;  %v13057_v62 = vld [vmem:[%s12964_s17 + $0x118] sm:$0xff]  ;;  %v9774_v63 = vpack.c.bf16 %v638_v57, %v635_v54  ;;  %v9826_v2 = vpack.c.bf16 %v640_v59, %v637_v58  ;;  %v9776_v3 = vpack.c.bf16 %v645_v61, %v642_v60  ;;  %v644_v4 = vld [vmem:[#allocation7 + $0x258] sm:$0xff]  ;;  %v643_v5 = vld [vmem:[#allocation7 + $0x250] sm:$0xff] }
 0x157   : > { %9755 = vmatpush1.bf16.msra.mxu0 %v9754_v10  ;;  %9813 = vmatprep.subr.bf16.mxu1 %v16340_v11  ;;  %v641_v1 = vld [vmem:[#allocation7 + $0x240] sm:$0xff]  ;;  %v646_v6 = vld [vmem:[#allocation7 + $0x268] sm:$0xff]  ;;  %v648_v7 = vld [vmem:[#allocation7 + $0x278] sm:$0xff] }
 0x158   : > { %9757 = vmatprep.subr.bf16.mxu0 %v9756_v13  ;;  %7820 = vmatmul.mubr.msk.f32.gmra.mrb[14].mxu1 %vm685_vm1, %v504_v19  ;;  %v651_v8 = vld [vmem:[#allocation7 + $0x290] sm:$0xff]  ;;  %v13064_v9 = vld [vmem:[%s12964_s17 + $0x130] sm:$0xff]  ;;  %v9778_v10 = vpack.c.bf16 %v644_v4, %v641_v1  ;;  %v9829_v13 = vpack.c.bf16 %v646_v6, %v643_v5  ;;  %v650_v15 = vld [vmem:[#allocation7 + $0x288] sm:$0xff] }
 0x159   : > { %1134 = vmatprep.mubr.f32.mxu1 %v16343_v0  ;;  %v647_v12 = vld [vmem:[#allocation7 + $0x270] sm:$0xff]  ;;  %v9780_v14 = vpack.c.bf16 %v651_v8, %v648_v7  ;;  %v649_v16 = vld [vmem:[#allocation7 + $0x280] sm:$0xff]  ;;  %v652_v17 = vld [vmem:[#allocation7 + $0x298] sm:$0xff] }
 0x15a   : > { %9815 = vmatpush1.bf16.msra.mxu1 %v9814_v23  ;;  %v654_v18 = vld [vmem:[#allocation7 + $0x2a8] sm:$0xff]  ;;  %v657_v19 = vld [vmem:[#allocation7 + $0x2c0] sm:$0xff]  ;;  %v13071_v20 = vld [vmem:[%s12964_s17 + $0x148] sm:$0xff]  ;;  %v9782_v21 = vpack.c.bf16 %v650_v15, %v647_v12  ;;  %v9832_v23 = vpack.c.bf16 %v652_v17, %v649_v16 }
 0x15b   : > { %9759 = vmatpush1.bf16.msra.mxu0 %v9758_v22  ;;  %9816 = vmatprep.subr.bf16.mxu1 %v16340_v11  ;;  %v653_v22 = vld [vmem:[#allocation7 + $0x2a0] sm:$0xff]  ;;  %v656_v25 = vld [vmem:[#allocation7 + $0x2b8] sm:$0xff]  ;;  %v655_v26 = vld [vmem:[#allocation7 + $0x2b0] sm:$0xff] }
 0x15c   : > { %9761 = vmatprep.subr.bf16.mxu0 %v9760_v24  ;;  %7821 = vmatmul.mubr.msk.f32.gmra.mrb[16].mxu1 %vm685_vm1, %v13032_v31  ;;  %v9784_v24 = vpack.c.bf16 %v657_v19, %v654_v18  ;;  %v658_v27 = vld [vmem:[#allocation7 + $0x2c8] sm:$0xff]  ;;  %v660_v28 = vld [vmem:[#allocation7 + $0x2d8] sm:$0xff]  ;;  %v663_v29 = vld [vmem:[#allocation7 + $0x2f0] sm:$0xff] }
 0x15d   : > { %1140 = vmatprep.mubr.f32.mxu1 %v16343_v0  ;;  %v13078_v30 = vld [vmem:[%s12964_s17 + $0x160] sm:$0xff]  ;;  %v9788_v36 = vpack.c.bf16 %v663_v29, %v660_v28  ;;  %v661_v38 = vld [vmem:[#allocation7 + $0x2e0] sm:$0xff]  ;;  %v664_v39 = vld [vmem:[#allocation7 + $0x2f8] sm:$0xff] }
 0x15e   : > { %9818 = vmatpush1.bf16.msra.mxu1 %v9817_v33  ;;  %v659_v33 = vld [vmem:[#allocation7 + $0x2d0] sm:$0xff]  ;;  %v662_v37 = vld [vmem:[#allocation7 + $0x2e8] sm:$0xff]  ;;  %v2105_v41 = vld [vmem:[#allocation10 + $0x20] sm:$0xff] }
 0x15f   : > { %9763 = vmatpush1.bf16.msra.mxu0 %v9762_v32  ;;  %9819 = vmatprep.subr.bf16.mxu1 %v16340_v11  ;;  %v9786_v32 = vpack.c.bf16 %v656_v25, %v653_v22  ;;  %v2102_v40 = vld [vmem:[#allocation10 + $0x8] sm:$0xff]  ;;  %v9790_v44 = vpack.c.bf16 %v662_v37, %v659_v33  ;;  %v2101_v47 = vld [vmem:[#allocation10] sm:$0xff]  ;;  %v2104_v48 = vld [vmem:[#allocation10 + $0x18] sm:$0xff] }
 0x160   : > { %9765 = vmatprep.subr.bf16.mxu0 %v9764_v35  ;;  %7822 = vmatmul.mubr.msk.f32.gmra.mrb[18].mxu1 %vm685_vm1, %v13043_v42  ;;  %v9835_v35 = vpack.c.bf16 %v658_v27, %v655_v26  ;;  %v2108_v49 = vld [vmem:[#allocation10 + $0x38] sm:$0xff]  ;;  %v2111_v50 = vld [vmem:[#allocation10 + $0x50] sm:$0xff]  ;;  %v13099_v54 = vpack.c.bf16 %v2104_v48, %v2101_v47  ;;  %v2110_v58 = vld [vmem:[#allocation10 + $0x48] sm:$0xff] }
 0x161   : > { %1146 = vmatprep.mubr.f32.mxu1 %v16343_v0  ;;  %v13094_v51 = vld [vmem:[%s12964_s17 + $0x190] sm:$0xff]  ;;  %v2107_v57 = vld [vmem:[#allocation10 + $0x30] sm:$0xff] }
 0x162   : > { %9821 = vmatpush1.bf16.msra.mxu1 %v9820_v45  ;;  %v9838_v45 = vpack.c.bf16 %v664_v39, %v661_v38  ;;  %16558 = vst [vmem:[#allocation28_spill] sm:$0xff] %v13099_v54  ;;  %v2114_v59 = vld [vmem:[#allocation10 + $0x68] sm:$0xff]  ;;  %v2117_v60 = vld [vmem:[#allocation10 + $0x80] sm:$0xff]  ;;  %v13120_v1 = vpack.c.bf16 %v2110_v58, %v2107_v57  ;;  %v2116_v5 = vld [vmem:[#allocation10 + $0x78] sm:$0xff] }
 0x163   : > { %9767 = vmatpush1.bf16.msra.mxu0 %v9766_v43  ;;  %9822 = vmatprep.subr.bf16.mxu1 %v16340_v11  ;;  %v13085_v43 = vld [vmem:[%s12964_s17 + $0x178] sm:$0xff]  ;;  %v13113_v61 = vld [vmem:[%s12964_s17 + $0x1a8] sm:$0xff]  ;;  %v13133_v8 = vld [vmem:[%s12964_s17 + $0x1c0] sm:$0xff] }
 0x164   : > { %9769 = vmatprep.subr.bf16.mxu0 %v9768_v46  ;;  %7823 = vmatmul.mubr.msk.f32.gmra.mrb[20].mxu1 %vm685_vm1, %v13050_v52  ;;  %v13088_v46 = vpack.c.bf16 %v2105_v41, %v2102_v40  ;;  %16560 = vst [vmem:[#allocation30_spill] sm:$0xff] %v13120_v1  ;;  %v2113_v4 = vld [vmem:[#allocation10 + $0x60] sm:$0xff]  ;;  %v2120_v6 = vld [vmem:[#allocation10 + $0x98] sm:$0xff]  ;;  %v2123_v7 = vld [vmem:[#allocation10 + $0xb0] sm:$0xff] }
 0x165   : > { %1152 = vmatprep.mubr.f32.mxu1 %v16343_v0  ;;  %v13140_v12 = vpack.c.bf16 %v2116_v5, %v2113_v4  ;;  %v2119_v15 = vld [vmem:[#allocation10 + $0x90] sm:$0xff]  ;;  %v2122_v16 = vld [vmem:[#allocation10 + $0xa8] sm:$0xff]  ;;  %v2129_v18 = vld [vmem:[#allocation10 + $0xe0] sm:$0xff] }
 0x166   : > { %9824 = vmatpush1.bf16.msra.mxu1 %v9823_v55  ;;  %16557 = vst [vmem:[#allocation27_spill] sm:$0xff] %v13088_v46  ;;  %v13102_v55 = vld [vmem:[%s12964_s17 + $0x20] sm:$0xff]  ;;  %v13153_v19 = vld [vmem:[%s12964_s17 + $0x1d8] sm:$0xff]  ;;  %v13160_v22 = vpack.c.bf16 %v2122_v16, %v2119_v15  ;;  %v13173_v29 = vld [vmem:[%s12964_s17 + $0x1f0] sm:$0xff] }
 0x167   : > { %9771 = vmatpush1.bf16.msra.mxu0 %v9770_v53  ;;  %9825 = vmatprep.subr.bf16.mxu1 %v16340_v11  ;;  %v13097_v53 = vld [vmem:[%s12964_s17] sm:$0xff]  ;;  %16562 = vst [vmem:[#allocation32_spill] sm:$0xff] %v13140_v12  ;;  %v2125_v25 = vld [vmem:[#allocation10 + $0xc0] sm:$0xff] }
 0x168   : > { %9773 = vmatprep.subr.bf16.mxu0 %v9772_v56  ;;  %7824 = vmatmul.mubr.msk.f32.gmra.mrb[22].mxu1 %vm685_vm1, %v13057_v62  ;;  %v13106_v56 = vpack.c.bf16 %v2111_v50, %v2108_v49  ;;  %v2126_v17 = vld [vmem:[#allocation10 + $0xc8] sm:$0xff]  ;;  %16564 = vst [vmem:[#allocation34_spill] sm:$0xff] %v13160_v22  ;;  %v2128_v26 = vld [vmem:[#allocation10 + $0xd8] sm:$0xff]  ;;  %v2135_v28 = vld [vmem:[#allocation10 + $0x110] sm:$0xff] }
 0x169   : > { %1158 = vmatprep.mubr.f32.mxu1 %v16343_v0  ;;  %v2132_v27 = vld [vmem:[#allocation10 + $0xf8] sm:$0xff]  ;;  %v13180_v33 = vpack.c.bf16 %v2128_v26, %v2125_v25  ;;  %v2131_v37 = vld [vmem:[#allocation10 + $0xf0] sm:$0xff]  ;;  %v2134_v38 = vld [vmem:[#allocation10 + $0x108] sm:$0xff] }
 0x16a   : > { %9827 = vmatpush1.bf16.msra.mxu1 %v9826_v2  ;;  %16559 = vst [vmem:[#allocation29_spill] sm:$0xff] %v13106_v56  ;;  %v13123_v2 = vld [vmem:[%s12964_s17 + $0x38] sm:$0xff]  ;;  %v13193_v41 = vld [vmem:[%s12964_s17 + $0x208] sm:$0xff]  ;;  %v13223_v5 = vld [vmem:[%s12964_s17 + $0xb0] sm:$0xff] }
 0x16b   : > { %9775 = vmatpush1.bf16.msra.mxu0 %v9774_v63  ;;  %9828 = vmatprep.subr.bf16.mxu1 %v16340_v11  ;;  %v13117_v63 = vld [vmem:[%s12964_s17 + $0x18] sm:$0xff]  ;;  %16566 = vst [vmem:[#allocation36_spill] sm:$0xff] %v13180_v33  ;;  %v2140_v50 = vld [vmem:[#allocation10 + $0x138] sm:$0xff] }
 0x16c   : > { %9777 = vmatprep.subr.bf16.mxu0 %v9776_v3  ;;  %7825 = vmatmul.mubr.msk.f32.gmra.mrb[24].mxu1 %vm685_vm1, %v13064_v9  ;;  %v13126_v3 = vpack.c.bf16 %v2117_v60, %v2114_v59  ;;  %v2138_v39 = vld [vmem:[#allocation10 + $0x128] sm:$0xff]  ;;  %v2141_v40 = vld [vmem:[#allocation10 + $0x140] sm:$0xff]  ;;  %v2144_v57 = vld [vmem:[#allocation10 + $0x158] sm:$0xff] }
 0x16d   : > { %1164 = vmatprep.mubr.f32.mxu1 %v16343_v0  ;;  %v13203_v47 = vld [vmem:[%s12964_s17 + $0x98] sm:$0xff]  ;;  %v13206_v48 = vpack.c.bf16 %v2141_v40, %v2138_v39  ;;  %v13213_v59 = vld [vmem:[%s12964_s17 + $0x220] sm:$0xff]  ;;  %v13217_v60 = vld [vmem:[%s12964_s17 + $0x90] sm:$0xff] }
 0x16e   : > { %9830 = vmatpush1.bf16.msra.mxu1 %v9829_v13  ;;  %16561 = vst [vmem:[#allocation31_spill] sm:$0xff] %v13126_v3  ;;  %v13143_v13 = vld [vmem:[%s12964_s17 + $0x50] sm:$0xff]  ;;  %v2147_v58 = vld [vmem:[#allocation10 + $0x170] sm:$0xff] }
 0x16f   : > { %9779 = vmatpush1.bf16.msra.mxu0 %v9778_v10  ;;  %9831 = vmatprep.subr.bf16.mxu1 %v16340_v11  ;;  %v13137_v10 = vld [vmem:[%s12964_s17 + $0x30] sm:$0xff]  ;;  %16569 = vst [vmem:[#allocation39_spill] sm:$0xff] %v13206_v48  ;;  %v13233_v16 = vld [vmem:[%s12964_s17 + $0x238] sm:$0xff]  ;;  %v13243_v25 = vld [vmem:[%s12964_s17 + $0xc8] sm:$0xff] }
 0x170   : > { %9781 = vmatprep.subr.bf16.mxu0 %v9780_v14  ;;  %7826 = vmatmul.mubr.msk.f32.gmra.mrb[26].mxu1 %vm685_vm1, %v13071_v20  ;;  %v13146_v14 = vpack.c.bf16 %v2123_v7, %v2120_v6  ;;  %v2137_v49 = vld [vmem:[#allocation10 + $0x120] sm:$0xff]  ;;  %v13226_v6 = vpack.c.bf16 %v2147_v58, %v2144_v57  ;;  %v2143_v7 = vld [vmem:[#allocation10 + $0x150] sm:$0xff]  ;;  %v2146_v15 = vld [vmem:[#allocation10 + $0x168] sm:$0xff]  ;;  %16572 = vst [vmem:[#allocation42_spill] sm:$0xff] %v13233_v16 }
 0x171   : > { %1170 = vmatprep.mubr.f32.mxu1 %v16343_v0  ;;  %v13220_v4 = vpack.c.bf16 %v2140_v50, %v2137_v49  ;;  %v13251_v26 = vld [vmem:[%s12964_s17 + $0x250] sm:$0xff]  ;;  %v13274_v39 = vld [vmem:[%s12964_s17 + $0xf8] sm:$0xff]  ;;  %v13281_v40 = vld [vmem:[%s12964_s17 + $0x280] sm:$0xff] }
 0x172   : > { %9833 = vmatpush1.bf16.msra.mxu1 %v9832_v23  ;;  %16563 = vst [vmem:[#allocation33_spill] sm:$0xff] %v13146_v14  ;;  %v13163_v23 = vld [vmem:[%s12964_s17 + $0x68] sm:$0xff]  ;;  %16571 = vst [vmem:[#allocation41_spill] sm:$0xff] %v13226_v6  ;;  %v13285_v49 = vld [vmem:[%s12964_s17 + $0xf0] sm:$0xff] }
 0x173   : > { %9783 = vmatpush1.bf16.msra.mxu0 %v9782_v21  ;;  %9834 = vmatprep.subr.bf16.mxu1 %v16340_v11  ;;  %v13157_v21 = vld [vmem:[%s12964_s17 + $0x48] sm:$0xff]  ;;  %16570 = vst [vmem:[#allocation40_spill] sm:$0xff] %v13220_v4  ;;  %16574 = vst [vmem:[#allocation44_spill] sm:$0xff] %v13251_v26  ;;  %v13288_v50 = vld [vmem:[%s12964_s17 + $0x110] sm:$0xff] }
 0x174   : > { %9785 = vmatprep.subr.bf16.mxu0 %v9784_v24  ;;  %7827 = vmatmul.mubr.msk.f32.gmra.mrb[28].mxu1 %vm685_vm1, %v13078_v30  ;;  %v13166_v24 = vpack.c.bf16 %v2129_v18, %v2126_v17  ;;  %v13237_v17 = vld [vmem:[%s12964_s17 + $0xa8] sm:$0xff]  ;;  %v13240_v18 = vpack.c.bf16 %v2146_v15, %v2143_v7  ;;  %16576 = vst [vmem:[#allocation46_spill] sm:$0xff] %v13281_v40  ;;  %v13295_v57 = vld [vmem:[%s12964_s17 + $0x298] sm:$0xff]  ;;  %v13309_v15 = vld [vmem:[%s12964_s17 + $0x2b0] sm:$0xff] }
 0x175   : > { %1176 = vmatprep.mubr.f32.mxu1 %v16343_v0  ;;  %16577 = vst [vmem:[#allocation47_spill] sm:$0xff] %v13295_v57  ;;  %v13299_v58 = vld [vmem:[%s12964_s17 + $0x108] sm:$0xff]  ;;  %16578 = vst [vmem:[#allocation48_spill] sm:$0xff] %v13309_v15 }
 0x176   : > { %9836 = vmatpush1.bf16.msra.mxu1 %v9835_v35  ;;  %16565 = vst [vmem:[#allocation35_spill] sm:$0xff] %v13166_v24  ;;  %v13183_v35 = vld [vmem:[%s12964_s17 + $0x80] sm:$0xff]  ;;  %16573 = vst [vmem:[#allocation43_spill] sm:$0xff] %v13240_v18  ;;  %v13302_v7 = vld [vmem:[%s12964_s17 + $0x128] sm:$0xff] }
 0x177   : > { %9787 = vmatpush1.bf16.msra.mxu0 %v9786_v32  ;;  %9837 = vmatprep.subr.bf16.mxu1 %v16340_v11  ;;  %v13177_v32 = vld [vmem:[%s12964_s17 + $0x60] sm:$0xff] }
 0x178   : > { %9789 = vmatprep.subr.bf16.mxu0 %v9788_v36  ;;  %7828 = vmatmul.mubr.msk.f32.gmra.mrb[30].mxu1 %vm685_vm1, %v13085_v43  ;;  %v13186_v36 = vpack.c.bf16 %v2135_v28, %v2132_v27  ;;  %v13255_v27 = vld [vmem:[%s12964_s17 + $0xc0] sm:$0xff] }
 0x179   : > { %1182 = vmatprep.mubr.f32.mxu1 %v16343_v0  ;;  %v13259_v28 = vld [vmem:[%s12964_s17 + $0xe0] sm:$0xff] }
 0x17a   : > { %9839 = vmatpush1.bf16.msra.mxu1 %v9838_v45  ;;  %16567 = vst [vmem:[#allocation37_spill] sm:$0xff] %v13186_v36  ;;  %v13200_v45 = vpack.c.bf16 %v2134_v38, %v2131_v37  ;;  %v13267_v37 = vld [vmem:[%s12964_s17 + $0x268] sm:$0xff]  ;;  %v13271_v38 = vld [vmem:[%s12964_s17 + $0xd8] sm:$0xff]  ;;  %v13313_v11 = vld [vmem:[%s12964_s17 + $0x120] sm:$0xff] }
 0x17b   : > { %9791 = vmatpush1.bf16.msra.mxu0 %v9790_v44  ;;  %8505 = vmatprep.subr.mxu1 %v16343_v0  ;;  %v13197_v44 = vld [vmem:[%s12964_s17 + $0x78] sm:$0xff]  ;;  %16575 = vst [vmem:[#allocation45_spill] sm:$0xff] %v13267_v37 }
 0x17c   : > { %9841 = vmatprep.subr.bf16.mxu0 %v13088_v46  ;;  %7829 = vmatmul.mubr.msk.f32.gmra.mrb[32].mxu1 %vm685_vm1, %v13094_v51  ;;  %16568 = vst [vmem:[#allocation38_spill] sm:$0xff] %v13200_v45 }
 0x17d   : > { %1188 = vmatprep.mubr.f32.mxu1 %v16343_v0 }
 0x17e   : > { %848 = vmatmul.mubr.f32.vlgmr.msra.gmra.mrb[0].mxu0 %v13097_v53 }
 0x17f   : > { %853 = vmatprep.mubr.f32.mxu0 %v13102_v55  ;;  %9843 = vmatpush1.bf16.msra.mxu0 %v13099_v54 }
 0x180   : > { %9845 = vmatprep.subr.bf16.mxu0 %v13106_v56  ;;  %7830 = vmatmul.mubr.msk.f32.gmra.mrb[34].mxu1 %vm685_vm1, %v13113_v61 }
 0x181   : > { %1194 = vmatprep.mubr.f32.mxu1 %v16343_v0 }
 0x182   : > { %854 = vmatmul.mubr.f32.gmra.mrb[2].mxu0 %v13117_v63 }
 0x183   : > { %859 = vmatprep.mubr.f32.mxu0 %v13123_v2  ;;  %9847 = vmatpush1.bf16.msra.mxu0 %v13120_v1 }
 0x184   : > { %9849 = vmatprep.subr.bf16.mxu0 %v13126_v3  ;;  %7831 = vmatmul.mubr.msk.f32.gmra.mrb[36].mxu1 %vm685_vm1, %v13133_v8 }
 0x185   : > { %1200 = vmatprep.mubr.f32.mxu1 %v16343_v0 }
 0x186   : > { %860 = vmatmul.mubr.f32.gmra.mrb[4].mxu0 %v13137_v10 }
 0x187   : > { %865 = vmatprep.mubr.f32.mxu0 %v13143_v13  ;;  %9851 = vmatpush1.bf16.msra.mxu0 %v13140_v12 }
 0x188   : > { %9853 = vmatprep.subr.bf16.mxu0 %v13146_v14  ;;  %7832 = vmatmul.mubr.msk.f32.gmra.mrb[38].mxu1 %vm685_vm1, %v13153_v19 }
 0x189   : > { %1206 = vmatprep.mubr.f32.mxu1 %v16343_v0 }
 0x18a   : > { %866 = vmatmul.mubr.f32.gmra.mrb[6].mxu0 %v13157_v21 }
 0x18b   : > { %871 = vmatprep.mubr.f32.mxu0 %v13163_v23  ;;  %9855 = vmatpush1.bf16.msra.mxu0 %v13160_v22 }
 0x18c   : > { %9857 = vmatprep.subr.bf16.mxu0 %v13166_v24  ;;  %7833 = vmatmul.mubr.msk.f32.gmra.mrb[40].mxu1 %vm685_vm1, %v13173_v29 }
 0x18d   : > { %1212 = vmatprep.mubr.f32.mxu1 %v16343_v0 }
 0x18e   : > { %872 = vmatmul.mubr.f32.gmra.mrb[8].mxu0 %v13177_v32 }
 0x18f   : > { %877 = vmatprep.mubr.f32.mxu0 %v13183_v35  ;;  %9859 = vmatpush1.bf16.msra.mxu0 %v13180_v33 }
 0x190   : > { %9861 = vmatprep.subr.bf16.mxu0 %v13186_v36  ;;  %7834 = vmatmul.mubr.msk.f32.gmra.mrb[42].mxu1 %vm685_vm1, %v13193_v41 }
 0x191   : > { %1218 = vmatprep.mubr.f32.mxu1 %v16343_v0 }
 0x192   : > { %878 = vmatmul.mubr.f32.gmra.mrb[10].mxu0 %v13197_v44 }
 0x193   : > { %883 = vmatprep.mubr.f32.mxu0 %v13203_v47  ;;  %9863 = vmatpush1.bf16.msra.mxu0 %v13200_v45 }
 0x194   : > { %9865 = vmatprep.subr.bf16.mxu0 %v13206_v48  ;;  %7835 = vmatmul.mubr.msk.f32.gmra.mrb[44].mxu1 %vm685_vm1, %v13213_v59 }
 0x195   : > { %1224 = vmatprep.mubr.f32.mxu1 %v16343_v0 }
 0x196   : > { %884 = vmatmul.mubr.f32.gmra.mrb[12].mxu0 %v13217_v60 }
 0x197   : > { %889 = vmatprep.mubr.f32.mxu0 %v13223_v5  ;;  %9867 = vmatpush1.bf16.msra.mxu0 %v13220_v4 }
 0x198   : > { %9869 = vmatprep.subr.bf16.mxu0 %v13226_v6  ;;  %7836 = vmatmul.mubr.msk.f32.gmra.mrb[46].mxu1 %vm685_vm1, %v13233_v16  ;;  %v566_v16 = vld [vmem:[%s12964_s17 + $0x2a8] sm:$0xff] }
 0x199   : > { %1230 = vmatprep.mubr.f32.mxu1 %v16343_v0 }
 0x19a   : > { %890 = vmatmul.mubr.f32.gmra.mrb[14].mxu0 %v13237_v17 }
 0x19b   : > { %895 = vmatprep.mubr.f32.mxu0 %v13243_v25  ;;  %9871 = vmatpush1.bf16.msra.mxu0 %v13240_v18 }
 0x19c   : > { %9897 = vmatprep.subr.bf16.mxu0 %v13088_v46  ;;  %7837 = vmatmul.mubr.msk.f32.gmra.mrb[48].mxu1 %vm685_vm1, %v13251_v26  ;;  %v16579_v26 = vmov 0.0|0.0  }
 0x19d   : > { %1236 = vmatprep.mubr.f32.mxu1 %v16343_v0 }
 0x19e   : > { %896 = vmatmul.mubr.f32.gmra.mrb[16].mxu0 %v13255_v27 }
 0x19f   : > { %901 = vmatprep.mubr.f32.mxu0 %v13259_v28 }
 0x1a0   : > { %7838 = vmatmul.mubr.msk.f32.gmra.mrb[50].mxu1 %vm685_vm1, %v13267_v37  ;;  %v13327_v37 = vld [vmem:[%s12964_s17 + $0x158] sm:$0xff] }
 0x1a1   : > { %1242 = vmatprep.mubr.f32.mxu1 %v16343_v0 }
 0x1a2   : > { %902 = vmatmul.mubr.f32.gmra.mrb[18].mxu0 %v13271_v38 }
 0x1a3   : > { %907 = vmatprep.mubr.f32.mxu0 %v13274_v39 }
 0x1a4   : > { %7839 = vmatmul.mubr.msk.f32.gmra.mrb[52].mxu1 %vm685_vm1, %v13281_v40  ;;  %v13316_v40 = vld [vmem:[%s12964_s17 + $0x140] sm:$0xff] }
 0x1a5   : > { %1248 = vmatprep.mubr.f32.mxu1 %v16343_v0 }
 0x1a6   : > { %908 = vmatmul.mubr.f32.gmra.mrb[20].mxu0 %v13285_v49 }
 0x1a7   : > { %913 = vmatprep.mubr.f32.mxu0 %v13288_v50 }
 0x1a8   : > { %7840 = vmatmul.mubr.msk.f32.gmra.mrb[54].mxu1 %vm685_vm1, %v13295_v57  ;;  %v667_v57 = vld [vmem:[#allocation7 + $0x310] sm:$0x3] }
 0x1a9   : > { %1254 = vmatprep.mubr.f32.mxu1 %v16343_v0  ;;  %v13324_v0 = vld [vmem:[%s12964_s17 + $0x138] sm:$0xff] }
 0x1aa   : > { %914 = vmatmul.mubr.f32.gmra.mrb[22].mxu0 %v13299_v58 }
 0x1ab   : > { %919 = vmatprep.mubr.f32.mxu0 %v13302_v7 }
 0x1ac   : > { %7841 = vmatmul.mubr.msk.f32.gmra.mrb[56].mxu1 %vm685_vm1, %v13309_v15  ;;  %v13338_v15 = vld [vmem:[%s12964_s17 + $0x170] sm:$0xff] }
 0x1ad   : > { %1325 = vmatprep.mubr.f32.mxu1 %v13035_v34  ;;  %v13335_v34 = vld [vmem:[%s12964_s17 + $0x150] sm:$0xff] }
 0x1ae   : > { %920 = vmatmul.mubr.f32.gmra.mrb[24].mxu0 %v13313_v11 }
 0x1af   : > { %925 = vmatprep.mubr.f32.mxu0 %v13316_v40 }
 0x1b0   : > { %1326 = vmatmul.mubr.f32.vlgmr.msra.gmra.mrb[58].mxu1 %v13097_v53  ;;  %v13346_v53 = vld [vmem:[%s12964_s17 + $0x168] sm:$0xff] }
 0x1b1   : > { %8506 = vmatpush3.msk.msra.mxu1 %vm773_vm0, %v667_v57  ;;  %1330 = vmatprep.mubr.f32.mxu1 %v13102_v55  ;;  %v13349_v57 = vld [vmem:[%s12964_s17 + $0x188] sm:$0xff]  ;;  %v13356_v55 = vld [vmem:[%s12964_s17 + $0x180] sm:$0xff] }
 0x1b2   : > { %926 = vmatmul.mubr.f32.gmra.mrb[26].mxu0 %v13324_v0  ;;  %9872 = vmatprep.subr.bf16.mxu1 %v16579_v26 }
 0x1b3   : > { %931 = vmatprep.mubr.f32.mxu0 %v13327_v37 }
 0x1b4   : > { %1331 = vmatmul.mubr.f32.gmra.mrb[60].mxu1 %v13117_v63  ;;  %v13359_v63 = vld [vmem:[%s12964_s17 + $0x1a0] sm:$0xff] }
 0x1b5   : > { %1335 = vmatprep.mubr.f32.mxu1 %v13123_v2  ;;  %v13366_v2 = vld [vmem:[%s12964_s17 + $0x198] sm:$0xff] }
 0x1b6   : > { %932 = vmatmul.mubr.f32.gmra.mrb[28].mxu0 %v13335_v34 }
 0x1b7   : > { %937 = vmatprep.mubr.f32.mxu0 %v13338_v15 }
 0x1b8   : > { %1336 = vmatmul.mubr.f32.gmra.mrb[62].mxu1 %v13137_v10  ;;  %v13369_v10 = vld [vmem:[%s12964_s17 + $0x1b8] sm:$0xff] }
 0x1b9   : > { %1340 = vmatprep.mubr.f32.mxu1 %v13143_v13  ;;  %v13376_v13 = vld [vmem:[%s12964_s17 + $0x1b0] sm:$0xff] }
 0x1ba   : > { %938 = vmatmul.mubr.f32.gmra.mrb[30].mxu0 %v13346_v53 }
 0x1bb   : > { %943 = vmatprep.mubr.f32.mxu0 %v13349_v57 }
 0x1bc   : > { %1341 = vmatmul.mubr.f32.gmra.mrb[64].mxu1 %v13157_v21  ;;  %v13379_v21 = vld [vmem:[%s12964_s17 + $0x1d0] sm:$0xff] }
 0x1bd   : > { %1345 = vmatprep.mubr.f32.mxu1 %v13163_v23  ;;  %v13386_v23 = vld [vmem:[%s12964_s17 + $0x1c8] sm:$0xff] }
 0x1be   : > { %944 = vmatmul.mubr.f32.gmra.mrb[32].mxu0 %v13356_v55 }
 0x1bf   : > { %949 = vmatprep.mubr.f32.mxu0 %v13359_v63 }
 0x1c0   : > { %1346 = vmatmul.mubr.f32.gmra.mrb[66].mxu1 %v13177_v32  ;;  %v13389_v32 = vld [vmem:[%s12964_s17 + $0x1e8] sm:$0xff] }
 0x1c1   : > { %1350 = vmatprep.mubr.f32.mxu1 %v13183_v35  ;;  %v13396_v35 = vld [vmem:[%s12964_s17 + $0x1e0] sm:$0xff] }
 0x1c2   : > { %950 = vmatmul.mubr.f32.gmra.mrb[34].mxu0 %v13366_v2 }
 0x1c3   : > { %955 = vmatprep.mubr.f32.mxu0 %v13369_v10 }
 0x1c4   : > { %1351 = vmatmul.mubr.f32.gmra.mrb[68].mxu1 %v13197_v44  ;;  %v13399_v44 = vld [vmem:[%s12964_s17 + $0x200] sm:$0xff] }
 0x1c5   : > { %1355 = vmatprep.mubr.f32.mxu1 %v13203_v47  ;;  %v13406_v47 = vld [vmem:[%s12964_s17 + $0x1f8] sm:$0xff] }
 0x1c6   : > { %956 = vmatmul.mubr.f32.gmra.mrb[36].mxu0 %v13376_v13 }
 0x1c7   : > { %961 = vmatprep.mubr.f32.mxu0 %v13379_v21 }
 0x1c8   : > { %1356 = vmatmul.mubr.f32.gmra.mrb[70].mxu1 %v13217_v60  ;;  %v13409_v60 = vld [vmem:[%s12964_s17 + $0x218] sm:$0xff] }
 0x1c9   : > { %1360 = vmatprep.mubr.f32.mxu1 %v13223_v5  ;;  %v13416_v5 = vld [vmem:[%s12964_s17 + $0x210] sm:$0xff] }
 0x1ca   : > { %962 = vmatmul.mubr.f32.gmra.mrb[38].mxu0 %v13386_v23 }
 0x1cb   : > { %967 = vmatprep.mubr.f32.mxu0 %v13389_v32 }
 0x1cc   : > { %1361 = vmatmul.mubr.f32.gmra.mrb[72].mxu1 %v13237_v17  ;;  %v13419_v17 = vld [vmem:[%s12964_s17 + $0x230] sm:$0xff] }
 0x1cd   : > { %1365 = vmatprep.mubr.f32.mxu1 %v13243_v25  ;;  %v13426_v25 = vld [vmem:[%s12964_s17 + $0x228] sm:$0xff] }
 0x1ce   : > { %968 = vmatmul.mubr.f32.gmra.mrb[40].mxu0 %v13396_v35 }
 0x1cf   : > { %973 = vmatprep.mubr.f32.mxu0 %v13399_v44 }
 0x1d0   : > { %1366 = vmatmul.mubr.f32.gmra.mrb[74].mxu1 %v13255_v27  ;;  %v13429_v27 = vld [vmem:[%s12964_s17 + $0x248] sm:$0xff] }
 0x1d1   : > { %1370 = vmatprep.mubr.f32.mxu1 %v13259_v28  ;;  %v13436_v28 = vld [vmem:[%s12964_s17 + $0x240] sm:$0xff] }
 0x1d2   : > { %974 = vmatmul.mubr.f32.gmra.mrb[42].mxu0 %v13406_v47 }
 0x1d3   : > { %979 = vmatprep.mubr.f32.mxu0 %v13409_v60 }
 0x1d4   : > { %1371 = vmatmul.mubr.f32.gmra.mrb[76].mxu1 %v13271_v38  ;;  %v13439_v38 = vld [vmem:[%s12964_s17 + $0x260] sm:$0xff] }
 0x1d5   : > { %1375 = vmatprep.mubr.f32.mxu1 %v13274_v39  ;;  %v13446_v39 = vld [vmem:[%s12964_s17 + $0x258] sm:$0xff] }
 0x1d6   : > { %980 = vmatmul.mubr.f32.gmra.mrb[44].mxu0 %v13416_v5 }
 0x1d7   : > { %985 = vmatprep.mubr.f32.mxu0 %v13419_v17 }
 0x1d8   : > { %1376 = vmatmul.mubr.f32.gmra.mrb[78].mxu1 %v13285_v49  ;;  %v13449_v49 = vld [vmem:[%s12964_s17 + $0x278] sm:$0xff] }
 0x1d9   : > { %1380 = vmatprep.mubr.f32.mxu1 %v13288_v50  ;;  %v559_v50 = vld [vmem:[%s12964_s17 + $0x270] sm:$0xff] }
 0x1da   : > { %986 = vmatmul.mubr.f32.gmra.mrb[46].mxu0 %v13426_v25 }
 0x1db   : > { %991 = vmatprep.mubr.f32.mxu0 %v13429_v27 }
 0x1dc   : > { %1381 = vmatmul.mubr.f32.gmra.mrb[80].mxu1 %v13299_v58  ;;  %v563_v58 = vld [vmem:[%s12964_s17 + $0x290] sm:$0xff] }
 0x1dd   : > { %1385 = vmatprep.mubr.f32.mxu1 %v13302_v7  ;;  %v562_v7 = vld [vmem:[%s12964_s17 + $0x288] sm:$0xff] }
 0x1de   : > { %992 = vmatmul.mubr.f32.gmra.mrb[48].mxu0 %v13436_v28 }
 0x1df   : > { %997 = vmatprep.mubr.f32.mxu0 %v13439_v38 }
 0x1e0   : > { %1386 = vmatmul.mubr.f32.gmra.mrb[82].mxu1 %v13313_v11  ;;  %v565_v11 = vld [vmem:[%s12964_s17 + $0x2a0] sm:$0xff] }
 0x1e1   : > { %1390 = vmatprep.mubr.f32.mxu1 %v13316_v40  ;;  %v16580_v40 = vmov 0.0  }
 0x1e2   : > { %998 = vmatmul.mubr.f32.gmra.mrb[50].mxu0 %v13446_v39 }
 0x1e3   : > { %1003 = vmatprep.mubr.f32.mxu0 %v13449_v49 }
 0x1e4   : > { %1391 = vmatmul.mubr.f32.gmra.mrb[84].mxu1 %v13324_v0  ;;  %v13468_v0 = vld [vmem:[%s12982_s1] sm:$0xff] }
 0x1e5   : > { %1395 = vmatprep.mubr.f32.mxu1 %v13327_v37 }
 0x1e6   : > { %1004 = vmatmul.mubr.f32.gmra.mrb[52].mxu0 %v559_v50 }
 0x1e7   : > { %1009 = vmatprep.mubr.f32.mxu0 %v563_v58 }
 0x1e8   : > { %1396 = vmatmul.mubr.f32.gmra.mrb[86].mxu1 %v13335_v34 }
 0x1e9   : > { %1400 = vmatprep.mubr.f32.mxu1 %v13338_v15 }
 0x1ea   : > { %1010 = vmatmul.mubr.f32.gmra.mrb[54].mxu0 %v562_v7 }
 0x1eb   : > { %1015 = vmatprep.mubr.f32.mxu0 %v566_v16 }
 0x1ec   : > { %1401 = vmatmul.mubr.f32.gmra.mrb[88].mxu1 %v13346_v53 }
 0x1ed   : > { %1405 = vmatprep.mubr.f32.mxu1 %v13349_v57 }
 0x1ee   : > { %1016 = vmatmul.mubr.f32.gmra.mrb[56].mxu0 %v565_v11 }
 0x1ef   : > { %2223 = vmatprep.mubr.f32.mxu0 %v16580_v40 }
 0x1f0   : > { %1406 = vmatmul.mubr.f32.gmra.mrb[90].mxu1 %v13356_v55 }
 0x1f1   : > { %1410 = vmatprep.mubr.f32.mxu1 %v13359_v63 }
 0x1f2   : > { %2224 = vmatmul.mubr.f32.vlgmr.msra.gmra.mrb[58].mxu0 %v13468_v0 }
 0x1f3   : > { %9899 = vmatpush1.bf16.msra.mxu0 %v13099_v54  ;;  %2390 = vmatprep.mubr.f32.mxu0 %v16580_v40 }
 0x1f4   : > { %9901 = vmatprep.subr.bf16.mxu0 %v13106_v56  ;;  %1411 = vmatmul.mubr.f32.gmra.mrb[92].mxu1 %v13366_v2 }
 0x1f5   : > { %1415 = vmatprep.mubr.f32.mxu1 %v13369_v10  ;;  %v2103_v10 = vld [vmem:[#allocation10 + $0x10] sm:$0xff] }
 0x1f7   : > { %9903 = vmatpush1.bf16.msra.mxu0 %v13120_v1 }
 0x1f8   : > { %9905 = vmatprep.subr.bf16.mxu0 %v13126_v3  ;;  %1416 = vmatmul.mubr.f32.gmra.mrb[94].mxu1 %v13376_v13  ;;  %v2106_v13 = vld [vmem:[#allocation10 + $0x28] sm:$0xff] }
 0x1f9   : > { %1420 = vmatprep.mubr.f32.mxu1 %v13379_v21 }
 0x1fb   : > { %9907 = vmatpush1.bf16.msra.mxu0 %v13140_v12  ;;  %v13646_v12 = vld [vmem:[#allocation9] sm:$0x7] }
 0x1fc   : > { %9909 = vmatprep.subr.bf16.mxu0 %v13146_v14  ;;  %1421 = vmatmul.mubr.f32.gmra.mrb[96].mxu1 %v13386_v23  ;;  %16586 = vst [vmem:[#allocation54_spill] sm:$0xff] %v13646_v12 }
 0x1fd   : > { %1425 = vmatprep.mubr.f32.mxu1 %v13389_v32  ;;  %v13530_v32 = vpack.c.bf16 %v2106_v13, %v2103_v10  ;;  %v2127_v13 = vld [vmem:[#allocation10 + $0xd0] sm:$0xff] }
 0x1ff   : > { %9911 = vmatpush1.bf16.msra.mxu0 %v13160_v22 }
 0x200   : > { %9913 = vmatprep.subr.bf16.mxu0 %v13166_v24  ;;  %1426 = vmatmul.mubr.f32.gmra.mrb[98].mxu1 %v13396_v35  ;;  %v2109_v35 = vld [vmem:[#allocation10 + $0x40] sm:$0xff] }
 0x201   : > { %1430 = vmatprep.mubr.f32.mxu1 %v13399_v44  ;;  %v2112_v44 = vld [vmem:[#allocation10 + $0x58] sm:$0xff] }
 0x203   : > { %9915 = vmatpush1.bf16.msra.mxu0 %v13180_v33  ;;  %v12236_v33 = vld [vmem:[%s12964_s17 + $0xb8] sm:$0xff] }
 0x204   : > { %9917 = vmatprep.subr.bf16.mxu0 %v13186_v36  ;;  %1431 = vmatmul.mubr.f32.gmra.mrb[100].mxu1 %v13406_v47  ;;  %v12235_v36 = vld [vmem:[%s12964_s17 + $0xa0] sm:$0xff] }
 0x205   : > { %1435 = vmatprep.mubr.f32.mxu1 %v13409_v60 }
 0x207   : > { %9919 = vmatpush1.bf16.msra.mxu0 %v13200_v45 }
 0x208   : > { %9921 = vmatprep.subr.bf16.mxu0 %v13206_v48  ;;  %1436 = vmatmul.mubr.f32.gmra.mrb[102].mxu1 %v13416_v5  ;;  %v13541_v5 = vpack.c.bf16 %v2112_v44, %v2109_v35  ;;  %v2130_v35 = vld [vmem:[#allocation10 + $0xe8] sm:$0xff] }
 0x209   : > { %1440 = vmatprep.mubr.f32.mxu1 %v13419_v17  ;;  %v2115_v17 = vld [vmem:[#allocation10 + $0x70] sm:$0xff] }
 0x20b   : > { %9923 = vmatpush1.bf16.msra.mxu0 %v13220_v4  ;;  %v12234_v4 = vld [vmem:[%s12964_s17 + $0x88] sm:$0xff] }
 0x20c   : > { %9925 = vmatprep.subr.bf16.mxu0 %v13226_v6  ;;  %1441 = vmatmul.mubr.f32.gmra.mrb[104].mxu1 %v13426_v25  ;;  %v2118_v25 = vld [vmem:[#allocation10 + $0x88] sm:$0xff] }
 0x20d   : > { %1445 = vmatprep.mubr.f32.mxu1 %v13429_v27 }
 0x20f   : > { %9927 = vmatpush1.bf16.msra.mxu0 %v13240_v18  ;;  %v13503_v37 = vpop.f32.mrb[0].mxu1 }
 0x210   : > { %9953 = vmatprep.subr.bf16.mxu0 %v13088_v46  ;;  %v13506_v15 = vpop.f32.mrb[1].mxu1  ;;  %1446 = vmatmul.mubr.f32.gmra.mrb[106].mxu1 %v13436_v28  ;;  %v12233_v46 = vld [vmem:[%s12964_s17 + $0x70] sm:$0xff] }
 0x211   : > { %1450 = vmatprep.mubr.f32.mxu1 %v13439_v38  ;;  %v12230_v38 = vld [vmem:[%s12964_s17 + $0x28] sm:$0xff] }
 0x213   : > { %v13510_v34 = vpop.f32.mrb[2].mxu1 }
 0x214   : > { %v13512_v53 = vpop.f32.mrb[3].mxu1  ;;  %1451 = vmatmul.mubr.f32.gmra.mrb[108].mxu1 %v13446_v39  ;;  %v13553_v39 = vpack.c.bf16 %v2118_v25, %v2115_v17  ;;  %v12232_v17 = vld [vmem:[%s12964_s17 + $0x58] sm:$0xff]  ;;  %v13577_v25 = vpack.c.bf16 %v2130_v35, %v2127_v13 }
 0x215   : > { %1455 = vmatprep.mubr.f32.mxu1 %v13449_v49  ;;  %v2121_v49 = vld [vmem:[#allocation10 + $0xa0] sm:$0xff]  ;;  %v2139_v13 = vld [vmem:[#allocation10 + $0x130] sm:$0xff]  ;;  %v2142_v35 = vld [vmem:[#allocation10 + $0x148] sm:$0xff] }
 0x216   : > { %16581 = vst [vmem:[#allocation49_spill] sm:$0xff] %v13577_v25 }
 0x217   : > { %v13516_v57 = vpop.f32.mrb[4].mxu1 }
 0x218   : > { %v13518_v55 = vpop.f32.mrb[5].mxu1  ;;  %1456 = vmatmul.mubr.f32.gmra.mrb[110].mxu1 %v559_v50  ;;  %v2124_v50 = vld [vmem:[#allocation10 + $0xb8] sm:$0xff] }
 0x219   : > { %1460 = vmatprep.mubr.f32.mxu1 %v563_v58  ;;  %v13565_v10 = vpack.c.bf16 %v2124_v50, %v2121_v49  ;;  %v2136_v49 = vld [vmem:[#allocation10 + $0x118] sm:$0xff] }
 0x21b   : > { %v13520_v63 = vpop.f32.mrb[6].mxu1 }
 0x21c   : > { %v13522_v2 = vpop.f32.mrb[7].mxu1  ;;  %1461 = vmatmul.mubr.f32.gmra.mrb[112].mxu1 %v562_v7 }
 0x21d   : > { %1465 = vmatprep.mubr.f32.mxu1 %v566_v16  ;;  %v12229_v16 = vld [vmem:[%s12964_s17 + $0x10] sm:$0xff] }
 0x21f   : > { %v13524_v21 = vpop.f32.mrb[8].mxu1 }
 0x220   : > { %v13526_v23 = vpop.f32.mrb[9].mxu1  ;;  %1466 = vmatmul.mubr.f32.gmra.mrb[114].mxu1 %v565_v11  ;;  %v12231_v11 = vld [vmem:[%s12964_s17 + $0x40] sm:$0xff] }
 0x221   : > { %8507 = vmatprep.mubr.msk.f32.mxu1 %vm12601_vm2, %v16580_v40 }
 0x223   : > { %v13532_v47 = vpop.f32.mrb[10].mxu1 }
 0x224   : > { %v13534_v60 = vpop.f32.mrb[11].mxu1  ;;  %8508 = vmatmul.mubr.msk.f32.vlgmr.msra.gmra.mrb[58].mxu1 %vm685_vm1, %v12229_v16 }
 0x225   : > { %9874 = vmatpush3.bf16.msra.mxu1 %v13530_v32  ;;  %8510 = vmatprep.mubr.msk.f32.mxu1 %vm12601_vm2, %v16580_v40 }
 0x226   : > { %9875 = vmatprep.subr.bf16.mxu1 %v16579_v26 }
 0x227   : > { %v13544_v27 = vpop.f32.mrb[12].mxu1 }
 0x228   : > { %v13546_v28 = vpop.f32.mrb[13].mxu1  ;;  %8511 = vmatmul.mubr.msk.f32.gmra.mrb[60].mxu1 %vm685_vm1, %v12230_v38  ;;  %v2133_v38 = vld [vmem:[#allocation10 + $0x100] sm:$0xff] }
 0x229   : > { %8513 = vmatprep.mubr.msk.f32.mxu1 %vm12601_vm2, %v16580_v40  ;;  %9877 = vmatpush3.bf16.msra.mxu1 %v13541_v5 }
 0x22a   : > { %9878 = vmatprep.subr.bf16.mxu1 %v16579_v26 }
 0x22b   : > { %v13556_v58 = vpop.f32.mrb[14].mxu1 }
 0x22c   : > { %v13558_v7 = vpop.f32.mrb[15].mxu1  ;;  %8514 = vmatmul.mubr.msk.f32.gmra.mrb[62].mxu1 %vm685_vm1, %v12231_v11 }
 0x22d   : > { %8516 = vmatprep.mubr.msk.f32.mxu1 %vm12601_vm2, %v16580_v40  ;;  %9880 = vmatpush3.bf16.msra.mxu1 %v13553_v39 }
 0x22e   : > { %9881 = vmatprep.subr.bf16.mxu1 %v16579_v26 }
 0x22f   : > { %v13568_v44 = vpop.f32.mrb[16].mxu1 }
 0x230   : > { %v13570_v16 = vpop.f32.mrb[17].mxu1  ;;  %8517 = vmatmul.mubr.msk.f32.gmra.mrb[64].mxu1 %vm685_vm1, %v12232_v17  ;;  %v13589_v17 = vpack.c.bf16 %v2136_v49, %v2133_v38  ;;  %v2145_v38 = vld [vmem:[#allocation10 + $0x160] sm:$0xff]  ;;  %v2148_v49 = vld [vmem:[#allocation10 + $0x178] sm:$0xff] }
 0x231   : > { %8519 = vmatprep.mubr.msk.f32.mxu1 %vm12601_vm2, %v16580_v40  ;;  %9883 = vmatpush3.bf16.msra.mxu1 %v13565_v10 }
 0x232   : > { %9884 = vmatprep.subr.bf16.mxu1 %v16579_v26  ;;  %16582 = vst [vmem:[#allocation50_spill] sm:$0xff] %v13589_v17 }
 0x233   : > { %v13580_v50 = vpop.f32.mrb[18].mxu1 }
 0x234   : > { %v13582_v11 = vpop.f32.mrb[19].mxu1  ;;  %8520 = vmatmul.mubr.msk.f32.gmra.mrb[66].mxu1 %vm685_vm1, %v12233_v46  ;;  %v13601_v46 = vpack.c.bf16 %v2142_v35, %v2139_v13 }
 0x235   : > { %8522 = vmatprep.mubr.msk.f32.mxu1 %vm12601_vm2, %v16580_v40  ;;  %9886 = vmatpush3.bf16.msra.mxu1 %v13577_v25 }
 0x236   : > { %9887 = vmatprep.subr.bf16.mxu1 %v16579_v26  ;;  %16583 = vst [vmem:[#allocation51_spill] sm:$0xff] %v13601_v46 }
 0x237   : > { %v13592_v18 = vpop.f32.mrb[20].mxu1 }
 0x238   : > { %v13594_v6 = vpop.f32.mrb[21].mxu1  ;;  %8523 = vmatmul.mubr.msk.f32.gmra.mrb[68].mxu1 %vm685_vm1, %v12234_v4  ;;  %v13613_v4 = vpack.c.bf16 %v2148_v49, %v2145_v38 }
 0x239   : > { %8525 = vmatprep.mubr.msk.f32.mxu1 %vm12601_vm2, %v16580_v40  ;;  %9889 = vmatpush3.bf16.msra.mxu1 %v13589_v17 }
 0x23a   : > { %9890 = vmatprep.subr.bf16.mxu1 %v16579_v26  ;;  %16584 = vst [vmem:[#allocation52_spill] sm:$0xff] %v13613_v4 }
 0x23b   : > { %v13604_v48 = vpop.f32.mrb[22].mxu1 }
 0x23c   : > { %v13606_v45 = vpop.f32.mrb[23].mxu1  ;;  %8526 = vmatmul.mubr.msk.f32.gmra.mrb[70].mxu1 %vm685_vm1, %v12235_v36  ;;  %v16376_v36 = vlaneseq }
 0x23d   : > { %8528 = vmatprep.mubr.msk.f32.mxu1 %vm12601_vm2, %v16580_v40  ;;  %9892 = vmatpush3.bf16.msra.mxu1 %v13601_v46 }
 0x23e   : > { %9893 = vmatprep.subr.bf16.mxu1 %v16579_v26 }
 0x23f   : > { %v13616_v13 = vpop.f32.mrb[24].mxu1 }
 0x240   : > { %v13618_v35 = vpop.f32.mrb[25].mxu1  ;;  %8529 = vmatmul.mubr.msk.f32.gmra.mrb[72].mxu1 %vm685_vm1, %v12236_v33  ;;  %v13635_v33 = vshrl.u32 %v16376_v36, 7 }
 0x241   : > { %8531 = vmatprep.mubr.msk.f32.mxu1 %vm12601_vm2, %v16580_v40  ;;  %9895 = vmatpush3.bf16.msra.mxu1 %v13613_v4 }
 0x242   : > { %9928 = vmatprep.subr.bf16.mxu1 %v16579_v26  ;;  %16585 = vst [vmem:[#allocation53_spill] sm:$0xff] %v13635_v33  ;;  %v672_v14 = vsub.s32 0, %v13635_v33 }
 0x243   : > { %v13626_v24 = vpop.f32.mrb[26].mxu1 }
 0x244   : > { %v13628_v38 = vpop.f32.mrb[27].mxu1  ;;  %8532 = vmatmul.mubr.msk.f32.gmra.mrb[74].mxu1 %vm685_vm1, %v13032_v31  ;;  %v676_v31 = vsub.s32 1, %v13635_v33  ;;  %v13656_v1 = vrot.slane %v13646_v12, %v672_v14 }
 0x245   : > { %8534 = vmatprep.mubr.msk.f32.mxu1 %vm12601_vm2, %v16580_v40 }
 0x247   : > { %v13637_v49 = vpop.f32.mrb[28].mxu1 }
 0x248   : > { %v13639_v22 = vpop.f32.mrb[29].mxu1  ;;  %8535 = vmatmul.mubr.msk.f32.gmra.mrb[76].mxu1 %vm685_vm1, %v13043_v42  ;;  %v13661_v42 = vrot.slane %v13646_v12, %v676_v31 }
 0x249   : > { %8537 = vmatprep.mubr.msk.f32.mxu1 %vm12601_vm2, %v16580_v40 }
 0x24b   : > { %v13649_v3 = vpop.f32.mrb[30].mxu1 }
 0x24c   : > { %v13651_v36 = vpop.f32.mrb[31].mxu1  ;;  %8538 = vmatmul.mubr.msk.f32.gmra.mrb[78].mxu1 %vm685_vm1, %v13050_v52 }
 0x24d   : > { %8540 = vmatprep.mubr.msk.f32.mxu1 %vm12601_vm2, %v16580_v40 }
 0x24f   : > { %v13663_v56 = vpop.f32.mrb[32].mxu1 }
 0x250   : > { %v13665_v33 = vpop.f32.mrb[33].mxu1  ;;  %8541 = vmatmul.mubr.msk.f32.gmra.mrb[80].mxu1 %vm685_vm1, %v13057_v62 }
 0x251   : > { %v849_v54 = vpop.f32.mrb[0].mxu0  ;;  %8543 = vmatprep.mubr.msk.f32.mxu1 %vm12601_vm2, %v16580_v40 }
 0x252   : > { %v850_v4 = vadd.f32 %v849_v54, %v13656_v1  ;;  %v851_v52 = vpop.f32.mrb[1].mxu0 }
 0x253   : > { %v852_v14 = vadd.f32 %v851_v52, %v13661_v42  ;;  %v13676_v31 = vpop.f32.mrb[34].mxu1 }
 0x254   : > { %v13674_v46 = vadd.f32 %v13503_v37, %v850_v4  ;;  %v13681_v25 = vpop.f32.mrb[35].mxu1  ;;  %8544 = vmatmul.mubr.msk.f32.gmra.mrb[82].mxu1 %vm685_vm1, %v13064_v9 }
 0x255   : > { %v13679_v12 = vadd.f32 %v13506_v15, %v852_v14  ;;  %v855_v17 = vpop.f32.mrb[2].mxu0  ;;  %8546 = vmatprep.mubr.msk.f32.mxu1 %vm12601_vm2, %v16580_v40 }
 0x256   : > { %16587 = vst [vmem:[#allocation55_spill] sm:$0xff] %v13674_v46  ;;  %v856_v62 = vadd.f32 %v855_v17, %v13656_v1  ;;  %v857_v54 = vpop.f32.mrb[3].mxu0 }
 0x257   : > { %16588 = vst [vmem:[#allocation56_spill] sm:$0xff] %v13679_v12  ;;  %v858_v37 = vadd.f32 %v857_v54, %v13661_v42  ;;  %v13692_v52 = vpop.f32.mrb[36].mxu1 }
 0x258   : > { %v13690_v4 = vadd.f32 %v13510_v34, %v856_v62  ;;  %v13697_v12 = vpop.f32.mrb[37].mxu1  ;;  %8547 = vmatmul.mubr.msk.f32.gmra.mrb[84].mxu1 %vm685_vm1, %v13071_v20 }
 0x259   : > { %v13695_v15 = vadd.f32 %v13512_v53, %v858_v37  ;;  %v861_v14 = vpop.f32.mrb[4].mxu0  ;;  %8549 = vmatprep.mubr.msk.f32.mxu1 %vm12601_vm2, %v16580_v40 }
 0x25a   : > { %16589 = vst [vmem:[#allocation57_spill] sm:$0xff] %v13690_v4  ;;  %v862_v9 = vadd.f32 %v861_v14, %v13656_v1  ;;  %v863_v17 = vpop.f32.mrb[5].mxu0 }
 0x25b   : > { %16590 = vst [vmem:[#allocation58_spill] sm:$0xff] %v13695_v15  ;;  %v864_v34 = vadd.f32 %v863_v17, %v13661_v42  ;;  %v13708_v54 = vpop.f32.mrb[38].mxu1 }
 0x25c   : > { %v13706_v62 = vadd.f32 %v13516_v57, %v862_v9  ;;  %v13713_v46 = vpop.f32.mrb[39].mxu1  ;;  %8550 = vmatmul.mubr.msk.f32.gmra.mrb[116].mxu1 %vm685_vm1, %v13078_v30 }
 0x25d   : > { %v13711_v53 = vadd.f32 %v13518_v55, %v864_v34  ;;  %v867_v37 = vpop.f32.mrb[6].mxu0  ;;  %8552 = vmatprep.mubr.msk.f32.mxu1 %vm12601_vm2, %v16580_v40 }
 0x25e   : > { %16591 = vst [vmem:[#allocation59_spill] sm:$0xff] %v13706_v62  ;;  %v868_v20 = vadd.f32 %v867_v37, %v13656_v1  ;;  %v869_v14 = vpop.f32.mrb[7].mxu0 }
 0x25f   : > { %16592 = vst [vmem:[#allocation60_spill] sm:$0xff] %v13711_v53  ;;  %v870_v57 = vadd.f32 %v869_v14, %v13661_v42  ;;  %v13724_v17 = vpop.f32.mrb[40].mxu1 }
 0x260   : > { %v13722_v9 = vadd.f32 %v13520_v63, %v868_v20  ;;  %v13729_v15 = vpop.f32.mrb[41].mxu1  ;;  %8553 = vmatmul.mubr.msk.f32.gmra.mrb[88].mxu1 %vm685_vm1, %v13085_v43 }
 0x261   : > { %v13727_v55 = vadd.f32 %v13522_v2, %v870_v57  ;;  %v873_v34 = vpop.f32.mrb[8].mxu0  ;;  %8555 = vmatprep.mubr.msk.f32.mxu1 %vm12601_vm2, %v16580_v40 }
 0x262   : > { %16593 = vst [vmem:[#allocation61_spill] sm:$0xff] %v13722_v9  ;;  %v874_v30 = vadd.f32 %v873_v34, %v13656_v1  ;;  %v875_v37 = vpop.f32.mrb[9].mxu0 }
 0x263   : > { %16594 = vst [vmem:[#allocation62_spill] sm:$0xff] %v13727_v55  ;;  %v876_v63 = vadd.f32 %v875_v37, %v13661_v42  ;;  %v13740_v14 = vpop.f32.mrb[42].mxu1 }
 0x264   : > { %v13738_v20 = vadd.f32 %v13524_v21, %v874_v30  ;;  %v13745_v4 = vpop.f32.mrb[43].mxu1  ;;  %8556 = vmatmul.mubr.msk.f32.gmra.mrb[90].mxu1 %vm685_vm1, %v13094_v51 }
 0x265   : > { %v13743_v2 = vadd.f32 %v13526_v23, %v876_v63  ;;  %v879_v57 = vpop.f32.mrb[10].mxu0  ;;  %8558 = vmatprep.mubr.msk.f32.mxu1 %vm12601_vm2, %v16580_v40 }
 0x266   : > { %v880_v43 = vadd.f32 %v879_v57, %v13656_v1  ;;  %v881_v34 = vpop.f32.mrb[11].mxu0 }
 0x267   : > { %16595 = vst [vmem:[#allocation63_spill] sm:$0xff] %v13743_v2  ;;  %v882_v21 = vadd.f32 %v881_v34, %v13661_v42  ;;  %v13756_v37 = vpop.f32.mrb[44].mxu1 }
 0x268   : > { %v13754_v30 = vadd.f32 %v13532_v47, %v880_v43  ;;  %v13761_v53 = vpop.f32.mrb[45].mxu1  ;;  %8559 = vmatmul.mubr.msk.f32.gmra.mrb[92].mxu1 %vm685_vm1, %v13113_v61 }
 0x269   : > { %v13759_v23 = vadd.f32 %v13534_v60, %v882_v21  ;;  %v885_v63 = vpop.f32.mrb[12].mxu0  ;;  %8561 = vmatprep.mubr.msk.f32.mxu1 %vm12601_vm2, %v16580_v40 }
 0x26a   : > { %v886_v51 = vadd.f32 %v885_v63, %v13656_v1  ;;  %v887_v57 = vpop.f32.mrb[13].mxu0 }
 0x26b   : > { %16596 = vst [vmem:[#allocation64_spill] sm:$0xff] %v13759_v23  ;;  %v888_v47 = vadd.f32 %v887_v57, %v13661_v42  ;;  %v13772_v34 = vpop.f32.mrb[46].mxu1 }
 0x26c   : > { %v13770_v43 = vadd.f32 %v13544_v27, %v886_v51  ;;  %v13777_v62 = vpop.f32.mrb[47].mxu1  ;;  %8562 = vmatmul.mubr.msk.f32.gmra.mrb[94].mxu1 %vm685_vm1, %v13133_v8 }
 0x26d   : > { %v13775_v60 = vadd.f32 %v13546_v28, %v888_v47  ;;  %v891_v21 = vpop.f32.mrb[14].mxu0  ;;  %8564 = vmatprep.mubr.msk.f32.mxu1 %vm12601_vm2, %v16580_v40 }
 0x26e   : > { %v892_v61 = vadd.f32 %v891_v21, %v13656_v1  ;;  %v893_v63 = vpop.f32.mrb[15].mxu0 }
 0x26f   : > { %16597 = vst [vmem:[#allocation65_spill] sm:$0xff] %v13775_v60  ;;  %v894_v27 = vadd.f32 %v893_v63, %v13661_v42  ;;  %v13788_v57 = vpop.f32.mrb[48].mxu1 }
 0x270   : > { %v13786_v51 = vadd.f32 %v13556_v58, %v892_v61  ;;  %v13793_v55 = vpop.f32.mrb[49].mxu1  ;;  %8565 = vmatmul.mubr.msk.f32.gmra.mrb[96].mxu1 %vm685_vm1, %v13153_v19 }
 0x271   : > { %v13791_v28 = vadd.f32 %v13558_v7, %v894_v27  ;;  %v897_v47 = vpop.f32.mrb[16].mxu0  ;;  %8567 = vmatprep.mubr.msk.f32.mxu1 %vm12601_vm2, %v16580_v40 }
 0x272   : > { %v898_v8 = vadd.f32 %v897_v47, %v13656_v1  ;;  %v899_v21 = vpop.f32.mrb[17].mxu0 }
 0x273   : > { %16598 = vst [vmem:[#allocation66_spill] sm:$0xff] %v13791_v28  ;;  %v900_v58 = vadd.f32 %v899_v21, %v13661_v42  ;;  %v13804_v63 = vpop.f32.mrb[50].mxu1 }
 0x274   : > { %v13802_v61 = vadd.f32 %v13568_v44, %v898_v8  ;;  %16599 = vst [vmem:[#allocation67_spill] sm:$0xff] %v13804_v63  ;;  %v13809_v9 = vpop.f32.mrb[51].mxu1  ;;  %8568 = vmatmul.mubr.msk.f32.gmra.mrb[98].mxu1 %vm685_vm1, %v13173_v29  ;;  %v16619_v63 = vld [vmem:[#allocation46_spill] sm:$0xff] }
 0x275   : > { %v13807_v7 = vadd.f32 %v13570_v16, %v900_v58  ;;  %v903_v27 = vpop.f32.mrb[18].mxu0  ;;  %16601 = vst [vmem:[#allocation69_spill] sm:$0xff] %v13809_v9  ;;  %8570 = vmatprep.mubr.msk.f32.mxu1 %vm12601_vm2, %v16580_v40 }
 0x276   : > { %v904_v19 = vadd.f32 %v903_v27, %v13656_v1  ;;  %v905_v47 = vpop.f32.mrb[19].mxu0 }
 0x277   : > { %16600 = vst [vmem:[#allocation68_spill] sm:$0xff] %v13807_v7  ;;  %v906_v44 = vadd.f32 %v905_v47, %v13661_v42  ;;  %v13820_v21 = vpop.f32.mrb[52].mxu1 }
 0x278   : > { %v13818_v8 = vadd.f32 %v13580_v50, %v904_v19  ;;  %16602 = vst [vmem:[#allocation70_spill] sm:$0xff] %v13820_v21  ;;  %v13825_v9 = vpop.f32.mrb[53].mxu1  ;;  %8571 = vmatmul.mubr.msk.f32.gmra.mrb[100].mxu1 %vm685_vm1, %v13193_v41 }
 0x279   : > { %v13823_v16 = vadd.f32 %v13582_v11, %v906_v44  ;;  %v909_v58 = vpop.f32.mrb[20].mxu0  ;;  %16604 = vst [vmem:[#allocation72_spill] sm:$0xff] %v13825_v9  ;;  %8573 = vmatprep.mubr.msk.f32.mxu1 %vm12601_vm2, %v16580_v40 }
 0x27a   : > { %v910_v29 = vadd.f32 %v909_v58, %v13656_v1  ;;  %v911_v27 = vpop.f32.mrb[21].mxu0 }
 0x27b   : > { %16603 = vst [vmem:[#allocation71_spill] sm:$0xff] %v13823_v16  ;;  %v912_v50 = vadd.f32 %v911_v27, %v13661_v42  ;;  %v13836_v47 = vpop.f32.mrb[54].mxu1  ;;  %v16683_v16 = vld [vmem:[#allocation54_spill] sm:$0xff] }
 0x27c   : > { %v13834_v19 = vadd.f32 %v13592_v18, %v910_v29  ;;  %16605 = vst [vmem:[#allocation73_spill] sm:$0xff] %v13836_v47  ;;  %v13841_v9 = vpop.f32.mrb[55].mxu1  ;;  %8574 = vmatmul.mubr.msk.f32.gmra.mrb[102].mxu1 %vm685_vm1, %v13213_v59  ;;  %v16611_v59 = vld [vmem:[#allocation42_spill] sm:$0xff] }
 0x27d   : > { %v13839_v11 = vadd.f32 %v13594_v6, %v912_v50  ;;  %v915_v44 = vpop.f32.mrb[22].mxu0  ;;  %16607 = vst [vmem:[#allocation75_spill] sm:$0xff] %v13841_v9  ;;  %8576 = vmatprep.mubr.msk.f32.mxu1 %vm12601_vm2, %v16580_v40 }
 0x27e   : > { %v916_v41 = vadd.f32 %v915_v44, %v13656_v1  ;;  %v917_v58 = vpop.f32.mrb[23].mxu0 }
 0x27f   : > { %16606 = vst [vmem:[#allocation74_spill] sm:$0xff] %v13839_v11  ;;  %v918_v18 = vadd.f32 %v917_v58, %v13661_v42  ;;  %v13852_v27 = vpop.f32.mrb[56].mxu1  ;;  %v16612_v58 = vlaneseq }
 0x280   : > { %v13850_v29 = vadd.f32 %v13604_v48, %v916_v41  ;;  %16608 = vst [vmem:[#allocation76_spill] sm:$0xff] %v13852_v27  ;;  %v13857_v9 = vpop.f32.mrb[57].mxu1  ;;  %8577 = vmatmul.mubr.msk.f32.gmra.mrb[104].mxu1 %vm685_vm1, %v16611_v59 }
 0x281   : > { %v13855_v6 = vadd.f32 %v13606_v45, %v918_v18  ;;  %v921_v50 = vpop.f32.mrb[24].mxu0  ;;  %16610 = vst [vmem:[#allocation78_spill] sm:$0xff] %v13857_v9  ;;  %8579 = vmatprep.mubr.msk.f32.mxu1 %vm12601_vm2, %v16580_v40  ;;  %v13867_v27 = vand.u32 127, %v16612_v58  ;;  %v16615_v9 = vld [vmem:[#allocation44_spill] sm:$0xff] }
 0x282   : > { %v922_v44 = vadd.f32 %v921_v50, %v13656_v1  ;;  %v923_v47 = vpop.f32.mrb[25].mxu0 }
 0x283   : > { %16609 = vst [vmem:[#allocation77_spill] sm:$0xff] %v13855_v6  ;;  %v924_v48 = vadd.f32 %v923_v47, %v13661_v42  ;;  %16613 = vst [vmem:[#allocation42_spill] sm:$0xff] %v13867_v27  ;;  %vm1808_vm3 = vcmp.lt.s32.totalorder %v13867_v27, 64 }
 0x284   : > { %v1161_v41 = vadd.f32 %v13616_v13, %v922_v44  ;;  %8580 = vmatmul.mubr.msk.f32.gmra.mrb[106].mxu1 %vm685_vm1, %v16615_v9  ;;  %v1770_v44 = vadd.s32 128, %v13867_v27 }
 0x285   : > { %v13870_v45 = vadd.f32 %v13618_v35, %v924_v48  ;;  %v927_v18 = vpop.f32.mrb[26].mxu0  ;;  %8582 = vmatprep.mubr.msk.f32.mxu1 %vm12601_vm2, %v16580_v40  ;;  %v16617_v48 = vld [vmem:[#allocation45_spill] sm:$0xff] }
 0x286   : > { %v928_v50 = vadd.f32 %v927_v18, %v13656_v1  ;;  %v929_v59 = vpop.f32.mrb[27].mxu0 }
 0x287   : > { %16614 = vst [vmem:[#allocation79_spill] sm:$0xff] %v13870_v45  ;;  %v930_v47 = vadd.f32 %v929_v59, %v13661_v42  ;;  %v1783_v59 = vand.u32 127, %v1770_v44 }
 0x288   : > { %v1167_v13 = vadd.f32 %v13626_v24, %v928_v50  ;;  %8583 = vmatmul.mubr.msk.f32.gmra.mrb[108].mxu1 %vm685_vm1, %v16617_v48 }
 0x289   : > { %v13881_v58 = vadd.f32 %v13628_v38, %v930_v47  ;;  %v933_v35 = vpop.f32.mrb[28].mxu0  ;;  %8585 = vmatprep.mubr.msk.f32.mxu1 %vm12601_vm2, %v16580_v40  ;;  %vm13903_vm4 = vcmp.lt.s32.totalorder %v1783_v59, 64 }
 0x28a   : > { %v934_v9 = vadd.f32 %v933_v35, %v13656_v1  ;;  %v935_v18 = vpop.f32.mrb[29].mxu0 }
 0x28b   : > { %16616 = vst [vmem:[#allocation44_spill] sm:$0xff] %v13881_v58  ;;  %v936_v21 = vadd.f32 %v935_v18, %v13661_v42 }
 0x28c   : > { %v13890_v24 = vadd.f32 %v13637_v49, %v934_v9  ;;  %8586 = vmatmul.mubr.msk.f32.gmra.mrb[110].mxu1 %vm685_vm1, %v16619_v63 }
 0x28d   : > { %v939_v50 = vpop.f32.mrb[30].mxu0  ;;  %v13895_v38 = vadd.f32 %v13639_v22, %v936_v21  ;;  %8588 = vmatprep.mubr.msk.f32.mxu1 %vm12601_vm2, %v16580_v40  ;;  %v16624_v21 = vld [vmem:[#allocation47_spill] sm:$0xff] }
 0x28e   : > { %16618 = vst [vmem:[#allocation45_spill] sm:$0xff] %v13890_v24  ;;  %v940_v47 = vadd.f32 %v939_v50, %v13656_v1  ;;  %v941_v35 = vpop.f32.mrb[31].mxu0 }
 0x28f   : > { %16620 = vst [vmem:[#allocation46_spill] sm:$0xff] %v13895_v38  ;;  %v942_v48 = vadd.f32 %v941_v35, %v13661_v42 }
 0x290   : > { %v1179_v49 = vadd.f32 %v13649_v3, %v940_v47  ;;  %8589 = vmatmul.mubr.msk.f32.gmra.mrb[112].mxu1 %vm685_vm1, %v16624_v21 }
 0x291   : > { %v13908_v63 = vadd.f32 %v13651_v36, %v942_v48  ;;  %v945_v22 = vpop.f32.mrb[32].mxu0  ;;  %8591 = vmatprep.mubr.msk.f32.mxu1 %vm12601_vm2, %v16580_v40 }
 0x292   : > { %v946_v9 = vadd.f32 %v945_v22, %v13656_v1  ;;  %v947_v18 = vpop.f32.mrb[33].mxu0  ;;  %v13917_v3 = vsel %vm1808_vm3, %v1167_v13, %v1179_v49  ;;  %v13921_v59 = vsel %vm1808_vm3, %v1179_v49, %v1167_v13  ;;  %v16628_v13 = vld [vmem:[#allocation48_spill] sm:$0xff] }
 0x293   : > { %16623 = vst [vmem:[#allocation80_spill] sm:$0xff] %v13908_v63  ;;  %16625 = vst [vmem:[#allocation47_spill] sm:$0xff] %v13917_v3  ;;  %v948_v36 = vadd.f32 %v947_v18, %v13661_v42 }
 0x294   : > { %16626 = vst [vmem:[#allocation81_spill] sm:$0xff] %v13921_v59  ;;  %v1185_v35 = vadd.f32 %v13663_v56, %v946_v9  ;;  %8592 = vmatmul.mubr.msk.f32.gmra.mrb[114].mxu1 %vm685_vm1, %v16628_v13  ;;  %v16671_v59 = vld [vmem:[#allocation75_spill] sm:$0xff] }
 0x295   : > { %v13934_v48 = vadd.f32 %v13665_v33, %v948_v36  ;;  %v951_v22 = vpop.f32.mrb[34].mxu0  ;;  %8626 = vmatprep.mubr.msk.f32.mxu1 %vm12601_vm2, %v16580_v40 }
 0x296   : > { %v952_v49 = vadd.f32 %v951_v22, %v13656_v1  ;;  %v953_v21 = vpop.f32.mrb[35].mxu0  ;;  %v13943_v18 = vsel %vm1808_vm3, %v1161_v41, %v1185_v35  ;;  %v13947_v56 = vsel %vm1808_vm3, %v1185_v35, %v1161_v41 }
 0x297   : > { %16627 = vst [vmem:[#allocation82_spill] sm:$0xff] %v13934_v48  ;;  %16629 = vst [vmem:[#allocation48_spill] sm:$0xff] %v13943_v18  ;;  %v954_v33 = vadd.f32 %v953_v21, %v13661_v42 }
 0x298   : > { %16630 = vst [vmem:[#allocation83_spill] sm:$0xff] %v13947_v56  ;;  %v1191_v22 = vadd.f32 %v13676_v31, %v952_v49  ;;  %8627 = vmatmul.mubr.f32.vlgmr.msra.gmra.mrb[118].mxu1 %v13468_v0  ;;  %v16644_v31 = vld [vmem:[#allocation49_spill] sm:$0xff]  ;;  %v16667_v56 = vld [vmem:[#allocation59_spill] sm:$0xff] }
 0x299   : > { %v13960_v13 = vadd.f32 %v13681_v25, %v954_v33  ;;  %v957_v47 = vpop.f32.mrb[36].mxu0  ;;  %9930 = vmatpush3.bf16.msra.mxu1 %v13530_v32  ;;  %8661 = vmatprep.mubr.msk.f32.mxu1 %vm12601_vm2, %v16580_v40 }
 0x29a   : > { %v958_v41 = vadd.f32 %v957_v47, %v13656_v1  ;;  %v959_v35 = vpop.f32.mrb[37].mxu0  ;;  %v13970_v21 = vsel %vm1808_vm3, %v13850_v29, %v1191_v22  ;;  %v13975_v25 = vsel %vm1808_vm3, %v1191_v22, %v13850_v29  ;;  %9931 = vmatprep.subr.bf16.mxu1 %v16579_v26 }
 0x29b   : > { %16631 = vst [vmem:[#allocation84_spill] sm:$0xff] %v13960_v13  ;;  %16632 = vst [vmem:[#allocation85_spill] sm:$0xff] %v13970_v21  ;;  %v960_v0 = vadd.f32 %v959_v35, %v13661_v42 }
 0x29c   : > { %16633 = vst [vmem:[#allocation86_spill] sm:$0xff] %v13975_v25  ;;  %v1197_v49 = vadd.f32 %v13692_v52, %v958_v41 }
 0x29d   : > { %v13989_v33 = vadd.f32 %v13697_v12, %v960_v0  ;;  %v963_v29 = vpop.f32.mrb[38].mxu0  ;;  %9933 = vmatpush3.bf16.msra.mxu1 %v13541_v5 }
 0x29e   : > { %v964_v22 = vadd.f32 %v963_v29, %v13656_v1  ;;  %v965_v35 = vpop.f32.mrb[39].mxu0  ;;  %v13996_v36 = vsel %vm1808_vm3, %v13834_v19, %v1197_v49  ;;  %v14001_v47 = vsel %vm1808_vm3, %v1197_v49, %v13834_v19  ;;  %9934 = vmatprep.subr.bf16.mxu1 %v16579_v26 }
 0x29f   : > { %16634 = vst [vmem:[#allocation87_spill] sm:$0xff] %v13989_v33  ;;  %16635 = vst [vmem:[#allocation88_spill] sm:$0xff] %v13996_v36  ;;  %v966_v52 = vadd.f32 %v965_v35, %v13661_v42 }
 0x2a0   : > { %16636 = vst [vmem:[#allocation89_spill] sm:$0xff] %v14001_v47  ;;  %v1203_v0 = vadd.f32 %v13708_v54, %v964_v22  ;;  %v16665_v47 = vld [vmem:[#allocation72_spill] sm:$0xff] }
 0x2a1   : > { %v14015_v29 = vadd.f32 %v13713_v46, %v966_v52  ;;  %v969_v19 = vpop.f32.mrb[40].mxu0  ;;  %9936 = vmatpush3.bf16.msra.mxu1 %v13553_v39  ;;  %v16648_v46 = vld [vmem:[#allocation50_spill] sm:$0xff] }
 0x2a2   : > { %v970_v49 = vadd.f32 %v969_v19, %v13656_v1  ;;  %v971_v35 = vpop.f32.mrb[41].mxu0  ;;  %v14022_v50 = vsel %vm1808_vm3, %v13818_v8, %v1203_v0  ;;  %v14027_v41 = vsel %vm1808_vm3, %v1203_v0, %v13818_v8  ;;  %9937 = vmatprep.subr.bf16.mxu1 %v16579_v26 }
 0x2a3   : > { %16637 = vst [vmem:[#allocation90_spill] sm:$0xff] %v14015_v29  ;;  %16638 = vst [vmem:[#allocation91_spill] sm:$0xff] %v14022_v50  ;;  %v972_v54 = vadd.f32 %v971_v35, %v13661_v42 }
 0x2a4   : > { %16639 = vst [vmem:[#allocation92_spill] sm:$0xff] %v14027_v41  ;;  %v1209_v52 = vadd.f32 %v13724_v17, %v970_v49 }
 0x2a5   : > { %v14041_v19 = vadd.f32 %v13729_v15, %v972_v54  ;;  %v975_v8 = vpop.f32.mrb[42].mxu0  ;;  %9939 = vmatpush3.bf16.msra.mxu1 %v13565_v10 }
 0x2a6   : > { %v976_v0 = vadd.f32 %v975_v8, %v13656_v1  ;;  %v977_v35 = vpop.f32.mrb[43].mxu0  ;;  %v14048_v9 = vsel %vm1808_vm3, %v13802_v61, %v1209_v52  ;;  %v14053_v22 = vsel %vm1808_vm3, %v1209_v52, %v13802_v61  ;;  %9940 = vmatprep.subr.bf16.mxu1 %v16579_v26 }
 0x2a7   : > { %16640 = vst [vmem:[#allocation93_spill] sm:$0xff] %v14041_v19  ;;  %16641 = vst [vmem:[#allocation94_spill] sm:$0xff] %v14048_v9  ;;  %v978_v17 = vadd.f32 %v977_v35, %v13661_v42 }
 0x2a8   : > { %16642 = vst [vmem:[#allocation95_spill] sm:$0xff] %v14053_v22  ;;  %v1215_v54 = vadd.f32 %v13740_v14, %v976_v0 }
 0x2a9   : > { %v14067_v8 = vadd.f32 %v13745_v4, %v978_v17  ;;  %v981_v61 = vpop.f32.mrb[44].mxu0  ;;  %9942 = vmatpush3.bf16.msra.mxu1 %v16644_v31  ;;  %v16652_v4 = vld [vmem:[#allocation51_spill] sm:$0xff] }
 0x2aa   : > { %v982_v52 = vadd.f32 %v981_v61, %v13656_v1  ;;  %v983_v35 = vpop.f32.mrb[45].mxu0  ;;  %v14074_v12 = vsel %vm1808_vm3, %v13786_v51, %v1215_v54  ;;  %v14079_v49 = vsel %vm1808_vm3, %v1215_v54, %v13786_v51  ;;  %9943 = vmatprep.subr.bf16.mxu1 %v16579_v26 }
 0x2ab   : > { %16643 = vst [vmem:[#allocation96_spill] sm:$0xff] %v14067_v8  ;;  %16645 = vst [vmem:[#allocation49_spill] sm:$0xff] %v14074_v12  ;;  %v984_v14 = vadd.f32 %v983_v35, %v13661_v42 }
 0x2ac   : > { %16646 = vst [vmem:[#allocation97_spill] sm:$0xff] %v14079_v49  ;;  %v1221_v17 = vadd.f32 %v13756_v37, %v982_v52 }
 0x2ad   : > { %v14093_v61 = vadd.f32 %v13761_v53, %v984_v14  ;;  %v987_v51 = vpop.f32.mrb[46].mxu0  ;;  %9945 = vmatpush3.bf16.msra.mxu1 %v16648_v46 }
 0x2ae   : > { %v988_v54 = vadd.f32 %v987_v51, %v13656_v1  ;;  %v989_v35 = vpop.f32.mrb[47].mxu0  ;;  %v14100_v15 = vsel %vm1808_vm3, %v13770_v43, %v1221_v17  ;;  %v14105_v0 = vsel %vm1808_vm3, %v1221_v17, %v13770_v43  ;;  %9946 = vmatprep.subr.bf16.mxu1 %v16579_v26 }
 0x2af   : > { %16647 = vst [vmem:[#allocation98_spill] sm:$0xff] %v14093_v61  ;;  %16649 = vst [vmem:[#allocation50_spill] sm:$0xff] %v14100_v15  ;;  %v990_v37 = vadd.f32 %v989_v35, %v13661_v42 }
 0x2b0   : > { %16650 = vst [vmem:[#allocation99_spill] sm:$0xff] %v14105_v0  ;;  %v1227_v14 = vadd.f32 %v13772_v34, %v988_v54  ;;  %v16659_v0 = vld [vmem:[#allocation69_spill] sm:$0xff] }
 0x2b1   : > { %v14119_v51 = vadd.f32 %v13777_v62, %v990_v37  ;;  %v993_v43 = vpop.f32.mrb[48].mxu0  ;;  %9948 = vmatpush3.bf16.msra.mxu1 %v16652_v4 }
 0x2b2   : > { %v994_v17 = vadd.f32 %v993_v43, %v13656_v1  ;;  %v995_v35 = vpop.f32.mrb[49].mxu0  ;;  %v14126_v53 = vsel %vm1808_vm3, %v13754_v30, %v1227_v14  ;;  %v14131_v52 = vsel %vm1808_vm3, %v1227_v14, %v13754_v30  ;;  %9949 = vmatprep.subr.bf16.mxu1 %v16579_v26 }
 0x2b3   : > { %16651 = vst [vmem:[#allocation100_spill] sm:$0xff] %v14119_v51  ;;  %16653 = vst [vmem:[#allocation51_spill] sm:$0xff] %v14126_v53  ;;  %v996_v34 = vadd.f32 %v995_v35, %v13661_v42 }
 0x2b4   : > { %16654 = vst [vmem:[#allocation101_spill] sm:$0xff] %v14131_v52  ;;  %v1233_v37 = vadd.f32 %v13788_v57, %v994_v17  ;;  %v16656_v52 = vld [vmem:[#allocation52_spill] sm:$0xff] }
 0x2b5   : > { %v14145_v43 = vadd.f32 %v13793_v55, %v996_v34  ;;  %v999_v30 = vpop.f32.mrb[50].mxu0  ;;  %9951 = vmatpush3.bf16.msra.mxu1 %v16656_v52  ;;  %v16658_v34 = vld [vmem:[#allocation67_spill] sm:$0xff] }
 0x2b6   : > { %v1000_v14 = vadd.f32 %v999_v30, %v13656_v1  ;;  %v1001_v35 = vpop.f32.mrb[51].mxu0  ;;  %v14152_v62 = vsel %vm1808_vm3, %v13738_v20, %v1233_v37  ;;  %v14157_v54 = vsel %vm1808_vm3, %v1233_v37, %v13738_v20  ;;  %9984 = vmatprep.subr.bf16.mxu1 %v16579_v26 }
 0x2b7   : > { %16655 = vst [vmem:[#allocation102_spill] sm:$0xff] %v14145_v43  ;;  %16657 = vst [vmem:[#allocation52_spill] sm:$0xff] %v14157_v54  ;;  %v1002_v57 = vadd.f32 %v1001_v35, %v13661_v42  ;;  %v16661_v54 = vld [vmem:[#allocation61_spill] sm:$0xff] }
 0x2b8   : > { %v1239_v30 = vadd.f32 %v16658_v34, %v1000_v14  ;;  %v16663_v14 = vld [vmem:[#allocation62_spill] sm:$0xff] }
 0x2b9   : > { %v14171_v49 = vadd.f32 %v16659_v0, %v1002_v57  ;;  %v1005_v20 = vpop.f32.mrb[52].mxu0  ;;  %v16664_v34 = vld [vmem:[#allocation70_spill] sm:$0xff] }
 0x2ba   : > { %v1006_v37 = vadd.f32 %v1005_v20, %v13656_v1  ;;  %v1007_v35 = vpop.f32.mrb[53].mxu0  ;;  %v14177_v22 = vsel %vm1808_vm3, %v16661_v54, %v1239_v30  ;;  %v14182_v55 = vsel %vm1808_vm3, %v1239_v30, %v16661_v54 }
 0x2bb   : > { %16660 = vst [vmem:[#allocation67_spill] sm:$0xff] %v14171_v49  ;;  %16662 = vst [vmem:[#allocation69_spill] sm:$0xff] %v14182_v55  ;;  %v1008_v17 = vadd.f32 %v1007_v35, %v13661_v42  ;;  %v1397_v41 = vpop.f32.mrb[86].mxu1 }
 0x2bc   : > { %v1245_v20 = vadd.f32 %v16664_v34, %v1006_v37  ;;  %v1399_v30 = vpop.f32.mrb[87].mxu1 }
 0x2bd   : > { %v14195_v25 = vadd.f32 %v16665_v47, %v1008_v17  ;;  %v1011_v54 = vpop.f32.mrb[54].mxu0  ;;  %v16669_v47 = vld [vmem:[#allocation60_spill] sm:$0xff] }
 0x2be   : > { %v1012_v35 = vadd.f32 %v1011_v54, %v13656_v1  ;;  %v1013_v55 = vpop.f32.mrb[55].mxu0  ;;  %v14201_v0 = vsel %vm1808_vm3, %v16667_v56, %v1245_v20  ;;  %v14206_v57 = vsel %vm1808_vm3, %v1245_v20, %v16667_v56  ;;  %v16670_v54 = vld [vmem:[#allocation73_spill] sm:$0xff] }
 0x2bf   : > { %16666 = vst [vmem:[#allocation61_spill] sm:$0xff] %v14195_v25  ;;  %16668 = vst [vmem:[#allocation70_spill] sm:$0xff] %v14206_v57  ;;  %v1014_v37 = vadd.f32 %v1013_v55, %v13661_v42  ;;  %v16673_v55 = vld [vmem:[#allocation57_spill] sm:$0xff] }
 0x2c0   : > { %v1251_v30 = vadd.f32 %v16670_v54, %v1012_v35  ;;  %v16675_v35 = vld [vmem:[#allocation58_spill] sm:$0xff] }
 0x2c1   : > { %v14219_v38 = vadd.f32 %v16671_v59, %v1014_v37  ;;  %v1017_v24 = vpop.f32.mrb[56].mxu0  ;;  %v16677_v54 = vld [vmem:[#allocation78_spill] sm:$0xff] }
 0x2c2   : > { %v1018_v56 = vadd.f32 %v1017_v24, %v13656_v1  ;;  %v1019_v20 = vpop.f32.mrb[57].mxu0  ;;  %v14225_v57 = vsel %vm1808_vm3, %v16673_v55, %v1251_v30  ;;  %v14230_v17 = vsel %vm1808_vm3, %v1251_v30, %v16673_v55  ;;  %v16676_v24 = vld [vmem:[#allocation76_spill] sm:$0xff]  ;;  %v16679_v30 = vld [vmem:[#allocation55_spill] sm:$0xff] }
 0x2c3   : > { %16672 = vst [vmem:[#allocation72_spill] sm:$0xff] %v14219_v38  ;;  %16674 = vst [vmem:[#allocation59_spill] sm:$0xff] %v14230_v17  ;;  %v1020_v34 = vadd.f32 %v1019_v20, %v13661_v42  ;;  %v16681_v1 = vld [vmem:[#allocation56_spill] sm:$0xff] }
 0x2c4   : > { %v1257_v37 = vadd.f32 %v16676_v24, %v1018_v56 }
 0x2c5   : > { %v14243_v63 = vadd.f32 %v16677_v54, %v1020_v34  ;;  %v2225_v58 = vpop.f32.mrb[58].mxu0 }
 0x2c6   : > { %v1818_v42 = vsel %vm1808_vm3, %v16679_v30, %v1257_v37  ;;  %v2227_v20 = vpop.f32.mrb[59].mxu0  ;;  %v14251_v55 = vsel %vm1808_vm3, %v1257_v37, %v16679_v30 }
 0x2c7   : > { %16678 = vst [vmem:[#allocation73_spill] sm:$0xff] %v14243_v63  ;;  %16680 = vst [vmem:[#allocation75_spill] sm:$0xff] %v14251_v55  ;;  %v14253_v59 = vadd.f32 %v2225_v58, %v1818_v42  ;;  %v1819_v56 = vsel %vm13903_vm4, %v16681_v1, %v14243_v63 }
 0x2c8   : > { %v14263_v24 = vadd.f32 %v2227_v20, %v1819_v56 }
 0x2f7   : > { %v14265_v54 = vpop.f32.mrb[58].mxu1 }
 0x2f8   : > { %v8509_v17 = vpop.f32.mrb[59].mxu1 }
 0x2fb   : > { %v14267_v3 = vpop.f32.mrb[60].mxu1 }
 0x2fc   : > { %v8512_v37 = vpop.f32.mrb[61].mxu1 }
 0x2ff   : > { %v14269_v58 = vpop.f32.mrb[62].mxu1 }
 0x300   : > { %v8515_v30 = vpop.f32.mrb[63].mxu1 }
 0x303   : > { %v14271_v42 = vpop.f32.mrb[64].mxu1 }
 0x304   : > { %v8518_v55 = vpop.f32.mrb[65].mxu1 }
 0x305   : > { %v16682_v55 = vld [vmem:[#allocation53_spill] sm:$0xff] }
 0x306   : > { %v680_v36 = vsub.s32 2, %v16682_v55 }
 0x307   : > { %v14273_v48 = vpop.f32.mrb[66].mxu1 }
 0x308   : > { %v8521_v45 = vpop.f32.mrb[67].mxu1  ;;  %v14281_v50 = vrot.slane %v16683_v16, %v680_v36 }
 0x30b   : > { %v14275_v18 = vpop.f32.mrb[68].mxu1 }
 0x30c   : > { %v8524_v34 = vpop.f32.mrb[69].mxu1 }
 0x30f   : > { %v14277_v20 = vpop.f32.mrb[70].mxu1 }
 0x310   : > { %v8527_v56 = vpop.f32.mrb[71].mxu1 }
 0x311   : > { %v1771_v56 = vadd.s32 256, %v13867_v27 }
 0x313   : > { %v1572_v1 = vpop.f32.mrb[72].mxu1  ;;  %v1790_v7 = vand.u32 127, %v1771_v56 }
 0x314   : > { %v8530_v17 = vpop.f32.mrb[73].mxu1 }
 0x315   : > { %v1398_v17 = vadd.f32 %v1397_v41, %v14281_v50  ;;  %vm14287_vm5 = vcmp.lt.s32.totalorder %v1790_v7, 64 }
 0x317   : > { %v1577_v63 = vpop.f32.mrb[74].mxu1 }
 0x318   : > { %v8533_v13 = vpop.f32.mrb[75].mxu1  ;;  %v14362_v41 = vadd.f32 %v1577_v63, %v14281_v50 }
 0x31a   : > { %16697 = vst [vmem:[#allocation108_spill] sm:$0xff] %v14362_v41  ;;  %v12237_v41 = vld [vmem:[%s12982_s1] sm:$0xff] }
 0x31b   : > { %v1582_v37 = vpop.f32.mrb[76].mxu1 }
 0x31c   : > { %v8536_v6 = vpop.f32.mrb[77].mxu1 }
 0x31f   : > { %v1587_v21 = vpop.f32.mrb[78].mxu1 }
 0x320   : > { %v8539_v30 = vpop.f32.mrb[79].mxu1 }
 0x323   : > { %v1592_v33 = vpop.f32.mrb[80].mxu1 }
 0x324   : > { %v8542_v11 = vpop.f32.mrb[81].mxu1 }
 0x327   : > { %v1597_v29 = vpop.f32.mrb[82].mxu1 }
 0x328   : > { %v8545_v45 = vpop.f32.mrb[83].mxu1 }
 0x329   : > { %v14306_v45 = vadd.f32 %v1597_v29, %v14281_v50 }
 0x32b   : > { %v1602_v34 = vpop.f32.mrb[84].mxu1  ;;  %16689 = vst [vmem:[#allocation55_spill] sm:$0xff] %v14306_v45 }
 0x32c   : > { %v8548_v19 = vpop.f32.mrb[85].mxu1  ;;  %v14292_v55 = vadd.f32 %v1602_v34, %v14281_v50 }
 0x32e   : > { %16687 = vst [vmem:[#allocation76_spill] sm:$0xff] %v14292_v55 }
 0x32f   : > { %v1607_v13 = vpop.f32.mrb[116].mxu1 }
 0x330   : > { %v14285_v6 = vadd.f32 %v1607_v13, %v1398_v17  ;;  %v8551_v30 = vpop.f32.mrb[117].mxu1  ;;  %v14334_v17 = vadd.f32 %v1587_v21, %v14281_v50 }
 0x331   : > { %v14320_v30 = vadd.f32 %v1592_v33, %v14281_v50 }
 0x332   : > { %16684 = vst [vmem:[#allocation57_spill] sm:$0xff] %v14285_v6  ;;  %16693 = vst [vmem:[#allocation104_spill] sm:$0xff] %v14334_v17 }
 0x333   : > { %v1612_v9 = vpop.f32.mrb[88].mxu1  ;;  %16691 = vst [vmem:[#allocation54_spill] sm:$0xff] %v14320_v30 }
 0x334   : > { %v14295_v16 = vadd.f32 %v1612_v9, %v14281_v50  ;;  %v8554_v36 = vpop.f32.mrb[89].mxu1 }
 0x336   : > { %16688 = vst [vmem:[#allocation78_spill] sm:$0xff] %v14295_v16  ;;  %v14422_v16 = vadd.f32 %v14273_v48, %v14281_v50  ;;  %v14438_v48 = vadd.f32 %v14271_v42, %v14281_v50  ;;  %v14453_v42 = vadd.f32 %v14269_v58, %v14281_v50  ;;  %v14468_v58 = vadd.f32 %v14267_v3, %v14281_v50 }
 0x337   : > { %v1617_v19 = vpop.f32.mrb[90].mxu1  ;;  %v14483_v3 = vadd.f32 %v14265_v54, %v14281_v50 }
 0x338   : > { %v14309_v34 = vadd.f32 %v1617_v19, %v14281_v50  ;;  %v8557_v9 = vpop.f32.mrb[91].mxu1  ;;  %v14376_v19 = vadd.f32 %v1572_v1, %v14281_v50  ;;  %v14392_v1 = vadd.f32 %v14277_v20, %v14281_v50  ;;  %v14407_v20 = vadd.f32 %v14275_v18, %v14281_v50  ;;  %16705 = vst [vmem:[#allocation116_spill] sm:$0xff] %v14422_v16 }
 0x339   : > { %v14348_v9 = vadd.f32 %v1582_v37, %v14281_v50  ;;  %16707 = vst [vmem:[#allocation118_spill] sm:$0xff] %v14438_v48  ;;  %16709 = vst [vmem:[#allocation120_spill] sm:$0xff] %v14453_v42 }
 0x33a   : > { %16690 = vst [vmem:[#allocation53_spill] sm:$0xff] %v14309_v34  ;;  %16699 = vst [vmem:[#allocation110_spill] sm:$0xff] %v14376_v19 }
 0x33b   : > { %v1622_v13 = vpop.f32.mrb[92].mxu1  ;;  %16695 = vst [vmem:[#allocation106_spill] sm:$0xff] %v14348_v9  ;;  %16701 = vst [vmem:[#allocation112_spill] sm:$0xff] %v14392_v1  ;;  %v16732_v1 = vsel %vm13903_vm4, %v16675_v35, %v14219_v38 }
 0x33c   : > { %v14323_v29 = vadd.f32 %v1622_v13, %v14281_v50  ;;  %v8560_v36 = vpop.f32.mrb[93].mxu1  ;;  %16703 = vst [vmem:[#allocation114_spill] sm:$0xff] %v14407_v20  ;;  %16711 = vst [vmem:[#allocation122_spill] sm:$0xff] %v14468_v58 }
 0x33d   : > { %16713 = vst [vmem:[#allocation124_spill] sm:$0xff] %v14483_v3 }
 0x33e   : > { %16692 = vst [vmem:[#allocation103_spill] sm:$0xff] %v14323_v29  ;;  %v14488_v29 = vld [vmem:[#allocation12] ss:$0 sm:$0xff] }
 0x33f   : > { %v1627_v7 = vpop.f32.mrb[94].mxu1 }
 0x340   : > { %v14337_v33 = vadd.f32 %v1627_v7, %v14281_v50  ;;  %v8563_v13 = vpop.f32.mrb[95].mxu1 }
 0x342   : > { %16694 = vst [vmem:[#allocation105_spill] sm:$0xff] %v14337_v33 }
 0x343   : > { %v1632_v56 = vpop.f32.mrb[96].mxu1 }
 0x344   : > { %v14351_v21 = vadd.f32 %v1632_v56, %v14281_v50  ;;  %v8566_v7 = vpop.f32.mrb[97].mxu1 }
 0x346   : > { %16696 = vst [vmem:[#allocation107_spill] sm:$0xff] %v14351_v21 }
 0x347   : > { %v1637_v36 = vpop.f32.mrb[98].mxu1 }
 0x348   : > { %v14365_v37 = vadd.f32 %v1637_v36, %v14281_v50  ;;  %v8569_v56 = vpop.f32.mrb[99].mxu1 }
 0x349   : > { %v7873_v56 = vmul.f32 -1.442695, %v14253_v59  ;;  %v16716_v59 = vld [vmem:[#allocation28_spill] sm:$0xff] }
 0x34a   : > { %16698 = vst [vmem:[#allocation109_spill] sm:$0xff] %v14365_v37 }
 0x34b   : > { %v1642_v27 = vpop.f32.mrb[100].mxu1  ;;  %11823 = vpow2.f32 %v7873_v56 }
 0x34c   : > { %v14379_v63 = vadd.f32 %v1642_v27, %v14281_v50  ;;  %v8572_v36 = vpop.f32.mrb[101].mxu1 }
 0x34e   : > { %16700 = vst [vmem:[#allocation111_spill] sm:$0xff] %v14379_v63 }
 0x34f   : > { %v1647_v6 = vpop.f32.mrb[102].mxu1 }
 0x350   : > { %v14395_v27 = vadd.f32 %v1647_v6, %v14281_v50  ;;  %v8575_v36 = vpop.f32.mrb[103].mxu1 }
 0x352   : > { %16702 = vst [vmem:[#allocation113_spill] sm:$0xff] %v14395_v27 }
 0x353   : > { %v1652_v7 = vpop.f32.mrb[104].mxu1 }
 0x354   : > { %v14410_v6 = vadd.f32 %v1652_v7, %v14281_v50  ;;  %v8578_v36 = vpop.f32.mrb[105].mxu1 }
 0x355   : > { %v7874_v36 = vmul.f32 -1.442695, %v14263_v24  ;;  %v11824_v34 = vpop.eup %11823 }
 0x356   : > { %16704 = vst [vmem:[#allocation115_spill] sm:$0xff] %v14410_v6  ;;  %v2304_v56 = vadd.f32 1.0, %v11824_v34 }
 0x357   : > { %v1657_v13 = vpop.f32.mrb[106].mxu1  ;;  %11825 = vpow2.f32 %v7874_v36 }
 0x358   : > { %v14425_v18 = vadd.f32 %v1657_v13, %v14281_v50  ;;  %v8581_v7 = vpop.f32.mrb[107].mxu1  ;;  %11827 = vrcp.f32 %v2304_v56 }
 0x359   : > { %v16757_v38 = vld [vmem:[#allocation113_spill] sm:$0xff] }
 0x35a   : > { %16706 = vst [vmem:[#allocation117_spill] sm:$0xff] %v14425_v18 }
 0x35b   : > { %v1662_v55 = vpop.f32.mrb[108].mxu1 }
 0x35c   : > { %v14441_v13 = vadd.f32 %v1662_v55, %v14281_v50  ;;  %v8584_v24 = vpop.f32.mrb[109].mxu1 }
 0x35e   : > { %16708 = vst [vmem:[#allocation119_spill] sm:$0xff] %v14441_v13 }
 0x35f   : > { %v1667_v45 = vpop.f32.mrb[110].mxu1 }
 0x360   : > { %v14456_v55 = vadd.f32 %v1667_v45, %v14281_v50  ;;  %v8587_v36 = vpop.f32.mrb[111].mxu1 }
 0x361   : > { %v11826_v56 = vpop.eup %11825 }
 0x362   : > { %16710 = vst [vmem:[#allocation121_spill] sm:$0xff] %v14456_v55  ;;  %v2311_v30 = vadd.f32 1.0, %v11826_v56 }
 0x363   : > { %v1672_v34 = vpop.f32.mrb[112].mxu1 }
 0x364   : > { %v14471_v45 = vadd.f32 %v1672_v34, %v14281_v50  ;;  %v8590_v36 = vpop.f32.mrb[113].mxu1  ;;  %11829 = vrcp.f32 %v2311_v30  ;;  %v16717_v30 = vld [vmem:[#allocation29_spill] sm:$0xff] }
 0x366   : > { %16712 = vst [vmem:[#allocation123_spill] sm:$0xff] %v14471_v45 }
 0x367   : > { %v1677_v24 = vpop.f32.mrb[114].mxu1 }
 0x368   : > { %v14486_v34 = vadd.f32 %v1677_v24, %v14281_v50  ;;  %v8593_v36 = vpop.f32.mrb[115].mxu1  ;;  %v11828_v24 = vpop.eup %11827 }
 0x36a   : > { %16714 = vst [vmem:[#allocation125_spill] sm:$0xff] %v14486_v34  ;;  %v1820_v7 = vsel %vm14287_vm5, %v14483_v3, %v14486_v34  ;;  %v16731_v3 = vld [vmem:[#allocation27_spill] sm:$0xff] }
 0x36b   : > { %v2296_v54 = vpop.f32.mrb[118].mxu1 }
 0x36c   : > { %v2314_v33 = vadd.f32 %v14488_v29, %v2296_v54  ;;  %v8628_v50 = vpop.f32.mrb[119].mxu1  ;;  %v16726_v54 = vld [vmem:[#allocation38_spill] sm:$0xff] }
 0x36d   : > { %v16727_v50 = vld [vmem:[#allocation39_spill] sm:$0xff] }
 0x36e   : > { %v2315_v36 = vmul.f32 %v11828_v24, %v2314_v33  ;;  %v11830_v56 = vpop.eup %11829  ;;  %v16721_v33 = vld [vmem:[#allocation33_spill] sm:$0xff]  ;;  %v16728_v24 = vld [vmem:[#allocation40_spill] sm:$0xff] }
 0x36f   : > { %v2318_v21 = vsub.f32 1.0, %v11830_v56  ;;  %v2320_v63 = vmul.f32 %v12237_v41, %v11830_v56  ;;  %v16718_v41 = vld [vmem:[#allocation30_spill] sm:$0xff]  ;;  %v16730_v56 = vld [vmem:[#allocation43_spill] sm:$0xff] }
 0x370   : > { %v2316_v17 = vadd.f32 %v2315_v36, %v1820_v7  ;;  %v16725_v7 = vld [vmem:[#allocation37_spill] sm:$0xff] }
 0x371   : > { %v16729_v36 = vld [vmem:[#allocation41_spill] sm:$0xff] }
 0x372   : > { %11831 = vtanh.f32 %v2316_v17  ;;  %v16719_v17 = vld [vmem:[#allocation31_spill] sm:$0xff]  ;;  %v16897_v44 = vld [vmem:[#allocation125_spill] sm:$0xff] }
 0x37c   : > { %v11832_v9 = vpop.eup %11831 }
 0x37d   : > { %v2319_v37 = vmul.f32 %v11832_v9, %v2318_v21  ;;  %v16720_v9 = vld [vmem:[#allocation32_spill] sm:$0xff]  ;;  %v16722_v21 = vld [vmem:[#allocation34_spill] sm:$0xff] }
 0x37f   : > { %v14500_v19 = vadd.f32 %v2320_v63, %v2319_v37  ;;  %v16723_v37 = vld [vmem:[#allocation35_spill] sm:$0xff]  ;;  %v16724_v63 = vld [vmem:[#allocation36_spill] sm:$0xff] }
 0x381   : > { %16715 = vst [vmem:[#allocation126_spill] sm:$0xff] %v14500_v19  ;;  %2391 = vmatmul.mubr.f32.vlgmr.msra.gmra.mrb[60].mxu0 %v14500_v19  ;;  %8662 = vmatmul.mubr.f32.vlgmr.msra.gmra.mrb[120].mxu1 %v14500_v19 }
 0x382   : > { %9955 = vmatpush1.bf16.msra.mxu0 %v16716_v59  ;;  %9986 = vmatpush3.bf16.msra.mxu1 %v13530_v32 }
 0x383   : > { %9957 = vmatprep.subr.bf16.mxu0 %v16717_v30  ;;  %9987 = vmatprep.subr.bf16.mxu1 %v16579_v26 }
 0x384   : > { %2558 = vmatprep.mubr.f32.mxu0 %v16580_v40  ;;  %8696 = vmatprep.mubr.msk.f32.mxu1 %vm12601_vm2, %v16580_v40 }
 0x386   : > { %9959 = vmatpush1.bf16.msra.mxu0 %v16718_v41  ;;  %9989 = vmatpush3.bf16.msra.mxu1 %v13541_v5 }
 0x387   : > { %9961 = vmatprep.subr.bf16.mxu0 %v16719_v17  ;;  %9990 = vmatprep.subr.bf16.mxu1 %v16579_v26 }
 0x38a   : > { %9963 = vmatpush1.bf16.msra.mxu0 %v16720_v9  ;;  %9992 = vmatpush3.bf16.msra.mxu1 %v13553_v39 }
 0x38b   : > { %9965 = vmatprep.subr.bf16.mxu0 %v16721_v33  ;;  %9993 = vmatprep.subr.bf16.mxu1 %v16579_v26 }
 0x38e   : > { %9967 = vmatpush1.bf16.msra.mxu0 %v16722_v21  ;;  %9995 = vmatpush3.bf16.msra.mxu1 %v13565_v10 }
 0x38f   : > { %9969 = vmatprep.subr.bf16.mxu0 %v16723_v37  ;;  %9996 = vmatprep.subr.bf16.mxu1 %v16579_v26 }
 0x392   : > { %9971 = vmatpush1.bf16.msra.mxu0 %v16724_v63  ;;  %9998 = vmatpush3.bf16.msra.mxu1 %v16644_v31 }
 0x393   : > { %9973 = vmatprep.subr.bf16.mxu0 %v16725_v7  ;;  %9999 = vmatprep.subr.bf16.mxu1 %v16579_v26 }
 0x396   : > { %9975 = vmatpush1.bf16.msra.mxu0 %v16726_v54  ;;  %10001 = vmatpush3.bf16.msra.mxu1 %v16648_v46 }
 0x397   : > { %9977 = vmatprep.subr.bf16.mxu0 %v16727_v50  ;;  %10002 = vmatprep.subr.bf16.mxu1 %v16579_v26 }
 0x39a   : > { %9979 = vmatpush1.bf16.msra.mxu0 %v16728_v24  ;;  %10004 = vmatpush3.bf16.msra.mxu1 %v16652_v4 }
 0x39b   : > { %9981 = vmatprep.subr.bf16.mxu0 %v16729_v36  ;;  %10005 = vmatprep.subr.bf16.mxu1 %v16579_v26 }
 0x39e   : > { %9983 = vmatpush1.bf16.msra.mxu0 %v16730_v56  ;;  %10007 = vmatpush3.bf16.msra.mxu1 %v16656_v52 }
 0x39f   : > { %10009 = vmatprep.subr.bf16.mxu0 %v16731_v3  ;;  %10040 = vmatprep.subr.bf16.mxu1 %v16579_v26 }
 0x454   : > { %v2392_v34 = vpop.f32.mrb[60].mxu0  ;;  %v2463_v8 = vpop.f32.mrb[120].mxu1 }
 0x455   : > { %v2467_v28 = vadd.f32 %v2392_v34, %v14225_v57  ;;  %v2394_v12 = vpop.f32.mrb[61].mxu0  ;;  %v8663_v27 = vpop.f32.mrb[121].mxu1  ;;  %v2481_v53 = vadd.f32 %v14488_v29, %v2463_v8 }
 0x456   : > { %v2474_v61 = vadd.f32 %v2394_v12, %v16732_v1  ;;  %v16733_v27 = vsel %vm14287_vm5, %v14468_v58, %v14471_v45 }
 0x457   : > { %v7875_v60 = vmul.f32 -1.442695, %v2467_v28 }
 0x458   : > { %v7876_v15 = vmul.f32 -1.442695, %v2474_v61 }
 0x459   : > { %11833 = vpow2.f32 %v7875_v60 }
 0x45a   : > { %11835 = vpow2.f32 %v7876_v15 }
 0x463   : > { %v11834_v6 = vpop.eup %11833 }
 0x464   : > { %v2471_v20 = vadd.f32 1.0, %v11834_v6  ;;  %v11836_v51 = vpop.eup %11835 }
 0x465   : > { %v2478_v23 = vadd.f32 1.0, %v11836_v51 }
 0x466   : > { %11837 = vrcp.f32 %v2471_v20 }
 0x467   : > { %11839 = vrcp.f32 %v2478_v23 }
 0x470   : > { %v11838_v57 = vpop.eup %11837 }
 0x471   : > { %v2482_v34 = vmul.f32 %v11838_v57, %v2481_v53  ;;  %v11840_v60 = vpop.eup %11839  ;;  %v16735_v57 = vsel %vm13903_vm4, %v16669_v47, %v14195_v25  ;;  %v16765_v25 = vld [vmem:[#allocation111_spill] sm:$0xff] }
 0x472   : > { %v2485_v28 = vsub.f32 1.0, %v11840_v60  ;;  %v2487_v1 = vmul.f32 %v11840_v60, %v14500_v19  ;;  %v16749_v19 = vld [vmem:[#allocation115_spill] sm:$0xff] }
 0x473   : > { %v2483_v12 = vadd.f32 %v2482_v34, %v16733_v27 }
 0x475   : > { %11841 = vtanh.f32 %v2483_v12 }
 0x47f   : > { %v11842_v15 = vpop.eup %11841 }
 0x480   : > { %v2486_v61 = vmul.f32 %v11842_v15, %v2485_v28 }
 0x482   : > { %v14552_v20 = vadd.f32 %v2487_v1, %v2486_v61 }
 0x484   : > { %16734 = vst [vmem:[#allocation28_spill] sm:$0xff] %v14552_v20  ;;  %2559 = vmatmul.mubr.f32.vlgmr.msra.gmra.mrb[62].mxu0 %v14552_v20  ;;  %8697 = vmatmul.mubr.f32.vlgmr.msra.gmra.mrb[122].mxu1 %v14552_v20 }
 0x485   : > { %10011 = vmatpush1.bf16.msra.mxu0 %v16716_v59  ;;  %10042 = vmatpush3.bf16.msra.mxu1 %v13530_v32 }
 0x486   : > { %10013 = vmatprep.subr.bf16.mxu0 %v16717_v30  ;;  %10043 = vmatprep.subr.bf16.mxu1 %v16579_v26 }
 0x487   : > { %2726 = vmatprep.mubr.f32.mxu0 %v16580_v40  ;;  %8731 = vmatprep.mubr.msk.f32.mxu1 %vm12601_vm2, %v16580_v40 }
 0x489   : > { %10015 = vmatpush1.bf16.msra.mxu0 %v16718_v41  ;;  %10045 = vmatpush3.bf16.msra.mxu1 %v13541_v5 }
 0x48a   : > { %10017 = vmatprep.subr.bf16.mxu0 %v16719_v17  ;;  %10046 = vmatprep.subr.bf16.mxu1 %v16579_v26 }
 0x48b   : > { %v16902_v11 = vld [vmem:[#allocation28_spill] sm:$0xff] }
 0x48d   : > { %10019 = vmatpush1.bf16.msra.mxu0 %v16720_v9  ;;  %10048 = vmatpush3.bf16.msra.mxu1 %v13553_v39 }
 0x48e   : > { %10021 = vmatprep.subr.bf16.mxu0 %v16721_v33  ;;  %10049 = vmatprep.subr.bf16.mxu1 %v16579_v26 }
 0x491   : > { %10023 = vmatpush1.bf16.msra.mxu0 %v16722_v21  ;;  %10051 = vmatpush3.bf16.msra.mxu1 %v13565_v10 }
 0x492   : > { %10025 = vmatprep.subr.bf16.mxu0 %v16723_v37  ;;  %10052 = vmatprep.subr.bf16.mxu1 %v16579_v26 }
 0x495   : > { %10027 = vmatpush1.bf16.msra.mxu0 %v16724_v63  ;;  %10054 = vmatpush3.bf16.msra.mxu1 %v16644_v31 }
 0x496   : > { %10029 = vmatprep.subr.bf16.mxu0 %v16725_v7  ;;  %10055 = vmatprep.subr.bf16.mxu1 %v16579_v26 }
 0x499   : > { %10031 = vmatpush1.bf16.msra.mxu0 %v16726_v54  ;;  %10057 = vmatpush3.bf16.msra.mxu1 %v16648_v46 }
 0x49a   : > { %10033 = vmatprep.subr.bf16.mxu0 %v16727_v50  ;;  %10058 = vmatprep.subr.bf16.mxu1 %v16579_v26 }
 0x49d   : > { %10035 = vmatpush1.bf16.msra.mxu0 %v16728_v24  ;;  %10060 = vmatpush3.bf16.msra.mxu1 %v16652_v4 }
 0x49e   : > { %10037 = vmatprep.subr.bf16.mxu0 %v16729_v36  ;;  %10061 = vmatprep.subr.bf16.mxu1 %v16579_v26 }
 0x4a1   : > { %10039 = vmatpush1.bf16.msra.mxu0 %v16730_v56  ;;  %10063 = vmatpush3.bf16.msra.mxu1 %v16656_v52 }
 0x4a2   : > { %10065 = vmatprep.subr.bf16.mxu0 %v16731_v3  ;;  %10096 = vmatprep.subr.bf16.mxu1 %v16579_v26 }
 0x557   : > { %v2560_v23 = vpop.f32.mrb[62].mxu0  ;;  %v2631_v8 = vpop.f32.mrb[122].mxu1 }
 0x558   : > { %v2635_v53 = vadd.f32 %v2560_v23, %v14201_v0  ;;  %v2562_v51 = vpop.f32.mrb[63].mxu0  ;;  %v8698_v6 = vpop.f32.mrb[123].mxu1  ;;  %v2649_v1 = vadd.f32 %v14488_v29, %v2631_v8 }
 0x559   : > { %v2642_v34 = vadd.f32 %v2562_v51, %v16735_v57  ;;  %v16736_v6 = vsel %vm14287_vm5, %v14453_v42, %v14456_v55 }
 0x55a   : > { %v7877_v27 = vmul.f32 -1.442695, %v2635_v53 }
 0x55b   : > { %v7878_v12 = vmul.f32 -1.442695, %v2642_v34 }
 0x55c   : > { %11843 = vpow2.f32 %v7877_v27 }
 0x55d   : > { %11845 = vpow2.f32 %v7878_v12 }
 0x566   : > { %v11844_v60 = vpop.eup %11843 }
 0x567   : > { %v2639_v28 = vadd.f32 1.0, %v11844_v60  ;;  %v11846_v15 = vpop.eup %11845 }
 0x568   : > { %v2646_v61 = vadd.f32 1.0, %v11846_v15 }
 0x569   : > { %11847 = vrcp.f32 %v2639_v28 }
 0x56a   : > { %11849 = vrcp.f32 %v2646_v61 }
 0x573   : > { %v11848_v0 = vpop.eup %11847 }
 0x574   : > { %v2650_v23 = vmul.f32 %v11848_v0, %v2649_v1  ;;  %v11850_v53 = vpop.eup %11849  ;;  %v16738_v0 = vsel %vm13903_vm4, %v16663_v14, %v14171_v49  ;;  %v16773_v49 = vld [vmem:[#allocation109_spill] sm:$0xff] }
 0x575   : > { %v2653_v57 = vsub.f32 1.0, %v11850_v53  ;;  %v2655_v12 = vmul.f32 %v11850_v53, %v14552_v20 }
 0x576   : > { %v2651_v51 = vadd.f32 %v2650_v23, %v16736_v6 }
 0x578   : > { %11851 = vtanh.f32 %v2651_v51 }
 0x582   : > { %v11852_v34 = vpop.eup %11851 }
 0x583   : > { %v2654_v27 = vmul.f32 %v11852_v34, %v2653_v57 }
 0x585   : > { %v14604_v60 = vadd.f32 %v2655_v12, %v2654_v27 }
 0x587   : > { %16737 = vst [vmem:[#allocation29_spill] sm:$0xff] %v14604_v60  ;;  %2727 = vmatmul.mubr.f32.vlgmr.msra.gmra.mrb[64].mxu0 %v14604_v60  ;;  %8732 = vmatmul.mubr.f32.vlgmr.msra.gmra.mrb[124].mxu1 %v14604_v60 }
 0x588   : > { %10067 = vmatpush1.bf16.msra.mxu0 %v16716_v59  ;;  %10098 = vmatpush3.bf16.msra.mxu1 %v13530_v32 }
 0x589   : > { %10069 = vmatprep.subr.bf16.mxu0 %v16717_v30  ;;  %10099 = vmatprep.subr.bf16.mxu1 %v16579_v26 }
 0x58a   : > { %2894 = vmatprep.mubr.f32.mxu0 %v16580_v40  ;;  %8766 = vmatprep.mubr.msk.f32.mxu1 %vm12601_vm2, %v16580_v40 }
 0x58c   : > { %10071 = vmatpush1.bf16.msra.mxu0 %v16718_v41  ;;  %10101 = vmatpush3.bf16.msra.mxu1 %v13541_v5 }
 0x58d   : > { %10073 = vmatprep.subr.bf16.mxu0 %v16719_v17  ;;  %10102 = vmatprep.subr.bf16.mxu1 %v16579_v26 }
 0x590   : > { %10075 = vmatpush1.bf16.msra.mxu0 %v16720_v9  ;;  %10104 = vmatpush3.bf16.msra.mxu1 %v13553_v39 }
 0x591   : > { %10077 = vmatprep.subr.bf16.mxu0 %v16721_v33  ;;  %10105 = vmatprep.subr.bf16.mxu1 %v16579_v26 }
 0x594   : > { %10079 = vmatpush1.bf16.msra.mxu0 %v16722_v21  ;;  %10107 = vmatpush3.bf16.msra.mxu1 %v13565_v10 }
 0x595   : > { %10081 = vmatprep.subr.bf16.mxu0 %v16723_v37  ;;  %10108 = vmatprep.subr.bf16.mxu1 %v16579_v26 }
 0x598   : > { %10083 = vmatpush1.bf16.msra.mxu0 %v16724_v63  ;;  %10110 = vmatpush3.bf16.msra.mxu1 %v16644_v31 }
 0x599   : > { %10085 = vmatprep.subr.bf16.mxu0 %v16725_v7  ;;  %10111 = vmatprep.subr.bf16.mxu1 %v16579_v26 }
 0x59c   : > { %10087 = vmatpush1.bf16.msra.mxu0 %v16726_v54  ;;  %10113 = vmatpush3.bf16.msra.mxu1 %v16648_v46 }
 0x59d   : > { %10089 = vmatprep.subr.bf16.mxu0 %v16727_v50  ;;  %10114 = vmatprep.subr.bf16.mxu1 %v16579_v26 }
 0x5a0   : > { %10091 = vmatpush1.bf16.msra.mxu0 %v16728_v24  ;;  %10116 = vmatpush3.bf16.msra.mxu1 %v16652_v4 }
 0x5a1   : > { %10093 = vmatprep.subr.bf16.mxu0 %v16729_v36  ;;  %10117 = vmatprep.subr.bf16.mxu1 %v16579_v26 }
 0x5a4   : > { %10095 = vmatpush1.bf16.msra.mxu0 %v16730_v56  ;;  %10119 = vmatpush3.bf16.msra.mxu1 %v16656_v52 }
 0x5a5   : > { %10121 = vmatprep.subr.bf16.mxu0 %v16731_v3  ;;  %10152 = vmatprep.subr.bf16.mxu1 %v16579_v26 }
 0x65a   : > { %v2728_v8 = vpop.f32.mrb[64].mxu0  ;;  %v2799_v28 = vpop.f32.mrb[124].mxu1 }
 0x65b   : > { %v2803_v15 = vadd.f32 %v2728_v8, %v14177_v22  ;;  %v2730_v61 = vpop.f32.mrb[65].mxu0  ;;  %v8733_v1 = vpop.f32.mrb[125].mxu1  ;;  %v2817_v12 = vadd.f32 %v14488_v29, %v2799_v28 }
 0x65c   : > { %v2810_v23 = vadd.f32 %v2730_v61, %v16738_v0  ;;  %v16739_v1 = vsel %vm14287_vm5, %v14438_v48, %v14441_v13 }
 0x65d   : > { %v7879_v6 = vmul.f32 -1.442695, %v2803_v15 }
 0x65e   : > { %v7880_v51 = vmul.f32 -1.442695, %v2810_v23 }
 0x65f   : > { %11853 = vpow2.f32 %v7879_v6 }
 0x660   : > { %11855 = vpow2.f32 %v7880_v51 }
 0x669   : > { %v11854_v53 = vpop.eup %11853 }
 0x66a   : > { %v2807_v57 = vadd.f32 1.0, %v11854_v53  ;;  %v11856_v34 = vpop.eup %11855 }
 0x66b   : > { %v2814_v27 = vadd.f32 1.0, %v11856_v34 }
 0x66c   : > { %11857 = vrcp.f32 %v2807_v57 }
 0x66d   : > { %11859 = vrcp.f32 %v2814_v27 }
 0x676   : > { %v11858_v22 = vpop.eup %11857 }
 0x677   : > { %v2818_v8 = vmul.f32 %v11858_v22, %v2817_v12  ;;  %v11860_v15 = vpop.eup %11859  ;;  %v16741_v22 = vsel %vm13903_vm4, %v13743_v2, %v14145_v43  ;;  %v16780_v2 = vld [vmem:[#allocation106_spill] sm:$0xff] }
 0x678   : > { %v2821_v0 = vsub.f32 1.0, %v11860_v15  ;;  %v2823_v51 = vmul.f32 %v11860_v15, %v14604_v60 }
 0x679   : > { %v2819_v61 = vadd.f32 %v2818_v8, %v16739_v1 }
 0x67b   : > { %11861 = vtanh.f32 %v2819_v61 }
 0x685   : > { %v11862_v23 = vpop.eup %11861 }
 0x686   : > { %v2822_v6 = vmul.f32 %v11862_v23, %v2821_v0 }
 0x688   : > { %v14656_v53 = vadd.f32 %v2823_v51, %v2822_v6 }
 0x68a   : > { %16740 = vst [vmem:[#allocation30_spill] sm:$0xff] %v14656_v53  ;;  %2895 = vmatmul.mubr.f32.vlgmr.msra.gmra.mrb[66].mxu0 %v14656_v53  ;;  %8767 = vmatmul.mubr.f32.vlgmr.msra.gmra.mrb[126].mxu1 %v14656_v53 }
 0x68b   : > { %10123 = vmatpush1.bf16.msra.mxu0 %v16716_v59  ;;  %10154 = vmatpush3.bf16.msra.mxu1 %v13530_v32 }
 0x68c   : > { %10125 = vmatprep.subr.bf16.mxu0 %v16717_v30  ;;  %10155 = vmatprep.subr.bf16.mxu1 %v16579_v26 }
 0x68d   : > { %3062 = vmatprep.mubr.f32.mxu0 %v16580_v40  ;;  %8801 = vmatprep.mubr.msk.f32.mxu1 %vm12601_vm2, %v16580_v40 }
 0x68f   : > { %10127 = vmatpush1.bf16.msra.mxu0 %v16718_v41  ;;  %10157 = vmatpush3.bf16.msra.mxu1 %v13541_v5 }
 0x690   : > { %10129 = vmatprep.subr.bf16.mxu0 %v16719_v17  ;;  %10158 = vmatprep.subr.bf16.mxu1 %v16579_v26 }
 0x693   : > { %10131 = vmatpush1.bf16.msra.mxu0 %v16720_v9  ;;  %10160 = vmatpush3.bf16.msra.mxu1 %v13553_v39 }
 0x694   : > { %10133 = vmatprep.subr.bf16.mxu0 %v16721_v33  ;;  %10161 = vmatprep.subr.bf16.mxu1 %v16579_v26 }
 0x697   : > { %10135 = vmatpush1.bf16.msra.mxu0 %v16722_v21  ;;  %10163 = vmatpush3.bf16.msra.mxu1 %v13565_v10 }
 0x698   : > { %10137 = vmatprep.subr.bf16.mxu0 %v16723_v37  ;;  %10164 = vmatprep.subr.bf16.mxu1 %v16579_v26 }
 0x69b   : > { %10139 = vmatpush1.bf16.msra.mxu0 %v16724_v63  ;;  %10166 = vmatpush3.bf16.msra.mxu1 %v16644_v31 }
 0x69c   : > { %10141 = vmatprep.subr.bf16.mxu0 %v16725_v7  ;;  %10167 = vmatprep.subr.bf16.mxu1 %v16579_v26 }
 0x69f   : > { %10143 = vmatpush1.bf16.msra.mxu0 %v16726_v54  ;;  %10169 = vmatpush3.bf16.msra.mxu1 %v16648_v46 }
 0x6a0   : > { %10145 = vmatprep.subr.bf16.mxu0 %v16727_v50  ;;  %10170 = vmatprep.subr.bf16.mxu1 %v16579_v26 }
 0x6a3   : > { %10147 = vmatpush1.bf16.msra.mxu0 %v16728_v24  ;;  %10172 = vmatpush3.bf16.msra.mxu1 %v16652_v4 }
 0x6a4   : > { %10149 = vmatprep.subr.bf16.mxu0 %v16729_v36  ;;  %10173 = vmatprep.subr.bf16.mxu1 %v16579_v26 }
 0x6a7   : > { %10151 = vmatpush1.bf16.msra.mxu0 %v16730_v56  ;;  %10175 = vmatpush3.bf16.msra.mxu1 %v16656_v52 }
 0x6a8   : > { %10177 = vmatprep.subr.bf16.mxu0 %v16731_v3  ;;  %10208 = vmatprep.subr.bf16.mxu1 %v16579_v26 }
 0x75d   : > { %v2896_v28 = vpop.f32.mrb[66].mxu0  ;;  %v2967_v57 = vpop.f32.mrb[126].mxu1 }
 0x75e   : > { %v2971_v34 = vadd.f32 %v2896_v28, %v14152_v62  ;;  %v2898_v27 = vpop.f32.mrb[67].mxu0  ;;  %v8768_v12 = vpop.f32.mrb[127].mxu1  ;;  %v2985_v51 = vadd.f32 %v14488_v29, %v2967_v57 }
 0x75f   : > { %v2978_v8 = vadd.f32 %v2898_v27, %v16741_v22  ;;  %v16742_v12 = vsel %vm14287_vm5, %v14422_v16, %v14425_v18  ;;  %v14961_v18 = vld [vmem:[#allocation12] ss:$0 sm:$0xff] }
 0x760   : > { %v7881_v1 = vmul.f32 -1.442695, %v2971_v34 }
 0x761   : > { %v7882_v61 = vmul.f32 -1.442695, %v2978_v8 }
 0x762   : > { %11863 = vpow2.f32 %v7881_v1 }
 0x763   : > { %11865 = vpow2.f32 %v7882_v61 }
 0x76c   : > { %v11864_v15 = vpop.eup %11863 }
 0x76d   : > { %v2975_v0 = vadd.f32 1.0, %v11864_v15  ;;  %v11866_v23 = vpop.eup %11865 }
 0x76e   : > { %v2982_v6 = vadd.f32 1.0, %v11866_v23  ;;  %v16744_v23 = vld [vmem:[#allocation51_spill] sm:$0xff] }
 0x76f   : > { %11867 = vrcp.f32 %v2975_v0 }
 0x770   : > { %11869 = vrcp.f32 %v2982_v6 }
 0x779   : > { %v11868_v62 = vpop.eup %11867 }
 0x77a   : > { %v2986_v28 = vmul.f32 %v11868_v62, %v2985_v51  ;;  %v11870_v34 = vpop.eup %11869 }
 0x77b   : > { %v2989_v22 = vsub.f32 1.0, %v11870_v34  ;;  %v2991_v61 = vmul.f32 %v11870_v34, %v14656_v53 }
 0x77c   : > { %v2987_v27 = vadd.f32 %v2986_v28, %v16742_v12  ;;  %v16745_v28 = vld [vmem:[#allocation64_spill] sm:$0xff] }
 0x77d   : > { %v16746_v12 = vld [vmem:[#allocation100_spill] sm:$0xff] }
 0x77e   : > { %11871 = vtanh.f32 %v2987_v27  ;;  %v16747_v27 = vsel %vm13903_vm4, %v16745_v28, %v16746_v12  ;;  %v16789_v12 = vld [vmem:[#allocation105_spill] sm:$0xff] }
 0x788   : > { %v11872_v8 = vpop.eup %11871 }
 0x789   : > { %v2990_v1 = vmul.f32 %v11872_v8, %v2989_v22 }
 0x78b   : > { %v14708_v15 = vadd.f32 %v2991_v61, %v2990_v1 }
 0x78d   : > { %16743 = vst [vmem:[#allocation31_spill] sm:$0xff] %v14708_v15  ;;  %3063 = vmatmul.mubr.f32.vlgmr.msra.gmra.mrb[68].mxu0 %v14708_v15  ;;  %8802 = vmatmul.mubr.f32.vlgmr.msra.gmra.mrb[128].mxu1 %v14708_v15 }
 0x78e   : > { %10179 = vmatpush1.bf16.msra.mxu0 %v16716_v59  ;;  %10210 = vmatpush3.bf16.msra.mxu1 %v13530_v32 }
 0x78f   : > { %10181 = vmatprep.subr.bf16.mxu0 %v16717_v30  ;;  %10211 = vmatprep.subr.bf16.mxu1 %v16579_v26 }
 0x790   : > { %3230 = vmatprep.mubr.f32.mxu0 %v16580_v40  ;;  %8836 = vmatprep.mubr.msk.f32.mxu1 %vm12601_vm2, %v16580_v40 }
 0x792   : > { %10183 = vmatpush1.bf16.msra.mxu0 %v16718_v41  ;;  %10213 = vmatpush3.bf16.msra.mxu1 %v13541_v5 }
 0x793   : > { %10185 = vmatprep.subr.bf16.mxu0 %v16719_v17  ;;  %10214 = vmatprep.subr.bf16.mxu1 %v16579_v26 }
 0x796   : > { %10187 = vmatpush1.bf16.msra.mxu0 %v16720_v9  ;;  %10216 = vmatpush3.bf16.msra.mxu1 %v13553_v39 }
 0x797   : > { %10189 = vmatprep.subr.bf16.mxu0 %v16721_v33  ;;  %10217 = vmatprep.subr.bf16.mxu1 %v16579_v26 }
 0x79a   : > { %10191 = vmatpush1.bf16.msra.mxu0 %v16722_v21  ;;  %10219 = vmatpush3.bf16.msra.mxu1 %v13565_v10 }
 0x79b   : > { %10193 = vmatprep.subr.bf16.mxu0 %v16723_v37  ;;  %10220 = vmatprep.subr.bf16.mxu1 %v16579_v26 }
 0x79e   : > { %10195 = vmatpush1.bf16.msra.mxu0 %v16724_v63  ;;  %10222 = vmatpush3.bf16.msra.mxu1 %v16644_v31 }
 0x79f   : > { %10197 = vmatprep.subr.bf16.mxu0 %v16725_v7  ;;  %10223 = vmatprep.subr.bf16.mxu1 %v16579_v26 }
 0x7a2   : > { %10199 = vmatpush1.bf16.msra.mxu0 %v16726_v54  ;;  %10225 = vmatpush3.bf16.msra.mxu1 %v16648_v46 }
 0x7a3   : > { %10201 = vmatprep.subr.bf16.mxu0 %v16727_v50  ;;  %10226 = vmatprep.subr.bf16.mxu1 %v16579_v26 }
 0x7a6   : > { %10203 = vmatpush1.bf16.msra.mxu0 %v16728_v24  ;;  %10228 = vmatpush3.bf16.msra.mxu1 %v16652_v4 }
 0x7a7   : > { %10205 = vmatprep.subr.bf16.mxu0 %v16729_v36  ;;  %10229 = vmatprep.subr.bf16.mxu1 %v16579_v26 }
 0x7aa   : > { %10207 = vmatpush1.bf16.msra.mxu0 %v16730_v56  ;;  %10231 = vmatpush3.bf16.msra.mxu1 %v16656_v52 }
 0x7ab   : > { %10233 = vmatprep.subr.bf16.mxu0 %v16731_v3  ;;  %10264 = vmatprep.subr.bf16.mxu1 %v16579_v26 }
 0x860   : > { %v3064_v57 = vpop.f32.mrb[68].mxu0  ;;  %v3135_v0 = vpop.f32.mrb[128].mxu1 }
 0x861   : > { %v3139_v6 = vadd.f32 %v3064_v57, %v16744_v23  ;;  %v3066_v51 = vpop.f32.mrb[69].mxu0  ;;  %v8803_v62 = vpop.f32.mrb[129].mxu1  ;;  %v3153_v20 = vadd.f32 %v14488_v29, %v3135_v0 }
 0x862   : > { %v3146_v34 = vadd.f32 %v3066_v51, %v16747_v27  ;;  %v16748_v62 = vld [vmem:[#allocation114_spill] sm:$0xff] }
 0x863   : > { %v7883_v22 = vmul.f32 -1.442695, %v3139_v6  ;;  %v16750_v58 = vsel %vm14287_vm5, %v16748_v62, %v16749_v19 }
 0x864   : > { %v7884_v8 = vmul.f32 -1.442695, %v3146_v34 }
 0x865   : > { %11873 = vpow2.f32 %v7883_v22 }
 0x866   : > { %11875 = vpow2.f32 %v7884_v8 }
 0x86f   : > { %v11874_v1 = vpop.eup %11873 }
 0x870   : > { %v3143_v61 = vadd.f32 1.0, %v11874_v1  ;;  %v11876_v53 = vpop.eup %11875 }
 0x871   : > { %v3150_v60 = vadd.f32 1.0, %v11876_v53 }
 0x872   : > { %11877 = vrcp.f32 %v3143_v61 }
 0x873   : > { %11879 = vrcp.f32 %v3150_v60  ;;  %v16752_v60 = vld [vmem:[#allocation50_spill] sm:$0xff] }
 0x87c   : > { %v11878_v57 = vpop.eup %11877 }
 0x87d   : > { %v3154_v23 = vmul.f32 %v11878_v57, %v3153_v20  ;;  %v11880_v6 = vpop.eup %11879  ;;  %v16753_v57 = vld [vmem:[#allocation65_spill] sm:$0xff] }
 0x87e   : > { %v3157_v27 = vsub.f32 1.0, %v11880_v6  ;;  %v3159_v8 = vmul.f32 %v11880_v6, %v14708_v15 }
 0x87f   : > { %v3155_v51 = vadd.f32 %v3154_v23, %v16750_v58  ;;  %v16754_v23 = vld [vmem:[#allocation98_spill] sm:$0xff] }
 0x881   : > { %11881 = vtanh.f32 %v3155_v51  ;;  %v16755_v51 = vsel %vm13903_vm4, %v16753_v57, %v16754_v23  ;;  %v16797_v23 = vld [vmem:[#allocation103_spill] sm:$0xff] }
 0x88b   : > { %v11882_v34 = vpop.eup %11881 }
 0x88c   : > { %v3158_v22 = vmul.f32 %v11882_v34, %v3157_v27 }
 0x88e   : > { %v14760_v1 = vadd.f32 %v3159_v8, %v3158_v22 }
 0x890   : > { %16751 = vst [vmem:[#allocation32_spill] sm:$0xff] %v14760_v1  ;;  %3231 = vmatmul.mubr.f32.vlgmr.msra.gmra.mrb[70].mxu0 %v14760_v1  ;;  %8837 = vmatmul.mubr.f32.vlgmr.msra.gmra.mrb[130].mxu1 %v14760_v1 }
 0x891   : > { %10235 = vmatpush1.bf16.msra.mxu0 %v16716_v59  ;;  %10266 = vmatpush3.bf16.msra.mxu1 %v13530_v32 }
 0x892   : > { %10237 = vmatprep.subr.bf16.mxu0 %v16717_v30  ;;  %10267 = vmatprep.subr.bf16.mxu1 %v16579_v26 }
 0x893   : > { %3398 = vmatprep.mubr.f32.mxu0 %v16580_v40  ;;  %8871 = vmatprep.mubr.msk.f32.mxu1 %vm12601_vm2, %v16580_v40 }
 0x895   : > { %10239 = vmatpush1.bf16.msra.mxu0 %v16718_v41  ;;  %10269 = vmatpush3.bf16.msra.mxu1 %v13541_v5 }
 0x896   : > { %10241 = vmatprep.subr.bf16.mxu0 %v16719_v17  ;;  %10270 = vmatprep.subr.bf16.mxu1 %v16579_v26 }
 0x899   : > { %10243 = vmatpush1.bf16.msra.mxu0 %v16720_v9  ;;  %10272 = vmatpush3.bf16.msra.mxu1 %v13553_v39 }
 0x89a   : > { %10245 = vmatprep.subr.bf16.mxu0 %v16721_v33  ;;  %10273 = vmatprep.subr.bf16.mxu1 %v16579_v26 }
 0x89d   : > { %10247 = vmatpush1.bf16.msra.mxu0 %v16722_v21  ;;  %10275 = vmatpush3.bf16.msra.mxu1 %v13565_v10 }
 0x89e   : > { %10249 = vmatprep.subr.bf16.mxu0 %v16723_v37  ;;  %10276 = vmatprep.subr.bf16.mxu1 %v16579_v26 }
 0x8a1   : > { %10251 = vmatpush1.bf16.msra.mxu0 %v16724_v63  ;;  %10278 = vmatpush3.bf16.msra.mxu1 %v16644_v31 }
 0x8a2   : > { %10253 = vmatprep.subr.bf16.mxu0 %v16725_v7  ;;  %10279 = vmatprep.subr.bf16.mxu1 %v16579_v26 }
 0x8a5   : > { %10255 = vmatpush1.bf16.msra.mxu0 %v16726_v54  ;;  %10281 = vmatpush3.bf16.msra.mxu1 %v16648_v46 }
 0x8a6   : > { %10257 = vmatprep.subr.bf16.mxu0 %v16727_v50  ;;  %10282 = vmatprep.subr.bf16.mxu1 %v16579_v26 }
 0x8a9   : > { %10259 = vmatpush1.bf16.msra.mxu0 %v16728_v24  ;;  %10284 = vmatpush3.bf16.msra.mxu1 %v16652_v4 }
 0x8aa   : > { %10261 = vmatprep.subr.bf16.mxu0 %v16729_v36  ;;  %10285 = vmatprep.subr.bf16.mxu1 %v16579_v26 }
 0x8ad   : > { %10263 = vmatpush1.bf16.msra.mxu0 %v16730_v56  ;;  %10287 = vmatpush3.bf16.msra.mxu1 %v16656_v52 }
 0x8ae   : > { %10289 = vmatprep.subr.bf16.mxu0 %v16731_v3  ;;  %10320 = vmatprep.subr.bf16.mxu1 %v16579_v26 }
 0x963   : > { %v3232_v58 = vpop.f32.mrb[70].mxu0  ;;  %v3303_v20 = vpop.f32.mrb[130].mxu1 }
 0x964   : > { %v3307_v53 = vadd.f32 %v3232_v58, %v16752_v60  ;;  %v3234_v0 = vpop.f32.mrb[71].mxu0  ;;  %v8838_v61 = vpop.f32.mrb[131].mxu1  ;;  %v3321_v35 = vadd.f32 %v14488_v29, %v3303_v20 }
 0x965   : > { %v3314_v6 = vadd.f32 %v3234_v0, %v16755_v51  ;;  %v16756_v61 = vld [vmem:[#allocation112_spill] sm:$0xff] }
 0x966   : > { %v7885_v27 = vmul.f32 -1.442695, %v3307_v53  ;;  %v16758_v42 = vsel %vm14287_vm5, %v16756_v61, %v16757_v38 }
 0x967   : > { %v7886_v34 = vmul.f32 -1.442695, %v3314_v6 }
 0x968   : > { %11883 = vpow2.f32 %v7885_v27 }
 0x969   : > { %11885 = vpow2.f32 %v7886_v34 }
 0x972   : > { %v11884_v22 = vpop.eup %11883 }
 0x973   : > { %v3311_v8 = vadd.f32 1.0, %v11884_v22  ;;  %v11886_v15 = vpop.eup %11885 }
 0x974   : > { %v3318_v45 = vadd.f32 1.0, %v11886_v15 }
 0x975   : > { %11887 = vrcp.f32 %v3311_v8 }
 0x976   : > { %11889 = vrcp.f32 %v3318_v45  ;;  %v16760_v45 = vld [vmem:[#allocation49_spill] sm:$0xff] }
 0x97f   : > { %v11888_v58 = vpop.eup %11887 }
 0x980   : > { %v3322_v60 = vmul.f32 %v11888_v58, %v3321_v35  ;;  %v11890_v53 = vpop.eup %11889  ;;  %v16761_v58 = vld [vmem:[#allocation66_spill] sm:$0xff] }
 0x981   : > { %v3325_v51 = vsub.f32 1.0, %v11890_v53  ;;  %v3327_v34 = vmul.f32 %v11890_v53, %v14760_v1 }
 0x982   : > { %v3323_v0 = vadd.f32 %v3322_v60, %v16758_v42  ;;  %v16762_v60 = vld [vmem:[#allocation96_spill] sm:$0xff] }
 0x984   : > { %11891 = vtanh.f32 %v3323_v0  ;;  %v16763_v0 = vsel %vm13903_vm4, %v16761_v58, %v16762_v60  ;;  %v16805_v60 = vld [vmem:[#allocation53_spill] sm:$0xff] }
 0x98e   : > { %v11892_v6 = vpop.eup %11891 }
 0x98f   : > { %v3326_v27 = vmul.f32 %v11892_v6, %v3325_v51 }
 0x991   : > { %v14812_v22 = vadd.f32 %v3327_v34, %v3326_v27 }
 0x993   : > { %16759 = vst [vmem:[#allocation33_spill] sm:$0xff] %v14812_v22  ;;  %3399 = vmatmul.mubr.f32.vlgmr.msra.gmra.mrb[72].mxu0 %v14812_v22  ;;  %8872 = vmatmul.mubr.f32.vlgmr.msra.gmra.mrb[132].mxu1 %v14812_v22 }
 0x994   : > { %10291 = vmatpush1.bf16.msra.mxu0 %v16716_v59  ;;  %10322 = vmatpush3.bf16.msra.mxu1 %v13530_v32 }
 0x995   : > { %10293 = vmatprep.subr.bf16.mxu0 %v16717_v30  ;;  %10323 = vmatprep.subr.bf16.mxu1 %v16579_v26 }
 0x996   : > { %3566 = vmatprep.mubr.f32.mxu0 %v16580_v40  ;;  %8906 = vmatprep.mubr.msk.f32.mxu1 %vm12601_vm2, %v16580_v40 }
 0x998   : > { %10295 = vmatpush1.bf16.msra.mxu0 %v16718_v41  ;;  %10325 = vmatpush3.bf16.msra.mxu1 %v13541_v5 }
 0x999   : > { %10297 = vmatprep.subr.bf16.mxu0 %v16719_v17  ;;  %10326 = vmatprep.subr.bf16.mxu1 %v16579_v26 }
 0x99c   : > { %10299 = vmatpush1.bf16.msra.mxu0 %v16720_v9  ;;  %10328 = vmatpush3.bf16.msra.mxu1 %v13553_v39 }
 0x99d   : > { %10301 = vmatprep.subr.bf16.mxu0 %v16721_v33  ;;  %10329 = vmatprep.subr.bf16.mxu1 %v16579_v26 }
 0x9a0   : > { %10303 = vmatpush1.bf16.msra.mxu0 %v16722_v21  ;;  %10331 = vmatpush3.bf16.msra.mxu1 %v13565_v10 }
 0x9a1   : > { %10305 = vmatprep.subr.bf16.mxu0 %v16723_v37  ;;  %10332 = vmatprep.subr.bf16.mxu1 %v16579_v26 }
 0x9a4   : > { %10307 = vmatpush1.bf16.msra.mxu0 %v16724_v63  ;;  %10334 = vmatpush3.bf16.msra.mxu1 %v16644_v31 }
 0x9a5   : > { %10309 = vmatprep.subr.bf16.mxu0 %v16725_v7  ;;  %10335 = vmatprep.subr.bf16.mxu1 %v16579_v26 }
 0x9a8   : > { %10311 = vmatpush1.bf16.msra.mxu0 %v16726_v54  ;;  %10337 = vmatpush3.bf16.msra.mxu1 %v16648_v46 }
 0x9a9   : > { %10313 = vmatprep.subr.bf16.mxu0 %v16727_v50  ;;  %10338 = vmatprep.subr.bf16.mxu1 %v16579_v26 }
 0x9ac   : > { %10315 = vmatpush1.bf16.msra.mxu0 %v16728_v24  ;;  %10340 = vmatpush3.bf16.msra.mxu1 %v16652_v4 }
 0x9ad   : > { %10317 = vmatprep.subr.bf16.mxu0 %v16729_v36  ;;  %10341 = vmatprep.subr.bf16.mxu1 %v16579_v26 }
 0x9b0   : > { %10319 = vmatpush1.bf16.msra.mxu0 %v16730_v56  ;;  %10343 = vmatpush3.bf16.msra.mxu1 %v16656_v52 }
 0x9b1   : > { %10345 = vmatprep.subr.bf16.mxu0 %v16731_v3  ;;  %10376 = vmatprep.subr.bf16.mxu1 %v16579_v26 }
 0xa66   : > { %v3400_v35 = vpop.f32.mrb[72].mxu0  ;;  %v3471_v42 = vpop.f32.mrb[132].mxu1 }
 0xa67   : > { %v3475_v15 = vadd.f32 %v3400_v35, %v16760_v45  ;;  %v3402_v20 = vpop.f32.mrb[73].mxu0  ;;  %v8873_v8 = vpop.f32.mrb[133].mxu1  ;;  %v3489_v47 = vadd.f32 %v14488_v29, %v3471_v42 }
 0xa68   : > { %v3482_v53 = vadd.f32 %v3402_v20, %v16763_v0  ;;  %v16764_v8 = vld [vmem:[#allocation110_spill] sm:$0xff] }
 0xa69   : > { %v7887_v51 = vmul.f32 -1.442695, %v3475_v15  ;;  %v16766_v48 = vsel %vm14287_vm5, %v16764_v8, %v16765_v25 }
 0xa6a   : > { %v7888_v6 = vmul.f32 -1.442695, %v3482_v53 }
 0xa6b   : > { %11893 = vpow2.f32 %v7887_v51 }
 0xa6c   : > { %11895 = vpow2.f32 %v7888_v6 }
 0xa75   : > { %v11894_v27 = vpop.eup %11893 }
 0xa76   : > { %v3479_v34 = vadd.f32 1.0, %v11894_v27  ;;  %v11896_v1 = vpop.eup %11895 }
 0xa77   : > { %v3486_v55 = vadd.f32 1.0, %v11896_v1 }
 0xa78   : > { %11897 = vrcp.f32 %v3479_v34 }
 0xa79   : > { %11899 = vrcp.f32 %v3486_v55  ;;  %v16768_v55 = vld [vmem:[#allocation94_spill] sm:$0xff] }
 0xa82   : > { %v11898_v35 = vpop.eup %11897 }
 0xa83   : > { %v3490_v45 = vmul.f32 %v11898_v35, %v3489_v47  ;;  %v11900_v15 = vpop.eup %11899  ;;  %v16769_v35 = vld [vmem:[#allocation68_spill] sm:$0xff] }
 0xa84   : > { %v3493_v0 = vsub.f32 1.0, %v11900_v15  ;;  %v3495_v6 = vmul.f32 %v11900_v15, %v14812_v22 }
 0xa85   : > { %v3491_v20 = vadd.f32 %v3490_v45, %v16766_v48  ;;  %v16770_v45 = vld [vmem:[#allocation93_spill] sm:$0xff] }
 0xa87   : > { %11901 = vtanh.f32 %v3491_v20  ;;  %v16771_v20 = vsel %vm13903_vm4, %v16769_v35, %v16770_v45  ;;  %v16813_v45 = vld [vmem:[#allocation78_spill] sm:$0xff] }
 0xa91   : > { %v11902_v53 = vpop.eup %11901 }
 0xa92   : > { %v3494_v51 = vmul.f32 %v11902_v53, %v3493_v0 }
 0xa94   : > { %v14864_v27 = vadd.f32 %v3495_v6, %v3494_v51 }
 0xa96   : > { %16767 = vst [vmem:[#allocation34_spill] sm:$0xff] %v14864_v27  ;;  %3567 = vmatmul.mubr.f32.vlgmr.msra.gmra.mrb[74].mxu0 %v14864_v27  ;;  %8907 = vmatmul.mubr.f32.vlgmr.msra.gmra.mrb[134].mxu1 %v14864_v27 }
 0xa97   : > { %10347 = vmatpush1.bf16.msra.mxu0 %v16716_v59  ;;  %10378 = vmatpush3.bf16.msra.mxu1 %v13530_v32 }
 0xa98   : > { %10349 = vmatprep.subr.bf16.mxu0 %v16717_v30  ;;  %10379 = vmatprep.subr.bf16.mxu1 %v16579_v26 }
 0xa99   : > { %3734 = vmatprep.mubr.f32.mxu0 %v16580_v40  ;;  %8941 = vmatprep.mubr.msk.f32.mxu1 %vm12601_vm2, %v16580_v40 }
 0xa9b   : > { %10351 = vmatpush1.bf16.msra.mxu0 %v16718_v41  ;;  %10381 = vmatpush3.bf16.msra.mxu1 %v13541_v5 }
 0xa9c   : > { %10353 = vmatprep.subr.bf16.mxu0 %v16719_v17  ;;  %10382 = vmatprep.subr.bf16.mxu1 %v16579_v26 }
 0xa9f   : > { %10355 = vmatpush1.bf16.msra.mxu0 %v16720_v9  ;;  %10384 = vmatpush3.bf16.msra.mxu1 %v13553_v39 }
 0xaa0   : > { %10357 = vmatprep.subr.bf16.mxu0 %v16721_v33  ;;  %10385 = vmatprep.subr.bf16.mxu1 %v16579_v26 }
 0xaa3   : > { %10359 = vmatpush1.bf16.msra.mxu0 %v16722_v21  ;;  %10387 = vmatpush3.bf16.msra.mxu1 %v13565_v10 }
 0xaa4   : > { %10361 = vmatprep.subr.bf16.mxu0 %v16723_v37  ;;  %10388 = vmatprep.subr.bf16.mxu1 %v16579_v26 }
 0xaa7   : > { %10363 = vmatpush1.bf16.msra.mxu0 %v16724_v63  ;;  %10390 = vmatpush3.bf16.msra.mxu1 %v16644_v31 }
 0xaa8   : > { %10365 = vmatprep.subr.bf16.mxu0 %v16725_v7  ;;  %10391 = vmatprep.subr.bf16.mxu1 %v16579_v26 }
 0xaab   : > { %10367 = vmatpush1.bf16.msra.mxu0 %v16726_v54  ;;  %10393 = vmatpush3.bf16.msra.mxu1 %v16648_v46 }
 0xaac   : > { %10369 = vmatprep.subr.bf16.mxu0 %v16727_v50  ;;  %10394 = vmatprep.subr.bf16.mxu1 %v16579_v26 }
 0xaaf   : > { %10371 = vmatpush1.bf16.msra.mxu0 %v16728_v24  ;;  %10396 = vmatpush3.bf16.msra.mxu1 %v16652_v4 }
 0xab0   : > { %10373 = vmatprep.subr.bf16.mxu0 %v16729_v36  ;;  %10397 = vmatprep.subr.bf16.mxu1 %v16579_v26 }
 0xab3   : > { %10375 = vmatpush1.bf16.msra.mxu0 %v16730_v56  ;;  %10399 = vmatpush3.bf16.msra.mxu1 %v16656_v52 }
 0xab4   : > { %10401 = vmatprep.subr.bf16.mxu0 %v16731_v3  ;;  %10432 = vmatprep.subr.bf16.mxu1 %v16579_v26 }
 0xb69   : > { %v3568_v47 = vpop.f32.mrb[74].mxu0  ;;  %v3639_v48 = vpop.f32.mrb[134].mxu1 }
 0xb6a   : > { %v3643_v1 = vadd.f32 %v3568_v47, %v16768_v55  ;;  %v3570_v42 = vpop.f32.mrb[75].mxu0  ;;  %v8908_v34 = vpop.f32.mrb[135].mxu1  ;;  %v3657_v14 = vadd.f32 %v14488_v29, %v3639_v48  ;;  %v16776_v29 = vld [vmem:[#allocation91_spill] sm:$0xff] }
 0xb6b   : > { %v3650_v15 = vadd.f32 %v3570_v42, %v16771_v20  ;;  %v16772_v34 = vld [vmem:[#allocation108_spill] sm:$0xff] }
 0xb6c   : > { %v7889_v0 = vmul.f32 -1.442695, %v3643_v1  ;;  %v16774_v16 = vsel %vm14287_vm5, %v16772_v34, %v16773_v49 }
 0xb6d   : > { %v7890_v53 = vmul.f32 -1.442695, %v3650_v15 }
 0xb6e   : > { %11903 = vpow2.f32 %v7889_v0 }
 0xb6f   : > { %11905 = vpow2.f32 %v7890_v53 }
 0xb78   : > { %v11904_v51 = vpop.eup %11903 }
 0xb79   : > { %v3647_v6 = vadd.f32 1.0, %v11904_v51  ;;  %v11906_v22 = vpop.eup %11905 }
 0xb7a   : > { %v3654_v13 = vadd.f32 1.0, %v11906_v22 }
 0xb7b   : > { %11907 = vrcp.f32 %v3647_v6  ;;  %v16777_v6 = vld [vmem:[#allocation71_spill] sm:$0xff] }
 0xb7c   : > { %11909 = vrcp.f32 %v3654_v13 }
 0xb85   : > { %v11908_v47 = vpop.eup %11907 }
 0xb86   : > { %v3658_v55 = vmul.f32 %v11908_v47, %v3657_v14  ;;  %v11910_v1 = vpop.eup %11909  ;;  %v16778_v47 = vld [vmem:[#allocation90_spill] sm:$0xff] }
 0xb87   : > { %v3661_v20 = vsub.f32 1.0, %v11910_v1  ;;  %v3663_v53 = vmul.f32 %v11910_v1, %v14864_v27 }
 0xb88   : > { %v3659_v42 = vadd.f32 %v3658_v55, %v16774_v16  ;;  %v16779_v55 = vsel %vm13903_vm4, %v16777_v6, %v16778_v47  ;;  %v16817_v47 = vld [vmem:[#allocation57_spill] sm:$0xff] }
 0xb8a   : > { %11911 = vtanh.f32 %v3659_v42 }
 0xb94   : > { %v11912_v15 = vpop.eup %11911 }
 0xb95   : > { %v3662_v0 = vmul.f32 %v11912_v15, %v3661_v20 }
 0xb97   : > { %v14916_v51 = vadd.f32 %v3663_v53, %v3662_v0 }
 0xb99   : > { %16775 = vst [vmem:[#allocation35_spill] sm:$0xff] %v14916_v51  ;;  %3735 = vmatmul.mubr.f32.vlgmr.msra.gmra.mrb[76].mxu0 %v14916_v51  ;;  %8942 = vmatmul.mubr.f32.vlgmr.msra.gmra.mrb[136].mxu1 %v14916_v51 }
 0xb9a   : > { %10403 = vmatpush1.bf16.msra.mxu0 %v16716_v59  ;;  %10434 = vmatpush3.bf16.msra.mxu1 %v13530_v32 }
 0xb9b   : > { %10405 = vmatprep.subr.bf16.mxu0 %v16717_v30  ;;  %10435 = vmatprep.subr.bf16.mxu1 %v16579_v26 }
 0xb9c   : > { %3902 = vmatprep.mubr.f32.mxu0 %v16580_v40  ;;  %8976 = vmatprep.mubr.msk.f32.mxu1 %vm12601_vm2, %v16580_v40 }
 0xb9e   : > { %10407 = vmatpush1.bf16.msra.mxu0 %v16718_v41  ;;  %10437 = vmatpush3.bf16.msra.mxu1 %v13541_v5 }
 0xb9f   : > { %10409 = vmatprep.subr.bf16.mxu0 %v16719_v17  ;;  %10438 = vmatprep.subr.bf16.mxu1 %v16579_v26 }
 0xba2   : > { %10411 = vmatpush1.bf16.msra.mxu0 %v16720_v9  ;;  %10440 = vmatpush3.bf16.msra.mxu1 %v13553_v39 }
 0xba3   : > { %10413 = vmatprep.subr.bf16.mxu0 %v16721_v33  ;;  %10441 = vmatprep.subr.bf16.mxu1 %v16579_v26 }
 0xba6   : > { %10415 = vmatpush1.bf16.msra.mxu0 %v16722_v21  ;;  %10443 = vmatpush3.bf16.msra.mxu1 %v13565_v10 }
 0xba7   : > { %10417 = vmatprep.subr.bf16.mxu0 %v16723_v37  ;;  %10444 = vmatprep.subr.bf16.mxu1 %v16579_v26 }
 0xbaa   : > { %10419 = vmatpush1.bf16.msra.mxu0 %v16724_v63  ;;  %10446 = vmatpush3.bf16.msra.mxu1 %v16644_v31 }
 0xbab   : > { %10421 = vmatprep.subr.bf16.mxu0 %v16725_v7  ;;  %10447 = vmatprep.subr.bf16.mxu1 %v16579_v26 }
 0xbae   : > { %10423 = vmatpush1.bf16.msra.mxu0 %v16726_v54  ;;  %10449 = vmatpush3.bf16.msra.mxu1 %v16648_v46 }
 0xbaf   : > { %10425 = vmatprep.subr.bf16.mxu0 %v16727_v50  ;;  %10450 = vmatprep.subr.bf16.mxu1 %v16579_v26 }
 0xbb2   : > { %10427 = vmatpush1.bf16.msra.mxu0 %v16728_v24  ;;  %10452 = vmatpush3.bf16.msra.mxu1 %v16652_v4 }
 0xbb3   : > { %10429 = vmatprep.subr.bf16.mxu0 %v16729_v36  ;;  %10453 = vmatprep.subr.bf16.mxu1 %v16579_v26 }
 0xbb6   : > { %10431 = vmatpush1.bf16.msra.mxu0 %v16730_v56  ;;  %10455 = vmatpush3.bf16.msra.mxu1 %v16656_v52 }
 0xbb7   : > { %10457 = vmatprep.subr.bf16.mxu0 %v16731_v3  ;;  %10488 = vmatprep.subr.bf16.mxu1 %v16579_v26 }
 0xc6c   : > { %v3736_v14 = vpop.f32.mrb[76].mxu0  ;;  %v3807_v16 = vpop.f32.mrb[136].mxu1 }
 0xc6d   : > { %v3811_v13 = vadd.f32 %v3736_v14, %v16776_v29  ;;  %v3738_v22 = vpop.f32.mrb[77].mxu0  ;;  %v8943_v48 = vpop.f32.mrb[137].mxu1  ;;  %v3825_v14 = vadd.f32 %v14961_v18, %v3807_v16 }
 0xc6e   : > { %v3818_v42 = vadd.f32 %v3738_v22, %v16779_v55  ;;  %v16781_v22 = vld [vmem:[#allocation107_spill] sm:$0xff] }
 0xc6f   : > { %v7891_v1 = vmul.f32 -1.442695, %v3811_v13  ;;  %v16782_v13 = vsel %vm14287_vm5, %v16780_v2, %v16781_v22 }
 0xc70   : > { %v7892_v20 = vmul.f32 -1.442695, %v3818_v42 }
 0xc71   : > { %11913 = vpow2.f32 %v7891_v1 }
 0xc72   : > { %11915 = vpow2.f32 %v7892_v20 }
 0xc7b   : > { %v11914_v15 = vpop.eup %11913 }
 0xc7c   : > { %v3815_v0 = vadd.f32 1.0, %v11914_v15  ;;  %v11916_v53 = vpop.eup %11915 }
 0xc7d   : > { %v3822_v27 = vadd.f32 1.0, %v11916_v53 }
 0xc7e   : > { %11917 = vrcp.f32 %v3815_v0 }
 0xc7f   : > { %11919 = vrcp.f32 %v3822_v27 }
 0xc88   : > { %v11918_v29 = vpop.eup %11917 }
 0xc89   : > { %v3826_v48 = vmul.f32 %v11918_v29, %v3825_v14  ;;  %v11920_v42 = vpop.eup %11919  ;;  %v16784_v14 = vld [vmem:[#allocation88_spill] sm:$0xff] }
 0xc8a   : > { %v3829_v1 = vsub.f32 1.0, %v11920_v42  ;;  %v3831_v0 = vmul.f32 %v11920_v42, %v14916_v51  ;;  %v16786_v42 = vld [vmem:[#allocation87_spill] sm:$0xff] }
 0xc8b   : > { %v3827_v55 = vadd.f32 %v3826_v48, %v16782_v13 }
 0xc8d   : > { %11921 = vtanh.f32 %v3827_v55  ;;  %v16785_v55 = vld [vmem:[#allocation74_spill] sm:$0xff] }
 0xc97   : > { %v11922_v20 = vpop.eup %11921 }
 0xc98   : > { %v3830_v15 = vmul.f32 %v11922_v20, %v3829_v1  ;;  %v16787_v1 = vsel %vm13903_vm4, %v16785_v55, %v16786_v42 }
 0xc9a   : > { %v14970_v53 = vadd.f32 %v3831_v0, %v3830_v15 }
 0xc9c   : > { %16783 = vst [vmem:[#allocation36_spill] sm:$0xff] %v14970_v53  ;;  %3903 = vmatmul.mubr.f32.vlgmr.msra.gmra.mrb[78].mxu0 %v14970_v53  ;;  %8977 = vmatmul.mubr.f32.vlgmr.msra.gmra.mrb[138].mxu1 %v14970_v53 }
 0xc9d   : > { %10459 = vmatpush1.bf16.msra.mxu0 %v16716_v59  ;;  %10490 = vmatpush3.bf16.msra.mxu1 %v13530_v32 }
 0xc9e   : > { %10461 = vmatprep.subr.bf16.mxu0 %v16717_v30  ;;  %10491 = vmatprep.subr.bf16.mxu1 %v16579_v26 }
 0xc9f   : > { %4070 = vmatprep.mubr.f32.mxu0 %v16580_v40  ;;  %9011 = vmatprep.mubr.msk.f32.mxu1 %vm12601_vm2, %v16580_v40 }
 0xca1   : > { %10463 = vmatpush1.bf16.msra.mxu0 %v16718_v41  ;;  %10493 = vmatpush3.bf16.msra.mxu1 %v13541_v5 }
 0xca2   : > { %10465 = vmatprep.subr.bf16.mxu0 %v16719_v17  ;;  %10494 = vmatprep.subr.bf16.mxu1 %v16579_v26 }
 0xca5   : > { %10467 = vmatpush1.bf16.msra.mxu0 %v16720_v9  ;;  %10496 = vmatpush3.bf16.msra.mxu1 %v13553_v39 }
 0xca6   : > { %10469 = vmatprep.subr.bf16.mxu0 %v16721_v33  ;;  %10497 = vmatprep.subr.bf16.mxu1 %v16579_v26 }
 0xca9   : > { %10471 = vmatpush1.bf16.msra.mxu0 %v16722_v21  ;;  %10499 = vmatpush3.bf16.msra.mxu1 %v13565_v10 }
 0xcaa   : > { %10473 = vmatprep.subr.bf16.mxu0 %v16723_v37  ;;  %10500 = vmatprep.subr.bf16.mxu1 %v16579_v26 }
 0xcad   : > { %10475 = vmatpush1.bf16.msra.mxu0 %v16724_v63  ;;  %10502 = vmatpush3.bf16.msra.mxu1 %v16644_v31 }
 0xcae   : > { %10477 = vmatprep.subr.bf16.mxu0 %v16725_v7  ;;  %10503 = vmatprep.subr.bf16.mxu1 %v16579_v26 }
 0xcb1   : > { %10479 = vmatpush1.bf16.msra.mxu0 %v16726_v54  ;;  %10505 = vmatpush3.bf16.msra.mxu1 %v16648_v46 }
 0xcb2   : > { %10481 = vmatprep.subr.bf16.mxu0 %v16727_v50  ;;  %10506 = vmatprep.subr.bf16.mxu1 %v16579_v26 }
 0xcb5   : > { %10483 = vmatpush1.bf16.msra.mxu0 %v16728_v24  ;;  %10508 = vmatpush3.bf16.msra.mxu1 %v16652_v4 }
 0xcb6   : > { %10485 = vmatprep.subr.bf16.mxu0 %v16729_v36  ;;  %10509 = vmatprep.subr.bf16.mxu1 %v16579_v26 }
 0xcb9   : > { %10487 = vmatpush1.bf16.msra.mxu0 %v16730_v56  ;;  %10511 = vmatpush3.bf16.msra.mxu1 %v16656_v52 }
 0xcba   : > { %10513 = vmatprep.subr.bf16.mxu0 %v16731_v3  ;;  %10544 = vmatprep.subr.bf16.mxu1 %v16579_v26 }
 0xd6f   : > { %v3904_v27 = vpop.f32.mrb[78].mxu0  ;;  %v3975_v16 = vpop.f32.mrb[138].mxu1 }
 0xd70   : > { %v3979_v29 = vadd.f32 %v3904_v27, %v16784_v14  ;;  %v3906_v48 = vpop.f32.mrb[79].mxu0  ;;  %v8978_v13 = vpop.f32.mrb[139].mxu1  ;;  %v3993_v28 = vadd.f32 %v14961_v18, %v3975_v16 }
 0xd71   : > { %v3986_v20 = vadd.f32 %v3906_v48, %v16787_v1  ;;  %v16788_v13 = vld [vmem:[#allocation104_spill] sm:$0xff] }
 0xd72   : > { %v7893_v15 = vmul.f32 -1.442695, %v3979_v29  ;;  %v16790_v61 = vsel %vm14287_vm5, %v16788_v13, %v16789_v12 }
 0xd73   : > { %v7894_v0 = vmul.f32 -1.442695, %v3986_v20 }
 0xd74   : > { %11923 = vpow2.f32 %v7893_v15 }
 0xd75   : > { %11925 = vpow2.f32 %v7894_v0 }
 0xd7e   : > { %v11924_v51 = vpop.eup %11923 }
 0xd7f   : > { %v3983_v43 = vadd.f32 1.0, %v11924_v51  ;;  %v11926_v62 = vpop.eup %11925 }
 0xd80   : > { %v3990_v19 = vadd.f32 1.0, %v11926_v62  ;;  %v16792_v62 = vld [vmem:[#allocation85_spill] sm:$0xff] }
 0xd81   : > { %11927 = vrcp.f32 %v3983_v43 }
 0xd82   : > { %11929 = vrcp.f32 %v3990_v19 }
 0xd8b   : > { %v11928_v27 = vpop.eup %11927 }
 0xd8c   : > { %v3994_v14 = vmul.f32 %v11928_v27, %v3993_v28  ;;  %v11930_v29 = vpop.eup %11929  ;;  %v16793_v27 = vld [vmem:[#allocation77_spill] sm:$0xff] }
 0xd8d   : > { %v3997_v1 = vsub.f32 1.0, %v11930_v29  ;;  %v3999_v43 = vmul.f32 %v11930_v29, %v14970_v53 }
 0xd8e   : > { %v3995_v48 = vadd.f32 %v3994_v14, %v16790_v61  ;;  %v16794_v14 = vld [vmem:[#allocation84_spill] sm:$0xff] }
 0xd90   : > { %11931 = vtanh.f32 %v3995_v48  ;;  %v16795_v48 = vsel %vm13903_vm4, %v16793_v27, %v16794_v14 }
 0xd9a   : > { %v11932_v20 = vpop.eup %11931 }
 0xd9b   : > { %v3998_v15 = vmul.f32 %v11932_v20, %v3997_v1 }
 0xd9d   : > { %v15022_v51 = vadd.f32 %v3999_v43, %v3998_v15 }
 0xd9f   : > { %16791 = vst [vmem:[#allocation37_spill] sm:$0xff] %v15022_v51  ;;  %4071 = vmatmul.mubr.f32.vlgmr.msra.gmra.mrb[80].mxu0 %v15022_v51  ;;  %9012 = vmatmul.mubr.f32.vlgmr.msra.gmra.mrb[140].mxu1 %v15022_v51 }
 0xda0   : > { %10515 = vmatpush1.bf16.msra.mxu0 %v16716_v59  ;;  %10546 = vmatpush3.bf16.msra.mxu1 %v13530_v32 }
 0xda1   : > { %10517 = vmatprep.subr.bf16.mxu0 %v16717_v30  ;;  %10547 = vmatprep.subr.bf16.mxu1 %v16579_v26 }
 0xda2   : > { %4238 = vmatprep.mubr.f32.mxu0 %v16580_v40  ;;  %9046 = vmatprep.mubr.msk.f32.mxu1 %vm12601_vm2, %v16580_v40 }
 0xda4   : > { %10519 = vmatpush1.bf16.msra.mxu0 %v16718_v41  ;;  %10549 = vmatpush3.bf16.msra.mxu1 %v13541_v5 }
 0xda5   : > { %10521 = vmatprep.subr.bf16.mxu0 %v16719_v17  ;;  %10550 = vmatprep.subr.bf16.mxu1 %v16579_v26 }
 0xda8   : > { %10523 = vmatpush1.bf16.msra.mxu0 %v16720_v9  ;;  %10552 = vmatpush3.bf16.msra.mxu1 %v13553_v39 }
 0xda9   : > { %10525 = vmatprep.subr.bf16.mxu0 %v16721_v33  ;;  %10553 = vmatprep.subr.bf16.mxu1 %v16579_v26 }
 0xdac   : > { %10527 = vmatpush1.bf16.msra.mxu0 %v16722_v21  ;;  %10555 = vmatpush3.bf16.msra.mxu1 %v13565_v10 }
 0xdad   : > { %10529 = vmatprep.subr.bf16.mxu0 %v16723_v37  ;;  %10556 = vmatprep.subr.bf16.mxu1 %v16579_v26 }
 0xdb0   : > { %10531 = vmatpush1.bf16.msra.mxu0 %v16724_v63  ;;  %10558 = vmatpush3.bf16.msra.mxu1 %v16644_v31 }
 0xdb1   : > { %10533 = vmatprep.subr.bf16.mxu0 %v16725_v7  ;;  %10559 = vmatprep.subr.bf16.mxu1 %v16579_v26 }
 0xdb4   : > { %10535 = vmatpush1.bf16.msra.mxu0 %v16726_v54  ;;  %10561 = vmatpush3.bf16.msra.mxu1 %v16648_v46 }
 0xdb5   : > { %10537 = vmatprep.subr.bf16.mxu0 %v16727_v50  ;;  %10562 = vmatprep.subr.bf16.mxu1 %v16579_v26 }
 0xdb8   : > { %10539 = vmatpush1.bf16.msra.mxu0 %v16728_v24  ;;  %10564 = vmatpush3.bf16.msra.mxu1 %v16652_v4 }
 0xdb9   : > { %10541 = vmatprep.subr.bf16.mxu0 %v16729_v36  ;;  %10565 = vmatprep.subr.bf16.mxu1 %v16579_v26 }
 0xdbc   : > { %10543 = vmatpush1.bf16.msra.mxu0 %v16730_v56  ;;  %10567 = vmatpush3.bf16.msra.mxu1 %v16656_v52 }
 0xdbd   : > { %10569 = vmatprep.subr.bf16.mxu0 %v16731_v3  ;;  %10600 = vmatprep.subr.bf16.mxu1 %v16579_v26 }
 0xe72   : > { %v4072_v19 = vpop.f32.mrb[80].mxu0  ;;  %v4143_v28 = vpop.f32.mrb[140].mxu1 }
 0xe73   : > { %v4147_v61 = vadd.f32 %v4072_v19, %v16792_v62  ;;  %v4074_v16 = vpop.f32.mrb[81].mxu0  ;;  %v9013_v0 = vpop.f32.mrb[141].mxu1  ;;  %v4161_v57 = vadd.f32 %v14961_v18, %v4143_v28 }
 0xe74   : > { %v4154_v29 = vadd.f32 %v4074_v16, %v16795_v48  ;;  %v16796_v0 = vld [vmem:[#allocation54_spill] sm:$0xff] }
 0xe75   : > { %v7895_v1 = vmul.f32 -1.442695, %v4147_v61  ;;  %v16798_v8 = vsel %vm14287_vm5, %v16796_v0, %v16797_v23 }
 0xe76   : > { %v7896_v20 = vmul.f32 -1.442695, %v4154_v29 }
 0xe77   : > { %11933 = vpow2.f32 %v7895_v1 }
 0xe78   : > { %11935 = vpow2.f32 %v7896_v20 }
 0xe81   : > { %v11934_v15 = vpop.eup %11933 }
 0xe82   : > { %v4151_v43 = vadd.f32 1.0, %v11934_v15  ;;  %v11936_v53 = vpop.eup %11935 }
 0xe83   : > { %v4158_v38 = vadd.f32 1.0, %v11936_v53 }
 0xe84   : > { %11937 = vrcp.f32 %v4151_v43 }
 0xe85   : > { %11939 = vrcp.f32 %v4158_v38 }
 0xe8e   : > { %v11938_v19 = vpop.eup %11937 }
 0xe8f   : > { %v4162_v62 = vmul.f32 %v11938_v19, %v4161_v57  ;;  %v11940_v61 = vpop.eup %11939  ;;  %v16801_v19 = vld [vmem:[#allocation79_spill] sm:$0xff] }
 0xe90   : > { %v4165_v48 = vsub.f32 1.0, %v11940_v61  ;;  %v4167_v20 = vmul.f32 %v11940_v61, %v15022_v51 }
 0xe91   : > { %v4163_v16 = vadd.f32 %v4162_v62, %v16798_v8  ;;  %v16800_v8 = vld [vmem:[#allocation48_spill] sm:$0xff]  ;;  %v16802_v62 = vld [vmem:[#allocation82_spill] sm:$0xff] }
 0xe93   : > { %11941 = vtanh.f32 %v4163_v16  ;;  %v16803_v16 = vsel %vm13903_vm4, %v16801_v19, %v16802_v62 }
 0xe9d   : > { %v11942_v29 = vpop.eup %11941 }
 0xe9e   : > { %v4166_v1 = vmul.f32 %v11942_v29, %v4165_v48 }
 0xea0   : > { %v15074_v15 = vadd.f32 %v4167_v20, %v4166_v1 }
 0xea2   : > { %16799 = vst [vmem:[#allocation38_spill] sm:$0xff] %v15074_v15  ;;  %4239 = vmatmul.mubr.f32.vlgmr.msra.gmra.mrb[82].mxu0 %v15074_v15  ;;  %9047 = vmatmul.mubr.f32.vlgmr.msra.gmra.mrb[142].mxu1 %v15074_v15 }
 0xea3   : > { %10571 = vmatpush1.bf16.msra.mxu0 %v16716_v59  ;;  %10602 = vmatpush3.bf16.msra.mxu1 %v13530_v32 }
 0xea4   : > { %10573 = vmatprep.subr.bf16.mxu0 %v16717_v30  ;;  %10603 = vmatprep.subr.bf16.mxu1 %v16579_v26 }
 0xea5   : > { %4406 = vmatprep.mubr.f32.mxu0 %v16580_v40  ;;  %9081 = vmatprep.mubr.msk.f32.mxu1 %vm12601_vm2, %v16580_v40 }
 0xea7   : > { %10575 = vmatpush1.bf16.msra.mxu0 %v16718_v41  ;;  %10605 = vmatpush3.bf16.msra.mxu1 %v13541_v5 }
 0xea8   : > { %10577 = vmatprep.subr.bf16.mxu0 %v16719_v17  ;;  %10606 = vmatprep.subr.bf16.mxu1 %v16579_v26 }
 0xeab   : > { %10579 = vmatpush1.bf16.msra.mxu0 %v16720_v9  ;;  %10608 = vmatpush3.bf16.msra.mxu1 %v13553_v39 }
 0xeac   : > { %10581 = vmatprep.subr.bf16.mxu0 %v16721_v33  ;;  %10609 = vmatprep.subr.bf16.mxu1 %v16579_v26 }
 0xeaf   : > { %10583 = vmatpush1.bf16.msra.mxu0 %v16722_v21  ;;  %10611 = vmatpush3.bf16.msra.mxu1 %v13565_v10 }
 0xeb0   : > { %10585 = vmatprep.subr.bf16.mxu0 %v16723_v37  ;;  %10612 = vmatprep.subr.bf16.mxu1 %v16579_v26 }
 0xeb3   : > { %10587 = vmatpush1.bf16.msra.mxu0 %v16724_v63  ;;  %10614 = vmatpush3.bf16.msra.mxu1 %v16644_v31 }
 0xeb4   : > { %10589 = vmatprep.subr.bf16.mxu0 %v16725_v7  ;;  %10615 = vmatprep.subr.bf16.mxu1 %v16579_v26 }
 0xeb7   : > { %10591 = vmatpush1.bf16.msra.mxu0 %v16726_v54  ;;  %10617 = vmatpush3.bf16.msra.mxu1 %v16648_v46 }
 0xeb8   : > { %10593 = vmatprep.subr.bf16.mxu0 %v16727_v50  ;;  %10618 = vmatprep.subr.bf16.mxu1 %v16579_v26 }
 0xebb   : > { %10595 = vmatpush1.bf16.msra.mxu0 %v16728_v24  ;;  %10620 = vmatpush3.bf16.msra.mxu1 %v16652_v4 }
 0xebc   : > { %10597 = vmatprep.subr.bf16.mxu0 %v16729_v36  ;;  %10621 = vmatprep.subr.bf16.mxu1 %v16579_v26 }
 0xebf   : > { %10599 = vmatpush1.bf16.msra.mxu0 %v16730_v56  ;;  %10623 = vmatpush3.bf16.msra.mxu1 %v16656_v52 }
 0xec0   : > { %10625 = vmatprep.subr.bf16.mxu0 %v16731_v3  ;;  %10656 = vmatprep.subr.bf16.mxu1 %v16579_v26 }
 0xf75   : > { %v4240_v38 = vpop.f32.mrb[82].mxu0  ;;  %v4311_v57 = vpop.f32.mrb[142].mxu1 }
 0xf76   : > { %v4315_v53 = vadd.f32 %v4240_v38, %v16800_v8  ;;  %v4242_v28 = vpop.f32.mrb[83].mxu0  ;;  %v9048_v43 = vpop.f32.mrb[143].mxu1  ;;  %v4329_v58 = vadd.f32 %v14961_v18, %v4311_v57 }
 0xf77   : > { %v4322_v61 = vadd.f32 %v4242_v28, %v16803_v16  ;;  %v16804_v43 = vld [vmem:[#allocation55_spill] sm:$0xff] }
 0xf78   : > { %v7897_v48 = vmul.f32 -1.442695, %v4315_v53  ;;  %v16806_v34 = vsel %vm14287_vm5, %v16804_v43, %v16805_v60 }
 0xf79   : > { %v7898_v29 = vmul.f32 -1.442695, %v4322_v61 }
 0xf7a   : > { %11943 = vpow2.f32 %v7897_v48 }
 0xf7b   : > { %11945 = vpow2.f32 %v7898_v29 }
 0xf84   : > { %v11944_v1 = vpop.eup %11943 }
 0xf85   : > { %v4319_v20 = vadd.f32 1.0, %v11944_v1  ;;  %v11946_v51 = vpop.eup %11945 }
 0xf86   : > { %v4326_v25 = vadd.f32 1.0, %v11946_v51 }
 0xf87   : > { %11947 = vrcp.f32 %v4319_v20 }
 0xf88   : > { %11949 = vrcp.f32 %v4326_v25 }
 0xf91   : > { %v11948_v38 = vpop.eup %11947 }
 0xf92   : > { %v4330_v8 = vmul.f32 %v11948_v38, %v4329_v58  ;;  %v11950_v53 = vpop.eup %11949  ;;  %v16809_v38 = vld [vmem:[#allocation44_spill] sm:$0xff] }
 0xf93   : > { %v4333_v16 = vsub.f32 1.0, %v11950_v53  ;;  %v4335_v29 = vmul.f32 %v11950_v53, %v15074_v15 }
 0xf94   : > { %v4331_v28 = vadd.f32 %v4330_v8, %v16806_v34  ;;  %v16808_v34 = vld [vmem:[#allocation47_spill] sm:$0xff]  ;;  %v16810_v8 = vld [vmem:[#allocation80_spill] sm:$0xff] }
 0xf96   : > { %11951 = vtanh.f32 %v4331_v28  ;;  %v16811_v28 = vsel %vm13903_vm4, %v16809_v38, %v16810_v8 }
 0xfa0   : > { %v11952_v61 = vpop.eup %11951 }
 0xfa1   : > { %v4334_v48 = vmul.f32 %v11952_v61, %v4333_v16 }
 0xfa3   : > { %v15126_v1 = vadd.f32 %v4335_v29, %v4334_v48 }
 0xfa5   : > { %16807 = vst [vmem:[#allocation39_spill] sm:$0xff] %v15126_v1  ;;  %4407 = vmatmul.mubr.f32.vlgmr.msra.gmra.mrb[84].mxu0 %v15126_v1  ;;  %9082 = vmatmul.mubr.f32.vlgmr.msra.gmra.mrb[144].mxu1 %v15126_v1 }
 0xfa6   : > { %10627 = vmatpush1.bf16.msra.mxu0 %v16716_v59  ;;  %10658 = vmatpush3.bf16.msra.mxu1 %v13530_v32 }
 0xfa7   : > { %10629 = vmatprep.subr.bf16.mxu0 %v16717_v30  ;;  %10659 = vmatprep.subr.bf16.mxu1 %v16579_v26 }
 0xfa8   : > { %4574 = vmatprep.mubr.f32.mxu0 %v16580_v40  ;;  %9116 = vmatprep.mubr.msk.f32.mxu1 %vm12601_vm2, %v16580_v40 }
 0xfaa   : > { %10631 = vmatpush1.bf16.msra.mxu0 %v16718_v41  ;;  %10661 = vmatpush3.bf16.msra.mxu1 %v13541_v5 }
 0xfab   : > { %10633 = vmatprep.subr.bf16.mxu0 %v16719_v17  ;;  %10662 = vmatprep.subr.bf16.mxu1 %v16579_v26 }
 0xfae   : > { %10635 = vmatpush1.bf16.msra.mxu0 %v16720_v9  ;;  %10664 = vmatpush3.bf16.msra.mxu1 %v13553_v39 }
 0xfaf   : > { %10637 = vmatprep.subr.bf16.mxu0 %v16721_v33  ;;  %10665 = vmatprep.subr.bf16.mxu1 %v16579_v26 }
 0xfb2   : > { %10639 = vmatpush1.bf16.msra.mxu0 %v16722_v21  ;;  %10667 = vmatpush3.bf16.msra.mxu1 %v13565_v10 }
 0xfb3   : > { %10641 = vmatprep.subr.bf16.mxu0 %v16723_v37  ;;  %10668 = vmatprep.subr.bf16.mxu1 %v16579_v26 }
 0xfb6   : > { %10643 = vmatpush1.bf16.msra.mxu0 %v16724_v63  ;;  %10670 = vmatpush3.bf16.msra.mxu1 %v16644_v31 }
 0xfb7   : > { %10645 = vmatprep.subr.bf16.mxu0 %v16725_v7  ;;  %10671 = vmatprep.subr.bf16.mxu1 %v16579_v26 }
 0xfba   : > { %10647 = vmatpush1.bf16.msra.mxu0 %v16726_v54  ;;  %10673 = vmatpush3.bf16.msra.mxu1 %v16648_v46 }
 0xfbb   : > { %10649 = vmatprep.subr.bf16.mxu0 %v16727_v50  ;;  %10674 = vmatprep.subr.bf16.mxu1 %v16579_v26 }
 0xfbe   : > { %10651 = vmatpush1.bf16.msra.mxu0 %v16728_v24  ;;  %10676 = vmatpush3.bf16.msra.mxu1 %v16652_v4 }
 0xfbf   : > { %10653 = vmatprep.subr.bf16.mxu0 %v16729_v36  ;;  %10677 = vmatprep.subr.bf16.mxu1 %v16579_v26 }
 0xfc2   : > { %10655 = vmatpush1.bf16.msra.mxu0 %v16730_v56  ;;  %10679 = vmatpush3.bf16.msra.mxu1 %v16656_v52 }
 0xfc3   : > { %10681 = vmatprep.subr.bf16.mxu0 %v16731_v3  ;;  %10712 = vmatprep.subr.bf16.mxu1 %v16579_v26 }
0x1078   : > { %v4408_v25 = vpop.f32.mrb[84].mxu0  ;;  %v4479_v58 = vpop.f32.mrb[144].mxu1 }
0x1079   : > { %v4483_v51 = vadd.f32 %v4408_v25, %v16808_v34  ;;  %v4410_v57 = vpop.f32.mrb[85].mxu0  ;;  %v9083_v20 = vpop.f32.mrb[145].mxu1  ;;  %v4497_v35 = vadd.f32 %v14961_v18, %v4479_v58 }
0x107a   : > { %v4490_v53 = vadd.f32 %v4410_v57, %v16811_v28  ;;  %v16812_v20 = vld [vmem:[#allocation76_spill] sm:$0xff] }
0x107b   : > { %v7899_v16 = vmul.f32 -1.442695, %v4483_v51  ;;  %v16814_v2 = vsel %vm14287_vm5, %v16812_v20, %v16813_v45 }
0x107c   : > { %v7900_v61 = vmul.f32 -1.442695, %v4490_v53 }
0x107d   : > { %11953 = vpow2.f32 %v7899_v16 }
0x107e   : > { %11955 = vpow2.f32 %v7900_v61 }
0x1087   : > { %v11954_v48 = vpop.eup %11953 }
0x1088   : > { %v4487_v29 = vadd.f32 1.0, %v11954_v48  ;;  %v11956_v15 = vpop.eup %11955 }
0x1089   : > { %v4494_v49 = vadd.f32 1.0, %v11956_v15 }
0x108a   : > { %11957 = vrcp.f32 %v4487_v29 }
0x108b   : > { %11959 = vrcp.f32 %v4494_v49 }
0x1094   : > { %v11958_v25 = vpop.eup %11957 }
0x1095   : > { %v4498_v34 = vmul.f32 %v11958_v25, %v4497_v35  ;;  %v11960_v51 = vpop.eup %11959  ;;  %v16815_v35 = vld [vmem:[#allocation45_spill] sm:$0xff]  ;;  %v16816_v25 = vld [vmem:[#allocation46_spill] sm:$0xff] }
0x1096   : > { %v4501_v28 = vsub.f32 1.0, %v11960_v51  ;;  %v4503_v61 = vmul.f32 %v11960_v51, %v15126_v1 }
0x1097   : > { %v4499_v57 = vadd.f32 %v4498_v34, %v16814_v2 }
0x1099   : > { %11961 = vtanh.f32 %v4499_v57 }
0x10a3   : > { %v11962_v53 = vpop.eup %11961 }
0x10a4   : > { %v4502_v16 = vmul.f32 %v11962_v53, %v4501_v28 }
0x10a6   : > { %v15178_v48 = vadd.f32 %v4503_v61, %v4502_v16 }
0x10a8   : > { %4575 = vmatmul.mubr.f32.vlgmr.msra.gmra.mrb[86].mxu0 %v15178_v48  ;;  %9117 = vmatmul.mubr.f32.vlgmr.msra.gmra.mrb[146].mxu1 %v15178_v48 }
0x10a9   : > { %10683 = vmatpush1.bf16.msra.mxu0 %v16716_v59  ;;  %10714 = vmatpush3.bf16.msra.mxu1 %v13530_v32 }
0x10aa   : > { %10685 = vmatprep.subr.bf16.mxu0 %v16717_v30  ;;  %10715 = vmatprep.subr.bf16.mxu1 %v16579_v26 }
0x10ab   : > { %4742 = vmatprep.mubr.f32.mxu0 %v16580_v40  ;;  %9151 = vmatprep.mubr.msk.f32.mxu1 %vm12601_vm2, %v16580_v40 }
0x10ad   : > { %10687 = vmatpush1.bf16.msra.mxu0 %v16718_v41  ;;  %10717 = vmatpush3.bf16.msra.mxu1 %v13541_v5 }
0x10ae   : > { %10689 = vmatprep.subr.bf16.mxu0 %v16719_v17  ;;  %10718 = vmatprep.subr.bf16.mxu1 %v16579_v26 }
0x10b1   : > { %10691 = vmatpush1.bf16.msra.mxu0 %v16720_v9  ;;  %10720 = vmatpush3.bf16.msra.mxu1 %v13553_v39 }
0x10b2   : > { %10693 = vmatprep.subr.bf16.mxu0 %v16721_v33  ;;  %10721 = vmatprep.subr.bf16.mxu1 %v16579_v26 }
0x10b5   : > { %10695 = vmatpush1.bf16.msra.mxu0 %v16722_v21  ;;  %10723 = vmatpush3.bf16.msra.mxu1 %v13565_v10 }
0x10b6   : > { %10697 = vmatprep.subr.bf16.mxu0 %v16723_v37  ;;  %10724 = vmatprep.subr.bf16.mxu1 %v16579_v26 }
0x10b9   : > { %10699 = vmatpush1.bf16.msra.mxu0 %v16724_v63  ;;  %10726 = vmatpush3.bf16.msra.mxu1 %v16644_v31 }
0x10ba   : > { %10701 = vmatprep.subr.bf16.mxu0 %v16725_v7  ;;  %10727 = vmatprep.subr.bf16.mxu1 %v16579_v26 }
0x10bd   : > { %10703 = vmatpush1.bf16.msra.mxu0 %v16726_v54  ;;  %10729 = vmatpush3.bf16.msra.mxu1 %v16648_v46 }
0x10be   : > { %10705 = vmatprep.subr.bf16.mxu0 %v16727_v50  ;;  %10730 = vmatprep.subr.bf16.mxu1 %v16579_v26 }
0x10c1   : > { %10707 = vmatpush1.bf16.msra.mxu0 %v16728_v24  ;;  %10732 = vmatpush3.bf16.msra.mxu1 %v16652_v4 }
0x10c2   : > { %10709 = vmatprep.subr.bf16.mxu0 %v16729_v36  ;;  %10733 = vmatprep.subr.bf16.mxu1 %v16579_v26 }
0x10c5   : > { %10711 = vmatpush1.bf16.msra.mxu0 %v16730_v56  ;;  %10735 = vmatpush3.bf16.msra.mxu1 %v16656_v52 }
0x10c6   : > { %10737 = vmatprep.subr.bf16.mxu0 %v16731_v3  ;;  %10768 = vmatprep.subr.bf16.mxu1 %v16579_v26 }
0x117b   : > { %v4576_v2 = vpop.f32.mrb[86].mxu0  ;;  %v4647_v49 = vpop.f32.mrb[146].mxu1 }
0x117c   : > { %v4651_v15 = vadd.f32 %v4576_v2, %v16815_v35  ;;  %v4578_v58 = vpop.f32.mrb[87].mxu0  ;;  %v9118_v29 = vpop.f32.mrb[147].mxu1  ;;  %v4665_v1 = vadd.f32 %v14961_v18, %v4647_v49 }
0x117d   : > { %v4658_v34 = vadd.f32 %v4578_v58, %v16816_v25 }
0x117e   : > { %v7901_v57 = vmul.f32 -1.442695, %v4651_v15 }
0x117f   : > { %v7902_v51 = vmul.f32 -1.442695, %v4658_v34 }
0x1180   : > { %11963 = vpow2.f32 %v7901_v57 }
0x1181   : > { %11965 = vpow2.f32 %v7902_v51  ;;  %v16819_v51 = vsel %vm13903_vm4, %v16810_v8, %v16809_v38  ;;  %v16820_v38 = vsel %vm14287_vm5, %v16813_v45, %v16812_v20 }
0x118a   : > { %v11964_v28 = vpop.eup %11963 }
0x118b   : > { %v4655_v53 = vadd.f32 1.0, %v11964_v28  ;;  %v11966_v16 = vpop.eup %11965 }
0x118c   : > { %v4662_v61 = vadd.f32 1.0, %v11966_v16 }
0x118d   : > { %11967 = vrcp.f32 %v4655_v53 }
0x118e   : > { %11969 = vrcp.f32 %v4662_v61 }
0x1197   : > { %v11968_v22 = vpop.eup %11967 }
0x1198   : > { %v4666_v6 = vmul.f32 %v11968_v22, %v4665_v1  ;;  %v11970_v35 = vpop.eup %11969  ;;  %v16818_v22 = vld [vmem:[#allocation81_spill] sm:$0xff] }
0x1199   : > { %v4669_v29 = vsub.f32 1.0, %v11970_v35  ;;  %v4671_v25 = vmul.f32 %v11970_v35, %v15178_v48 }
0x119a   : > { %v4667_v2 = vadd.f32 %v4666_v6, %v16817_v47 }
0x119c   : > { %11971 = vtanh.f32 %v4667_v2 }
0x11a6   : > { %v11972_v58 = vpop.eup %11971 }
0x11a7   : > { %v4670_v15 = vmul.f32 %v11972_v58, %v4669_v29 }
0x11a9   : > { %v15222_v34 = vadd.f32 %v4671_v25, %v4670_v15 }
0x11ab   : > { %4743 = vmatmul.mubr.f32.vlgmr.msra.gmra.mrb[88].mxu0 %v15222_v34  ;;  %9152 = vmatmul.mubr.f32.vlgmr.msra.gmra.mrb[148].mxu1 %v15222_v34 }
0x11ac   : > { %10739 = vmatpush1.bf16.msra.mxu0 %v16716_v59  ;;  %10770 = vmatpush3.bf16.msra.mxu1 %v13530_v32 }
0x11ad   : > { %10741 = vmatprep.subr.bf16.mxu0 %v16717_v30  ;;  %10771 = vmatprep.subr.bf16.mxu1 %v16579_v26 }
0x11ae   : > { %4910 = vmatprep.mubr.f32.mxu0 %v16580_v40  ;;  %9186 = vmatprep.mubr.msk.f32.mxu1 %vm12601_vm2, %v16580_v40 }
0x11b0   : > { %10743 = vmatpush1.bf16.msra.mxu0 %v16718_v41  ;;  %10773 = vmatpush3.bf16.msra.mxu1 %v13541_v5 }
0x11b1   : > { %10745 = vmatprep.subr.bf16.mxu0 %v16719_v17  ;;  %10774 = vmatprep.subr.bf16.mxu1 %v16579_v26 }
0x11b4   : > { %10747 = vmatpush1.bf16.msra.mxu0 %v16720_v9  ;;  %10776 = vmatpush3.bf16.msra.mxu1 %v13553_v39 }
0x11b5   : > { %10749 = vmatprep.subr.bf16.mxu0 %v16721_v33  ;;  %10777 = vmatprep.subr.bf16.mxu1 %v16579_v26 }
0x11b8   : > { %10751 = vmatpush1.bf16.msra.mxu0 %v16722_v21  ;;  %10779 = vmatpush3.bf16.msra.mxu1 %v13565_v10 }
0x11b9   : > { %10753 = vmatprep.subr.bf16.mxu0 %v16723_v37  ;;  %10780 = vmatprep.subr.bf16.mxu1 %v16579_v26 }
0x11bc   : > { %10755 = vmatpush1.bf16.msra.mxu0 %v16724_v63  ;;  %10782 = vmatpush3.bf16.msra.mxu1 %v16644_v31 }
0x11bd   : > { %10757 = vmatprep.subr.bf16.mxu0 %v16725_v7  ;;  %10783 = vmatprep.subr.bf16.mxu1 %v16579_v26 }
0x11c0   : > { %10759 = vmatpush1.bf16.msra.mxu0 %v16726_v54  ;;  %10785 = vmatpush3.bf16.msra.mxu1 %v16648_v46 }
0x11c1   : > { %10761 = vmatprep.subr.bf16.mxu0 %v16727_v50  ;;  %10786 = vmatprep.subr.bf16.mxu1 %v16579_v26 }
0x11c4   : > { %10763 = vmatpush1.bf16.msra.mxu0 %v16728_v24  ;;  %10788 = vmatpush3.bf16.msra.mxu1 %v16652_v4 }
0x11c5   : > { %10765 = vmatprep.subr.bf16.mxu0 %v16729_v36  ;;  %10789 = vmatprep.subr.bf16.mxu1 %v16579_v26 }
0x11c8   : > { %10767 = vmatpush1.bf16.msra.mxu0 %v16730_v56  ;;  %10791 = vmatpush3.bf16.msra.mxu1 %v16656_v52 }
0x11c9   : > { %10793 = vmatprep.subr.bf16.mxu0 %v16731_v3  ;;  %10824 = vmatprep.subr.bf16.mxu1 %v16579_v26 }
0x127e   : > { %v4744_v6 = vpop.f32.mrb[88].mxu0  ;;  %v4815_v47 = vpop.f32.mrb[148].mxu1 }
0x127f   : > { %v4819_v1 = vadd.f32 %v4744_v6, %v16818_v22  ;;  %v4746_v49 = vpop.f32.mrb[89].mxu0  ;;  %v9153_v57 = vpop.f32.mrb[149].mxu1  ;;  %v4833_v58 = vadd.f32 %v14961_v18, %v4815_v47  ;;  %v16821_v47 = vld [vmem:[#allocation83_spill] sm:$0xff] }
0x1280   : > { %v4826_v28 = vadd.f32 %v4746_v49, %v16819_v51 }
0x1281   : > { %v7903_v53 = vmul.f32 -1.442695, %v4819_v1 }
0x1282   : > { %v7904_v16 = vmul.f32 -1.442695, %v4826_v28 }
0x1283   : > { %11973 = vpow2.f32 %v7903_v53 }
0x1284   : > { %11975 = vpow2.f32 %v7904_v16 }
0x128d   : > { %v11974_v61 = vpop.eup %11973 }
0x128e   : > { %v4823_v2 = vadd.f32 1.0, %v11974_v61  ;;  %v11976_v35 = vpop.eup %11975  ;;  %v16822_v61 = vsel %vm13903_vm4, %v16802_v62, %v16801_v19  ;;  %v16823_v19 = vsel %vm14287_vm5, %v16805_v60, %v16804_v43 }
0x128f   : > { %v4830_v29 = vadd.f32 1.0, %v11976_v35 }
0x1290   : > { %11977 = vrcp.f32 %v4823_v2 }
0x1291   : > { %11979 = vrcp.f32 %v4830_v29 }
0x129a   : > { %v11978_v15 = vpop.eup %11977 }
0x129b   : > { %v4834_v25 = vmul.f32 %v11978_v15, %v4833_v58  ;;  %v11980_v6 = vpop.eup %11979 }
0x129c   : > { %v4837_v22 = vsub.f32 1.0, %v11980_v6  ;;  %v4839_v57 = vmul.f32 %v11980_v6, %v15222_v34 }
0x129d   : > { %v4835_v8 = vadd.f32 %v4834_v25, %v16820_v38 }
0x129f   : > { %11981 = vtanh.f32 %v4835_v8 }
0x12a9   : > { %v11982_v1 = vpop.eup %11981 }
0x12aa   : > { %v4838_v49 = vmul.f32 %v11982_v1, %v4837_v22 }
0x12ac   : > { %v15274_v51 = vadd.f32 %v4839_v57, %v4838_v49 }
0x12ae   : > { %4911 = vmatmul.mubr.f32.vlgmr.msra.gmra.mrb[90].mxu0 %v15274_v51  ;;  %9187 = vmatmul.mubr.f32.vlgmr.msra.gmra.mrb[150].mxu1 %v15274_v51 }
0x12af   : > { %10795 = vmatpush1.bf16.msra.mxu0 %v16716_v59  ;;  %10826 = vmatpush3.bf16.msra.mxu1 %v13530_v32 }
0x12b0   : > { %10797 = vmatprep.subr.bf16.mxu0 %v16717_v30  ;;  %10827 = vmatprep.subr.bf16.mxu1 %v16579_v26 }
0x12b1   : > { %5078 = vmatprep.mubr.f32.mxu0 %v16580_v40  ;;  %9221 = vmatprep.mubr.msk.f32.mxu1 %vm12601_vm2, %v16580_v40 }
0x12b3   : > { %10799 = vmatpush1.bf16.msra.mxu0 %v16718_v41  ;;  %10829 = vmatpush3.bf16.msra.mxu1 %v13541_v5 }
0x12b4   : > { %10801 = vmatprep.subr.bf16.mxu0 %v16719_v17  ;;  %10830 = vmatprep.subr.bf16.mxu1 %v16579_v26 }
0x12b7   : > { %10803 = vmatpush1.bf16.msra.mxu0 %v16720_v9  ;;  %10832 = vmatpush3.bf16.msra.mxu1 %v13553_v39 }
0x12b8   : > { %10805 = vmatprep.subr.bf16.mxu0 %v16721_v33  ;;  %10833 = vmatprep.subr.bf16.mxu1 %v16579_v26 }
0x12bb   : > { %10807 = vmatpush1.bf16.msra.mxu0 %v16722_v21  ;;  %10835 = vmatpush3.bf16.msra.mxu1 %v13565_v10 }
0x12bc   : > { %10809 = vmatprep.subr.bf16.mxu0 %v16723_v37  ;;  %10836 = vmatprep.subr.bf16.mxu1 %v16579_v26 }
0x12bf   : > { %10811 = vmatpush1.bf16.msra.mxu0 %v16724_v63  ;;  %10838 = vmatpush3.bf16.msra.mxu1 %v16644_v31 }
0x12c0   : > { %10813 = vmatprep.subr.bf16.mxu0 %v16725_v7  ;;  %10839 = vmatprep.subr.bf16.mxu1 %v16579_v26 }
0x12c3   : > { %10815 = vmatpush1.bf16.msra.mxu0 %v16726_v54  ;;  %10841 = vmatpush3.bf16.msra.mxu1 %v16648_v46 }
0x12c4   : > { %10817 = vmatprep.subr.bf16.mxu0 %v16727_v50  ;;  %10842 = vmatprep.subr.bf16.mxu1 %v16579_v26 }
0x12c7   : > { %10819 = vmatpush1.bf16.msra.mxu0 %v16728_v24  ;;  %10844 = vmatpush3.bf16.msra.mxu1 %v16652_v4 }
0x12c8   : > { %10821 = vmatprep.subr.bf16.mxu0 %v16729_v36  ;;  %10845 = vmatprep.subr.bf16.mxu1 %v16579_v26 }
0x12cb   : > { %10823 = vmatpush1.bf16.msra.mxu0 %v16730_v56  ;;  %10847 = vmatpush3.bf16.msra.mxu1 %v16656_v52 }
0x12cc   : > { %10849 = vmatprep.subr.bf16.mxu0 %v16731_v3  ;;  %10880 = vmatprep.subr.bf16.mxu1 %v16579_v26 }
0x1381   : > { %v4912_v45 = vpop.f32.mrb[90].mxu0  ;;  %v4983_v20 = vpop.f32.mrb[150].mxu1 }
0x1382   : > { %v4987_v28 = vadd.f32 %v4912_v45, %v16821_v47  ;;  %v4914_v53 = vpop.f32.mrb[91].mxu0  ;;  %v9188_v16 = vpop.f32.mrb[151].mxu1  ;;  %v5001_v8 = vadd.f32 %v14961_v18, %v4983_v20  ;;  %v16824_v20 = vld [vmem:[#allocation86_spill] sm:$0xff] }
0x1383   : > { %v4994_v2 = vadd.f32 %v4914_v53, %v16822_v61 }
0x1384   : > { %v7905_v35 = vmul.f32 -1.442695, %v4987_v28 }
0x1385   : > { %v7906_v29 = vmul.f32 -1.442695, %v4994_v2  ;;  %v16825_v2 = vsel %vm13903_vm4, %v16794_v14, %v16793_v27  ;;  %v16826_v27 = vsel %vm14287_vm5, %v16797_v23, %v16796_v0  ;;  %v16827_v0 = vld [vmem:[#allocation89_spill] sm:$0xff] }
0x1386   : > { %11983 = vpow2.f32 %v7905_v35 }
0x1387   : > { %11985 = vpow2.f32 %v7906_v29 }
0x1390   : > { %v11984_v58 = vpop.eup %11983 }
0x1391   : > { %v4991_v15 = vadd.f32 1.0, %v11984_v58  ;;  %v11986_v25 = vpop.eup %11985 }
0x1392   : > { %v4998_v38 = vadd.f32 1.0, %v11986_v25 }
0x1393   : > { %11987 = vrcp.f32 %v4991_v15 }
0x1394   : > { %11989 = vrcp.f32 %v4998_v38 }
0x139d   : > { %v11988_v6 = vpop.eup %11987 }
0x139e   : > { %v5002_v22 = vmul.f32 %v11988_v6, %v5001_v8  ;;  %v11990_v1 = vpop.eup %11989 }
0x139f   : > { %v5005_v49 = vsub.f32 1.0, %v11990_v1  ;;  %v5007_v47 = vmul.f32 %v11990_v1, %v15274_v51 }
0x13a0   : > { %v5003_v62 = vadd.f32 %v5002_v22, %v16823_v19 }
0x13a2   : > { %11991 = vtanh.f32 %v5003_v62 }
0x13ac   : > { %v11992_v57 = vpop.eup %11991 }
0x13ad   : > { %v5006_v45 = vmul.f32 %v11992_v57, %v5005_v49 }
0x13af   : > { %v15326_v28 = vadd.f32 %v5007_v47, %v5006_v45 }
0x13b1   : > { %5079 = vmatmul.mubr.f32.vlgmr.msra.gmra.mrb[92].mxu0 %v15326_v28  ;;  %9222 = vmatmul.mubr.f32.vlgmr.msra.gmra.mrb[152].mxu1 %v15326_v28 }
0x13b2   : > { %10851 = vmatpush1.bf16.msra.mxu0 %v16716_v59  ;;  %10882 = vmatpush3.bf16.msra.mxu1 %v13530_v32 }
0x13b3   : > { %10853 = vmatprep.subr.bf16.mxu0 %v16717_v30  ;;  %10883 = vmatprep.subr.bf16.mxu1 %v16579_v26 }
0x13b4   : > { %5246 = vmatprep.mubr.f32.mxu0 %v16580_v40  ;;  %9256 = vmatprep.mubr.msk.f32.mxu1 %vm12601_vm2, %v16580_v40 }
0x13b6   : > { %10855 = vmatpush1.bf16.msra.mxu0 %v16718_v41  ;;  %10885 = vmatpush3.bf16.msra.mxu1 %v13541_v5 }
0x13b7   : > { %10857 = vmatprep.subr.bf16.mxu0 %v16719_v17  ;;  %10886 = vmatprep.subr.bf16.mxu1 %v16579_v26 }
0x13ba   : > { %10859 = vmatpush1.bf16.msra.mxu0 %v16720_v9  ;;  %10888 = vmatpush3.bf16.msra.mxu1 %v13553_v39 }
0x13bb   : > { %10861 = vmatprep.subr.bf16.mxu0 %v16721_v33  ;;  %10889 = vmatprep.subr.bf16.mxu1 %v16579_v26 }
0x13be   : > { %10863 = vmatpush1.bf16.msra.mxu0 %v16722_v21  ;;  %10891 = vmatpush3.bf16.msra.mxu1 %v13565_v10 }
0x13bf   : > { %10865 = vmatprep.subr.bf16.mxu0 %v16723_v37  ;;  %10892 = vmatprep.subr.bf16.mxu1 %v16579_v26 }
0x13c2   : > { %10867 = vmatpush1.bf16.msra.mxu0 %v16724_v63  ;;  %10894 = vmatpush3.bf16.msra.mxu1 %v16644_v31 }
0x13c3   : > { %10869 = vmatprep.subr.bf16.mxu0 %v16725_v7  ;;  %10895 = vmatprep.subr.bf16.mxu1 %v16579_v26 }
0x13c6   : > { %10871 = vmatpush1.bf16.msra.mxu0 %v16726_v54  ;;  %10897 = vmatpush3.bf16.msra.mxu1 %v16648_v46 }
0x13c7   : > { %10873 = vmatprep.subr.bf16.mxu0 %v16727_v50  ;;  %10898 = vmatprep.subr.bf16.mxu1 %v16579_v26 }
0x13ca   : > { %10875 = vmatpush1.bf16.msra.mxu0 %v16728_v24  ;;  %10900 = vmatpush3.bf16.msra.mxu1 %v16652_v4 }
0x13cb   : > { %10877 = vmatprep.subr.bf16.mxu0 %v16729_v36  ;;  %10901 = vmatprep.subr.bf16.mxu1 %v16579_v26 }
0x13ce   : > { %10879 = vmatpush1.bf16.msra.mxu0 %v16730_v56  ;;  %10903 = vmatpush3.bf16.msra.mxu1 %v16656_v52 }
0x13cf   : > { %10905 = vmatprep.subr.bf16.mxu0 %v16731_v3  ;;  %10936 = vmatprep.subr.bf16.mxu1 %v16579_v26 }
0x1484   : > { %v5080_v60 = vpop.f32.mrb[92].mxu0  ;;  %v5151_v43 = vpop.f32.mrb[152].mxu1 }
0x1485   : > { %v5155_v53 = vadd.f32 %v5080_v60, %v16824_v20  ;;  %v5082_v16 = vpop.f32.mrb[93].mxu0  ;;  %v9223_v61 = vpop.f32.mrb[153].mxu1  ;;  %v5169_v6 = vadd.f32 %v14961_v18, %v5151_v43 }
0x1486   : > { %v5162_v35 = vadd.f32 %v5082_v16, %v16825_v2 }
0x1487   : > { %v7907_v29 = vmul.f32 -1.442695, %v5155_v53  ;;  %v16828_v53 = vsel %vm13903_vm4, %v16786_v42, %v16785_v55  ;;  %v16829_v55 = vsel %vm14287_vm5, %v16789_v12, %v16788_v13 }
0x1488   : > { %v7908_v58 = vmul.f32 -1.442695, %v5162_v35 }
0x1489   : > { %11993 = vpow2.f32 %v7907_v29 }
0x148a   : > { %11995 = vpow2.f32 %v7908_v58 }
0x1493   : > { %v11994_v15 = vpop.eup %11993 }
0x1494   : > { %v5159_v25 = vadd.f32 1.0, %v11994_v15  ;;  %v11996_v38 = vpop.eup %11995 }
0x1495   : > { %v5166_v8 = vadd.f32 1.0, %v11996_v38 }
0x1496   : > { %11997 = vrcp.f32 %v5159_v25  ;;  %v15423_v25 = vld [vmem:[#allocation12] ss:$0 sm:$0xff] }
0x1497   : > { %11999 = vrcp.f32 %v5166_v8 }
0x14a0   : > { %v11998_v22 = vpop.eup %11997 }
0x14a1   : > { %v5170_v19 = vmul.f32 %v11998_v22, %v5169_v6  ;;  %v12000_v62 = vpop.eup %11999 }
0x14a2   : > { %v5173_v1 = vsub.f32 1.0, %v12000_v62  ;;  %v5175_v45 = vmul.f32 %v12000_v62, %v15326_v28 }
0x14a3   : > { %v5171_v14 = vadd.f32 %v5170_v19, %v16826_v27 }
0x14a5   : > { %12001 = vtanh.f32 %v5171_v14 }
0x14af   : > { %v12002_v49 = vpop.eup %12001 }
0x14b0   : > { %v5174_v57 = vmul.f32 %v12002_v49, %v5173_v1  ;;  %v16830_v49 = vld [vmem:[#allocation92_spill] sm:$0xff] }
0x14b2   : > { %v15378_v47 = vadd.f32 %v5175_v45, %v5174_v57 }
0x14b4   : > { %5247 = vmatmul.mubr.f32.vlgmr.msra.gmra.mrb[94].mxu0 %v15378_v47  ;;  %9257 = vmatmul.mubr.f32.vlgmr.msra.gmra.mrb[154].mxu1 %v15378_v47 }
0x14b5   : > { %10907 = vmatpush1.bf16.msra.mxu0 %v16716_v59  ;;  %10938 = vmatpush3.bf16.msra.mxu1 %v13530_v32 }
0x14b6   : > { %10909 = vmatprep.subr.bf16.mxu0 %v16717_v30  ;;  %10939 = vmatprep.subr.bf16.mxu1 %v16579_v26 }
0x14b7   : > { %5414 = vmatprep.mubr.f32.mxu0 %v16580_v40  ;;  %9291 = vmatprep.mubr.msk.f32.mxu1 %vm12601_vm2, %v16580_v40 }
0x14b9   : > { %10911 = vmatpush1.bf16.msra.mxu0 %v16718_v41  ;;  %10941 = vmatpush3.bf16.msra.mxu1 %v13541_v5 }
0x14ba   : > { %10913 = vmatprep.subr.bf16.mxu0 %v16719_v17  ;;  %10942 = vmatprep.subr.bf16.mxu1 %v16579_v26 }
0x14bd   : > { %10915 = vmatpush1.bf16.msra.mxu0 %v16720_v9  ;;  %10944 = vmatpush3.bf16.msra.mxu1 %v13553_v39 }
0x14be   : > { %10917 = vmatprep.subr.bf16.mxu0 %v16721_v33  ;;  %10945 = vmatprep.subr.bf16.mxu1 %v16579_v26 }
0x14c1   : > { %10919 = vmatpush1.bf16.msra.mxu0 %v16722_v21  ;;  %10947 = vmatpush3.bf16.msra.mxu1 %v13565_v10 }
0x14c2   : > { %10921 = vmatprep.subr.bf16.mxu0 %v16723_v37  ;;  %10948 = vmatprep.subr.bf16.mxu1 %v16579_v26 }
0x14c5   : > { %10923 = vmatpush1.bf16.msra.mxu0 %v16724_v63  ;;  %10950 = vmatpush3.bf16.msra.mxu1 %v16644_v31 }
0x14c6   : > { %10925 = vmatprep.subr.bf16.mxu0 %v16725_v7  ;;  %10951 = vmatprep.subr.bf16.mxu1 %v16579_v26 }
0x14c9   : > { %10927 = vmatpush1.bf16.msra.mxu0 %v16726_v54  ;;  %10953 = vmatpush3.bf16.msra.mxu1 %v16648_v46 }
0x14ca   : > { %10929 = vmatprep.subr.bf16.mxu0 %v16727_v50  ;;  %10954 = vmatprep.subr.bf16.mxu1 %v16579_v26 }
0x14cd   : > { %10931 = vmatpush1.bf16.msra.mxu0 %v16728_v24  ;;  %10956 = vmatpush3.bf16.msra.mxu1 %v16652_v4 }
0x14ce   : > { %10933 = vmatprep.subr.bf16.mxu0 %v16729_v36  ;;  %10957 = vmatprep.subr.bf16.mxu1 %v16579_v26 }
0x14d1   : > { %10935 = vmatpush1.bf16.msra.mxu0 %v16730_v56  ;;  %10959 = vmatpush3.bf16.msra.mxu1 %v16656_v52 }
0x14d2   : > { %10961 = vmatprep.subr.bf16.mxu0 %v16731_v3  ;;  %10992 = vmatprep.subr.bf16.mxu1 %v16579_v26 }
0x1587   : > { %v5248_v18 = vpop.f32.mrb[94].mxu0  ;;  %v5319_v23 = vpop.f32.mrb[154].mxu1 }
0x1588   : > { %v5323_v60 = vadd.f32 %v5248_v18, %v16827_v0  ;;  %v5250_v43 = vpop.f32.mrb[95].mxu0  ;;  %v9258_v20 = vpop.f32.mrb[155].mxu1  ;;  %v5337_v38 = vadd.f32 %v15423_v25, %v5319_v23  ;;  %v16831_v23 = vld [vmem:[#allocation90_spill] sm:$0xff]  ;;  %v16832_v0 = vld [vmem:[#allocation71_spill] sm:$0xff] }
0x1589   : > { %v5330_v16 = vadd.f32 %v5250_v43, %v16828_v53 }
0x158a   : > { %v7909_v61 = vmul.f32 -1.442695, %v5323_v60  ;;  %v16833_v60 = vsel %vm13903_vm4, %v16831_v23, %v16832_v0  ;;  %v16838_v23 = vld [vmem:[#allocation93_spill] sm:$0xff]  ;;  %v16839_v0 = vld [vmem:[#allocation68_spill] sm:$0xff] }
0x158b   : > { %v7910_v2 = vmul.f32 -1.442695, %v5330_v16 }
0x158c   : > { %12003 = vpow2.f32 %v7909_v61 }
0x158d   : > { %12005 = vpow2.f32 %v7910_v2 }
0x1596   : > { %v12004_v35 = vpop.eup %12003 }
0x1597   : > { %v5327_v29 = vadd.f32 1.0, %v12004_v35  ;;  %v12006_v58 = vpop.eup %12005 }
0x1598   : > { %v5334_v15 = vadd.f32 1.0, %v12006_v58 }
0x1599   : > { %12007 = vrcp.f32 %v5327_v29 }
0x159a   : > { %12009 = vrcp.f32 %v5334_v15 }
0x15a3   : > { %v12008_v8 = vpop.eup %12007 }
0x15a4   : > { %v5338_v6 = vmul.f32 %v12008_v8, %v5337_v38  ;;  %v12010_v22 = vpop.eup %12009  ;;  %v16834_v38 = vld [vmem:[#allocation107_spill] sm:$0xff]  ;;  %v16835_v8 = vld [vmem:[#allocation106_spill] sm:$0xff] }
0x15a5   : > { %v5341_v19 = vsub.f32 1.0, %v12010_v22  ;;  %v5343_v62 = vmul.f32 %v12010_v22, %v15378_v47 }
0x15a6   : > { %v5339_v42 = vadd.f32 %v5338_v6, %v16829_v55  ;;  %v16836_v6 = vsel %vm14287_vm5, %v16834_v38, %v16835_v8  ;;  %v16841_v38 = vld [vmem:[#allocation109_spill] sm:$0xff]  ;;  %v16842_v8 = vld [vmem:[#allocation108_spill] sm:$0xff] }
0x15a8   : > { %12011 = vtanh.f32 %v5339_v42 }
0x15b2   : > { %v12012_v27 = vpop.eup %12011 }
0x15b3   : > { %v5342_v14 = vmul.f32 %v12012_v27, %v5341_v19 }
0x15b5   : > { %v15432_v1 = vadd.f32 %v5343_v62, %v5342_v14 }
0x15b7   : > { %5415 = vmatmul.mubr.f32.vlgmr.msra.gmra.mrb[96].mxu0 %v15432_v1  ;;  %9292 = vmatmul.mubr.f32.vlgmr.msra.gmra.mrb[156].mxu1 %v15432_v1 }
0x15b8   : > { %10963 = vmatpush1.bf16.msra.mxu0 %v16716_v59  ;;  %10994 = vmatpush3.bf16.msra.mxu1 %v13530_v32 }
0x15b9   : > { %10965 = vmatprep.subr.bf16.mxu0 %v16717_v30  ;;  %10995 = vmatprep.subr.bf16.mxu1 %v16579_v26 }
0x15ba   : > { %5582 = vmatprep.mubr.f32.mxu0 %v16580_v40  ;;  %9326 = vmatprep.mubr.msk.f32.mxu1 %vm12601_vm2, %v16580_v40 }
0x15bc   : > { %10967 = vmatpush1.bf16.msra.mxu0 %v16718_v41  ;;  %10997 = vmatpush3.bf16.msra.mxu1 %v13541_v5 }
0x15bd   : > { %10969 = vmatprep.subr.bf16.mxu0 %v16719_v17  ;;  %10998 = vmatprep.subr.bf16.mxu1 %v16579_v26 }
0x15c0   : > { %10971 = vmatpush1.bf16.msra.mxu0 %v16720_v9  ;;  %11000 = vmatpush3.bf16.msra.mxu1 %v13553_v39 }
0x15c1   : > { %10973 = vmatprep.subr.bf16.mxu0 %v16721_v33  ;;  %11001 = vmatprep.subr.bf16.mxu1 %v16579_v26 }
0x15c4   : > { %10975 = vmatpush1.bf16.msra.mxu0 %v16722_v21  ;;  %11003 = vmatpush3.bf16.msra.mxu1 %v13565_v10 }
0x15c5   : > { %10977 = vmatprep.subr.bf16.mxu0 %v16723_v37  ;;  %11004 = vmatprep.subr.bf16.mxu1 %v16579_v26 }
0x15c8   : > { %10979 = vmatpush1.bf16.msra.mxu0 %v16724_v63  ;;  %11006 = vmatpush3.bf16.msra.mxu1 %v16644_v31 }
0x15c9   : > { %10981 = vmatprep.subr.bf16.mxu0 %v16725_v7  ;;  %11007 = vmatprep.subr.bf16.mxu1 %v16579_v26 }
0x15cc   : > { %10983 = vmatpush1.bf16.msra.mxu0 %v16726_v54  ;;  %11009 = vmatpush3.bf16.msra.mxu1 %v16648_v46 }
0x15cd   : > { %10985 = vmatprep.subr.bf16.mxu0 %v16727_v50  ;;  %11010 = vmatprep.subr.bf16.mxu1 %v16579_v26 }
0x15d0   : > { %10987 = vmatpush1.bf16.msra.mxu0 %v16728_v24  ;;  %11012 = vmatpush3.bf16.msra.mxu1 %v16652_v4 }
0x15d1   : > { %10989 = vmatprep.subr.bf16.mxu0 %v16729_v36  ;;  %11013 = vmatprep.subr.bf16.mxu1 %v16579_v26 }
0x15d4   : > { %10991 = vmatpush1.bf16.msra.mxu0 %v16730_v56  ;;  %11015 = vmatpush3.bf16.msra.mxu1 %v16656_v52 }
0x15d5   : > { %11017 = vmatprep.subr.bf16.mxu0 %v16731_v3  ;;  %11048 = vmatprep.subr.bf16.mxu1 %v16579_v26 }
0x168a   : > { %v5416_v12 = vpop.f32.mrb[96].mxu0  ;;  %v5487_v13 = vpop.f32.mrb[156].mxu1 }
0x168b   : > { %v5491_v57 = vadd.f32 %v5416_v12, %v16830_v49  ;;  %v5418_v45 = vpop.f32.mrb[97].mxu0  ;;  %v9293_v18 = vpop.f32.mrb[157].mxu1  ;;  %v5505_v29 = vadd.f32 %v15423_v25, %v5487_v13  ;;  %v16837_v49 = vld [vmem:[#allocation95_spill] sm:$0xff] }
0x168c   : > { %v5498_v43 = vadd.f32 %v5418_v45, %v16833_v60  ;;  %v16840_v60 = vsel %vm13903_vm4, %v16838_v23, %v16839_v0  ;;  %v16845_v0 = vld [vmem:[#allocation96_spill] sm:$0xff] }
0x168d   : > { %v7911_v20 = vmul.f32 -1.442695, %v5491_v57 }
0x168e   : > { %v7912_v53 = vmul.f32 -1.442695, %v5498_v43 }
0x168f   : > { %12013 = vpow2.f32 %v7911_v20 }
0x1690   : > { %12015 = vpow2.f32 %v7912_v53 }
0x1699   : > { %v12014_v16 = vpop.eup %12013 }
0x169a   : > { %v5495_v61 = vadd.f32 1.0, %v12014_v16  ;;  %v12016_v2 = vpop.eup %12015 }
0x169b   : > { %v5502_v35 = vadd.f32 1.0, %v12016_v2 }
0x169c   : > { %12017 = vrcp.f32 %v5495_v61 }
0x169d   : > { %12019 = vrcp.f32 %v5502_v35 }
0x16a6   : > { %v12018_v58 = vpop.eup %12017 }
0x16a7   : > { %v5506_v15 = vmul.f32 %v12018_v58, %v5505_v29  ;;  %v12020_v42 = vpop.eup %12019 }
0x16a8   : > { %v5509_v22 = vsub.f32 1.0, %v12020_v42  ;;  %v5511_v14 = vmul.f32 %v12020_v42, %v15432_v1 }
0x16a9   : > { %v5507_v55 = vadd.f32 %v5506_v15, %v16836_v6  ;;  %v16843_v6 = vsel %vm14287_vm5, %v16841_v38, %v16842_v8  ;;  %v16848_v8 = vld [vmem:[#allocation111_spill] sm:$0xff] }
0x16ab   : > { %12021 = vtanh.f32 %v5507_v55 }
0x16b5   : > { %v12022_v19 = vpop.eup %12021 }
0x16b6   : > { %v5510_v27 = vmul.f32 %v12022_v19, %v5509_v22 }
0x16b8   : > { %v15484_v62 = vadd.f32 %v5511_v14, %v5510_v27 }
0x16ba   : > { %5583 = vmatmul.mubr.f32.vlgmr.msra.gmra.mrb[98].mxu0 %v15484_v62  ;;  %9327 = vmatmul.mubr.f32.vlgmr.msra.gmra.mrb[158].mxu1 %v15484_v62 }
0x16bb   : > { %11019 = vmatpush1.bf16.msra.mxu0 %v16716_v59  ;;  %11050 = vmatpush3.bf16.msra.mxu1 %v13530_v32 }
0x16bc   : > { %11021 = vmatprep.subr.bf16.mxu0 %v16717_v30  ;;  %11051 = vmatprep.subr.bf16.mxu1 %v16579_v26 }
0x16bd   : > { %5750 = vmatprep.mubr.f32.mxu0 %v16580_v40  ;;  %9361 = vmatprep.mubr.msk.f32.mxu1 %vm12601_vm2, %v16580_v40 }
0x16bf   : > { %11023 = vmatpush1.bf16.msra.mxu0 %v16718_v41  ;;  %11053 = vmatpush3.bf16.msra.mxu1 %v13541_v5 }
0x16c0   : > { %11025 = vmatprep.subr.bf16.mxu0 %v16719_v17  ;;  %11054 = vmatprep.subr.bf16.mxu1 %v16579_v26 }
0x16c3   : > { %11027 = vmatpush1.bf16.msra.mxu0 %v16720_v9  ;;  %11056 = vmatpush3.bf16.msra.mxu1 %v13553_v39 }
0x16c4   : > { %11029 = vmatprep.subr.bf16.mxu0 %v16721_v33  ;;  %11057 = vmatprep.subr.bf16.mxu1 %v16579_v26 }
0x16c7   : > { %11031 = vmatpush1.bf16.msra.mxu0 %v16722_v21  ;;  %11059 = vmatpush3.bf16.msra.mxu1 %v13565_v10 }
0x16c8   : > { %11033 = vmatprep.subr.bf16.mxu0 %v16723_v37  ;;  %11060 = vmatprep.subr.bf16.mxu1 %v16579_v26 }
0x16cb   : > { %11035 = vmatpush1.bf16.msra.mxu0 %v16724_v63  ;;  %11062 = vmatpush3.bf16.msra.mxu1 %v16644_v31 }
0x16cc   : > { %11037 = vmatprep.subr.bf16.mxu0 %v16725_v7  ;;  %11063 = vmatprep.subr.bf16.mxu1 %v16579_v26 }
0x16cf   : > { %11039 = vmatpush1.bf16.msra.mxu0 %v16726_v54  ;;  %11065 = vmatpush3.bf16.msra.mxu1 %v16648_v46 }
0x16d0   : > { %11041 = vmatprep.subr.bf16.mxu0 %v16727_v50  ;;  %11066 = vmatprep.subr.bf16.mxu1 %v16579_v26 }
0x16d3   : > { %11043 = vmatpush1.bf16.msra.mxu0 %v16728_v24  ;;  %11068 = vmatpush3.bf16.msra.mxu1 %v16652_v4 }
0x16d4   : > { %11045 = vmatprep.subr.bf16.mxu0 %v16729_v36  ;;  %11069 = vmatprep.subr.bf16.mxu1 %v16579_v26 }
0x16d7   : > { %11047 = vmatpush1.bf16.msra.mxu0 %v16730_v56  ;;  %11071 = vmatpush3.bf16.msra.mxu1 %v16656_v52 }
0x16d8   : > { %11073 = vmatprep.subr.bf16.mxu0 %v16731_v3  ;;  %11104 = vmatprep.subr.bf16.mxu1 %v16579_v26 }
0x178d   : > { %v5584_v12 = vpop.f32.mrb[98].mxu0  ;;  %v5655_v13 = vpop.f32.mrb[158].mxu1 }
0x178e   : > { %v5659_v57 = vadd.f32 %v5584_v12, %v16837_v49  ;;  %v5586_v45 = vpop.f32.mrb[99].mxu0  ;;  %v9328_v18 = vpop.f32.mrb[159].mxu1  ;;  %v5673_v29 = vadd.f32 %v15423_v25, %v5655_v13 }
0x178f   : > { %v5666_v43 = vadd.f32 %v5586_v45, %v16840_v60  ;;  %v16846_v60 = vld [vmem:[#allocation66_spill] sm:$0xff] }
0x1790   : > { %v7913_v20 = vmul.f32 -1.442695, %v5659_v57  ;;  %v16844_v57 = vld [vmem:[#allocation97_spill] sm:$0xff] }
0x1791   : > { %v7914_v53 = vmul.f32 -1.442695, %v5666_v43  ;;  %v16847_v43 = vsel %vm13903_vm4, %v16845_v0, %v16846_v60 }
0x1792   : > { %12023 = vpow2.f32 %v7913_v20 }
0x1793   : > { %12025 = vpow2.f32 %v7914_v53 }
0x179c   : > { %v12024_v16 = vpop.eup %12023 }
0x179d   : > { %v5663_v61 = vadd.f32 1.0, %v12024_v16  ;;  %v12026_v2 = vpop.eup %12025 }
0x179e   : > { %v5670_v35 = vadd.f32 1.0, %v12026_v2 }
0x179f   : > { %12027 = vrcp.f32 %v5663_v61 }
0x17a0   : > { %12029 = vrcp.f32 %v5670_v35 }
0x17a9   : > { %v12028_v58 = vpop.eup %12027 }
0x17aa   : > { %v5674_v15 = vmul.f32 %v12028_v58, %v5673_v29  ;;  %v12030_v42 = vpop.eup %12029 }
0x17ab   : > { %v5677_v22 = vsub.f32 1.0, %v12030_v42  ;;  %v5679_v14 = vmul.f32 %v12030_v42, %v15484_v62 }
0x17ac   : > { %v5675_v55 = vadd.f32 %v5674_v15, %v16843_v6  ;;  %v16849_v6 = vld [vmem:[#allocation110_spill] sm:$0xff] }
0x17ae   : > { %12031 = vtanh.f32 %v5675_v55  ;;  %v16850_v55 = vsel %vm14287_vm5, %v16848_v8, %v16849_v6 }
0x17b8   : > { %v12032_v19 = vpop.eup %12031 }
0x17b9   : > { %v5678_v27 = vmul.f32 %v12032_v19, %v5677_v22 }
0x17bb   : > { %v15536_v12 = vadd.f32 %v5679_v14, %v5678_v27 }
0x17bd   : > { %5751 = vmatmul.mubr.f32.vlgmr.msra.gmra.mrb[100].mxu0 %v15536_v12  ;;  %9362 = vmatmul.mubr.f32.vlgmr.msra.gmra.mrb[160].mxu1 %v15536_v12 }
0x17be   : > { %11075 = vmatpush1.bf16.msra.mxu0 %v16716_v59  ;;  %11106 = vmatpush3.bf16.msra.mxu1 %v13530_v32 }
0x17bf   : > { %11077 = vmatprep.subr.bf16.mxu0 %v16717_v30  ;;  %11107 = vmatprep.subr.bf16.mxu1 %v16579_v26 }
0x17c0   : > { %5918 = vmatprep.mubr.f32.mxu0 %v16580_v40  ;;  %9396 = vmatprep.mubr.msk.f32.mxu1 %vm12601_vm2, %v16580_v40 }
0x17c2   : > { %11079 = vmatpush1.bf16.msra.mxu0 %v16718_v41  ;;  %11109 = vmatpush3.bf16.msra.mxu1 %v13541_v5 }
0x17c3   : > { %11081 = vmatprep.subr.bf16.mxu0 %v16719_v17  ;;  %11110 = vmatprep.subr.bf16.mxu1 %v16579_v26 }
0x17c6   : > { %11083 = vmatpush1.bf16.msra.mxu0 %v16720_v9  ;;  %11112 = vmatpush3.bf16.msra.mxu1 %v13553_v39 }
0x17c7   : > { %11085 = vmatprep.subr.bf16.mxu0 %v16721_v33  ;;  %11113 = vmatprep.subr.bf16.mxu1 %v16579_v26 }
0x17ca   : > { %11087 = vmatpush1.bf16.msra.mxu0 %v16722_v21  ;;  %11115 = vmatpush3.bf16.msra.mxu1 %v13565_v10 }
0x17cb   : > { %11089 = vmatprep.subr.bf16.mxu0 %v16723_v37  ;;  %11116 = vmatprep.subr.bf16.mxu1 %v16579_v26 }
0x17ce   : > { %11091 = vmatpush1.bf16.msra.mxu0 %v16724_v63  ;;  %11118 = vmatpush3.bf16.msra.mxu1 %v16644_v31 }
0x17cf   : > { %11093 = vmatprep.subr.bf16.mxu0 %v16725_v7  ;;  %11119 = vmatprep.subr.bf16.mxu1 %v16579_v26 }
0x17d2   : > { %11095 = vmatpush1.bf16.msra.mxu0 %v16726_v54  ;;  %11121 = vmatpush3.bf16.msra.mxu1 %v16648_v46 }
0x17d3   : > { %11097 = vmatprep.subr.bf16.mxu0 %v16727_v50  ;;  %11122 = vmatprep.subr.bf16.mxu1 %v16579_v26 }
0x17d6   : > { %11099 = vmatpush1.bf16.msra.mxu0 %v16728_v24  ;;  %11124 = vmatpush3.bf16.msra.mxu1 %v16652_v4 }
0x17d7   : > { %11101 = vmatprep.subr.bf16.mxu0 %v16729_v36  ;;  %11125 = vmatprep.subr.bf16.mxu1 %v16579_v26 }
0x17da   : > { %11103 = vmatpush1.bf16.msra.mxu0 %v16730_v56  ;;  %11127 = vmatpush3.bf16.msra.mxu1 %v16656_v52 }
0x17db   : > { %11129 = vmatprep.subr.bf16.mxu0 %v16731_v3  ;;  %11160 = vmatprep.subr.bf16.mxu1 %v16579_v26 }
0x1890   : > { %v5752_v13 = vpop.f32.mrb[100].mxu0  ;;  %v5823_v49 = vpop.f32.mrb[160].mxu1 }
0x1891   : > { %v5827_v45 = vadd.f32 %v5752_v13, %v16844_v57  ;;  %v5754_v18 = vpop.f32.mrb[101].mxu0  ;;  %v9363_v23 = vpop.f32.mrb[161].mxu1  ;;  %v5841_v58 = vadd.f32 %v15423_v25, %v5823_v49 }
0x1892   : > { %v5834_v20 = vadd.f32 %v5754_v18, %v16847_v43  ;;  %v16851_v18 = vld [vmem:[#allocation99_spill] sm:$0xff]  ;;  %v16852_v43 = vld [vmem:[#allocation98_spill] sm:$0xff] }
0x1893   : > { %v7915_v53 = vmul.f32 -1.442695, %v5827_v45 }
0x1894   : > { %v7916_v16 = vmul.f32 -1.442695, %v5834_v20  ;;  %v16853_v20 = vld [vmem:[#allocation65_spill] sm:$0xff] }
0x1895   : > { %12033 = vpow2.f32 %v7915_v53  ;;  %v16854_v53 = vsel %vm13903_vm4, %v16852_v43, %v16853_v20 }
0x1896   : > { %12035 = vpow2.f32 %v7916_v16 }
0x189f   : > { %v12034_v61 = vpop.eup %12033 }
0x18a0   : > { %v5831_v2 = vadd.f32 1.0, %v12034_v61  ;;  %v12036_v35 = vpop.eup %12035 }
0x18a1   : > { %v5838_v29 = vadd.f32 1.0, %v12036_v35 }
0x18a2   : > { %12037 = vrcp.f32 %v5831_v2 }
0x18a3   : > { %12039 = vrcp.f32 %v5838_v29 }
0x18ac   : > { %v12038_v15 = vpop.eup %12037 }
0x18ad   : > { %v5842_v38 = vmul.f32 %v12038_v15, %v5841_v58  ;;  %v12040_v22 = vpop.eup %12039 }
0x18ae   : > { %v5845_v19 = vsub.f32 1.0, %v12040_v22  ;;  %v5847_v13 = vmul.f32 %v12040_v22, %v15536_v12 }
0x18af   : > { %v5843_v42 = vadd.f32 %v5842_v38, %v16850_v55  ;;  %v16855_v55 = vld [vmem:[#allocation113_spill] sm:$0xff] }
0x18b1   : > { %12041 = vtanh.f32 %v5843_v42  ;;  %v16856_v42 = vld [vmem:[#allocation112_spill] sm:$0xff] }
0x18b2   : > { %v16857_v22 = vsel %vm14287_vm5, %v16855_v55, %v16856_v42 }
0x18bb   : > { %v12042_v27 = vpop.eup %12041 }
0x18bc   : > { %v5846_v14 = vmul.f32 %v12042_v27, %v5845_v19 }
0x18be   : > { %v15588_v57 = vadd.f32 %v5847_v13, %v5846_v14 }
0x18c0   : > { %5919 = vmatmul.mubr.f32.vlgmr.msra.gmra.mrb[102].mxu0 %v15588_v57  ;;  %9397 = vmatmul.mubr.f32.vlgmr.msra.gmra.mrb[162].mxu1 %v15588_v57 }
0x18c1   : > { %11131 = vmatpush1.bf16.msra.mxu0 %v16716_v59  ;;  %11162 = vmatpush3.bf16.msra.mxu1 %v13530_v32 }
0x18c2   : > { %11133 = vmatprep.subr.bf16.mxu0 %v16717_v30  ;;  %11163 = vmatprep.subr.bf16.mxu1 %v16579_v26 }
0x18c3   : > { %6086 = vmatprep.mubr.f32.mxu0 %v16580_v40  ;;  %9431 = vmatprep.mubr.msk.f32.mxu1 %vm12601_vm2, %v16580_v40 }
0x18c5   : > { %11135 = vmatpush1.bf16.msra.mxu0 %v16718_v41  ;;  %11165 = vmatpush3.bf16.msra.mxu1 %v13541_v5 }
0x18c6   : > { %11137 = vmatprep.subr.bf16.mxu0 %v16719_v17  ;;  %11166 = vmatprep.subr.bf16.mxu1 %v16579_v26 }
0x18c9   : > { %11139 = vmatpush1.bf16.msra.mxu0 %v16720_v9  ;;  %11168 = vmatpush3.bf16.msra.mxu1 %v13553_v39 }
0x18ca   : > { %11141 = vmatprep.subr.bf16.mxu0 %v16721_v33  ;;  %11169 = vmatprep.subr.bf16.mxu1 %v16579_v26 }
0x18cd   : > { %11143 = vmatpush1.bf16.msra.mxu0 %v16722_v21  ;;  %11171 = vmatpush3.bf16.msra.mxu1 %v13565_v10 }
0x18ce   : > { %11145 = vmatprep.subr.bf16.mxu0 %v16723_v37  ;;  %11172 = vmatprep.subr.bf16.mxu1 %v16579_v26 }
0x18d1   : > { %11147 = vmatpush1.bf16.msra.mxu0 %v16724_v63  ;;  %11174 = vmatpush3.bf16.msra.mxu1 %v16644_v31 }
0x18d2   : > { %11149 = vmatprep.subr.bf16.mxu0 %v16725_v7  ;;  %11175 = vmatprep.subr.bf16.mxu1 %v16579_v26 }
0x18d5   : > { %11151 = vmatpush1.bf16.msra.mxu0 %v16726_v54  ;;  %11177 = vmatpush3.bf16.msra.mxu1 %v16648_v46 }
0x18d6   : > { %11153 = vmatprep.subr.bf16.mxu0 %v16727_v50  ;;  %11178 = vmatprep.subr.bf16.mxu1 %v16579_v26 }
0x18d9   : > { %11155 = vmatpush1.bf16.msra.mxu0 %v16728_v24  ;;  %11180 = vmatpush3.bf16.msra.mxu1 %v16652_v4 }
0x18da   : > { %11157 = vmatprep.subr.bf16.mxu0 %v16729_v36  ;;  %11181 = vmatprep.subr.bf16.mxu1 %v16579_v26 }
0x18dd   : > { %11159 = vmatpush1.bf16.msra.mxu0 %v16730_v56  ;;  %11183 = vmatpush3.bf16.msra.mxu1 %v16656_v52 }
0x18de   : > { %11185 = vmatprep.subr.bf16.mxu0 %v16731_v3  ;;  %11216 = vmatprep.subr.bf16.mxu1 %v16579_v26 }
0x1993   : > { %v5920_v49 = vpop.f32.mrb[102].mxu0  ;;  %v5991_v45 = vpop.f32.mrb[162].mxu1 }
0x1994   : > { %v5995_v23 = vadd.f32 %v5920_v49, %v16851_v18  ;;  %v5922_v0 = vpop.f32.mrb[103].mxu0  ;;  %v9398_v60 = vpop.f32.mrb[163].mxu1  ;;  %v6009_v38 = vadd.f32 %v15423_v25, %v5991_v45 }
0x1995   : > { %v6002_v16 = vadd.f32 %v5922_v0, %v16854_v53  ;;  %v16858_v60 = vld [vmem:[#allocation101_spill] sm:$0xff] }
0x1996   : > { %v7917_v61 = vmul.f32 -1.442695, %v5995_v23 }
0x1997   : > { %v7918_v2 = vmul.f32 -1.442695, %v6002_v16  ;;  %v16859_v16 = vld [vmem:[#allocation100_spill] sm:$0xff] }
0x1998   : > { %12043 = vpow2.f32 %v7917_v61  ;;  %v16860_v61 = vld [vmem:[#allocation64_spill] sm:$0xff] }
0x1999   : > { %12045 = vpow2.f32 %v7918_v2  ;;  %v16861_v2 = vsel %vm13903_vm4, %v16859_v16, %v16860_v61  ;;  %v16865_v16 = vld [vmem:[#allocation52_spill] sm:$0xff] }
0x19a2   : > { %v12044_v35 = vpop.eup %12043 }
0x19a3   : > { %v5999_v29 = vadd.f32 1.0, %v12044_v35  ;;  %v12046_v58 = vpop.eup %12045 }
0x19a4   : > { %v6006_v15 = vadd.f32 1.0, %v12046_v58 }
0x19a5   : > { %12047 = vrcp.f32 %v5999_v29 }
0x19a6   : > { %12049 = vrcp.f32 %v6006_v15 }
0x19af   : > { %v12048_v8 = vpop.eup %12047 }
0x19b0   : > { %v6010_v6 = vmul.f32 %v12048_v8, %v6009_v38  ;;  %v12050_v27 = vpop.eup %12049 }
0x19b1   : > { %v6013_v14 = vsub.f32 1.0, %v12050_v27  ;;  %v6015_v18 = vmul.f32 %v12050_v27, %v15588_v57  ;;  %v16863_v27 = vld [vmem:[#allocation114_spill] sm:$0xff] }
0x19b2   : > { %v6011_v19 = vadd.f32 %v6010_v6, %v16857_v22 }
0x19b4   : > { %12051 = vtanh.f32 %v6011_v19  ;;  %v16862_v19 = vld [vmem:[#allocation115_spill] sm:$0xff] }
0x19be   : > { %v12052_v13 = vpop.eup %12051 }
0x19bf   : > { %v6014_v49 = vmul.f32 %v12052_v13, %v6013_v14  ;;  %v16864_v14 = vsel %vm14287_vm5, %v16862_v19, %v16863_v27 }
0x19c1   : > { %v15640_v23 = vadd.f32 %v6015_v18, %v6014_v49 }
0x19c3   : > { %6087 = vmatmul.mubr.f32.vlgmr.msra.gmra.mrb[104].mxu0 %v15640_v23  ;;  %9432 = vmatmul.mubr.f32.vlgmr.msra.gmra.mrb[164].mxu1 %v15640_v23 }
0x19c4   : > { %11187 = vmatpush1.bf16.msra.mxu0 %v16716_v59  ;;  %11218 = vmatpush3.bf16.msra.mxu1 %v13530_v32 }
0x19c5   : > { %11189 = vmatprep.subr.bf16.mxu0 %v16717_v30  ;;  %11219 = vmatprep.subr.bf16.mxu1 %v16579_v26 }
0x19c6   : > { %6254 = vmatprep.mubr.f32.mxu0 %v16580_v40  ;;  %9466 = vmatprep.mubr.msk.f32.mxu1 %vm12601_vm2, %v16580_v40 }
0x19c8   : > { %11191 = vmatpush1.bf16.msra.mxu0 %v16718_v41  ;;  %11221 = vmatpush3.bf16.msra.mxu1 %v13541_v5 }
0x19c9   : > { %11193 = vmatprep.subr.bf16.mxu0 %v16719_v17  ;;  %11222 = vmatprep.subr.bf16.mxu1 %v16579_v26 }
0x19cc   : > { %11195 = vmatpush1.bf16.msra.mxu0 %v16720_v9  ;;  %11224 = vmatpush3.bf16.msra.mxu1 %v13553_v39 }
0x19cd   : > { %11197 = vmatprep.subr.bf16.mxu0 %v16721_v33  ;;  %11225 = vmatprep.subr.bf16.mxu1 %v16579_v26 }
0x19d0   : > { %11199 = vmatpush1.bf16.msra.mxu0 %v16722_v21  ;;  %11227 = vmatpush3.bf16.msra.mxu1 %v13565_v10 }
0x19d1   : > { %11201 = vmatprep.subr.bf16.mxu0 %v16723_v37  ;;  %11228 = vmatprep.subr.bf16.mxu1 %v16579_v26 }
0x19d4   : > { %11203 = vmatpush1.bf16.msra.mxu0 %v16724_v63  ;;  %11230 = vmatpush3.bf16.msra.mxu1 %v16644_v31 }
0x19d5   : > { %11205 = vmatprep.subr.bf16.mxu0 %v16725_v7  ;;  %11231 = vmatprep.subr.bf16.mxu1 %v16579_v26 }
0x19d8   : > { %11207 = vmatpush1.bf16.msra.mxu0 %v16726_v54  ;;  %11233 = vmatpush3.bf16.msra.mxu1 %v16648_v46 }
0x19d9   : > { %11209 = vmatprep.subr.bf16.mxu0 %v16727_v50  ;;  %11234 = vmatprep.subr.bf16.mxu1 %v16579_v26 }
0x19dc   : > { %11211 = vmatpush1.bf16.msra.mxu0 %v16728_v24  ;;  %11236 = vmatpush3.bf16.msra.mxu1 %v16652_v4 }
0x19dd   : > { %11213 = vmatprep.subr.bf16.mxu0 %v16729_v36  ;;  %11237 = vmatprep.subr.bf16.mxu1 %v16579_v26 }
0x19e0   : > { %11215 = vmatpush1.bf16.msra.mxu0 %v16730_v56  ;;  %11239 = vmatpush3.bf16.msra.mxu1 %v16656_v52 }
0x19e1   : > { %11241 = vmatprep.subr.bf16.mxu0 %v16731_v3  ;;  %11272 = vmatprep.subr.bf16.mxu1 %v16579_v26 }
0x1a96   : > { %v6088_v45 = vpop.f32.mrb[104].mxu0  ;;  %v6159_v0 = vpop.f32.mrb[164].mxu1 }
0x1a97   : > { %v6163_v43 = vadd.f32 %v6088_v45, %v16858_v60  ;;  %v6090_v20 = vpop.f32.mrb[105].mxu0  ;;  %v9433_v53 = vpop.f32.mrb[165].mxu1  ;;  %v6177_v55 = vadd.f32 %v15423_v25, %v6159_v0 }
0x1a98   : > { %v6170_v35 = vadd.f32 %v6090_v20, %v16861_v2 }
0x1a99   : > { %v7919_v29 = vmul.f32 -1.442695, %v6163_v43 }
0x1a9a   : > { %v7920_v58 = vmul.f32 -1.442695, %v6170_v35 }
0x1a9b   : > { %12053 = vpow2.f32 %v7919_v29  ;;  %v16866_v29 = vld [vmem:[#allocation102_spill] sm:$0xff] }
0x1a9c   : > { %12055 = vpow2.f32 %v7920_v58  ;;  %v16867_v58 = vld [vmem:[#allocation63_spill] sm:$0xff] }
0x1aa5   : > { %v12054_v15 = vpop.eup %12053 }
0x1aa6   : > { %v6167_v38 = vadd.f32 1.0, %v12054_v15  ;;  %v12056_v8 = vpop.eup %12055  ;;  %v16868_v15 = vsel %vm13903_vm4, %v16866_v29, %v16867_v58  ;;  %v16872_v58 = vld [vmem:[#allocation69_spill] sm:$0xff] }
0x1aa7   : > { %v6174_v6 = vadd.f32 1.0, %v12056_v8 }
0x1aa8   : > { %12057 = vrcp.f32 %v6167_v38 }
0x1aa9   : > { %12059 = vrcp.f32 %v6174_v6 }
0x1ab2   : > { %v12058_v42 = vpop.eup %12057 }
0x1ab3   : > { %v6178_v22 = vmul.f32 %v12058_v42, %v6177_v55  ;;  %v12060_v49 = vpop.eup %12059 }
0x1ab4   : > { %v6181_v18 = vsub.f32 1.0, %v12060_v49  ;;  %v6183_v43 = vmul.f32 %v12060_v49, %v15640_v23  ;;  %v16869_v49 = vld [vmem:[#allocation117_spill] sm:$0xff] }
0x1ab5   : > { %v6179_v13 = vadd.f32 %v6178_v22, %v16864_v14 }
0x1ab7   : > { %12061 = vtanh.f32 %v6179_v13 }
0x1ac1   : > { %v12062_v45 = vpop.eup %12061 }
0x1ac2   : > { %v6182_v60 = vmul.f32 %v12062_v45, %v6181_v18  ;;  %v16870_v18 = vld [vmem:[#allocation116_spill] sm:$0xff] }
0x1ac3   : > { %v16871_v45 = vsel %vm14287_vm5, %v16869_v49, %v16870_v18 }
0x1ac4   : > { %v15692_v20 = vadd.f32 %v6183_v43, %v6182_v60 }
0x1ac6   : > { %6255 = vmatmul.mubr.f32.vlgmr.msra.gmra.mrb[106].mxu0 %v15692_v20  ;;  %9467 = vmatmul.mubr.f32.vlgmr.msra.gmra.mrb[166].mxu1 %v15692_v20 }
0x1ac7   : > { %11243 = vmatpush1.bf16.msra.mxu0 %v16716_v59  ;;  %11274 = vmatpush3.bf16.msra.mxu1 %v13530_v32 }
0x1ac8   : > { %11245 = vmatprep.subr.bf16.mxu0 %v16717_v30  ;;  %11275 = vmatprep.subr.bf16.mxu1 %v16579_v26 }
0x1ac9   : > { %6422 = vmatprep.mubr.f32.mxu0 %v16580_v40  ;;  %9501 = vmatprep.mubr.msk.f32.mxu1 %vm12601_vm2, %v16580_v40 }
0x1acb   : > { %11247 = vmatpush1.bf16.msra.mxu0 %v16718_v41  ;;  %11277 = vmatpush3.bf16.msra.mxu1 %v13541_v5 }
0x1acc   : > { %11249 = vmatprep.subr.bf16.mxu0 %v16719_v17  ;;  %11278 = vmatprep.subr.bf16.mxu1 %v16579_v26 }
0x1acf   : > { %11251 = vmatpush1.bf16.msra.mxu0 %v16720_v9  ;;  %11280 = vmatpush3.bf16.msra.mxu1 %v13553_v39 }
0x1ad0   : > { %11253 = vmatprep.subr.bf16.mxu0 %v16721_v33  ;;  %11281 = vmatprep.subr.bf16.mxu1 %v16579_v26 }
0x1ad3   : > { %11255 = vmatpush1.bf16.msra.mxu0 %v16722_v21  ;;  %11283 = vmatpush3.bf16.msra.mxu1 %v13565_v10 }
0x1ad4   : > { %11257 = vmatprep.subr.bf16.mxu0 %v16723_v37  ;;  %11284 = vmatprep.subr.bf16.mxu1 %v16579_v26 }
0x1ad7   : > { %11259 = vmatpush1.bf16.msra.mxu0 %v16724_v63  ;;  %11286 = vmatpush3.bf16.msra.mxu1 %v16644_v31 }
0x1ad8   : > { %11261 = vmatprep.subr.bf16.mxu0 %v16725_v7  ;;  %11287 = vmatprep.subr.bf16.mxu1 %v16579_v26 }
0x1adb   : > { %11263 = vmatpush1.bf16.msra.mxu0 %v16726_v54  ;;  %11289 = vmatpush3.bf16.msra.mxu1 %v16648_v46 }
0x1adc   : > { %11265 = vmatprep.subr.bf16.mxu0 %v16727_v50  ;;  %11290 = vmatprep.subr.bf16.mxu1 %v16579_v26 }
0x1adf   : > { %11267 = vmatpush1.bf16.msra.mxu0 %v16728_v24  ;;  %11292 = vmatpush3.bf16.msra.mxu1 %v16652_v4 }
0x1ae0   : > { %11269 = vmatprep.subr.bf16.mxu0 %v16729_v36  ;;  %11293 = vmatprep.subr.bf16.mxu1 %v16579_v26 }
0x1ae3   : > { %11271 = vmatpush1.bf16.msra.mxu0 %v16730_v56  ;;  %11295 = vmatpush3.bf16.msra.mxu1 %v16656_v52 }
0x1ae4   : > { %11297 = vmatprep.subr.bf16.mxu0 %v16731_v3  ;;  %11328 = vmatprep.subr.bf16.mxu1 %v16579_v26 }
0x1b99   : > { %v6256_v0 = vpop.f32.mrb[106].mxu0  ;;  %v6327_v53 = vpop.f32.mrb[166].mxu1 }
0x1b9a   : > { %v6331_v61 = vadd.f32 %v6256_v0, %v16865_v16  ;;  %v6258_v2 = vpop.f32.mrb[107].mxu0  ;;  %v9468_v35 = vpop.f32.mrb[167].mxu1  ;;  %v6345_v27 = vadd.f32 %v15423_v25, %v6327_v53 }
0x1b9b   : > { %v6338_v38 = vadd.f32 %v6258_v2, %v16868_v15 }
0x1b9c   : > { %v7921_v8 = vmul.f32 -1.442695, %v6331_v61 }
0x1b9d   : > { %v7922_v6 = vmul.f32 -1.442695, %v6338_v38 }
0x1b9e   : > { %12063 = vpow2.f32 %v7921_v8 }
0x1b9f   : > { %12065 = vpow2.f32 %v7922_v6  ;;  %v16873_v6 = vld [vmem:[#allocation67_spill] sm:$0xff] }
0x1ba8   : > { %v12064_v55 = vpop.eup %12063 }
0x1ba9   : > { %v6335_v42 = vadd.f32 1.0, %v12064_v55  ;;  %v12066_v22 = vpop.eup %12065  ;;  %v16874_v55 = vld [vmem:[#allocation62_spill] sm:$0xff] }
0x1baa   : > { %v6342_v19 = vadd.f32 1.0, %v12066_v22 }
0x1bab   : > { %12067 = vrcp.f32 %v6335_v42  ;;  %v16875_v42 = vsel %vm13903_vm4, %v16873_v6, %v16874_v55 }
0x1bac   : > { %12069 = vrcp.f32 %v6342_v19 }
0x1bb5   : > { %v12068_v14 = vpop.eup %12067 }
0x1bb6   : > { %v6346_v13 = vmul.f32 %v12068_v14, %v6345_v27  ;;  %v12070_v43 = vpop.eup %12069 }
0x1bb7   : > { %v6349_v0 = vsub.f32 1.0, %v12070_v43  ;;  %v6351_v2 = vmul.f32 %v12070_v43, %v15692_v20 }
0x1bb8   : > { %v6347_v60 = vadd.f32 %v6346_v13, %v16871_v45 }
0x1bba   : > { %12071 = vtanh.f32 %v6347_v60 }
0x1bc4   : > { %v12072_v16 = vpop.eup %12071 }
0x1bc5   : > { %v6350_v61 = vmul.f32 %v12072_v16, %v6349_v0  ;;  %v16876_v0 = vld [vmem:[#allocation119_spill] sm:$0xff]  ;;  %v16877_v16 = vld [vmem:[#allocation118_spill] sm:$0xff] }
0x1bc7   : > { %v15744_v35 = vadd.f32 %v6351_v2, %v6350_v61  ;;  %v16878_v61 = vsel %vm14287_vm5, %v16876_v0, %v16877_v16 }
0x1bc9   : > { %6423 = vmatmul.mubr.f32.vlgmr.msra.gmra.mrb[108].mxu0 %v15744_v35  ;;  %9502 = vmatmul.mubr.f32.vlgmr.msra.gmra.mrb[168].mxu1 %v15744_v35 }
0x1bca   : > { %11299 = vmatpush1.bf16.msra.mxu0 %v16716_v59  ;;  %11330 = vmatpush3.bf16.msra.mxu1 %v13530_v32 }
0x1bcb   : > { %11301 = vmatprep.subr.bf16.mxu0 %v16717_v30  ;;  %11331 = vmatprep.subr.bf16.mxu1 %v16579_v26 }
0x1bcc   : > { %6590 = vmatprep.mubr.f32.mxu0 %v16580_v40  ;;  %9536 = vmatprep.mubr.msk.f32.mxu1 %vm12601_vm2, %v16580_v40 }
0x1bce   : > { %11303 = vmatpush1.bf16.msra.mxu0 %v16718_v41  ;;  %11333 = vmatpush3.bf16.msra.mxu1 %v13541_v5 }
0x1bcf   : > { %11305 = vmatprep.subr.bf16.mxu0 %v16719_v17  ;;  %11334 = vmatprep.subr.bf16.mxu1 %v16579_v26 }
0x1bd2   : > { %11307 = vmatpush1.bf16.msra.mxu0 %v16720_v9  ;;  %11336 = vmatpush3.bf16.msra.mxu1 %v13553_v39 }
0x1bd3   : > { %11309 = vmatprep.subr.bf16.mxu0 %v16721_v33  ;;  %11337 = vmatprep.subr.bf16.mxu1 %v16579_v26 }
0x1bd6   : > { %11311 = vmatpush1.bf16.msra.mxu0 %v16722_v21  ;;  %11339 = vmatpush3.bf16.msra.mxu1 %v13565_v10 }
0x1bd7   : > { %11313 = vmatprep.subr.bf16.mxu0 %v16723_v37  ;;  %11340 = vmatprep.subr.bf16.mxu1 %v16579_v26 }
0x1bda   : > { %11315 = vmatpush1.bf16.msra.mxu0 %v16724_v63  ;;  %11342 = vmatpush3.bf16.msra.mxu1 %v16644_v31 }
0x1bdb   : > { %11317 = vmatprep.subr.bf16.mxu0 %v16725_v7  ;;  %11343 = vmatprep.subr.bf16.mxu1 %v16579_v26 }
0x1bde   : > { %11319 = vmatpush1.bf16.msra.mxu0 %v16726_v54  ;;  %11345 = vmatpush3.bf16.msra.mxu1 %v16648_v46 }
0x1bdf   : > { %11321 = vmatprep.subr.bf16.mxu0 %v16727_v50  ;;  %11346 = vmatprep.subr.bf16.mxu1 %v16579_v26 }
0x1be2   : > { %11323 = vmatpush1.bf16.msra.mxu0 %v16728_v24  ;;  %11348 = vmatpush3.bf16.msra.mxu1 %v16652_v4 }
0x1be3   : > { %11325 = vmatprep.subr.bf16.mxu0 %v16729_v36  ;;  %11349 = vmatprep.subr.bf16.mxu1 %v16579_v26 }
0x1be6   : > { %11327 = vmatpush1.bf16.msra.mxu0 %v16730_v56  ;;  %11351 = vmatpush3.bf16.msra.mxu1 %v16656_v52 }
0x1be7   : > { %11353 = vmatprep.subr.bf16.mxu0 %v16731_v3  ;;  %11384 = vmatprep.subr.bf16.mxu1 %v16579_v26 }
0x1c9c   : > { %v6424_v53 = vpop.f32.mrb[108].mxu0  ;;  %v6495_v29 = vpop.f32.mrb[168].mxu1 }
0x1c9d   : > { %v6499_v15 = vadd.f32 %v6424_v53, %v16872_v58  ;;  %v6426_v38 = vpop.f32.mrb[109].mxu0  ;;  %v9503_v8 = vpop.f32.mrb[169].mxu1  ;;  %v6513_v45 = vadd.f32 %v15423_v25, %v6495_v29 }
0x1c9e   : > { %v6506_v22 = vadd.f32 %v6426_v38, %v16875_v42  ;;  %v16879_v42 = vld [vmem:[#allocation70_spill] sm:$0xff] }
0x1c9f   : > { %v7923_v19 = vmul.f32 -1.442695, %v6499_v15 }
0x1ca0   : > { %v7924_v27 = vmul.f32 -1.442695, %v6506_v22 }
0x1ca1   : > { %12073 = vpow2.f32 %v7923_v19 }
0x1ca2   : > { %12075 = vpow2.f32 %v7924_v27 }
0x1cab   : > { %v12074_v14 = vpop.eup %12073 }
0x1cac   : > { %v6503_v13 = vadd.f32 1.0, %v12074_v14  ;;  %v12076_v49 = vpop.eup %12075  ;;  %v16880_v14 = vld [vmem:[#allocation61_spill] sm:$0xff] }
0x1cad   : > { %v6510_v18 = vadd.f32 1.0, %v12076_v49 }
0x1cae   : > { %12077 = vrcp.f32 %v6503_v13  ;;  %v16881_v13 = vld [vmem:[#allocation60_spill] sm:$0xff] }
0x1caf   : > { %12079 = vrcp.f32 %v6510_v18  ;;  %v16882_v49 = vsel %vm13903_vm4, %v16880_v14, %v16881_v13 }
0x1cb8   : > { %v12078_v60 = vpop.eup %12077 }
0x1cb9   : > { %v6514_v43 = vmul.f32 %v12078_v60, %v6513_v45  ;;  %v12080_v53 = vpop.eup %12079 }
0x1cba   : > { %v6517_v58 = vsub.f32 1.0, %v12080_v53  ;;  %v6519_v8 = vmul.f32 %v12080_v53, %v15744_v35 }
0x1cbb   : > { %v6515_v2 = vadd.f32 %v6514_v43, %v16878_v61 }
0x1cbd   : > { %12081 = vtanh.f32 %v6515_v2 }
0x1cc7   : > { %v12082_v15 = vpop.eup %12081 }
0x1cc8   : > { %v6518_v38 = vmul.f32 %v12082_v15, %v6517_v58  ;;  %v16883_v58 = vld [vmem:[#allocation121_spill] sm:$0xff]  ;;  %v16884_v15 = vld [vmem:[#allocation120_spill] sm:$0xff] }
0x1cca   : > { %v15796_v6 = vadd.f32 %v6519_v8, %v6518_v38  ;;  %v16885_v38 = vsel %vm14287_vm5, %v16883_v58, %v16884_v15  ;;  %v7148_v58 = vld [vmem:[#allocation15 + $0x28] sm:$0xff] }
0x1ccc   : > { %6591 = vmatmul.mubr.f32.vlgmr.msra.gmra.mrb[110].mxu0 %v15796_v6  ;;  %9537 = vmatmul.mubr.f32.vlgmr.msra.gmra.mrb[170].mxu1 %v15796_v6 }
0x1ccd   : > { %11355 = vmatpush1.bf16.msra.mxu0 %v16716_v59  ;;  %11386 = vmatpush3.bf16.msra.mxu1 %v13530_v32 }
0x1cce   : > { %11357 = vmatprep.subr.bf16.mxu0 %v16717_v30  ;;  %11387 = vmatprep.subr.bf16.mxu1 %v16579_v26 }
0x1ccf   : > { %6758 = vmatprep.mubr.f32.mxu0 %v16580_v40  ;;  %9571 = vmatprep.mubr.msk.f32.mxu1 %vm12601_vm2, %v16580_v40 }
0x1cd1   : > { %11359 = vmatpush1.bf16.msra.mxu0 %v16718_v41  ;;  %11389 = vmatpush3.bf16.msra.mxu1 %v13541_v5 }
0x1cd2   : > { %11361 = vmatprep.subr.bf16.mxu0 %v16719_v17  ;;  %11390 = vmatprep.subr.bf16.mxu1 %v16579_v26 }
0x1cd5   : > { %11363 = vmatpush1.bf16.msra.mxu0 %v16720_v9  ;;  %11392 = vmatpush3.bf16.msra.mxu1 %v13553_v39 }
0x1cd6   : > { %11365 = vmatprep.subr.bf16.mxu0 %v16721_v33  ;;  %11393 = vmatprep.subr.bf16.mxu1 %v16579_v26 }
0x1cd9   : > { %11367 = vmatpush1.bf16.msra.mxu0 %v16722_v21  ;;  %11395 = vmatpush3.bf16.msra.mxu1 %v13565_v10 }
0x1cda   : > { %11369 = vmatprep.subr.bf16.mxu0 %v16723_v37  ;;  %11396 = vmatprep.subr.bf16.mxu1 %v16579_v26 }
0x1cdd   : > { %11371 = vmatpush1.bf16.msra.mxu0 %v16724_v63  ;;  %11398 = vmatpush3.bf16.msra.mxu1 %v16644_v31 }
0x1cde   : > { %11373 = vmatprep.subr.bf16.mxu0 %v16725_v7  ;;  %11399 = vmatprep.subr.bf16.mxu1 %v16579_v26 }
0x1ce1   : > { %11375 = vmatpush1.bf16.msra.mxu0 %v16726_v54  ;;  %11401 = vmatpush3.bf16.msra.mxu1 %v16648_v46 }
0x1ce2   : > { %11377 = vmatprep.subr.bf16.mxu0 %v16727_v50  ;;  %11402 = vmatprep.subr.bf16.mxu1 %v16579_v26 }
0x1ce5   : > { %11379 = vmatpush1.bf16.msra.mxu0 %v16728_v24  ;;  %11404 = vmatpush3.bf16.msra.mxu1 %v16652_v4 }
0x1ce6   : > { %11381 = vmatprep.subr.bf16.mxu0 %v16729_v36  ;;  %11405 = vmatprep.subr.bf16.mxu1 %v16579_v26 }
0x1ce9   : > { %11383 = vmatpush1.bf16.msra.mxu0 %v16730_v56  ;;  %11407 = vmatpush3.bf16.msra.mxu1 %v16656_v52 }
0x1cea   : > { %11409 = vmatprep.subr.bf16.mxu0 %v16731_v3  ;;  %11440 = vmatprep.subr.bf16.mxu1 %v16579_v26 }
0x1d9f   : > { %v6592_v29 = vpop.f32.mrb[110].mxu0  ;;  %v6663_v55 = vpop.f32.mrb[170].mxu1 }
0x1da0   : > { %v6667_v22 = vadd.f32 %v6592_v29, %v16879_v42  ;;  %v6594_v19 = vpop.f32.mrb[111].mxu0  ;;  %v9538_v27 = vpop.f32.mrb[171].mxu1  ;;  %v6681_v61 = vadd.f32 %v15423_v25, %v6663_v55 }
0x1da1   : > { %v6674_v18 = vadd.f32 %v6594_v19, %v16882_v49 }
0x1da2   : > { %v7925_v45 = vmul.f32 -1.442695, %v6667_v22 }
0x1da3   : > { %v7926_v60 = vmul.f32 -1.442695, %v6674_v18 }
0x1da4   : > { %12083 = vpow2.f32 %v7925_v45 }
0x1da5   : > { %12085 = vpow2.f32 %v7926_v60 }
0x1dae   : > { %v12084_v43 = vpop.eup %12083 }
0x1daf   : > { %v6671_v3 = vadd.f32 1.0, %v12084_v43  ;;  %v12086_v0 = vpop.eup %12085  ;;  %v7143_v43 = vld [vmem:[#allocation15] sm:$0xff] }
0x1db0   : > { %v6678_v16 = vadd.f32 1.0, %v12086_v0 }
0x1db1   : > { %12087 = vrcp.f32 %v6671_v3  ;;  %v7144_v3 = vld [vmem:[#allocation15 + $0x8] sm:$0xff] }
0x1db2   : > { %12089 = vrcp.f32 %v6678_v16  ;;  %v11465_v0 = vpack.c.bf16 %v7144_v3, %v7143_v43  ;;  %v7145_v16 = vld [vmem:[#allocation15 + $0x10] sm:$0xff] }
0x1dbb   : > { %v12088_v2 = vpop.eup %12087 }
0x1dbc   : > { %v6682_v53 = vmul.f32 %v12088_v2, %v6681_v61  ;;  %v12090_v29 = vpop.eup %12089  ;;  %v7146_v61 = vld [vmem:[#allocation15 + $0x18] sm:$0xff] }
0x1dbd   : > { %v6685_v42 = vsub.f32 1.0, %v12090_v29  ;;  %v6687_v27 = vmul.f32 %v12090_v29, %v15796_v6  ;;  %v11468_v2 = vpack.c.bf16 %v7146_v61, %v7145_v16 }
0x1dbe   : > { %v6683_v8 = vadd.f32 %v6682_v53, %v16885_v38  ;;  %v7147_v53 = vld [vmem:[#allocation15 + $0x20] sm:$0xff]  ;;  %v7149_v38 = vld [vmem:[#allocation15 + $0x30] sm:$0xff] }
0x1dbf   : > { %v11471_v15 = vpack.c.bf16 %v7148_v58, %v7147_v53 }
0x1dc0   : > { %12091 = vtanh.f32 %v6683_v8  ;;  %v7150_v8 = vld [vmem:[#allocation15 + $0x38] sm:$0xff] }
0x1dc1   : > { %v11474_v29 = vpack.c.bf16 %v7150_v8, %v7149_v38  ;;  %v16903_v8 = vld [vmem:[#allocation29_spill] sm:$0xff] }
0x1dca   : > { %v12092_v22 = vpop.eup %12091 }
0x1dcb   : > { %v6686_v19 = vmul.f32 %v12092_v22, %v6685_v42  ;;  %v7151_v42 = vld [vmem:[#allocation15 + $0x40] sm:$0xff]  ;;  %v7152_v22 = vld [vmem:[#allocation15 + $0x48] sm:$0xff] }
0x1dcd   : > { %v15848_v14 = vadd.f32 %v6687_v27, %v6686_v19  ;;  %v11477_v19 = vpack.c.bf16 %v7152_v22, %v7151_v42  ;;  %v7153_v27 = vld [vmem:[#allocation15 + $0x50] sm:$0xff] }
0x1dce   : > { %v16904_v42 = vld [vmem:[#allocation30_spill] sm:$0xff] }
0x1dcf   : > { %6759 = vmatmul.mubr.f32.vlgmr.msra.gmra.mrb[112].mxu0 %v15848_v14  ;;  %9572 = vmatmul.mubr.f32.vlgmr.msra.gmra.mrb[172].mxu1 %v15848_v14  ;;  %v15960_v22 = vsel %vm1808_vm3, %v16904_v42, %v15796_v6 }
0x1dd0   : > { %11411 = vmatpush1.bf16.msra.mxu0 %v16716_v59  ;;  %11442 = vmatpush3.bf16.msra.mxu1 %v13530_v32  ;;  %v16887_v59 = vld [vmem:[#allocation72_spill] sm:$0xff] }
0x1dd1   : > { %11413 = vmatprep.subr.bf16.mxu0 %v16717_v30  ;;  %11443 = vmatprep.subr.bf16.mxu1 %v16579_v26 }
0x1dd2   : > { %6926 = vmatprep.mubr.f32.mxu0 %v16580_v40  ;;  %9606 = vmatprep.mubr.msk.f32.mxu1 %vm12601_vm2, %v16580_v40 }
0x1dd4   : > { %11415 = vmatpush1.bf16.msra.mxu0 %v16718_v41  ;;  %11445 = vmatpush3.bf16.msra.mxu1 %v13541_v5 }
0x1dd5   : > { %11417 = vmatprep.subr.bf16.mxu0 %v16719_v17  ;;  %11446 = vmatprep.subr.bf16.mxu1 %v16579_v26 }
0x1dd8   : > { %11419 = vmatpush1.bf16.msra.mxu0 %v16720_v9  ;;  %11448 = vmatpush3.bf16.msra.mxu1 %v13553_v39  ;;  %v16886_v39 = vld [vmem:[#allocation59_spill] sm:$0xff] }
0x1dd9   : > { %11421 = vmatprep.subr.bf16.mxu0 %v16721_v33  ;;  %11449 = vmatprep.subr.bf16.mxu1 %v16579_v26 }
0x1ddc   : > { %11423 = vmatpush1.bf16.msra.mxu0 %v16722_v21  ;;  %11451 = vmatpush3.bf16.msra.mxu1 %v13565_v10 }
0x1ddd   : > { %11425 = vmatprep.subr.bf16.mxu0 %v16723_v37  ;;  %11452 = vmatprep.subr.bf16.mxu1 %v16579_v26 }
0x1de0   : > { %11427 = vmatpush1.bf16.msra.mxu0 %v16724_v63  ;;  %11454 = vmatpush3.bf16.msra.mxu1 %v16644_v31  ;;  %v15892_v63 = vld [vmem:[#allocation12] ss:$0 sm:$0xff] }
0x1de1   : > { %11429 = vmatprep.subr.bf16.mxu0 %v16725_v7  ;;  %11455 = vmatprep.subr.bf16.mxu1 %v16579_v26 }
0x1de4   : > { %11431 = vmatpush1.bf16.msra.mxu0 %v16726_v54  ;;  %11457 = vmatpush3.bf16.msra.mxu1 %v16648_v46 }
0x1de5   : > { %11433 = vmatprep.subr.bf16.mxu0 %v16727_v50  ;;  %11458 = vmatprep.subr.bf16.mxu1 %v16579_v26 }
0x1de8   : > { %11435 = vmatpush1.bf16.msra.mxu0 %v16728_v24  ;;  %11460 = vmatpush3.bf16.msra.mxu1 %v16652_v4  ;;  %v16888_v4 = vld [vmem:[#allocation58_spill] sm:$0xff]  ;;  %v16890_v24 = vld [vmem:[#allocation123_spill] sm:$0xff] }
0x1de9   : > { %11437 = vmatprep.subr.bf16.mxu0 %v16729_v36  ;;  %11461 = vmatprep.subr.bf16.mxu1 %v16579_v26  ;;  %v16889_v30 = vsel %vm13903_vm4, %v16887_v59, %v16888_v4  ;;  %v16891_v36 = vld [vmem:[#allocation122_spill] sm:$0xff]  ;;  %v7158_v59 = vld [vmem:[#allocation15 + $0x78] sm:$0xff] }
0x1dec   : > { %11439 = vmatpush1.bf16.msra.mxu0 %v16730_v56  ;;  %11463 = vmatpush3.bf16.msra.mxu1 %v16656_v52  ;;  %v16892_v56 = vsel %vm14287_vm5, %v16890_v24, %v16891_v36 }
0x1ded   : > { %11464 = vmatprep.subr.bf16.mxu0 %v16579_v26 }
0x1ea2   : > { %v6760_v32 = vpop.f32.mrb[112].mxu0  ;;  %v6831_v5 = vpop.f32.mrb[172].mxu1 }
0x1ea3   : > { %v6835_v10 = vadd.f32 %v6760_v32, %v16886_v39  ;;  %v6762_v31 = vpop.f32.mrb[113].mxu0  ;;  %v9573_v46 = vpop.f32.mrb[173].mxu1  ;;  %v6849_v7 = vadd.f32 %v15892_v63, %v6831_v5  ;;  %v7154_v32 = vld [vmem:[#allocation15 + $0x58] sm:$0xff]  ;;  %v7155_v39 = vld [vmem:[#allocation15 + $0x60] sm:$0xff] }
0x1ea4   : > { %v6842_v41 = vadd.f32 %v6762_v31, %v16889_v30  ;;  %v11480_v5 = vpack.c.bf16 %v7154_v32, %v7153_v27  ;;  %v7157_v46 = vld [vmem:[#allocation15 + $0x70] sm:$0xff]  ;;  %v16906_v32 = vld [vmem:[#allocation32_spill] sm:$0xff] }
0x1ea5   : > { %v7927_v17 = vmul.f32 -1.442695, %v6835_v10  ;;  %v7156_v10 = vld [vmem:[#allocation15 + $0x68] sm:$0xff]  ;;  %v11486_v4 = vpack.c.bf16 %v7158_v59, %v7157_v46  ;;  %v16909_v59 = vld [vmem:[#allocation35_spill] sm:$0xff] }
0x1ea6   : > { %v7928_v9 = vmul.f32 -1.442695, %v6842_v41  ;;  %v11483_v31 = vpack.c.bf16 %v7156_v10, %v7155_v39  ;;  %v16907_v39 = vld [vmem:[#allocation33_spill] sm:$0xff] }
0x1ea7   : > { %12093 = vpow2.f32 %v7927_v17  ;;  %v16893_v17 = vld [vmem:[#allocation75_spill] sm:$0xff]  ;;  %v15987_v10 = vsel %vm1808_vm3, %v16907_v39, %v15640_v23 }
0x1ea8   : > { %12095 = vpow2.f32 %v7928_v9 }
0x1eb1   : > { %v12094_v33 = vpop.eup %12093 }
0x1eb2   : > { %v6839_v52 = vadd.f32 1.0, %v12094_v33  ;;  %v12096_v21 = vpop.eup %12095 }
0x1eb3   : > { %v6846_v37 = vadd.f32 1.0, %v12096_v21  ;;  %v16894_v21 = vld [vmem:[#allocation73_spill] sm:$0xff] }
0x1eb4   : > { %12097 = vrcp.f32 %v6839_v52 }
0x1eb5   : > { %12099 = vrcp.f32 %v6846_v37  ;;  %v16895_v37 = vld [vmem:[#allocation56_spill] sm:$0xff] }
0x1ebe   : > { %v12098_v54 = vpop.eup %12097 }
0x1ebf   : > { %v6850_v50 = vmul.f32 %v12098_v54, %v6849_v7  ;;  %v12100_v55 = vpop.eup %12099  ;;  %v16896_v7 = vsel %vm13903_vm4, %v16894_v21, %v16895_v37  ;;  %v16913_v21 = vld [vmem:[#allocation39_spill] sm:$0xff] }
0x1ec0   : > { %v6853_v13 = vsub.f32 1.0, %v12100_v55  ;;  %v6855_v45 = vmul.f32 %v12100_v55, %v15848_v14  ;;  %v16041_v37 = vsel %vm1808_vm3, %v16913_v21, %v15326_v28 }
0x1ec1   : > { %v6851_v25 = vadd.f32 %v6850_v50, %v16892_v56 }
0x1ec3   : > { %12101 = vtanh.f32 %v6851_v25 }
0x1ecd   : > { %v12102_v49 = vpop.eup %12101 }
0x1ece   : > { %v6854_v18 = vmul.f32 %v12102_v49, %v6853_v13 }
0x1ed0   : > { %v15901_v60 = vadd.f32 %v6855_v45, %v6854_v18  ;;  %v16898_v18 = vld [vmem:[#allocation124_spill] sm:$0xff] }
0x1ed1   : > { %v16899_v45 = vsel %vm14287_vm5, %v16897_v44, %v16898_v18 }
0x1ed2   : > { %6927 = vmatmul.mubr.f32.vlgmr.msra.gmra.mrb[114].mxu0 %v15901_v60  ;;  %9607 = vmatmul.mubr.f32.vlgmr.msra.gmra.mrb[174].mxu1 %v15901_v60  ;;  %v15942_v38 = vsel %vm1808_vm3, %v16902_v11, %v15901_v60 }
0x1ed3   : > { %9641 = vmatprep.mubr.msk.f32.mxu0 %vm12601_vm2, %v16580_v40  ;;  %11466 = vmatpush3.bf16.msra.mxu0 %v11465_v0 }
0x1ed4   : > { %11467 = vmatprep.subr.bf16.mxu0 %v16579_v26 }
0x1ed7   : > { %11469 = vmatpush3.bf16.msra.mxu0 %v11468_v2 }
0x1ed8   : > { %11470 = vmatprep.subr.bf16.mxu0 %v16579_v26 }
0x1edb   : > { %11472 = vmatpush3.bf16.msra.mxu0 %v11471_v15 }
0x1edc   : > { %11473 = vmatprep.subr.bf16.mxu0 %v16579_v26 }
0x1edf   : > { %11475 = vmatpush3.bf16.msra.mxu0 %v11474_v29  ;;  %v15951_v29 = vsel %vm1808_vm3, %v16903_v8, %v15848_v14 }
0x1ee0   : > { %11476 = vmatprep.subr.bf16.mxu0 %v16579_v26 }
0x1ee3   : > { %11478 = vmatpush3.bf16.msra.mxu0 %v11477_v19  ;;  %v16905_v19 = vld [vmem:[#allocation31_spill] sm:$0xff] }
0x1ee4   : > { %11479 = vmatprep.subr.bf16.mxu0 %v16579_v26  ;;  %v15969_v27 = vsel %vm1808_vm3, %v16905_v19, %v15744_v35 }
0x1ee7   : > { %11481 = vmatpush3.bf16.msra.mxu0 %v11480_v5  ;;  %v15978_v5 = vsel %vm1808_vm3, %v16906_v32, %v15692_v20 }
0x1ee8   : > { %11482 = vmatprep.subr.bf16.mxu0 %v16579_v26 }
0x1eeb   : > { %11484 = vmatpush3.bf16.msra.mxu0 %v11483_v31  ;;  %v16908_v31 = vld [vmem:[#allocation34_spill] sm:$0xff] }
0x1eec   : > { %11485 = vmatprep.subr.bf16.mxu0 %v16579_v26  ;;  %v15996_v46 = vsel %vm1808_vm3, %v16908_v31, %v15588_v57 }
0x1eef   : > { %11487 = vmatpush3.bf16.msra.mxu0 %v11486_v4  ;;  %v16005_v4 = vsel %vm1808_vm3, %v16909_v59, %v15536_v12 }
0x1fa5   : > { %v6928_v30 = vpop.f32.mrb[114].mxu0  ;;  %v6999_v41 = vpop.f32.mrb[174].mxu1 }
0x1fa6   : > { %v7003_v9 = vadd.f32 %v6928_v30, %v16893_v17  ;;  %v6930_v33 = vpop.f32.mrb[115].mxu0  ;;  %v9608_v52 = vpop.f32.mrb[175].mxu1  ;;  %v7017_v55 = vadd.f32 %v15892_v63, %v6999_v41  ;;  %v16900_v63 = vld [vmem:[#allocation126_spill] sm:$0xff]  ;;  %v16910_v30 = vld [vmem:[#allocation36_spill] sm:$0xff]  ;;  %v16911_v17 = vld [vmem:[#allocation37_spill] sm:$0xff] }
0x1fa7   : > { %v7010_v54 = vadd.f32 %v6930_v33, %v16896_v7  ;;  %v16014_v41 = vsel %vm1808_vm3, %v16910_v30, %v15484_v62  ;;  %v16912_v33 = vld [vmem:[#allocation38_spill] sm:$0xff]  ;;  %v16050_v7 = vsel %vm1808_vm3, %v15178_v48, %v15274_v51 }
0x1fa8   : > { %v7929_v50 = vmul.f32 -1.442695, %v7003_v9  ;;  %v16023_v9 = vsel %vm1808_vm3, %v16911_v17, %v15432_v1  ;;  %v16032_v52 = vsel %vm1808_vm3, %v16912_v33, %v15378_v47 }
0x1fa9   : > { %v7930_v24 = vmul.f32 -1.442695, %v7010_v54  ;;  %v16062_v54 = vsel %vm1808_vm3, %v15274_v51, %v15178_v48  ;;  %v16080_v48 = vsel %vm1808_vm3, %v15378_v47, %v16912_v33  ;;  %v16089_v51 = vsel %vm1808_vm3, %v15432_v1, %v16911_v17 }
0x1faa   : > { %12103 = vpow2.f32 %v7929_v50  ;;  %v16071_v50 = vsel %vm1808_vm3, %v15326_v28, %v16913_v21  ;;  %v16098_v28 = vsel %vm1808_vm3, %v15484_v62, %v16910_v30  ;;  %v16107_v47 = vsel %vm1808_vm3, %v15536_v12, %v16909_v59 }
0x1fab   : > { %12105 = vpow2.f32 %v7930_v24  ;;  %v16116_v1 = vsel %vm1808_vm3, %v15588_v57, %v16908_v31  ;;  %v16125_v62 = vsel %vm1808_vm3, %v15640_v23, %v16907_v39  ;;  %v16134_v12 = vsel %vm1808_vm3, %v15692_v20, %v16906_v32 }
0x1fac   : > { %v16143_v57 = vsel %vm1808_vm3, %v15744_v35, %v16905_v19  ;;  %v16152_v23 = vsel %vm1808_vm3, %v15796_v6, %v16904_v42  ;;  %v16161_v20 = vsel %vm1808_vm3, %v15848_v14, %v16903_v8  ;;  %v16170_v35 = vsel %vm1808_vm3, %v15901_v60, %v16902_v11  ;;  %v16182_v14 = vld [vmem:[#allocation16] ss:$0 sm:$0xff] }
0x1fb4   : > { %v12104_v36 = vpop.eup %12103 }
0x1fb5   : > { %v7007_v56 = vadd.f32 1.0, %v12104_v36  ;;  %v12106_v26 = vpop.eup %12105 }
0x1fb6   : > { %v7014_v25 = vadd.f32 1.0, %v12106_v26 }
0x1fb7   : > { %12107 = vrcp.f32 %v7007_v56 }
0x1fb8   : > { %12109 = vrcp.f32 %v7014_v25 }
0x1fc1   : > { %v12108_v13 = vpop.eup %12107 }
0x1fc2   : > { %v7018_v49 = vmul.f32 %v12108_v13, %v7017_v55  ;;  %v12110_v3 = vpop.eup %12109 }
0x1fc3   : > { %v7021_v0 = vsub.f32 1.0, %v12110_v3  ;;  %v7023_v2 = vmul.f32 %v12110_v3, %v15901_v60 }
0x1fc4   : > { %v7019_v43 = vadd.f32 %v7018_v49, %v16899_v45  ;;  %v16187_v49 = vld [vmem:[#allocation18] ss:$0 sm:$0xff] }
0x1fc6   : > { %12111 = vtanh.f32 %v7019_v43 }
0x1fd0   : > { %v12112_v16 = vpop.eup %12111 }
0x1fd1   : > { %v7022_v61 = vmul.f32 %v12112_v16, %v7021_v0 }
0x1fd3   : > { %v15927_v53 = vadd.f32 %v7023_v2, %v7022_v61 }
0x1fd5   : > { %v15933_v15 = vsel %vm1808_vm3, %v16900_v63, %v15927_v53  ;;  %v16179_v6 = vsel %vm1808_vm3, %v15927_v53, %v16900_v63 }
0x1fd6   : > { %9642 = vmatmul.mubr.f32.vlgmr.msra.gmra.mrb[116].mxu0 %v15933_v15 }
0x1fd7   : > { %9644 = vmatprep.mubr.msk.f32.mxu0 %vm12601_vm2, %v16580_v40 }
0x1fda   : > { %9645 = vmatmul.mubr.f32.gmra.mrb[118].mxu0 %v15942_v38 }
0x1fdb   : > { %9647 = vmatprep.mubr.msk.f32.mxu0 %vm12601_vm2, %v16580_v40 }
0x1fde   : > { %9648 = vmatmul.mubr.f32.gmra.mrb[120].mxu0 %v15951_v29 }
0x1fdf   : > { %9650 = vmatprep.mubr.msk.f32.mxu0 %vm12601_vm2, %v16580_v40 }
0x1fe2   : > { %9651 = vmatmul.mubr.f32.gmra.mrb[122].mxu0 %v15960_v22 }
0x1fe3   : > { %9653 = vmatprep.mubr.msk.f32.mxu0 %vm12601_vm2, %v16580_v40 }
0x1fe6   : > { %9654 = vmatmul.mubr.f32.gmra.mrb[124].mxu0 %v15969_v27 }
0x1fe7   : > { %9656 = vmatprep.mubr.msk.f32.mxu0 %vm12601_vm2, %v16580_v40 }
0x1fea   : > { %9657 = vmatmul.mubr.f32.gmra.mrb[126].mxu0 %v15978_v5 }
0x1feb   : > { %9659 = vmatprep.mubr.msk.f32.mxu0 %vm12601_vm2, %v16580_v40 }
0x1fee   : > { %9660 = vmatmul.mubr.f32.gmra.mrb[128].mxu0 %v15987_v10 }
0x1fef   : > { %9662 = vmatprep.mubr.msk.f32.mxu0 %vm12601_vm2, %v16580_v40 }
0x1ff2   : > { %9663 = vmatmul.mubr.f32.gmra.mrb[130].mxu0 %v15996_v46 }
0x1ff3   : > { %9665 = vmatprep.mubr.msk.f32.mxu0 %vm12601_vm2, %v16580_v40 }
0x1ff6   : > { %9666 = vmatmul.mubr.f32.gmra.mrb[132].mxu0 %v16005_v4 }
0x1ff7   : > { %9668 = vmatprep.mubr.msk.f32.mxu0 %vm12601_vm2, %v16580_v40 }
0x1ffa   : > { %9669 = vmatmul.mubr.f32.gmra.mrb[134].mxu0 %v16014_v41 }
0x1ffb   : > { %9671 = vmatprep.mubr.msk.f32.mxu0 %vm12601_vm2, %v16580_v40 }
0x1ffe   : > { %9672 = vmatmul.mubr.f32.gmra.mrb[136].mxu0 %v16023_v9 }
0x1fff   : > { %9674 = vmatprep.mubr.msk.f32.mxu0 %vm12601_vm2, %v16580_v40 }
0x2002   : > { %9675 = vmatmul.mubr.f32.gmra.mrb[138].mxu0 %v16032_v52 }
0x2003   : > { %9677 = vmatprep.mubr.msk.f32.mxu0 %vm12601_vm2, %v16580_v40 }
0x2006   : > { %9678 = vmatmul.mubr.f32.gmra.mrb[140].mxu0 %v16041_v37 }
0x2007   : > { %9680 = vmatprep.mubr.msk.f32.mxu0 %vm12601_vm2, %v16580_v40 }
0x200a   : > { %9681 = vmatmul.mubr.f32.gmra.mrb[142].mxu0 %v16050_v7 }
0x200b   : > { %9683 = vmatprep.mubr.msk.f32.mxu0 %vm12601_vm2, %v16580_v40 }
0x200e   : > { %9684 = vmatmul.mubr.f32.gmra.mrb[144].mxu0 %v15222_v34 }
0x200f   : > { %9686 = vmatprep.mubr.msk.f32.mxu0 %vm12601_vm2, %v16580_v40 }
0x2012   : > { %9687 = vmatmul.mubr.f32.gmra.mrb[146].mxu0 %v16062_v54 }
0x2013   : > { %9689 = vmatprep.mubr.msk.f32.mxu0 %vm12601_vm2, %v16580_v40 }
0x2016   : > { %9690 = vmatmul.mubr.f32.gmra.mrb[148].mxu0 %v16071_v50 }
0x2017   : > { %9692 = vmatprep.mubr.msk.f32.mxu0 %vm12601_vm2, %v16580_v40 }
0x201a   : > { %9693 = vmatmul.mubr.f32.gmra.mrb[150].mxu0 %v16080_v48 }
0x201b   : > { %9695 = vmatprep.mubr.msk.f32.mxu0 %vm12601_vm2, %v16580_v40 }
0x201e   : > { %9696 = vmatmul.mubr.f32.gmra.mrb[152].mxu0 %v16089_v51 }
0x201f   : > { %9698 = vmatprep.mubr.msk.f32.mxu0 %vm12601_vm2, %v16580_v40 }
0x2022   : > { %9699 = vmatmul.mubr.f32.gmra.mrb[154].mxu0 %v16098_v28 }
0x2023   : > { %9701 = vmatprep.mubr.msk.f32.mxu0 %vm12601_vm2, %v16580_v40 }
0x2026   : > { %9702 = vmatmul.mubr.f32.gmra.mrb[156].mxu0 %v16107_v47 }
0x2027   : > { %9704 = vmatprep.mubr.msk.f32.mxu0 %vm12601_vm2, %v16580_v40 }
0x202a   : > { %9705 = vmatmul.mubr.f32.gmra.mrb[158].mxu0 %v16116_v1 }
0x202b   : > { %9707 = vmatprep.mubr.msk.f32.mxu0 %vm12601_vm2, %v16580_v40 }
0x202e   : > { %9708 = vmatmul.mubr.f32.gmra.mrb[160].mxu0 %v16125_v62 }
0x202f   : > { %9710 = vmatprep.mubr.msk.f32.mxu0 %vm12601_vm2, %v16580_v40 }
0x2032   : > { %9711 = vmatmul.mubr.f32.gmra.mrb[162].mxu0 %v16134_v12 }
0x2033   : > { %9713 = vmatprep.mubr.msk.f32.mxu0 %vm12601_vm2, %v16580_v40 }
0x2036   : > { %9714 = vmatmul.mubr.f32.gmra.mrb[164].mxu0 %v16143_v57 }
0x2037   : > { %9716 = vmatprep.mubr.msk.f32.mxu0 %vm12601_vm2, %v16580_v40 }
0x203a   : > { %9717 = vmatmul.mubr.f32.gmra.mrb[166].mxu0 %v16152_v23 }
0x203b   : > { %9719 = vmatprep.mubr.msk.f32.mxu0 %vm12601_vm2, %v16580_v40 }
0x203e   : > { %9720 = vmatmul.mubr.f32.gmra.mrb[168].mxu0 %v16161_v20 }
0x203f   : > { %9722 = vmatprep.mubr.msk.f32.mxu0 %vm12601_vm2, %v16580_v40 }
0x2042   : > { %9723 = vmatmul.mubr.f32.gmra.mrb[170].mxu0 %v16170_v35 }
0x2043   : > { %9725 = vmatprep.mubr.msk.f32.mxu0 %vm12601_vm2, %v16580_v40 }
0x2046   : > { %9726 = vmatmul.mubr.f32.gmra.mrb[172].mxu0 %v16179_v6 }
0x20a9   : > { %v7232_v24 = vpop.f32.mrb[116].mxu0 }
0x20aa   : > { %v7233_v36 = vadd.f32 %v16182_v14, %v7232_v24  ;;  %v9643_v60 = vpop.f32.mrb[117].mxu0 }
0x20ac   : > { %12113 = vtanh.f32 %v7233_v36 }
0x20ad   : > { %v7237_v56 = vpop.f32.mrb[118].mxu0 }
0x20ae   : > { %v7238_v26 = vadd.f32 %v16182_v14, %v7237_v56  ;;  %v9646_v25 = vpop.f32.mrb[119].mxu0 }
0x20b0   : > { %12115 = vtanh.f32 %v7238_v26 }
0x20b1   : > { %v7242_v40 = vpop.f32.mrb[120].mxu0 }
0x20b2   : > { %v7243_v55 = vadd.f32 %v16182_v14, %v7242_v40  ;;  %v9649_v13 = vpop.f32.mrb[121].mxu0 }
0x20b4   : > { %12117 = vtanh.f32 %v7243_v55 }
0x20b5   : > { %v7247_v44 = vpop.f32.mrb[122].mxu0 }
0x20b6   : > { %v12114_v18 = vpop.eup %12113  ;;  %v7248_v45 = vadd.f32 %v16182_v14, %v7247_v44  ;;  %v9652_v43 = vpop.f32.mrb[123].mxu0 }
0x20b7   : > { %v7412_v3 = vmul.f32 %v12114_v18, %v16187_v49 }
0x20b8   : > { %12119 = vtanh.f32 %v7248_v45 }
0x20b9   : > { %7441 = vadd.xlane.f32.xlu0 %v7412_v3  ;;  %v7252_v0 = vpop.f32.mrb[124].mxu0 }
0x20ba   : > { %v12116_v16 = vpop.eup %12115  ;;  %v7253_v61 = vadd.f32 %v16182_v14, %v7252_v0  ;;  %v9655_v2 = vpop.f32.mrb[125].mxu0 }
0x20bb   : > { %v7413_v53 = vmul.f32 %v12116_v16, %v16187_v49 }
0x20bc   : > { %12121 = vtanh.f32 %v7253_v61 }
0x20bd   : > { %7443 = vadd.xlane.f32.xlu0 %v7413_v53  ;;  %v7257_v63 = vpop.f32.mrb[126].mxu0 }
0x20be   : > { %v12118_v58 = vpop.eup %12117  ;;  %v7258_v11 = vadd.f32 %v16182_v14, %v7257_v63  ;;  %v9658_v8 = vpop.f32.mrb[127].mxu0 }
0x20bf   : > { %v7414_v42 = vmul.f32 %v12118_v58, %v16187_v49 }
0x20c0   : > { %12123 = vtanh.f32 %v7258_v11 }
0x20c1   : > { %7445 = vadd.xlane.f32.xlu1 %v7414_v42  ;;  %v7262_v19 = vpop.f32.mrb[128].mxu0 }
0x20c2   : > { %v12120_v32 = vpop.eup %12119  ;;  %v7263_v39 = vadd.f32 %v16182_v14, %v7262_v19  ;;  %v9661_v31 = vpop.f32.mrb[129].mxu0 }
0x20c3   : > { %v7415_v59 = vmul.f32 %v12120_v32, %v16187_v49 }
0x20c4   : > { %12125 = vtanh.f32 %v7263_v39 }
0x20c5   : > { %7447 = vadd.xlane.f32.xlu1 %v7415_v59  ;;  %v7267_v30 = vpop.f32.mrb[130].mxu0 }
0x20c6   : > { %v12122_v17 = vpop.eup %12121  ;;  %v7268_v33 = vadd.f32 %v16182_v14, %v7267_v30  ;;  %v9664_v21 = vpop.f32.mrb[131].mxu0 }
0x20c7   : > { %v7416_v24 = vmul.f32 %v12122_v17, %v16187_v49 }
0x20c8   : > { %12127 = vtanh.f32 %v7268_v33 }
0x20c9   : > { %7449 = vadd.xlane.f32.xlu0 %v7416_v24  ;;  %v7272_v36 = vpop.f32.mrb[132].mxu0 }
0x20ca   : > { %v12124_v60 = vpop.eup %12123  ;;  %v7273_v56 = vadd.f32 %v16182_v14, %v7272_v36  ;;  %v9667_v26 = vpop.f32.mrb[133].mxu0 }
0x20cb   : > { %v7417_v25 = vmul.f32 %v12124_v60, %v16187_v49 }
0x20cc   : > { %12129 = vtanh.f32 %v7273_v56 }
0x20cd   : > { %7451 = vadd.xlane.f32.xlu1 %v7417_v25  ;;  %v7277_v40 = vpop.f32.mrb[134].mxu0 }
0x20ce   : > { %v12126_v55 = vpop.eup %12125  ;;  %v7278_v13 = vadd.f32 %v16182_v14, %v7277_v40  ;;  %v9670_v44 = vpop.f32.mrb[135].mxu0 }
0x20cf   : > { %v7418_v18 = vmul.f32 %v12126_v55, %v16187_v49 }
0x20d0   : > { %12131 = vtanh.f32 %v7278_v13 }
0x20d1   : > { %7453 = vadd.xlane.f32.xlu0 %v7418_v18  ;;  %v7282_v45 = vpop.f32.mrb[136].mxu0 }
0x20d2   : > { %v12128_v43 = vpop.eup %12127  ;;  %v7283_v3 = vadd.f32 %v16182_v14, %v7282_v45  ;;  %v9673_v0 = vpop.f32.mrb[137].mxu0 }
0x20d3   : > { %v7419_v16 = vmul.f32 %v12128_v43, %v16187_v49 }
0x20d4   : > { %12133 = vtanh.f32 %v7283_v3 }
0x20d5   : > { %7455 = vadd.xlane.f32.xlu1 %v7419_v16  ;;  %v7287_v61 = vpop.f32.mrb[138].mxu0 }
0x20d6   : > { %v12130_v2 = vpop.eup %12129  ;;  %v7288_v53 = vadd.f32 %v16182_v14, %v7287_v61  ;;  %v9676_v63 = vpop.f32.mrb[139].mxu0 }
0x20d7   : > { %v7420_v58 = vmul.f32 %v12130_v2, %v16187_v49 }
0x20d8   : > { %12135 = vtanh.f32 %v7288_v53 }
0x20d9   : > { %7457 = vadd.xlane.f32.xlu0 %v7420_v58  ;;  %v7292_v11 = vpop.f32.mrb[140].mxu0 }
0x20da   : > { %v12132_v8 = vpop.eup %12131  ;;  %v7293_v42 = vadd.f32 %v16182_v14, %v7292_v11  ;;  %v9679_v19 = vpop.f32.mrb[141].mxu0 }
0x20db   : > { %v7421_v32 = vmul.f32 %v12132_v8, %v16187_v49 }
0x20dc   : > { %12137 = vtanh.f32 %v7293_v42 }
0x20dd   : > { %7459 = vadd.xlane.f32.xlu1 %v7421_v32  ;;  %v7297_v39 = vpop.f32.mrb[142].mxu0 }
0x20de   : > { %v12134_v31 = vpop.eup %12133  ;;  %v7298_v59 = vadd.f32 %v16182_v14, %v7297_v39  ;;  %v9682_v30 = vpop.f32.mrb[143].mxu0 }
0x20df   : > { %v7422_v17 = vmul.f32 %v12134_v31, %v16187_v49 }
0x20e0   : > { %12139 = vtanh.f32 %v7298_v59 }
0x20e1   : > { %7461 = vadd.xlane.f32.xlu0 %v7422_v17  ;;  %v7302_v33 = vpop.f32.mrb[144].mxu0 }
0x20e2   : > { %v12136_v21 = vpop.eup %12135  ;;  %v7303_v24 = vadd.f32 %v16182_v14, %v7302_v33  ;;  %v9685_v36 = vpop.f32.mrb[145].mxu0 }
0x20e3   : > { %v7423_v60 = vmul.f32 %v12136_v21, %v16187_v49 }
0x20e4   : > { %12141 = vtanh.f32 %v7303_v24 }
0x20e5   : > { %7463 = vadd.xlane.f32.xlu1 %v7423_v60  ;;  %v7307_v56 = vpop.f32.mrb[146].mxu0 }
0x20e6   : > { %v12138_v26 = vpop.eup %12137  ;;  %v7308_v25 = vadd.f32 %v16182_v14, %v7307_v56  ;;  %v9688_v40 = vpop.f32.mrb[147].mxu0 }
0x20e7   : > { %v7424_v55 = vmul.f32 %v12138_v26, %v16187_v49 }
0x20e8   : > { %12143 = vtanh.f32 %v7308_v25 }
0x20e9   : > { %7465 = vadd.xlane.f32.xlu0 %v7424_v55  ;;  %v7312_v13 = vpop.f32.mrb[148].mxu0 }
0x20ea   : > { %v12140_v44 = vpop.eup %12139  ;;  %v7313_v18 = vadd.f32 %v16182_v14, %v7312_v13  ;;  %v9691_v45 = vpop.f32.mrb[149].mxu0 }
0x20eb   : > { %v7425_v43 = vmul.f32 %v12140_v44, %v16187_v49 }
0x20ec   : > { %12145 = vtanh.f32 %v7313_v18 }
0x20ed   : > { %7467 = vadd.xlane.f32.xlu1 %v7425_v43  ;;  %v7317_v3 = vpop.f32.mrb[150].mxu0 }
0x20ee   : > { %v12142_v0 = vpop.eup %12141  ;;  %v7318_v16 = vadd.f32 %v16182_v14, %v7317_v3  ;;  %v9694_v61 = vpop.f32.mrb[151].mxu0 }
0x20ef   : > { %v7426_v2 = vmul.f32 %v12142_v0, %v16187_v49 }
0x20f0   : > { %12147 = vtanh.f32 %v7318_v16 }
0x20f1   : > { %7469 = vadd.xlane.f32.xlu0 %v7426_v2  ;;  %v7322_v53 = vpop.f32.mrb[152].mxu0 }
0x20f2   : > { %v12144_v63 = vpop.eup %12143  ;;  %v7323_v58 = vadd.f32 %v16182_v14, %v7322_v53  ;;  %v9697_v11 = vpop.f32.mrb[153].mxu0 }
0x20f3   : > { %v7427_v8 = vmul.f32 %v12144_v63, %v16187_v49 }
0x20f4   : > { %12149 = vtanh.f32 %v7323_v58 }
0x20f5   : > { %7471 = vadd.xlane.f32.xlu1 %v7427_v8  ;;  %v7327_v42 = vpop.f32.mrb[154].mxu0 }
0x20f6   : > { %v12146_v19 = vpop.eup %12145  ;;  %v7328_v32 = vadd.f32 %v16182_v14, %v7327_v42  ;;  %v9700_v39 = vpop.f32.mrb[155].mxu0 }
0x20f7   : > { %v7428_v31 = vmul.f32 %v12146_v19, %v16187_v49 }
0x20f8   : > { %12151 = vtanh.f32 %v7328_v32 }
0x20f9   : > { %7473 = vadd.xlane.f32.xlu0 %v7428_v31  ;;  %v7332_v59 = vpop.f32.mrb[156].mxu0 }
0x20fa   : > { %v12148_v30 = vpop.eup %12147  ;;  %v7333_v17 = vadd.f32 %v16182_v14, %v7332_v59  ;;  %v9703_v33 = vpop.f32.mrb[157].mxu0 }
0x20fb   : > { %v7429_v21 = vmul.f32 %v12148_v30, %v16187_v49 }
0x20fc   : > { %12153 = vtanh.f32 %v7333_v17 }
0x20fd   : > { %7475 = vadd.xlane.f32.xlu1 %v7429_v21  ;;  %v7337_v24 = vpop.f32.mrb[158].mxu0 }
0x20fe   : > { %v12150_v36 = vpop.eup %12149  ;;  %v7338_v60 = vadd.f32 %v16182_v14, %v7337_v24  ;;  %v9706_v56 = vpop.f32.mrb[159].mxu0 }
0x20ff   : > { %v7430_v26 = vmul.f32 %v12150_v36, %v16187_v49 }
0x2100   : > { %12155 = vtanh.f32 %v7338_v60 }
0x2101   : > { %7477 = vadd.xlane.f32.xlu0 %v7430_v26  ;;  %v7342_v25 = vpop.f32.mrb[160].mxu0 }
0x2102   : > { %v12152_v40 = vpop.eup %12151  ;;  %v7343_v55 = vadd.f32 %v16182_v14, %v7342_v25  ;;  %v9709_v13 = vpop.f32.mrb[161].mxu0 }
0x2103   : > { %v7431_v44 = vmul.f32 %v12152_v40, %v16187_v49 }
0x2104   : > { %12157 = vtanh.f32 %v7343_v55 }
0x2105   : > { %7479 = vadd.xlane.f32.xlu1 %v7431_v44  ;;  %v7347_v18 = vpop.f32.mrb[162].mxu0 }
0x2106   : > { %v12154_v45 = vpop.eup %12153  ;;  %v7348_v43 = vadd.f32 %v16182_v14, %v7347_v18  ;;  %v9712_v3 = vpop.f32.mrb[163].mxu0 }
0x2107   : > { %v7432_v0 = vmul.f32 %v12154_v45, %v16187_v49 }
0x2108   : > { %12159 = vtanh.f32 %v7348_v43 }
0x2109   : > { %7481 = vadd.xlane.f32.xlu0 %v7432_v0  ;;  %v7352_v16 = vpop.f32.mrb[164].mxu0 }
0x210a   : > { %v12156_v61 = vpop.eup %12155  ;;  %v7353_v2 = vadd.f32 %v16182_v14, %v7352_v16  ;;  %v9715_v53 = vpop.f32.mrb[165].mxu0 }
0x210b   : > { %v7433_v63 = vmul.f32 %v12156_v61, %v16187_v49 }
0x210c   : > { %12161 = vtanh.f32 %v7353_v2 }
0x210d   : > { %7483 = vadd.xlane.f32.xlu1 %v7433_v63  ;;  %v7357_v58 = vpop.f32.mrb[166].mxu0 }
0x210e   : > { %v12158_v11 = vpop.eup %12157  ;;  %v7358_v8 = vadd.f32 %v16182_v14, %v7357_v58  ;;  %v9718_v42 = vpop.f32.mrb[167].mxu0 }
0x210f   : > { %v7434_v19 = vmul.f32 %v12158_v11, %v16187_v49 }
0x2110   : > { %12163 = vtanh.f32 %v7358_v8 }
0x2111   : > { %7485 = vadd.xlane.f32.xlu0 %v7434_v19  ;;  %v7362_v32 = vpop.f32.mrb[168].mxu0 }
0x2112   : > { %v12160_v39 = vpop.eup %12159  ;;  %v7363_v31 = vadd.f32 %v16182_v14, %v7362_v32  ;;  %v9721_v59 = vpop.f32.mrb[169].mxu0 }
0x2113   : > { %v7435_v30 = vmul.f32 %v12160_v39, %v16187_v49 }
0x2114   : > { %12165 = vtanh.f32 %v7363_v31 }
0x2115   : > { %7487 = vadd.xlane.f32.xlu1 %v7435_v30  ;;  %v7367_v17 = vpop.f32.mrb[170].mxu0 }
0x2116   : > { %v12162_v33 = vpop.eup %12161  ;;  %v7368_v21 = vadd.f32 %v16182_v14, %v7367_v17  ;;  %v9724_v24 = vpop.f32.mrb[171].mxu0 }
0x2117   : > { %v7436_v36 = vmul.f32 %v12162_v33, %v16187_v49 }
0x2118   : > { %12167 = vtanh.f32 %v7368_v21 }
0x2119   : > { %7489 = vadd.xlane.f32.xlu0 %v7436_v36  ;;  %v7372_v60 = vpop.f32.mrb[172].mxu0 }
0x211a   : > { %v12164_v56 = vpop.eup %12163  ;;  %v7373_v26 = vadd.f32 %v16182_v14, %v7372_v60  ;;  %v9727_v25 = vpop.f32.mrb[173].mxu0 }
0x211b   : > { %v7437_v40 = vmul.f32 %v12164_v56, %v16187_v49 }
0x211c   : > { %12169 = vtanh.f32 %v7373_v26 }
0x211d   : > { %7491 = vadd.xlane.f32.xlu1 %v7437_v40 }
0x211e   : > { %v12166_v55 = vpop.eup %12165 }
0x211f   : > { %v7438_v13 = vmul.f32 %v12166_v55, %v16187_v49 }
0x2121   : > { %7493 = vadd.xlane.f32.xlu0 %v7438_v13 }
0x2122   : > { %v12168_v44 = vpop.eup %12167 }
0x2123   : > { %v7439_v18 = vmul.f32 %v12168_v44, %v16187_v49 }
0x2125   : > { %7495 = vadd.xlane.f32.xlu1 %v7439_v18 }
0x2126   : > { %v12170_v45 = vpop.eup %12169 }
0x2127   : > { %v7440_v43 = vmul.f32 %v12170_v45, %v16187_v49 }
0x2129   : > { %7497 = vadd.xlane.f32.xlu0 %v7440_v43 }
0x2146   : > { %v7442_v3 = vpop.xlane.xlu0 %7441 }
0x2147   : > { %v7499_v61 = vmul.f32 1.442695, %v7442_v3 }
0x214a   : > { %v7444_v14 = vpop.xlane.xlu0 %7443 }
0x214b   : > { %v7501_v16 = vmul.f32 1.442695, %v7444_v14 }
0x214d   : > { %12171 = vpow2.f32 %v7501_v16 }
0x214e   : > { %v7446_v0 = vpop.xlane.xlu1 %7445  ;;  %12173 = vpow2.f32 %v7499_v61 }
0x214f   : > { %v7503_v53 = vmul.f32 1.442695, %v7446_v0 }
0x2151   : > { %12175 = vpow2.f32 %v7503_v53 }
0x2152   : > { %v7448_v2 = vpop.xlane.xlu1 %7447 }
0x2153   : > { %v7505_v58 = vmul.f32 1.442695, %v7448_v2 }
0x2155   : > { %12177 = vpow2.f32 %v7505_v58 }
0x2156   : > { %v7450_v63 = vpop.xlane.xlu0 %7449 }
0x2157   : > { %v7507_v8 = vmul.f32 1.442695, %v7450_v63  ;;  %v12172_v30 = vpop.eup %12171 }
0x2158   : > { %v12174_v33 = vpop.eup %12173  ;;  %v7558_v60 = vmul.f32 %v12172_v30, %v15942_v38 }
0x2159   : > { %12179 = vpow2.f32 %v7507_v8  ;;  %v7557_v40 = vmul.f32 %v12174_v33, %v15933_v15 }
0x215a   : > { %v7452_v11 = vpop.xlane.xlu1 %7451 }
0x215b   : > { %v7509_v19 = vmul.f32 1.442695, %v7452_v11  ;;  %v12176_v24 = vpop.eup %12175  ;;  %v7586_v45 = vadd.f32 %v7558_v60, %v7557_v40 }
0x215c   : > { %v7559_v55 = vmul.f32 %v12176_v24, %v15951_v29 }
0x215d   : > { %12181 = vpow2.f32 %v7509_v19 }
0x215e   : > { %v7454_v42 = vpop.xlane.xlu0 %7453  ;;  %v7587_v38 = vadd.f32 %v7586_v45, %v7559_v55 }
0x215f   : > { %v7511_v49 = vmul.f32 1.442695, %v7454_v42  ;;  %v12178_v26 = vpop.eup %12177 }
0x2160   : > { %v7560_v43 = vmul.f32 %v12178_v26, %v15960_v22 }
0x2161   : > { %12183 = vpow2.f32 %v7511_v49 }
0x2162   : > { %v7456_v32 = vpop.xlane.xlu1 %7455  ;;  %v7588_v53 = vadd.f32 %v7587_v38, %v7560_v43 }
0x2163   : > { %v7513_v31 = vmul.f32 1.442695, %v7456_v32  ;;  %v12180_v44 = vpop.eup %12179 }
0x2164   : > { %v7561_v16 = vmul.f32 %v12180_v44, %v15969_v27 }
0x2165   : > { %12185 = vpow2.f32 %v7513_v31 }
0x2166   : > { %v7458_v39 = vpop.xlane.xlu0 %7457  ;;  %v7589_v8 = vadd.f32 %v7588_v53, %v7561_v16 }
0x2167   : > { %v7515_v17 = vmul.f32 1.442695, %v7458_v39  ;;  %v12182_v0 = vpop.eup %12181 }
0x2168   : > { %v7562_v29 = vmul.f32 %v12182_v0, %v15978_v5 }
0x2169   : > { %12187 = vpow2.f32 %v7515_v17 }
0x216a   : > { %v7460_v59 = vpop.xlane.xlu1 %7459  ;;  %v7590_v49 = vadd.f32 %v7589_v8, %v7562_v29 }
0x216b   : > { %v7517_v36 = vmul.f32 1.442695, %v7460_v59  ;;  %v12184_v2 = vpop.eup %12183 }
0x216c   : > { %v7563_v22 = vmul.f32 %v12184_v2, %v15987_v10 }
0x216d   : > { %12189 = vpow2.f32 %v7517_v36 }
0x216e   : > { %v7462_v21 = vpop.xlane.xlu0 %7461  ;;  %v7591_v30 = vadd.f32 %v7590_v49, %v7563_v22 }
0x216f   : > { %v7519_v25 = vmul.f32 1.442695, %v7462_v21  ;;  %v12186_v58 = vpop.eup %12185 }
0x2170   : > { %v7564_v27 = vmul.f32 %v12186_v58, %v15996_v46 }
0x2171   : > { %12191 = vpow2.f32 %v7519_v25 }
0x2172   : > { %v7464_v56 = vpop.xlane.xlu1 %7463  ;;  %v7592_v24 = vadd.f32 %v7591_v30, %v7564_v27 }
0x2173   : > { %v7521_v18 = vmul.f32 1.442695, %v7464_v56  ;;  %v12188_v19 = vpop.eup %12187 }
0x2174   : > { %v7565_v5 = vmul.f32 %v12188_v19, %v16005_v4 }
0x2175   : > { %12193 = vpow2.f32 %v7521_v18 }
0x2176   : > { %v7466_v13 = vpop.xlane.xlu0 %7465  ;;  %v7593_v26 = vadd.f32 %v7592_v24, %v7565_v5 }
0x2177   : > { %v7523_v14 = vmul.f32 1.442695, %v7466_v13  ;;  %v12190_v31 = vpop.eup %12189 }
0x2178   : > { %v7566_v10 = vmul.f32 %v12190_v31, %v16014_v41 }
0x2179   : > { %12195 = vpow2.f32 %v7523_v14 }
0x217a   : > { %v7468_v3 = vpop.xlane.xlu1 %7467  ;;  %v7594_v13 = vadd.f32 %v7593_v26, %v7566_v10 }
0x217b   : > { %v7525_v15 = vmul.f32 1.442695, %v7468_v3  ;;  %v12192_v33 = vpop.eup %12191 }
0x217c   : > { %v7567_v46 = vmul.f32 %v12192_v33, %v16023_v9 }
0x217d   : > { %12197 = vpow2.f32 %v7525_v15 }
0x217e   : > { %v7470_v61 = vpop.xlane.xlu0 %7469  ;;  %v7595_v43 = vadd.f32 %v7594_v13, %v7567_v46 }
0x217f   : > { %v7527_v11 = vmul.f32 1.442695, %v7470_v61  ;;  %v12194_v60 = vpop.eup %12193 }
0x2180   : > { %v7568_v4 = vmul.f32 %v12194_v60, %v16032_v52 }
0x2181   : > { %12199 = vpow2.f32 %v7527_v11 }
0x2182   : > { %v7472_v63 = vpop.xlane.xlu1 %7471  ;;  %v7596_v38 = vadd.f32 %v7595_v43, %v7568_v4 }
0x2183   : > { %v7529_v32 = vmul.f32 1.442695, %v7472_v63  ;;  %v12196_v40 = vpop.eup %12195 }
0x2184   : > { %v7569_v41 = vmul.f32 %v12196_v40, %v16041_v37 }
0x2185   : > { %12201 = vpow2.f32 %v7529_v32 }
0x2186   : > { %v7474_v42 = vpop.xlane.xlu0 %7473  ;;  %v7597_v15 = vadd.f32 %v7596_v38, %v7569_v41 }
0x2187   : > { %v7531_v59 = vmul.f32 1.442695, %v7474_v42  ;;  %v12198_v18 = vpop.eup %12197 }
0x2188   : > { %v7570_v9 = vmul.f32 %v12198_v18, %v16050_v7 }
0x2189   : > { %12203 = vpow2.f32 %v7531_v59 }
0x218a   : > { %v7476_v39 = vpop.xlane.xlu1 %7475  ;;  %v7598_v58 = vadd.f32 %v7597_v15, %v7570_v9 }
0x218b   : > { %v7533_v21 = vmul.f32 1.442695, %v7476_v39  ;;  %v12200_v0 = vpop.eup %12199 }
0x218c   : > { %v7571_v52 = vmul.f32 %v12200_v0, %v15222_v34 }
0x218d   : > { %12205 = vpow2.f32 %v7533_v21 }
0x218e   : > { %v7478_v17 = vpop.xlane.xlu0 %7477  ;;  %v7599_v22 = vadd.f32 %v7598_v58, %v7571_v52 }
0x218f   : > { %v7535_v56 = vmul.f32 1.442695, %v7478_v17  ;;  %v12202_v61 = vpop.eup %12201 }
0x2190   : > { %v7572_v37 = vmul.f32 %v12202_v61, %v16062_v54 }
0x2191   : > { %12207 = vpow2.f32 %v7535_v56 }
0x2192   : > { %v7480_v36 = vpop.xlane.xlu1 %7479  ;;  %v7600_v49 = vadd.f32 %v7599_v22, %v7572_v37 }
0x2193   : > { %v7537_v55 = vmul.f32 1.442695, %v7480_v36  ;;  %v12204_v29 = vpop.eup %12203 }
0x2194   : > { %v7573_v7 = vmul.f32 %v12204_v29, %v16071_v50 }
0x2195   : > { %12209 = vpow2.f32 %v7537_v55 }
0x2196   : > { %v7482_v25 = vpop.xlane.xlu0 %7481  ;;  %v7601_v39 = vadd.f32 %v7600_v49, %v7573_v7 }
0x2197   : > { %v7539_v45 = vmul.f32 1.442695, %v7482_v25  ;;  %v12206_v11 = vpop.eup %12205 }
0x2198   : > { %v7574_v34 = vmul.f32 %v12206_v11, %v16080_v48 }
0x2199   : > { %12211 = vpow2.f32 %v7539_v45 }
0x219a   : > { %v7484_v44 = vpop.xlane.xlu1 %7483  ;;  %v7602_v5 = vadd.f32 %v7601_v39, %v7574_v34 }
0x219b   : > { %v7541_v14 = vmul.f32 1.442695, %v7484_v44  ;;  %v12208_v19 = vpop.eup %12207 }
0x219c   : > { %v7575_v31 = vmul.f32 %v12208_v19, %v16089_v51 }
0x219d   : > { %12213 = vpow2.f32 %v7541_v14 }
0x219e   : > { %v7486_v3 = vpop.xlane.xlu0 %7485  ;;  %v7603_v33 = vadd.f32 %v7602_v5, %v7575_v31 }
0x219f   : > { %v7543_v2 = vmul.f32 1.442695, %v7486_v3  ;;  %v12210_v27 = vpop.eup %12209 }
0x21a0   : > { %v7576_v17 = vmul.f32 %v12210_v27, %v16098_v28 }
0x21a1   : > { %12215 = vpow2.f32 %v7543_v2 }
0x21a2   : > { %v7488_v16 = vpop.xlane.xlu1 %7487  ;;  %v7604_v36 = vadd.f32 %v7603_v33, %v7576_v17 }
0x21a3   : > { %v7545_v63 = vmul.f32 1.442695, %v7488_v16  ;;  %v12212_v54 = vpop.eup %12211 }
0x21a4   : > { %v7577_v21 = vmul.f32 %v12212_v54, %v16107_v47 }
0x21a5   : > { %12217 = vpow2.f32 %v7545_v63 }
0x21a6   : > { %v7490_v53 = vpop.xlane.xlu0 %7489  ;;  %v7605_v51 = vadd.f32 %v7604_v36, %v7577_v21 }
0x21a7   : > { %v7547_v8 = vmul.f32 1.442695, %v7490_v53  ;;  %v12214_v50 = vpop.eup %12213 }
0x21a8   : > { %v7578_v60 = vmul.f32 %v12214_v50, %v16116_v1 }
0x21a9   : > { %12219 = vpow2.f32 %v7547_v8 }
0x21aa   : > { %v7492_v42 = vpop.xlane.xlu1 %7491  ;;  %v7606_v28 = vadd.f32 %v7605_v51, %v7578_v60 }
0x21ab   : > { %v7549_v32 = vmul.f32 1.442695, %v7492_v42  ;;  %v12216_v10 = vpop.eup %12215 }
0x21ac   : > { %v7579_v26 = vmul.f32 %v12216_v10, %v16125_v62 }
0x21ad   : > { %12221 = vpow2.f32 %v7549_v32 }
0x21ae   : > { %v7494_v59 = vpop.xlane.xlu0 %7493  ;;  %v7607_v13 = vadd.f32 %v7606_v28, %v7579_v26 }
0x21af   : > { %v7551_v30 = vmul.f32 1.442695, %v7494_v59  ;;  %v12218_v56 = vpop.eup %12217 }
0x21b0   : > { %v7580_v55 = vmul.f32 %v12218_v56, %v16134_v12 }
0x21b1   : > { %12223 = vpow2.f32 %v7551_v30 }
0x21b2   : > { %v7496_v24 = vpop.xlane.xlu1 %7495  ;;  %v7608_v1 = vadd.f32 %v7607_v13, %v7580_v55 }
0x21b3   : > { %v7553_v48 = vmul.f32 1.442695, %v7496_v24  ;;  %v12220_v25 = vpop.eup %12219 }
0x21b4   : > { %v7581_v4 = vmul.f32 %v12220_v25, %v16143_v57 }
0x21b5   : > { %12225 = vpow2.f32 %v7553_v48 }
0x21b6   : > { %v7498_v46 = vpop.xlane.xlu0 %7497  ;;  %v7609_v45 = vadd.f32 %v7608_v1, %v7581_v4 }
0x21b7   : > { %v7555_v40 = vmul.f32 1.442695, %v7498_v46  ;;  %v12222_v47 = vpop.eup %12221 }
0x21b8   : > { %v7582_v18 = vmul.f32 %v12222_v47, %v16152_v23 }
0x21b9   : > { %12227 = vpow2.f32 %v7555_v40 }
0x21ba   : > { %v7610_v41 = vadd.f32 %v7609_v45, %v7582_v18 }
0x21bb   : > { %v12224_v44 = vpop.eup %12223 }
0x21bc   : > { %v7583_v62 = vmul.f32 %v12224_v44, %v16161_v20 }
0x21be   : > { %v7611_v12 = vadd.f32 %v7610_v41, %v7583_v62 }
0x21bf   : > { %v12226_v43 = vpop.eup %12225 }
0x21c0   : > { %v7584_v3 = vmul.f32 %v12226_v43, %v16170_v35 }
0x21c2   : > { %v7612_v14 = vadd.f32 %v7611_v12, %v7584_v3 }
0x21c3   : > { %v12228_v0 = vpop.eup %12227 }
0x21c4   : > { %v7585_v57 = vmul.f32 %v12228_v0, %v16179_v6 }
0x21c6   : > { %v7613_v38 = vadd.f32 %v7612_v14, %v7585_v57 }
0x21c8   : > { %7614 = vst [vmem:[%s480_s29] sm:$0xff] %v7613_v38 }
0x21c9   : > { %12510 = shalt.err (!%p12507_p8)
}
0x21ca   : > { %s12511_s9 = scalar_lea.hbm %s16279_s27, 128  ;;  %s12515_s14 = scalar_lea.hbm %s16914_s24, 256 }
0x21cb   : > { %p12512_p4 = scmp.ne.s32.totalorder %s16279_s27, %s12511_s9  ;;  %p12516_p1 = scmp.lt.u32.totalorder %s16279_s27, %s16914_s24 }
0x21cc   : > { %p12517_p3 = scmp.lt.u32.totalorder %s12515_s14, %s12511_s9  ;;  %p12519_p6 = scmp.lt.u32.totalorder %s12511_s9, %s16279_s27 }
0x21cd   : > { %p12513_p12 = pnand %p12512_p4, %p16915_p10 }
0x21ce   : > { %p12518_p2 = por %p12517_p3, %p12516_p1 }
0x21cf   : > { %p12514_p13 = pneg %p12513_p12 }
0x21d0   : > { %p12520_p5 = por %p12519_p6, %p12518_p2 }
0x21d2   : > { %p12521_p9 = pnand %p12520_p5, %p12514_p13 }
0x21d4   : > { %12524 = shalt.err (!%p12521_p9)
}
0x21d5   : > { %11725 = dma.vmem_to_hbm [thread:$0]  (%p16915_p10), %s16281_s2, 128, %s16279_s27, %s7616_s28  }
0x21d6 PF: > { %s7641_s6 = sand.u32 1, %s12571_s30   ;;  %p16916_p0 = scmp.ne.s32.totalorder %s16541_s21, 0 }
0x21d7   : > { %p16917_p7 = scmp.ge.s32.totalorder %s12583_s12, 2  ;;  %s7642_s16 = scalar_lea.sflag [#allocation6], %s7641_s6 }
0x21d9   : > { %p11757_p11 = pnand %p16917_p7, %p16916_p0 }
0x21db   : > { %12566 = dma.done.wait (!%p11757_p11), %s7642_s16, 128  }
0x21dc   : > { %12568 = vsyncadd (!%p11757_p11), %s7642_s16, 4294967168  ;;  %p28_p8 = scmp.ge.s32.totalorder %s12853_s19, 4   ;;  %s16918_s30 = smov %s12575_s10 }
0x21dd   : > { %s16919_s10 = smov %s12579_s11  ;;  %s16920_s11 = smov %s12865_s25 }
0x21de   : > { %s16921_s12 = smov %s12853_s19  ;;  %30 = sbr.rel (!%p28_p8) target bundleno = 19 (0x13), region = 198 }
0x21e5   :  { %7647 = vsyncpa [#allocation5], 1 }
0x21e6   :  { %7649 = vsyncpa [#allocation5 + $0x1], 1 }
0x21e7   :  { %7650 = vsyncpa [#allocation8], 1 }
0x21e8   :  { %7651 = vsyncpa [#allocation11], 1 }
0x21e9   :  { %7652 = vsyncpa [#allocation14], 1 }
0x21ea   :  { %7654 = vsyncpa [#allocation14 + $0x1], 1 }
0x21eb   :  { %7655 = vsyncpa [#allocation17], 1 }
0x21ec   :  { %7656 = vsyncpa [#allocation6], 1 }
0x21ed   :  { %7658 = vsyncpa [#allocation6 + $0x1], 1 }

</bundles_post_ra>
